<compile_context>
chip_gen: v7x
topology: tpu7x:2x2x1
jax: 0.10.0
libtpu: 0.0.40
codegen_flags: <defaults>
</compile_context>

<pallas_src>
import jax
import jax.numpy as jnp
from jax.experimental import pallas as pl
from jax.experimental.pallas import tpu as pltpu


def _round_up(n, m):
    return (n + m - 1) // m * m


def _num_tensorcores_per_chip():
    """Best-effort TensorCores-per-chip detection (v7x: 2, v5e/v6e: 1)."""
    try:
        d = jax.devices()[0]
        cores = getattr(d, "num_cores", None)
        if isinstance(cores, int) and cores > 0:
            return cores
        kind = str(getattr(d, "device_kind", "")).lower()
        if "v7" in kind:
            return 2
    except Exception:
        pass
    return 1


def _pick_batch_tile(B, num_cores, tb_max=1024):
    # Fewest sequential grid steps on single-TC chips; at least `num_cores`
    # tiles so a dual-TC chip (v7x, dimension_semantics="parallel") is fully
    # used.  Cap the tile so large batches stay inside v7x's VMEM budget.
    per_core = -(-B // num_cores)
    tb = min(tb_max, _round_up(per_core, 8))
    return max(8, tb)


def amazon_books_model_v2(ids, desc_table, title_table, w1, b1, w2, b2,
                          *, tb=None, compute_dtype=jnp.bfloat16,
                          out_dtype=jnp.float32, l1_chunk=256):
    """Pallas implementation of AmazonBooksModelv2.forward.

    ids:         (B,) int32 item ids
    desc_table:  (N, d_description) f32 embedding table
    title_table: (N, d_title)       f32 embedding table
    w1: (d_description + d_title, L1)  b1: (L1,)
    w2: (L1, L2)                       b2: (L2,)
    returns: (B, L2) out_dtype
    """
    B = ids.shape[0]
    d_desc = desc_table.shape[1]
    d_title = title_table.shape[1]
    d_in = d_desc + d_title
    assert w1.shape[0] == d_in
    L1 = w1.shape[1]
    L2 = w2.shape[1]

    # --- tiling ---------------------------------------------------------------
    if tb is None:
        tb = _pick_batch_tile(B, _num_tensorcores_per_chip())
    tb = max(8, _round_up(min(tb, _round_up(B, 8)), 8))
    B_pad = _round_up(B, tb)
    grid = (B_pad // tb,)

    # L1 chunking keeps the hidden activation out of VMEM; fall back to a
    # single chunk if L1 isn't a clean multiple.
    if l1_chunk % 128 != 0 or L1 % l1_chunk != 0:
        l1_chunk = L1
    n_chunks = L1 // l1_chunk

    # --- glue: embedding lookup (torch.nn.Embedding) ---------------------------
    # Pad the ids (valid index 0, int32 — cheap) instead of the gathered slabs,
    # so the gather output is already tile-aligned and no extra HBM pass over
    # the activations is needed; concat / cast are fused into the kernel.
    # TODO(synk): fuse the gather itself (scalar-prefetched ids + VMEM-resident
    # tables) once the in-kernel gather path has been profiled.
    ids_p = ids if B_pad == B else jnp.pad(ids, (0, B_pad - B))
    x_desc = jnp.take(desc_table, ids_p, axis=0)      # (B_pad, d_desc)  f32
    x_title = jnp.take(title_table, ids_p, axis=0)    # (B_pad, d_title) f32

    # --- one-time (cold-path) weight prep --------------------------------------
    # Row-split W1 so the concat folds into two accumulating K-slices; bf16
    # MXU operands, f32 biases.
    w1a = w1[:d_desc].astype(compute_dtype)           # (d_desc,  L1)
    w1b = w1[d_desc:].astype(compute_dtype)           # (d_title, L1)
    w2c = w2.astype(compute_dtype)                    # (L1, L2)
    b1_2d = b1.reshape(1, L1).astype(jnp.float32)
    b2_2d = b2.reshape(1, L2).astype(jnp.float32)

    def kernel(xd_ref, xt_ref, w1a_ref, w1b_ref, b1_ref, w2_ref, b2_ref, o_ref):
        t = o_ref.shape[0]
        # Fused concat + cast: slabs go straight to bf16 vregs, no padded copy.
        xd = xd_ref[...].astype(compute_dtype)        # (tb, d_desc)
        xt = xt_ref[...].astype(compute_dtype)        # (tb, d_title)
        acc = jnp.zeros((t, L2), jnp.float32)
        for c in range(n_chunks):                     # static, unrolled
            c0, c1 = c * l1_chunk, (c + 1) * l1_chunk
            # linear1 chunk = desc-part + title-part (concat folded into K).
            h = jnp.dot(xd, w1a_ref[:, c0:c1],
                        preferred_element_type=jnp.float32)
            h = h + jnp.dot(xt, w1b_ref[:, c0:c1],
                            preferred_element_type=jnp.float32)
            h = jnp.maximum(h + b1_ref[:, c0:c1], 0.0)        # f32 bias+ReLU (VPU)
            # linear2 chunk, accumulated in f32 — (tb, L1) hidden never stored.
            acc = acc + jnp.dot(h.astype(compute_dtype), w2_ref[c0:c1, :],
                                preferred_element_type=jnp.float32)
        o_ref[...] = (acc + b2_ref[...]).astype(o_ref.dtype)

    out = pl.pallas_call(
        kernel,
        out_shape=jax.ShapeDtypeStruct((B_pad, L2), out_dtype),
        grid_spec=pltpu.PrefetchScalarGridSpec(
            num_scalar_prefetch=0,
            grid=grid,
            in_specs=[
                # streaming activations: one batch tile per grid step
                pl.BlockSpec((tb, d_desc), lambda i: (i, 0)),
                pl.BlockSpec((tb, d_title), lambda i: (i, 0)),
                # weights / biases: constant block index -> VMEM-resident
                pl.BlockSpec((d_desc, L1), lambda i: (0, 0)),
                pl.BlockSpec((d_title, L1), lambda i: (0, 0)),
                pl.BlockSpec((1, L1), lambda i: (0, 0)),
                pl.BlockSpec((L1, L2), lambda i: (0, 0)),
                pl.BlockSpec((1, L2), lambda i: (0, 0)),
            ],
            out_specs=pl.BlockSpec((tb, L2), lambda i: (i, 0)),
        ),
        compiler_params=pltpu.CompilerParams(
            dimension_semantics=("parallel",)),
    )(x_desc, x_title, w1a, w1b, b1_2d, w2c, b2_2d)
    return out[:B]


def _reference(ids, desc_table, title_table, w1, b1, w2, b2):
    x = jnp.concatenate(
        [jnp.take(desc_table, ids, axis=0), jnp.take(title_table, ids, axis=0)],
        axis=1)
    x = jnp.maximum(x @ w1 + b1, 0.0)
    return x @ w2 + b2


if __name__ == "__main__":
    # small, deterministic shapes consistent with the module
    num_items = 1000
    d_description, d_title = 128, 64
    linear1_size, linear2_size = 1024, 256
    batch = 512   # 1 tile on v5e/v6e, 2 parallel tiles on v7x

    key = jax.random.PRNGKey(0)
    k_desc, k_title, k_w1, k_b1, k_w2, k_b2, k_id = jax.random.split(key, 7)

    desc_table = jax.random.normal(k_desc, (num_items, d_description), jnp.float32)
    title_table = jax.random.normal(k_title, (num_items, d_title), jnp.float32)

    d_in = d_description + d_title
    # mimic torch.nn.Linear init: U(-1/sqrt(fan_in), 1/sqrt(fan_in))
    lim1 = 1.0 / (d_in ** 0.5)
    lim2 = 1.0 / (linear1_size ** 0.5)
    w1 = jax.random.uniform(k_w1, (d_in, linear1_size), jnp.float32, -lim1, lim1)
    b1 = jax.random.uniform(k_b1, (linear1_size,), jnp.float32, -lim1, lim1)
    w2 = jax.random.uniform(k_w2, (linear1_size, linear2_size), jnp.float32, -lim2, lim2)
    b2 = jax.random.uniform(k_b2, (linear2_size,), jnp.float32, -lim2, lim2)

    ids = jax.random.randint(k_id, (batch,), 0, num_items, jnp.int32)

    fwd = jax.jit(amazon_books_model_v2)
    out = jax.block_until_ready(fwd(ids, desc_table, title_table, w1, b1, w2, b2))

    ref = _reference(ids, desc_table, title_table, w1, b1, w2, b2)
    assert out.shape == (batch, linear2_size)
    # bf16 matmul operands (f32 accumulation) vs an all-f32 reference.
    assert jnp.allclose(out, ref, rtol=2e-2, atol=2e-2), "mismatch vs JAX reference"

    print("KERNEL_OK")
</pallas_src>

<mosaic_0001>
module attributes {stable_mosaic.version = 11 : i64} {
  func.func @kernel(%arg0: i32, %arg1: memref<512x128xf32, #tpu.memory_space<vmem>>, %arg2: memref<512x64xf32, #tpu.memory_space<vmem>>, %arg3: memref<128x1024xbf16, #tpu.memory_space<vmem>>, %arg4: memref<64x1024xbf16, #tpu.memory_space<vmem>>, %arg5: memref<1x1024xf32, #tpu.memory_space<vmem>>, %arg6: memref<1024x256xbf16, #tpu.memory_space<vmem>>, %arg7: memref<1x256xf32, #tpu.memory_space<vmem>>, %arg8: memref<512x256xf32, #tpu.memory_space<vmem>>) attributes {dimension_semantics = [#tpu.dimension_semantics<parallel>], iteration_bounds = array<i64: 1>, scalar_prefetch = 0 : i64, scratch_operands = 0 : i64, tpu.core_type = #tpu.core_type<tc>, window_params = [{transform_indices = @transform_0, window_bounds = array<i64: 512, 128>}, {transform_indices = @transform_1, window_bounds = array<i64: 512, 64>}, {pipeline_mode = #tpu.pipeline_mode<synchronous>, transform_indices = @transform_2, window_bounds = array<i64: 128, 1024>}, {pipeline_mode = #tpu.pipeline_mode<synchronous>, transform_indices = @transform_3, window_bounds = array<i64: 64, 1024>}, {pipeline_mode = #tpu.pipeline_mode<synchronous>, transform_indices = @transform_4, window_bounds = array<i64: 1, 1024>}, {pipeline_mode = #tpu.pipeline_mode<synchronous>, transform_indices = @transform_5, window_bounds = array<i64: 1024, 256>}, {pipeline_mode = #tpu.pipeline_mode<synchronous>, transform_indices = @transform_6, window_bounds = array<i64: 1, 256>}, {transform_indices = @transform_7, window_bounds = array<i64: 512, 256>}]} {
    %c0 = arith.constant 0 : index
    %c0_0 = arith.constant 0 : index
    %0 = vector.load %arg1[%c0, %c0_0] : memref<512x128xf32, #tpu.memory_space<vmem>>, vector<512x128xf32>
    %1 = arith.truncf %0 : vector<512x128xf32> to vector<512x128xbf16>
    %c0_1 = arith.constant 0 : index
    %c0_2 = arith.constant 0 : index
    %2 = vector.load %arg2[%c0_1, %c0_2] : memref<512x64xf32, #tpu.memory_space<vmem>>, vector<512x64xf32>
    %3 = arith.truncf %2 : vector<512x64xf32> to vector<512x64xbf16>
    %cst = arith.constant 0.000000e+00 : f32
    %4 = vector.broadcast %cst : f32 to vector<512x256xf32>
    %c0_3 = arith.constant 0 : index
    %c0_4 = arith.constant 0 : index
    %5 = vector.load %arg3[%c0_3, %c0_4] : memref<128x1024xbf16, #tpu.memory_space<vmem>>, vector<128x256xbf16>
    %cst_5 = arith.constant dense<0.000000e+00> : vector<512x256xf32>
    %6 = tpu.matmul %1, %5, %cst_5 {dimension_numbers = #tpu.dot_dimension_numbers<[1], [0], [0], [1], [0, 0, 1, 1], [], []>} : vector<512x128xbf16>, vector<128x256xbf16>, vector<512x256xf32> -> vector<512x256xf32>
    %c0_6 = arith.constant 0 : index
    %c0_7 = arith.constant 0 : index
    %7 = vector.load %arg4[%c0_6, %c0_7] : memref<64x1024xbf16, #tpu.memory_space<vmem>>, vector<64x256xbf16>
    %cst_8 = arith.constant dense<0.000000e+00> : vector<512x256xf32>
    %8 = tpu.matmul %3, %7, %cst_8 {dimension_numbers = #tpu.dot_dimension_numbers<[1], [0], [0], [1], [0, 0, 1, 1], [], []>} : vector<512x64xbf16>, vector<64x256xbf16>, vector<512x256xf32> -> vector<512x256xf32>
    %9 = arith.addf %6, %8 : vector<512x256xf32>
    %c0_9 = arith.constant 0 : index
    %c0_10 = arith.constant 0 : index
    %10 = vector.load %arg5[%c0_9, %c0_10] : memref<1x1024xf32, #tpu.memory_space<vmem>>, vector<1x256xf32>
    %11 = vector.broadcast %10 : vector<1x256xf32> to vector<512x256xf32>
    %12 = arith.addf %9, %11 : vector<512x256xf32>
    %cst_11 = arith.constant 0.000000e+00 : f32
    %13 = vector.broadcast %cst_11 : f32 to vector<512x256xf32>
    %14 = arith.maximumf %12, %13 : vector<512x256xf32>
    %15 = arith.truncf %14 : vector<512x256xf32> to vector<512x256xbf16>
    %c0_12 = arith.constant 0 : index
    %c0_13 = arith.constant 0 : index
    %16 = vector.load %arg6[%c0_12, %c0_13] : memref<1024x256xbf16, #tpu.memory_space<vmem>>, vector<256x256xbf16>
    %cst_14 = arith.constant dense<0.000000e+00> : vector<512x256xf32>
    %17 = tpu.matmul %15, %16, %cst_14 {dimension_numbers = #tpu.dot_dimension_numbers<[1], [0], [0], [1], [0, 0, 1, 1], [], []>} : vector<512x256xbf16>, vector<256x256xbf16>, vector<512x256xf32> -> vector<512x256xf32>
    %18 = arith.addf %4, %17 : vector<512x256xf32>
    %c0_15 = arith.constant 0 : index
    %c256 = arith.constant 256 : index
    %19 = vector.load %arg3[%c0_15, %c256] : memref<128x1024xbf16, #tpu.memory_space<vmem>>, vector<128x256xbf16>
    %cst_16 = arith.constant dense<0.000000e+00> : vector<512x256xf32>
    %20 = tpu.matmul %1, %19, %cst_16 {dimension_numbers = #tpu.dot_dimension_numbers<[1], [0], [0], [1], [0, 0, 1, 1], [], []>} : vector<512x128xbf16>, vector<128x256xbf16>, vector<512x256xf32> -> vector<512x256xf32>
    %c0_17 = arith.constant 0 : index
    %c256_18 = arith.constant 256 : index
    %21 = vector.load %arg4[%c0_17, %c256_18] : memref<64x1024xbf16, #tpu.memory_space<vmem>>, vector<64x256xbf16>
    %cst_19 = arith.constant dense<0.000000e+00> : vector<512x256xf32>
    %22 = tpu.matmul %3, %21, %cst_19 {dimension_numbers = #tpu.dot_dimension_numbers<[1], [0], [0], [1], [0, 0, 1, 1], [], []>} : vector<512x64xbf16>, vector<64x256xbf16>, vector<512x256xf32> -> vector<512x256xf32>
    %23 = arith.addf %20, %22 : vector<512x256xf32>
    %c0_20 = arith.constant 0 : index
    %c256_21 = arith.constant 256 : index
    %24 = vector.load %arg5[%c0_20, %c256_21] : memref<1x1024xf32, #tpu.memory_space<vmem>>, vector<1x256xf32>
    %25 = vector.broadcast %24 : vector<1x256xf32> to vector<512x256xf32>
    %26 = arith.addf %23, %25 : vector<512x256xf32>
    %cst_22 = arith.constant 0.000000e+00 : f32
    %27 = vector.broadcast %cst_22 : f32 to vector<512x256xf32>
    %28 = arith.maximumf %26, %27 : vector<512x256xf32>
    %29 = arith.truncf %28 : vector<512x256xf32> to vector<512x256xbf16>
    %c256_23 = arith.constant 256 : index
    %c0_24 = arith.constant 0 : index
    %30 = vector.load %arg6[%c256_23, %c0_24] : memref<1024x256xbf16, #tpu.memory_space<vmem>>, vector<256x256xbf16>
    %cst_25 = arith.constant dense<0.000000e+00> : vector<512x256xf32>
    %31 = tpu.matmul %29, %30, %cst_25 {dimension_numbers = #tpu.dot_dimension_numbers<[1], [0], [0], [1], [0, 0, 1, 1], [], []>} : vector<512x256xbf16>, vector<256x256xbf16>, vector<512x256xf32> -> vector<512x256xf32>
    %32 = arith.addf %18, %31 : vector<512x256xf32>
    %c0_26 = arith.constant 0 : index
    %c512 = arith.constant 512 : index
    %33 = vector.load %arg3[%c0_26, %c512] : memref<128x1024xbf16, #tpu.memory_space<vmem>>, vector<128x256xbf16>
    %cst_27 = arith.constant dense<0.000000e+00> : vector<512x256xf32>
    %34 = tpu.matmul %1, %33, %cst_27 {dimension_numbers = #tpu.dot_dimension_numbers<[1], [0], [0], [1], [0, 0, 1, 1], [], []>} : vector<512x128xbf16>, vector<128x256xbf16>, vector<512x256xf32> -> vector<512x256xf32>
    %c0_28 = arith.constant 0 : index
    %c512_29 = arith.constant 512 : index
    %35 = vector.load %arg4[%c0_28, %c512_29] : memref<64x1024xbf16, #tpu.memory_space<vmem>>, vector<64x256xbf16>
    %cst_30 = arith.constant dense<0.000000e+00> : vector<512x256xf32>
    %36 = tpu.matmul %3, %35, %cst_30 {dimension_numbers = #tpu.dot_dimension_numbers<[1], [0], [0], [1], [0, 0, 1, 1], [], []>} : vector<512x64xbf16>, vector<64x256xbf16>, vector<512x256xf32> -> vector<512x256xf32>
    %37 = arith.addf %34, %36 : vector<512x256xf32>
    %c0_31 = arith.constant 0 : index
    %c512_32 = arith.constant 512 : index
    %38 = vector.load %arg5[%c0_31, %c512_32] : memref<1x1024xf32, #tpu.memory_space<vmem>>, vector<1x256xf32>
    %39 = vector.broadcast %38 : vector<1x256xf32> to vector<512x256xf32>
    %40 = arith.addf %37, %39 : vector<512x256xf32>
    %cst_33 = arith.constant 0.000000e+00 : f32
    %41 = vector.broadcast %cst_33 : f32 to vector<512x256xf32>
    %42 = arith.maximumf %40, %41 : vector<512x256xf32>
    %43 = arith.truncf %42 : vector<512x256xf32> to vector<512x256xbf16>
    %c512_34 = arith.constant 512 : index
    %c0_35 = arith.constant 0 : index
    %44 = vector.load %arg6[%c512_34, %c0_35] : memref<1024x256xbf16, #tpu.memory_space<vmem>>, vector<256x256xbf16>
    %cst_36 = arith.constant dense<0.000000e+00> : vector<512x256xf32>
    %45 = tpu.matmul %43, %44, %cst_36 {dimension_numbers = #tpu.dot_dimension_numbers<[1], [0], [0], [1], [0, 0, 1, 1], [], []>} : vector<512x256xbf16>, vector<256x256xbf16>, vector<512x256xf32> -> vector<512x256xf32>
    %46 = arith.addf %32, %45 : vector<512x256xf32>
    %c0_37 = arith.constant 0 : index
    %c768 = arith.constant 768 : index
    %47 = vector.load %arg3[%c0_37, %c768] : memref<128x1024xbf16, #tpu.memory_space<vmem>>, vector<128x256xbf16>
    %cst_38 = arith.constant dense<0.000000e+00> : vector<512x256xf32>
    %48 = tpu.matmul %1, %47, %cst_38 {dimension_numbers = #tpu.dot_dimension_numbers<[1], [0], [0], [1], [0, 0, 1, 1], [], []>} : vector<512x128xbf16>, vector<128x256xbf16>, vector<512x256xf32> -> vector<512x256xf32>
    %c0_39 = arith.constant 0 : index
    %c768_40 = arith.constant 768 : index
    %49 = vector.load %arg4[%c0_39, %c768_40] : memref<64x1024xbf16, #tpu.memory_space<vmem>>, vector<64x256xbf16>
    %cst_41 = arith.constant dense<0.000000e+00> : vector<512x256xf32>
    %50 = tpu.matmul %3, %49, %cst_41 {dimension_numbers = #tpu.dot_dimension_numbers<[1], [0], [0], [1], [0, 0, 1, 1], [], []>} : vector<512x64xbf16>, vector<64x256xbf16>, vector<512x256xf32> -> vector<512x256xf32>
    %51 = arith.addf %48, %50 : vector<512x256xf32>
    %c0_42 = arith.constant 0 : index
    %c768_43 = arith.constant 768 : index
    %52 = vector.load %arg5[%c0_42, %c768_43] : memref<1x1024xf32, #tpu.memory_space<vmem>>, vector<1x256xf32>
    %53 = vector.broadcast %52 : vector<1x256xf32> to vector<512x256xf32>
    %54 = arith.addf %51, %53 : vector<512x256xf32>
    %cst_44 = arith.constant 0.000000e+00 : f32
    %55 = vector.broadcast %cst_44 : f32 to vector<512x256xf32>
    %56 = arith.maximumf %54, %55 : vector<512x256xf32>
    %57 = arith.truncf %56 : vector<512x256xf32> to vector<512x256xbf16>
    %c768_45 = arith.constant 768 : index
    %c0_46 = arith.constant 0 : index
    %58 = vector.load %arg6[%c768_45, %c0_46] : memref<1024x256xbf16, #tpu.memory_space<vmem>>, vector<256x256xbf16>
    %cst_47 = arith.constant dense<0.000000e+00> : vector<512x256xf32>
    %59 = tpu.matmul %57, %58, %cst_47 {dimension_numbers = #tpu.dot_dimension_numbers<[1], [0], [0], [1], [0, 0, 1, 1], [], []>} : vector<512x256xbf16>, vector<256x256xbf16>, vector<512x256xf32> -> vector<512x256xf32>
    %60 = arith.addf %46, %59 : vector<512x256xf32>
    %c0_48 = arith.constant 0 : index
    %c0_49 = arith.constant 0 : index
    %61 = vector.load %arg7[%c0_48, %c0_49] : memref<1x256xf32, #tpu.memory_space<vmem>>, vector<1x256xf32>
    %62 = vector.broadcast %61 : vector<1x256xf32> to vector<512x256xf32>
    %63 = arith.addf %60, %62 : vector<512x256xf32>
    %c0_50 = arith.constant 0 : index
    %c0_51 = arith.constant 0 : index
    %64 = vector.load %arg8[%c0_50, %c0_51] : memref<512x256xf32, #tpu.memory_space<vmem>>, vector<512x256xf32>
    tpu.vector_store %arg8[%c0_50, %c0_51], %63 {strides = array<i32>} : memref<512x256xf32, #tpu.memory_space<vmem>>, vector<512x256xf32>,
    return
  }
  func.func @transform_0(%arg0: i32) -> (i32, i32) {
    %c0_i32 = arith.constant 0 : i32
    %c0_i32_0 = arith.constant 0 : i32
    return %arg0, %c0_i32 : i32, i32
  }
  func.func @transform_1(%arg0: i32) -> (i32, i32) {
    %c0_i32 = arith.constant 0 : i32
    %c0_i32_0 = arith.constant 0 : i32
    return %arg0, %c0_i32 : i32, i32
  }
  func.func @transform_2(%arg0: i32) -> (i32, i32) {
    %c0_i32 = arith.constant 0 : i32
    %c0_i32_0 = arith.constant 0 : i32
    %c0_i32_1 = arith.constant 0 : i32
    return %c0_i32, %c0_i32_0 : i32, i32
  }
  func.func @transform_3(%arg0: i32) -> (i32, i32) {
    %c0_i32 = arith.constant 0 : i32
    %c0_i32_0 = arith.constant 0 : i32
    %c0_i32_1 = arith.constant 0 : i32
    return %c0_i32, %c0_i32_0 : i32, i32
  }
  func.func @transform_4(%arg0: i32) -> (i32, i32) {
    %c0_i32 = arith.constant 0 : i32
    %c0_i32_0 = arith.constant 0 : i32
    %c0_i32_1 = arith.constant 0 : i32
    return %c0_i32, %c0_i32_0 : i32, i32
  }
  func.func @transform_5(%arg0: i32) -> (i32, i32) {
    %c0_i32 = arith.constant 0 : i32
    %c0_i32_0 = arith.constant 0 : i32
    %c0_i32_1 = arith.constant 0 : i32
    return %c0_i32, %c0_i32_0 : i32, i32
  }
  func.func @transform_6(%arg0: i32) -> (i32, i32) {
    %c0_i32 = arith.constant 0 : i32
    %c0_i32_0 = arith.constant 0 : i32
    %c0_i32_1 = arith.constant 0 : i32
    return %c0_i32, %c0_i32_0 : i32, i32
  }
  func.func @transform_7(%arg0: i32) -> (i32, i32) {
    %c0_i32 = arith.constant 0 : i32
    %c0_i32_0 = arith.constant 0 : i32
    return %arg0, %c0_i32 : i32, i32
  }
}

</mosaic_0001>

<bundles_post_ra>
// kernel: amazon_books_model_v2.1
= control target key start
LH: loop header
LB: loop body
LE: loop exit
PB: predicated region body
PF: predicated region fallthrough
CT: control target
= control target key end

     0   :  { %v12435_v8 = vmov 0   ;;  %vm284_vm0 = vcmask 523264   ;;  %s12389_s0 = inlined_call_operand.vmem [shape: f32[512,128], index: 0, kind: input, shape index: {}]   ;;  %s12390_s1 = inlined_call_operand.vmem [shape: f32[512,64], index: 1, kind: input, shape index: {}]   ;;  %s12391_s2 = inlined_call_operand.vmem [shape: bf16[128,1024], index: 2, kind: input, shape index: {}]   ;;  %s12392_s3 = inlined_call_operand.vmem [shape: bf16[64,1024], index: 3, kind: input, shape index: {}]   ;;  %s12393_s4 = inlined_call_operand.vmem [shape: f32[1,1024], index: 4, kind: input, shape index: {}]   ;;  %s12394_s5 = inlined_call_operand.vmem [shape: bf16[1024,256], index: 5, kind: input, shape index: {}]   ;;  %s12395_s6 = inlined_call_operand.vmem [shape: f32[1,256], index: 6, kind: input, shape index: {}]   ;;  %s12396_s7 = inlined_call_operand.hbm [shape: f32[512,256], index: 7, kind: output, shape index: {}]  }
   0x1   :  { %v236_v0 = vld [vmem:[%s12392_s3] sm:$0xff]  ;;  %v1547_v2 = vld [vmem:[%s12392_s3 + $0x8] sm:$0xff]  ;;  %413 = vmatprep.mubr.bf16.mxu0 %v12435_v8  ;;  %1627 = vmatprep.mubr.bf16.mxu1 %v12435_v8  ;;  %v126_v45 = vld [vmem:[%s12390_s1 + $0x10] sm:$0xff] }
   0x2   :  { %v237_v1 = vld [vmem:[%s12392_s3 + $0x20] sm:$0xff]  ;;  %v1548_v4 = vld [vmem:[%s12392_s3 + $0x28] sm:$0xff]  ;;  %v127_v46 = vld [vmem:[%s12390_s1 + $0x18] sm:$0xff] }
   0x3   :  { %v7766_v3 = vcombine.high %v236_v0, %v237_v1  ;;  %v7765_v5 = vcombine.low %v236_v0, %v237_v1  ;;  %v238_v6 = vld [vmem:[%s12392_s3 + $0x40] sm:$0xff]  ;;  %v7822_v9 = vcombine.high %v1547_v2, %v1548_v4  ;;  %v7821_v10 = vcombine.low %v1547_v2, %v1548_v4  ;;  %v1549_v12 = vld [vmem:[%s12392_s3 + $0x48] sm:$0xff]  ;;  %v130_v62 = vld [vmem:[%s12390_s1 + $0x30] sm:$0xff] }
   0x4   :  { %v239_v7 = vld [vmem:[%s12392_s3 + $0x60] sm:$0xff]  ;;  %v1550_v13 = vld [vmem:[%s12392_s3 + $0x68] sm:$0xff]  ;;  %v9371_v51 = vpack.c.bf16 %v127_v46, %v126_v45  ;;  %v131_v63 = vld [vmem:[%s12390_s1 + $0x38] sm:$0xff] }
   0x5   :  { %v7768_v11 = vcombine.high %v238_v6, %v239_v7  ;;  %v240_v14 = vld [vmem:[%s12392_s3 + $0x80] sm:$0xff]  ;;  %381 = vmatprep.subr.bf16.mxu0 %v7766_v3  ;;  %v7824_v15 = vcombine.high %v1549_v12, %v1550_v13  ;;  %v1551_v17 = vld [vmem:[%s12392_s3 + $0x88] sm:$0xff]  ;;  %1595 = vmatprep.subr.bf16.mxu1 %v7822_v9  ;;  %v7767_v19 = vcombine.low %v238_v6, %v239_v7  ;;  %v134_v4 = vld [vmem:[%s12390_s1 + $0x50] sm:$0xff] }
   0x6   :  { %v241_v16 = vld [vmem:[%s12392_s3 + $0xa0] sm:$0xff]  ;;  %v1552_v18 = vld [vmem:[%s12392_s3 + $0xa8] sm:$0xff]  ;;  %382 = vmatpush1.bf16.msra.mxu0 %v7765_v5  ;;  %1596 = vmatpush1.bf16.msra.mxu1 %v7821_v10  ;;  %v7823_v20 = vcombine.low %v1549_v12, %v1550_v13  ;;  %12504 = vst [vmem:[#allocation6_spill] sm:$0xff] %v9371_v51  ;;  %v9405_v0 = vpack.c.bf16 %v131_v63, %v130_v62  ;;  %v135_v5 = vld [vmem:[%s12390_s1 + $0x58] sm:$0xff] }
   0x7   :  { %383 = vmatprep.subr.bf16.mxu0 %v7768_v11  ;;  %v7770_v21 = vcombine.high %v240_v14, %v241_v16  ;;  %1597 = vmatprep.subr.bf16.mxu1 %v7824_v15  ;;  %v7826_v22 = vcombine.high %v1551_v17, %v1552_v18  ;;  %v242_v23 = vld [vmem:[%s12392_s3 + $0xc0] sm:$0xff]  ;;  %v1553_v25 = vld [vmem:[%s12392_s3 + $0xc8] sm:$0xff]  ;;  %v7769_v27 = vcombine.low %v240_v14, %v241_v16 }
   0x8   :  { %v243_v24 = vld [vmem:[%s12392_s3 + $0xe0] sm:$0xff]  ;;  %v1554_v26 = vld [vmem:[%s12392_s3 + $0xe8] sm:$0xff]  ;;  %v7825_v28 = vcombine.low %v1551_v17, %v1552_v18  ;;  %12506 = vst [vmem:[#allocation8_spill] sm:$0xff] %v9405_v0  ;;  %v9439_v11 = vpack.c.bf16 %v135_v5, %v134_v4 }
   0x9   :  { %v7772_v29 = vcombine.high %v242_v23, %v243_v24  ;;  %v7828_v30 = vcombine.high %v1553_v25, %v1554_v26  ;;  %v1531_v31 = vld [vmem:[%s12391_s2 + $0x8] sm:$0xff]  ;;  %v7771_v33 = vcombine.low %v242_v23, %v243_v24  ;;  %v124_v34 = vld [vmem:[%s12390_s1] sm:$0xff]  ;;  %v7827_v36 = vcombine.low %v1553_v25, %v1554_v26 }
   0xa   :  { %384 = vmatpush1.bf16.msra.mxu0 %v7767_v19  ;;  %1598 = vmatpush1.bf16.msra.mxu1 %v7823_v20  ;;  %v1532_v32 = vld [vmem:[%s12391_s2 + $0x28] sm:$0xff]  ;;  %v128_v55 = vld [vmem:[%s12390_s1 + $0x20] sm:$0xff]  ;;  %12508 = vst [vmem:[#allocation10_spill] sm:$0xff] %v9439_v11 }
   0xb   :  { %385 = vmatprep.subr.bf16.mxu0 %v7770_v21  ;;  %1599 = vmatprep.subr.bf16.mxu1 %v7826_v22  ;;  %v125_v35 = vld [vmem:[%s12390_s1 + $0x8] sm:$0xff]  ;;  %v7862_v37 = vcombine.high %v1531_v31, %v1532_v32  ;;  %v7861_v41 = vcombine.low %v1531_v31, %v1532_v32  ;;  %v132_v1 = vld [vmem:[%s12390_s1 + $0x40] sm:$0xff] }
   0xc   :  { %v9339_v38 = vpack.c.bf16 %v125_v35, %v124_v34  ;;  %v1533_v39 = vld [vmem:[%s12391_s2 + $0x48] sm:$0xff]  ;;  %v136_v12 = vld [vmem:[%s12390_s1 + $0x60] sm:$0xff] }
   0xd   :  { %v1534_v40 = vld [vmem:[%s12391_s2 + $0x68] sm:$0xff] }
   0xe   :  { %386 = vmatpush1.bf16.msra.mxu0 %v7769_v27  ;;  %1600 = vmatpush1.bf16.msra.mxu1 %v7825_v28  ;;  %12503 = vst [vmem:[#allocation5_spill] sm:$0xff] %v9339_v38  ;;  %v7864_v42 = vcombine.high %v1533_v39, %v1534_v40  ;;  %v1535_v43 = vld [vmem:[%s12391_s2 + $0x88] sm:$0xff]  ;;  %v7863_v47 = vcombine.low %v1533_v39, %v1534_v40 }
   0xf   :  { %387 = vmatprep.subr.bf16.mxu0 %v7772_v29  ;;  %1601 = vmatprep.subr.bf16.mxu1 %v7828_v30  ;;  %v1536_v44 = vld [vmem:[%s12391_s2 + $0xa8] sm:$0xff] }
  0x10   :  { %v1537_v48 = vld [vmem:[%s12391_s2 + $0xc8] sm:$0xff]  ;;  %v7866_v50 = vcombine.high %v1535_v43, %v1536_v44  ;;  %v7865_v52 = vcombine.low %v1535_v43, %v1536_v44 }
  0x11   :  { %v1538_v49 = vld [vmem:[%s12391_s2 + $0xe8] sm:$0xff] }
  0x12   :  { %388 = vmatpush1.bf16.msra.mxu0 %v7771_v33  ;;  %1602 = vmatpush1.bf16.msra.mxu1 %v7827_v36  ;;  %v1539_v53 = vld [vmem:[%s12391_s2 + $0x108] sm:$0xff]  ;;  %v7868_v57 = vcombine.high %v1537_v48, %v1538_v49  ;;  %v7867_v58 = vcombine.low %v1537_v48, %v1538_v49 }
  0x13   :  { %2028 = vmatprep.subr.bf16.mxu1 %v7862_v37  ;;  %v1540_v54 = vld [vmem:[%s12391_s2 + $0x128] sm:$0xff] }
  0x14   :  { %v129_v56 = vld [vmem:[%s12390_s1 + $0x28] sm:$0xff]  ;;  %v7870_v59 = vcombine.high %v1539_v53, %v1540_v54  ;;  %v7869_v61 = vcombine.low %v1539_v53, %v1540_v54 }
  0x15   :  { %7773 = vmatmul.mubr.msk.bf16.vlgmr.msra.gmra.mrb[0].mxu0 %vm284_vm0, %v9339_v38  ;;  %7829 = vmatmul.mubr.msk.bf16.vlgmr.msra.gmra.mrb[0].mxu1 %vm284_vm0, %v9339_v38  ;;  %v9391_v60 = vpack.c.bf16 %v129_v56, %v128_v55  ;;  %v133_v2 = vld [vmem:[%s12390_s1 + $0x48] sm:$0xff] }
  0x16   :  { %423 = vmatprep.mubr.bf16.mxu0 %v12435_v8  ;;  %2029 = vmatpush1.bf16.msra.mxu1 %v7861_v41  ;;  %v9419_v3 = vpack.c.bf16 %v133_v2, %v132_v1  ;;  %v1541_v6 = vld [vmem:[%s12391_s2 + $0x148] sm:$0xff] }
  0x17   :  { %1637 = vmatprep.mubr.bf16.mxu1 %v12435_v8  ;;  %2030 = vmatprep.subr.bf16.mxu1 %v7864_v42  ;;  %12505 = vst [vmem:[#allocation7_spill] sm:$0xff] %v9391_v60  ;;  %v1542_v7 = vld [vmem:[%s12391_s2 + $0x168] sm:$0xff] }
  0x18   :  { %12507 = vst [vmem:[#allocation9_spill] sm:$0xff] %v9419_v3  ;;  %v7871_v9 = vcombine.low %v1541_v6, %v1542_v7  ;;  %v7872_v10 = vcombine.high %v1541_v6, %v1542_v7  ;;  %v137_v13 = vld [vmem:[%s12390_s1 + $0x68] sm:$0xff] }
  0x19   :  { %v9453_v14 = vpack.c.bf16 %v137_v13, %v136_v12 }
  0x1a   :  { %2031 = vmatpush1.bf16.msra.mxu1 %v7863_v47 }
  0x1b   :  { %2032 = vmatprep.subr.bf16.mxu1 %v7866_v50  ;;  %12509 = vst [vmem:[#allocation11_spill] sm:$0xff] %v9453_v14 }
  0x1d   :  { %7774 = vmatmul.mubr.msk.bf16.gmra.mrb[4].mxu0 %vm284_vm0, %v9371_v51  ;;  %7830 = vmatmul.mubr.msk.bf16.gmra.mrb[4].mxu1 %vm284_vm0, %v9371_v51 }
  0x1e   :  { %433 = vmatprep.mubr.bf16.mxu0 %v12435_v8  ;;  %1647 = vmatprep.mubr.bf16.mxu1 %v12435_v8 }
  0x1f   :  { %2033 = vmatpush1.bf16.msra.mxu1 %v7865_v52 }
  0x20   :  { %2034 = vmatprep.subr.bf16.mxu1 %v7868_v57 }
  0x23   :  { %2035 = vmatpush1.bf16.msra.mxu1 %v7867_v58 }
  0x24   :  { %2036 = vmatprep.subr.bf16.mxu1 %v7870_v59 }
  0x25   :  { %7775 = vmatmul.mubr.msk.bf16.gmra.mrb[8].mxu0 %vm284_vm0, %v9391_v60  ;;  %7831 = vmatmul.mubr.msk.bf16.gmra.mrb[8].mxu1 %vm284_vm0, %v9391_v60 }
  0x26   :  { %443 = vmatprep.mubr.bf16.mxu0 %v12435_v8  ;;  %1657 = vmatprep.mubr.bf16.mxu1 %v12435_v8 }
  0x27   :  { %2037 = vmatpush1.bf16.msra.mxu1 %v7869_v61 }
  0x28   :  { %2038 = vmatprep.subr.bf16.mxu1 %v7872_v10 }
  0x2b   :  { %2039 = vmatpush1.bf16.msra.mxu1 %v7871_v9 }
  0x2d   :  { %7776 = vmatmul.mubr.msk.bf16.gmra.mrb[12].mxu0 %vm284_vm0, %v9405_v0  ;;  %7832 = vmatmul.mubr.msk.bf16.gmra.mrb[12].mxu1 %vm284_vm0, %v9405_v0 }
  0x2e   :  { %453 = vmatprep.mubr.bf16.mxu0 %v12435_v8  ;;  %1667 = vmatprep.mubr.bf16.mxu1 %v12435_v8 }
  0x35   :  { %7777 = vmatmul.mubr.msk.bf16.gmra.mrb[16].mxu0 %vm284_vm0, %v9419_v3  ;;  %7833 = vmatmul.mubr.msk.bf16.gmra.mrb[16].mxu1 %vm284_vm0, %v9419_v3 }
  0x36   :  { %463 = vmatprep.mubr.bf16.mxu0 %v12435_v8  ;;  %1677 = vmatprep.mubr.bf16.mxu1 %v12435_v8 }
  0x3d   :  { %7778 = vmatmul.mubr.msk.bf16.gmra.mrb[20].mxu0 %vm284_vm0, %v9439_v11  ;;  %7834 = vmatmul.mubr.msk.bf16.gmra.mrb[20].mxu1 %vm284_vm0, %v9439_v11 }
  0x3e   :  { %473 = vmatprep.mubr.bf16.mxu0 %v12435_v8  ;;  %1687 = vmatprep.mubr.bf16.mxu1 %v12435_v8 }
  0x45   :  { %7779 = vmatmul.mubr.msk.bf16.gmra.mrb[24].mxu0 %vm284_vm0, %v9453_v14 }
  0x46   :  { %12 = vsyncpa [#allocation3], 0  ;;  %7835 = vmatmul.mubr.msk.bf16.gmra.mrb[24].mxu1 %vm284_vm0, %v9453_v14  ;;  %483 = vmatprep.mubr.bf16.mxu0 %v12435_v8  ;;  %v138_v15 = vld [vmem:[%s12390_s1 + $0x70] sm:$0xff]  ;;  %v139_v16 = vld [vmem:[%s12390_s1 + $0x78] sm:$0xff] }
  0x47   :  { %1697 = vmatprep.mubr.bf16.mxu1 %v12435_v8  ;;  %v9467_v17 = vpack.c.bf16 %v139_v16, %v138_v15  ;;  %v140_v18 = vld [vmem:[%s12390_s1 + $0x80] sm:$0xff]  ;;  %v141_v19 = vld [vmem:[%s12390_s1 + $0x88] sm:$0xff]  ;;  %v142_v21 = vld [vmem:[%s12390_s1 + $0x90] sm:$0xff] }
  0x48   :  { %v9481_v20 = vpack.c.bf16 %v141_v19, %v140_v18  ;;  %v143_v22 = vld [vmem:[%s12390_s1 + $0x98] sm:$0xff]  ;;  %v1543_v23 = vld [vmem:[%s12391_s2 + $0x188] sm:$0xff]  ;;  %v144_v28 = vld [vmem:[%s12390_s1 + $0xa0] sm:$0xff] }
  0x49   :  { %12510 = vst [vmem:[#allocation12_spill] sm:$0xff] %v9467_v17  ;;  %v1544_v24 = vld [vmem:[%s12391_s2 + $0x1a8] sm:$0xff]  ;;  %v9501_v27 = vpack.c.bf16 %v143_v22, %v142_v21  ;;  %v146_v31 = vld [vmem:[%s12390_s1 + $0xb0] sm:$0xff]  ;;  %v147_v32 = vld [vmem:[%s12390_s1 + $0xb8] sm:$0xff] }
  0x4a   :  { %12511 = vst [vmem:[#allocation13_spill] sm:$0xff] %v9481_v20  ;;  %v7873_v25 = vcombine.low %v1543_v23, %v1544_v24  ;;  %v7874_v26 = vcombine.high %v1543_v23, %v1544_v24  ;;  %v145_v29 = vld [vmem:[%s12390_s1 + $0xa8] sm:$0xff]  ;;  %v9529_v33 = vpack.c.bf16 %v147_v32, %v146_v31  ;;  %v148_v34 = vld [vmem:[%s12390_s1 + $0xc0] sm:$0xff]  ;;  %v150_v42 = vld [vmem:[%s12390_s1 + $0xd0] sm:$0xff] }
  0x4b   :  { %12512 = vst [vmem:[#allocation14_spill] sm:$0xff] %v9501_v27  ;;  %v9515_v30 = vpack.c.bf16 %v145_v29, %v144_v28  ;;  %v149_v35 = vld [vmem:[%s12390_s1 + $0xc8] sm:$0xff]  ;;  %v220_v36 = vld [vmem:[%s12391_s2] sm:$0xff]  ;;  %v151_v43 = vld [vmem:[%s12390_s1 + $0xd8] sm:$0xff] }
  0x4c   :  { %2040 = vmatprep.subr.bf16.mxu1 %v7874_v26  ;;  %12514 = vst [vmem:[#allocation16_spill] sm:$0xff] %v9529_v33  ;;  %v221_v37 = vld [vmem:[%s12391_s2 + $0x20] sm:$0xff]  ;;  %v9549_v41 = vpack.c.bf16 %v149_v35, %v148_v34  ;;  %v1545_v44 = vld [vmem:[%s12391_s2 + $0x1c8] sm:$0xff]  ;;  %v9575_v53 = vpack.c.bf16 %v151_v43, %v150_v42  ;;  %v154_v7 = vld [vmem:[%s12390_s1 + $0xf0] sm:$0xff] }
  0x4d   :  { %7780 = vmatmul.mubr.msk.bf16.gmra.mrb[28].mxu0 %vm284_vm0, %v9467_v17  ;;  %2041 = vmatpush1.bf16.msra.mxu1 %v7873_v25  ;;  %12513 = vst [vmem:[#allocation15_spill] sm:$0xff] %v9515_v30  ;;  %v7805_v39 = vcombine.low %v220_v36, %v221_v37  ;;  %v7806_v40 = vcombine.high %v220_v36, %v221_v37  ;;  %v1546_v45 = vld [vmem:[%s12391_s2 + $0x1e8] sm:$0xff]  ;;  %v222_v46 = vld [vmem:[%s12391_s2 + $0x40] sm:$0xff]  ;;  %v155_v10 = vld [vmem:[%s12390_s1 + $0xf8] sm:$0xff] }
  0x4e   :  { %7836 = vmatmul.mubr.msk.bf16.gmra.mrb[28].mxu1 %vm284_vm0, %v9467_v17  ;;  %493 = vmatprep.mubr.bf16.mxu0 %v12435_v8  ;;  %12515 = vst [vmem:[#allocation17_spill] sm:$0xff] %v9549_v41  ;;  %v7875_v47 = vcombine.low %v1545_v44, %v1546_v45  ;;  %v7876_v48 = vcombine.high %v1545_v44, %v1546_v45  ;;  %v223_v49 = vld [vmem:[%s12391_s2 + $0x60] sm:$0xff]  ;;  %12516 = vst [vmem:[#allocation18_spill] sm:$0xff] %v9575_v53  ;;  %v153_v59 = vld [vmem:[%s12390_s1 + $0xe8] sm:$0xff] }
  0x4f   :  { %1707 = vmatprep.mubr.bf16.mxu1 %v12435_v8  ;;  %814 = vmatprep.subr.bf16.mxu0 %v7806_v40  ;;  %v7807_v50 = vcombine.low %v222_v46, %v223_v49  ;;  %v7808_v52 = vcombine.high %v222_v46, %v223_v49  ;;  %v224_v54 = vld [vmem:[%s12391_s2 + $0x80] sm:$0xff]  ;;  %v9627_v18 = vpack.c.bf16 %v155_v10, %v154_v7  ;;  %v157_v25 = vld [vmem:[%s12390_s1 + $0x108] sm:$0xff]  ;;  %v158_v34 = vld [vmem:[%s12390_s1 + $0x110] sm:$0xff] }
  0x50   :  { %815 = vmatpush1.bf16.msra.mxu0 %v7805_v39  ;;  %2042 = vmatprep.subr.bf16.mxu1 %v7876_v48  ;;  %v225_v55 = vld [vmem:[%s12391_s2 + $0xa0] sm:$0xff]  ;;  %v159_v35 = vld [vmem:[%s12390_s1 + $0x118] sm:$0xff]  ;;  %v9669_v36 = vld [vmem:[%s12392_s3 + $0x10] sm:$0xff] }
  0x51   :  { %2043 = vmatpush1.bf16.msra.mxu1 %v7875_v47  ;;  %816 = vmatprep.subr.bf16.mxu0 %v7808_v52  ;;  %v7810_v56 = vcombine.high %v224_v54, %v225_v55  ;;  %v152_v57 = vld [vmem:[%s12390_s1 + $0xe0] sm:$0xff]  ;;  %v7809_v58 = vcombine.low %v224_v54, %v225_v55  ;;  %12518 = vst [vmem:[#allocation20_spill] sm:$0xff] %v9627_v18  ;;  %v9674_v37 = vld [vmem:[%s12392_s3 + $0x30] sm:$0xff]  ;;  %v161_v44 = vld [vmem:[%s12390_s1 + $0x128] sm:$0xff] }
  0x52   :  { %v226_v61 = vld [vmem:[%s12391_s2 + $0xc0] sm:$0xff]  ;;  %v9601_v2 = vpack.c.bf16 %v153_v59, %v152_v57  ;;  %v7941_v39 = vcombine.low %v9669_v36, %v9674_v37  ;;  %v7942_v40 = vcombine.high %v9669_v36, %v9674_v37  ;;  %v9681_v42 = vpack.c.bf16 %v159_v35, %v158_v34  ;;  %v162_v46 = vld [vmem:[%s12390_s1 + $0x130] sm:$0xff]  ;;  %v163_v47 = vld [vmem:[%s12390_s1 + $0x138] sm:$0xff] }
  0x53   :  { %v227_v62 = vld [vmem:[%s12391_s2 + $0xe0] sm:$0xff]  ;;  %v9709_v48 = vpack.c.bf16 %v163_v47, %v162_v46  ;;  %v166_v54 = vld [vmem:[%s12390_s1 + $0x150] sm:$0xff]  ;;  %v167_v55 = vld [vmem:[%s12390_s1 + $0x158] sm:$0xff] }
  0x54   :  { %817 = vmatpush1.bf16.msra.mxu0 %v7807_v50  ;;  %v7812_v63 = vcombine.high %v226_v61, %v227_v62  ;;  %v7811_v1 = vcombine.low %v226_v61, %v227_v62  ;;  %12517 = vst [vmem:[#allocation19_spill] sm:$0xff] %v9601_v2  ;;  %v228_v4 = vld [vmem:[%s12391_s2 + $0x100] sm:$0xff]  ;;  %12520 = vst [vmem:[#allocation22_spill] sm:$0xff] %v9681_v42  ;;  %3835 = vmatprep.subr.bf16.mxu1 %v7942_v40  ;;  %v165_v50 = vld [vmem:[%s12390_s1 + $0x148] sm:$0xff] }
  0x55   :  { %7781 = vmatmul.mubr.msk.bf16.gmra.mrb[32].mxu0 %vm284_vm0, %v9481_v20  ;;  %818 = vmatprep.subr.bf16.mxu0 %v7810_v56  ;;  %v229_v5 = vld [vmem:[%s12391_s2 + $0x120] sm:$0xff]  ;;  %12522 = vst [vmem:[#allocation24_spill] sm:$0xff] %v9709_v48  ;;  %v9737_v56 = vpack.c.bf16 %v167_v55, %v166_v54  ;;  %v170_v61 = vld [vmem:[%s12390_s1 + $0x170] sm:$0xff]  ;;  %v171_v62 = vld [vmem:[%s12390_s1 + $0x178] sm:$0xff] }
  0x56   :  { %7837 = vmatmul.mubr.msk.bf16.gmra.mrb[32].mxu1 %vm284_vm0, %v9481_v20  ;;  %503 = vmatprep.mubr.bf16.mxu0 %v12435_v8  ;;  %v7814_v6 = vcombine.high %v228_v4, %v229_v5  ;;  %v7813_v9 = vcombine.low %v228_v4, %v229_v5  ;;  %v230_v12 = vld [vmem:[%s12391_s2 + $0x140] sm:$0xff]  ;;  %v173_v4 = vld [vmem:[%s12390_s1 + $0x188] sm:$0xff]  ;;  %v175_v7 = vld [vmem:[%s12390_s1 + $0x198] sm:$0xff] }
  0x57   :  { %1717 = vmatprep.mubr.bf16.mxu1 %v12435_v8  ;;  %v231_v13 = vld [vmem:[%s12391_s2 + $0x160] sm:$0xff]  ;;  %12524 = vst [vmem:[#allocation26_spill] sm:$0xff] %v9737_v56  ;;  %v186_v34 = vld [vmem:[%s12390_s1 + $0x1f0] sm:$0xff]  ;;  %v187_v35 = vld [vmem:[%s12390_s1 + $0x1f8] sm:$0xff] }
  0x58   :  { %819 = vmatpush1.bf16.msra.mxu0 %v7809_v58  ;;  %v7816_v15 = vcombine.high %v230_v12, %v231_v13  ;;  %v7815_v16 = vcombine.low %v230_v12, %v231_v13  ;;  %v232_v19 = vld [vmem:[%s12391_s2 + $0x180] sm:$0xff]  ;;  %v169_v58 = vld [vmem:[%s12390_s1 + $0x168] sm:$0xff]  ;;  %v9877_v40 = vpack.c.bf16 %v187_v35, %v186_v34  ;;  %v3789_v47 = vld [vmem:[%s12392_s3 + $0x50] sm:$0xff] }
  0x59   :  { %820 = vmatprep.subr.bf16.mxu0 %v7812_v63  ;;  %v233_v21 = vld [vmem:[%s12391_s2 + $0x1a0] sm:$0xff]  ;;  %v9765_v63 = vpack.c.bf16 %v171_v62, %v170_v61  ;;  %v177_v12 = vld [vmem:[%s12390_s1 + $0x1a8] sm:$0xff]  ;;  %v30_v54 = vld [vmem:[%s12389_s0 + $0x10] sm:$0xff] }
  0x5a   :  { %v7818_v22 = vcombine.high %v232_v19, %v233_v21  ;;  %v156_v23 = vld [vmem:[%s12390_s1 + $0x100] sm:$0xff]  ;;  %v7817_v24 = vcombine.low %v232_v19, %v233_v21  ;;  %12533 = vst [vmem:[#allocation35_spill] sm:$0xff] %v9877_v40  ;;  %v31_v55 = vld [vmem:[%s12389_s0 + $0x18] sm:$0xff]  ;;  %v33_v37 = vld [vmem:[%s12389_s0 + $0x28] sm:$0xff] }
  0x5b   :  { %v234_v26 = vld [vmem:[%s12391_s2 + $0x1c0] sm:$0xff]  ;;  %v9653_v32 = vpack.c.bf16 %v157_v25, %v156_v23  ;;  %12526 = vst [vmem:[#allocation28_spill] sm:$0xff] %v9765_v63  ;;  %v183_v25 = vld [vmem:[%s12390_s1 + $0x1d8] sm:$0xff]  ;;  %v42_v34 = vld [vmem:[%s12389_s0 + $0x70] sm:$0xff] }
  0x5c   :  { %821 = vmatpush1.bf16.msra.mxu0 %v7811_v1  ;;  %v235_v28 = vld [vmem:[%s12391_s2 + $0x1e0] sm:$0xff]  ;;  %v43_v35 = vld [vmem:[%s12389_s0 + $0x78] sm:$0xff] }
  0x5d   :  { %7782 = vmatmul.mubr.msk.bf16.gmra.mrb[36].mxu0 %vm284_vm0, %v9501_v27  ;;  %822 = vmatprep.subr.bf16.mxu0 %v7814_v6  ;;  %v7820_v29 = vcombine.high %v234_v26, %v235_v28  ;;  %v7819_v31 = vcombine.low %v234_v26, %v235_v28  ;;  %12519 = vst [vmem:[#allocation21_spill] sm:$0xff] %v9653_v32  ;;  %v160_v43 = vld [vmem:[%s12390_s1 + $0x120] sm:$0xff]  ;;  %v174_v6 = vld [vmem:[%s12390_s1 + $0x190] sm:$0xff] }
  0x5e   :  { %7838 = vmatmul.mubr.msk.bf16.gmra.mrb[36].mxu1 %vm284_vm0, %v9501_v27  ;;  %513 = vmatprep.mubr.bf16.mxu0 %v12435_v8  ;;  %v9695_v45 = vpack.c.bf16 %v161_v44, %v160_v43  ;;  %v164_v49 = vld [vmem:[%s12390_s1 + $0x140] sm:$0xff]  ;;  %v29_v44 = vld [vmem:[%s12389_s0 + $0x8] sm:$0xff] }
  0x5f   :  { %1727 = vmatprep.mubr.bf16.mxu1 %v12435_v8  ;;  %v9723_v52 = vpack.c.bf16 %v165_v50, %v164_v49  ;;  %v168_v57 = vld [vmem:[%s12390_s1 + $0x160] sm:$0xff]  ;;  %v3790_v49 = vld [vmem:[%s12392_s3 + $0x70] sm:$0xff] }
  0x60   :  { %823 = vmatpush1.bf16.msra.mxu0 %v7813_v9  ;;  %12521 = vst [vmem:[#allocation23_spill] sm:$0xff] %v9695_v45  ;;  %v9751_v59 = vpack.c.bf16 %v169_v58, %v168_v57  ;;  %v172_v1 = vld [vmem:[%s12390_s1 + $0x180] sm:$0xff]  ;;  %v9793_v9 = vpack.c.bf16 %v175_v7, %v174_v6  ;;  %v7944_v50 = vcombine.high %v3789_v47, %v3790_v49  ;;  %v3791_v57 = vld [vmem:[%s12392_s3 + $0x90] sm:$0xff]  ;;  %v35_v7 = vld [vmem:[%s12389_s0 + $0x38] sm:$0xff] }
  0x61   :  { %824 = vmatprep.subr.bf16.mxu0 %v7816_v15  ;;  %12523 = vst [vmem:[#allocation25_spill] sm:$0xff] %v9723_v52  ;;  %v9779_v5 = vpack.c.bf16 %v173_v4, %v172_v1  ;;  %v176_v10 = vld [vmem:[%s12390_s1 + $0x1a0] sm:$0xff]  ;;  %v178_v15 = vld [vmem:[%s12390_s1 + $0x1b0] sm:$0xff]  ;;  %v7943_v61 = vcombine.low %v3789_v47, %v3790_v49  ;;  %v9918_v1 = vpack.c.bf16 %v31_v55, %v30_v54  ;;  %v45_v47 = vld [vmem:[%s12389_s0 + $0x88] sm:$0xff] }
  0x62   :  { %12525 = vst [vmem:[#allocation27_spill] sm:$0xff] %v9751_v59  ;;  %12528 = vst [vmem:[#allocation30_spill] sm:$0xff] %v9793_v9  ;;  %v9807_v13 = vpack.c.bf16 %v177_v12, %v176_v10  ;;  %v180_v21 = vld [vmem:[%s12390_s1 + $0x1c0] sm:$0xff]  ;;  %v3792_v58 = vld [vmem:[%s12392_s3 + $0xb0] sm:$0xff] }
  0x63   :  { %12527 = vst [vmem:[#allocation29_spill] sm:$0xff] %v9779_v5  ;;  %v184_v28 = vld [vmem:[%s12390_s1 + $0x1e0] sm:$0xff]  ;;  %v7946_v62 = vcombine.high %v3791_v57, %v3792_v58  ;;  %12535 = vst [vmem:[#allocation37_spill] sm:$0xff] %v9918_v1  ;;  %v7945_v4 = vcombine.low %v3791_v57, %v3792_v58  ;;  %v34_v6 = vld [vmem:[%s12389_s0 + $0x30] sm:$0xff] }
  0x64   :  { %825 = vmatpush1.bf16.msra.mxu0 %v7815_v16  ;;  %v179_v16 = vld [vmem:[%s12390_s1 + $0x1b8] sm:$0xff]  ;;  %v28_v43 = vld [vmem:[%s12389_s0] sm:$0xff]  ;;  %v9942_v10 = vpack.c.bf16 %v35_v7, %v34_v6  ;;  %v46_v54 = vld [vmem:[%s12389_s0 + $0x90] sm:$0xff] }
  0x65   :  { %7783 = vmatmul.mubr.msk.bf16.gmra.mrb[40].mxu0 %vm284_vm0, %v9515_v30  ;;  %826 = vmatprep.subr.bf16.mxu0 %v7818_v22  ;;  %v9821_v19 = vpack.c.bf16 %v179_v16, %v178_v15  ;;  %v181_v22 = vld [vmem:[%s12390_s1 + $0x1c8] sm:$0xff]  ;;  %v9891_v46 = vpack.c.bf16 %v29_v44, %v28_v43  ;;  %v32_v36 = vld [vmem:[%s12389_s0 + $0x20] sm:$0xff]  ;;  %v9990_v43 = vpack.c.bf16 %v43_v35, %v42_v34  ;;  %v47_v57 = vld [vmem:[%s12389_s0 + $0x98] sm:$0xff] }
  0x66   :  { %7839 = vmatmul.mubr.msk.bf16.gmra.mrb[40].mxu1 %vm284_vm0, %v9515_v30  ;;  %523 = vmatprep.mubr.bf16.mxu0 %v12435_v8  ;;  %v9835_v23 = vpack.c.bf16 %v181_v22, %v180_v21  ;;  %12537 = vst [vmem:[#allocation39_spill] sm:$0xff] %v9942_v10  ;;  %v36_v12 = vld [vmem:[%s12389_s0 + $0x40] sm:$0xff]  ;;  %v37_v15 = vld [vmem:[%s12389_s0 + $0x48] sm:$0xff]  ;;  %v38_v21 = vld [vmem:[%s12389_s0 + $0x50] sm:$0xff]  ;;  %v10032_v6 = vpack.c.bf16 %v47_v57, %v46_v54 }
  0x67   :  { %1737 = vmatprep.mubr.bf16.mxu1 %v12435_v8  ;;  %12529 = vst [vmem:[#allocation31_spill] sm:$0xff] %v9821_v19  ;;  %12534 = vst [vmem:[#allocation36_spill] sm:$0xff] %v9891_v46  ;;  %v9954_v16 = vpack.c.bf16 %v37_v15, %v36_v12  ;;  %v39_v22 = vld [vmem:[%s12389_s0 + $0x58] sm:$0xff]  ;;  %v44_v44 = vld [vmem:[%s12389_s0 + $0x80] sm:$0xff] }
  0x68   :  { %827 = vmatpush1.bf16.msra.mxu0 %v7817_v24  ;;  %12530 = vst [vmem:[#allocation32_spill] sm:$0xff] %v9835_v23  ;;  %v182_v24 = vld [vmem:[%s12390_s1 + $0x1d0] sm:$0xff]  ;;  %12541 = vst [vmem:[#allocation43_spill] sm:$0xff] %v9990_v43  ;;  %v10002_v49 = vpack.c.bf16 %v45_v47, %v44_v44  ;;  %v9017_v55 = vld [vmem:[%s12394_s5 + $0x100] ss:$8 sps:$4 sm:$0xff]  }
  0x69   :  { %828 = vmatprep.subr.bf16.mxu0 %v7820_v29  ;;  %v9849_v26 = vpack.c.bf16 %v183_v25, %v182_v24  ;;  %v185_v29 = vld [vmem:[%s12390_s1 + $0x1e8] sm:$0xff]  ;;  %12538 = vst [vmem:[#allocation40_spill] sm:$0xff] %v9954_v16  ;;  %v9966_v24 = vpack.c.bf16 %v39_v22, %v38_v21  ;;  %v40_v25 = vld [vmem:[%s12389_s0 + $0x60] sm:$0xff]  ;;  %v3793_v58 = vld [vmem:[%s12392_s3 + $0xd0] sm:$0xff] }
  0x6a   :  { %12542 = vst [vmem:[#allocation44_spill] sm:$0xff] %v10002_v49  ;;  %12543 = vst [vmem:[#allocation45_spill] sm:$0xff] %v10032_v6  ;;  %v9025_v7 = vld [vmem:[%s12394_s5 + $0x124] ss:$8 sps:$4 sm:$0xff]   ;;  %v9023_v12 = vld [vmem:[%s12394_s5 + $0x120] ss:$8 sps:$4 sm:$0xff]  }
  0x6b   :  { %12531 = vst [vmem:[#allocation33_spill] sm:$0xff] %v9849_v26  ;;  %12539 = vst [vmem:[#allocation41_spill] sm:$0xff] %v9966_v24  ;;  %v48_v15 = vld [vmem:[%s12389_s0 + $0xa0] sm:$0xff]  ;;  %v49_v21 = vld [vmem:[%s12389_s0 + $0xa8] sm:$0xff] }
  0x6c   :  { %829 = vmatpush1.bf16.msra.mxu0 %v7819_v31  ;;  %v9863_v31 = vpack.c.bf16 %v185_v29, %v184_v28  ;;  %v41_v28 = vld [vmem:[%s12389_s0 + $0x68] sm:$0xff]  ;;  %v9028_v22 = vld [vmem:[%s12394_s5 + $0x134] ss:$8 sps:$4 sm:$0xff]  }
  0x6d   :  { %7784 = vmatmul.mubr.msk.bf16.gmra.mrb[44].mxu0 %vm284_vm0, %v9529_v33  ;;  %v9978_v29 = vpack.c.bf16 %v41_v28, %v40_v25  ;;  %v9026_v25 = vld [vmem:[%s12394_s5 + $0x130] ss:$8 sps:$4 sm:$0xff]   ;;  %v10056_v28 = vpack.c.bf16 %v49_v21, %v48_v15  ;;  %v9031_v34 = vld [vmem:[%s12394_s5 + $0x144] ss:$8 sps:$4 sm:$0xff]   ;;  %v9029_v35 = vld [vmem:[%s12394_s5 + $0x140] ss:$8 sps:$4 sm:$0xff]  }
  0x6e   :  { %7840 = vmatmul.mubr.msk.bf16.gmra.mrb[44].mxu1 %vm284_vm0, %v9529_v33  ;;  %533 = vmatprep.mubr.bf16.mxu0 %v12435_v8  ;;  %12532 = vst [vmem:[#allocation34_spill] sm:$0xff] %v9863_v31  ;;  %v50_v44 = vld [vmem:[%s12389_s0 + $0xb0] sm:$0xff]  ;;  %v51_v47 = vld [vmem:[%s12389_s0 + $0xb8] sm:$0xff]  ;;  %v9037_v57 = vld [vmem:[%s12394_s5 + $0x164] ss:$8 sps:$4 sm:$0xff]  }
  0x6f   :  { %1747 = vmatprep.mubr.bf16.mxu1 %v12435_v8  ;;  %12540 = vst [vmem:[#allocation42_spill] sm:$0xff] %v9978_v29  ;;  %12544 = vst [vmem:[#allocation46_spill] sm:$0xff] %v10056_v28  ;;  %v10077_v54 = vpack.c.bf16 %v51_v47, %v50_v44  ;;  %v54_v15 = vld [vmem:[%s12389_s0 + $0xd0] sm:$0xff]  ;;  %v55_v21 = vld [vmem:[%s12389_s0 + $0xd8] sm:$0xff] }
  0x70   :  { %v9047_v44 = vld [vmem:[%s12394_s5 + $0x1a0] ss:$8 sps:$4 sm:$0xff]  }
  0x71   :  { %12545 = vst [vmem:[#allocation47_spill] sm:$0xff] %v10077_v54  ;;  %v56_v47 = vld [vmem:[%s12389_s0 + $0xe0] sm:$0xff] }
  0x75   :  { %7785 = vmatmul.mubr.msk.bf16.gmra.mrb[48].mxu0 %vm284_vm0, %v9549_v41 }
  0x76   :  { %7841 = vmatmul.mubr.msk.bf16.gmra.mrb[48].mxu1 %vm284_vm0, %v9549_v41  ;;  %543 = vmatprep.mubr.bf16.mxu0 %v12435_v8 }
  0x77   :  { %1757 = vmatprep.mubr.bf16.mxu1 %v12435_v8 }
  0x7d   :  { %7786 = vmatmul.mubr.msk.bf16.gmra.mrb[52].mxu0 %vm284_vm0, %v9575_v53 }
  0x7e   :  { %7842 = vmatmul.mubr.msk.bf16.gmra.mrb[52].mxu1 %vm284_vm0, %v9575_v53  ;;  %553 = vmatprep.mubr.bf16.mxu0 %v12435_v8 }
  0x7f   :  { %1767 = vmatprep.mubr.bf16.mxu1 %v12435_v8 }
  0x85   :  { %7787 = vmatmul.mubr.msk.bf16.gmra.mrb[56].mxu0 %vm284_vm0, %v9601_v2 }
  0x86   :  { %7843 = vmatmul.mubr.msk.bf16.gmra.mrb[56].mxu1 %vm284_vm0, %v9601_v2  ;;  %563 = vmatprep.mubr.bf16.mxu0 %v12435_v8 }
  0x87   :  { %1777 = vmatprep.mubr.bf16.mxu1 %v12435_v8 }
  0x8d   :  { %7788 = vmatmul.mubr.msk.bf16.gmra.mrb[60].mxu0 %vm284_vm0, %v9627_v18 }
  0x8e   :  { %7844 = vmatmul.mubr.msk.bf16.gmra.mrb[60].mxu1 %vm284_vm0, %v9627_v18  ;;  %573 = vmatprep.mubr.bf16.mxu0 %v12435_v8 }
  0x8f   :  { %1787 = vmatprep.mubr.bf16.mxu1 %v12435_v8 }
  0x95   :  { %7789 = vmatmul.mubr.msk.bf16.gmra.mrb[64].mxu0 %vm284_vm0, %v9653_v32 }
  0x96   :  { %7845 = vmatmul.mubr.msk.bf16.gmra.mrb[64].mxu1 %vm284_vm0, %v9653_v32  ;;  %583 = vmatprep.mubr.bf16.mxu0 %v12435_v8 }
  0x97   :  { %1797 = vmatprep.mubr.bf16.mxu1 %v12435_v8 }
  0x9d   :  { %7790 = vmatmul.mubr.msk.bf16.gmra.mrb[68].mxu0 %vm284_vm0, %v9681_v42 }
  0x9e   :  { %7846 = vmatmul.mubr.msk.bf16.gmra.mrb[68].mxu1 %vm284_vm0, %v9681_v42  ;;  %593 = vmatprep.mubr.bf16.mxu0 %v12435_v8 }
  0x9f   :  { %1807 = vmatprep.mubr.bf16.mxu1 %v12435_v8 }
  0xa5   :  { %7791 = vmatmul.mubr.msk.bf16.gmra.mrb[72].mxu0 %vm284_vm0, %v9695_v45 }
  0xa6   :  { %7847 = vmatmul.mubr.msk.bf16.gmra.mrb[72].mxu1 %vm284_vm0, %v9695_v45  ;;  %603 = vmatprep.mubr.bf16.mxu0 %v12435_v8 }
  0xa7   :  { %1817 = vmatprep.mubr.bf16.mxu1 %v12435_v8 }
  0xad   :  { %7792 = vmatmul.mubr.msk.bf16.gmra.mrb[76].mxu0 %vm284_vm0, %v9709_v48 }
  0xae   :  { %7848 = vmatmul.mubr.msk.bf16.gmra.mrb[76].mxu1 %vm284_vm0, %v9709_v48  ;;  %613 = vmatprep.mubr.bf16.mxu0 %v12435_v8 }
  0xaf   :  { %1827 = vmatprep.mubr.bf16.mxu1 %v12435_v8 }
  0xb5   :  { %7793 = vmatmul.mubr.msk.bf16.gmra.mrb[80].mxu0 %vm284_vm0, %v9723_v52 }
  0xb6   :  { %7849 = vmatmul.mubr.msk.bf16.gmra.mrb[80].mxu1 %vm284_vm0, %v9723_v52  ;;  %623 = vmatprep.mubr.bf16.mxu0 %v12435_v8 }
  0xb7   :  { %1837 = vmatprep.mubr.bf16.mxu1 %v12435_v8 }
  0xbd   :  { %7794 = vmatmul.mubr.msk.bf16.gmra.mrb[84].mxu0 %vm284_vm0, %v9737_v56 }
  0xbe   :  { %7850 = vmatmul.mubr.msk.bf16.gmra.mrb[84].mxu1 %vm284_vm0, %v9737_v56  ;;  %633 = vmatprep.mubr.bf16.mxu0 %v12435_v8 }
  0xbf   :  { %1847 = vmatprep.mubr.bf16.mxu1 %v12435_v8 }
  0xc5   :  { %7795 = vmatmul.mubr.msk.bf16.gmra.mrb[88].mxu0 %vm284_vm0, %v9751_v59 }
  0xc6   :  { %7851 = vmatmul.mubr.msk.bf16.gmra.mrb[88].mxu1 %vm284_vm0, %v9751_v59  ;;  %643 = vmatprep.mubr.bf16.mxu0 %v12435_v8 }
  0xc7   :  { %1857 = vmatprep.mubr.bf16.mxu1 %v12435_v8 }
  0xcd   :  { %7796 = vmatmul.mubr.msk.bf16.gmra.mrb[92].mxu0 %vm284_vm0, %v9765_v63 }
  0xce   :  { %7852 = vmatmul.mubr.msk.bf16.gmra.mrb[92].mxu1 %vm284_vm0, %v9765_v63  ;;  %653 = vmatprep.mubr.bf16.mxu0 %v12435_v8 }
  0xcf   :  { %1867 = vmatprep.mubr.bf16.mxu1 %v12435_v8 }
  0xd5   :  { %7797 = vmatmul.mubr.msk.bf16.gmra.mrb[96].mxu0 %vm284_vm0, %v9779_v5 }
  0xd6   :  { %7853 = vmatmul.mubr.msk.bf16.gmra.mrb[96].mxu1 %vm284_vm0, %v9779_v5  ;;  %663 = vmatprep.mubr.bf16.mxu0 %v12435_v8 }
  0xd7   :  { %1877 = vmatprep.mubr.bf16.mxu1 %v12435_v8 }
  0xdd   :  { %7798 = vmatmul.mubr.msk.bf16.gmra.mrb[100].mxu0 %vm284_vm0, %v9793_v9 }
  0xde   :  { %7854 = vmatmul.mubr.msk.bf16.gmra.mrb[100].mxu1 %vm284_vm0, %v9793_v9  ;;  %673 = vmatprep.mubr.bf16.mxu0 %v12435_v8 }
  0xdf   :  { %1887 = vmatprep.mubr.bf16.mxu1 %v12435_v8 }
  0xe5   :  { %7799 = vmatmul.mubr.msk.bf16.gmra.mrb[104].mxu0 %vm284_vm0, %v9807_v13 }
  0xe6   :  { %7855 = vmatmul.mubr.msk.bf16.gmra.mrb[104].mxu1 %vm284_vm0, %v9807_v13  ;;  %683 = vmatprep.mubr.bf16.mxu0 %v12435_v8 }
  0xe7   :  { %1897 = vmatprep.mubr.bf16.mxu1 %v12435_v8 }
  0xed   :  { %7800 = vmatmul.mubr.msk.bf16.gmra.mrb[108].mxu0 %vm284_vm0, %v9821_v19 }
  0xee   :  { %7856 = vmatmul.mubr.msk.bf16.gmra.mrb[108].mxu1 %vm284_vm0, %v9821_v19  ;;  %693 = vmatprep.mubr.bf16.mxu0 %v12435_v8 }
  0xef   :  { %1907 = vmatprep.mubr.bf16.mxu1 %v12435_v8 }
  0xf5   :  { %7801 = vmatmul.mubr.msk.bf16.gmra.mrb[112].mxu0 %vm284_vm0, %v9835_v23 }
  0xf6   :  { %7857 = vmatmul.mubr.msk.bf16.gmra.mrb[112].mxu1 %vm284_vm0, %v9835_v23  ;;  %703 = vmatprep.mubr.bf16.mxu0 %v12435_v8 }
  0xf7   :  { %1917 = vmatprep.mubr.bf16.mxu1 %v12435_v8 }
  0xfd   :  { %7802 = vmatmul.mubr.msk.bf16.gmra.mrb[116].mxu0 %vm284_vm0, %v9849_v26 }
  0xfe   :  { %7858 = vmatmul.mubr.msk.bf16.gmra.mrb[116].mxu1 %vm284_vm0, %v9849_v26  ;;  %713 = vmatprep.mubr.bf16.mxu0 %v12435_v8 }
  0xff   :  { %1927 = vmatprep.mubr.bf16.mxu1 %v12435_v8 }
 0x105   :  { %7803 = vmatmul.mubr.msk.bf16.gmra.mrb[120].mxu0 %vm284_vm0, %v9863_v31 }
 0x106   :  { %7859 = vmatmul.mubr.msk.bf16.gmra.mrb[120].mxu1 %vm284_vm0, %v9863_v31  ;;  %723 = vmatprep.mubr.bf16.mxu0 %v12435_v8 }
 0x107   :  { %1937 = vmatprep.mubr.bf16.mxu1 %v12435_v8 }
 0x10d   :  { %7804 = vmatmul.mubr.msk.bf16.gmra.mrb[124].mxu0 %vm284_vm0, %v9877_v40 }
 0x10e   :  { %7860 = vmatmul.mubr.msk.bf16.gmra.mrb[124].mxu1 %vm284_vm0, %v9877_v40  ;;  %846 = vmatprep.mubr.bf16.mxu0 %v12435_v8 }
 0x10f   :  { %2060 = vmatprep.mubr.bf16.mxu1 %v12435_v8 }
 0x115   :  { %847 = vmatmul.mubr.bf16.vlgmr.msra.gmra.mrb[0].mxu0 %v9891_v46 }
 0x116   :  { %2061 = vmatmul.mubr.bf16.vlgmr.msra.gmra.mrb[0].mxu1 %v9891_v46  ;;  %856 = vmatprep.mubr.bf16.mxu0 %v12435_v8 }
 0x117   :  { %3836 = vmatpush1.bf16.msra.mxu1 %v7941_v39  ;;  %2070 = vmatprep.mubr.bf16.mxu1 %v12435_v8  ;;  %v9930_v39 = vpack.c.bf16 %v33_v37, %v32_v36  ;;  %v9022_v36 = vld [vmem:[%s12394_s5 + $0x114] ss:$8 sps:$4 sm:$0xff]   ;;  %v9020_v37 = vld [vmem:[%s12394_s5 + $0x110] ss:$8 sps:$4 sm:$0xff]  }
 0x118   :  { %3837 = vmatprep.subr.bf16.mxu1 %v7944_v50  ;;  %v9019_v50 = vld [vmem:[%s12394_s5 + $0x104] ss:$8 sps:$4 sm:$0xff]  }
 0x119   :  { %12536 = vst [vmem:[#allocation38_spill] sm:$0xff] %v9930_v39  ;;  %2905 = vmatprep.subr.bf16.mxu0 %v9019_v50  ;;  %v9034_v50 = vld [vmem:[%s12394_s5 + $0x154] ss:$8 sps:$4 sm:$0xff]  }
 0x11a   :  { %2906 = vmatpush1.bf16.msra.mxu0 %v9017_v55  ;;  %v9032_v55 = vld [vmem:[%s12394_s5 + $0x150] ss:$8 sps:$4 sm:$0xff]  }
 0x11b   :  { %3838 = vmatpush1.bf16.msra.mxu1 %v7943_v61  ;;  %v3794_v61 = vld [vmem:[%s12392_s3 + $0xf0] sm:$0xff]  ;;  %2907 = vmatprep.subr.bf16.mxu0 %v9022_v36 }
 0x11c   :  { %3839 = vmatprep.subr.bf16.mxu1 %v7946_v62  ;;  %v7947_v62 = vcombine.low %v3793_v58, %v3794_v61 }
 0x11d   :  { %857 = vmatmul.mubr.bf16.gmra.mrb[4].mxu0 %v9918_v1 }
 0x11e   :  { %2071 = vmatmul.mubr.bf16.gmra.mrb[4].mxu1 %v9918_v1  ;;  %866 = vmatprep.mubr.bf16.mxu0 %v12435_v8 }
 0x11f   :  { %2080 = vmatprep.mubr.bf16.mxu1 %v12435_v8  ;;  %3840 = vmatpush1.bf16.msra.mxu1 %v7945_v4  ;;  %v7948_v4 = vcombine.high %v3793_v58, %v3794_v61  ;;  %v9035_v58 = vld [vmem:[%s12394_s5 + $0x160] ss:$8 sps:$4 sm:$0xff]  }
 0x120   :  { %2908 = vmatpush1.bf16.msra.mxu0 %v9020_v37  ;;  %v52_v61 = vld [vmem:[%s12389_s0 + $0xc0] sm:$0xff]  ;;  %v9038_v37 = vld [vmem:[%s12394_s5 + $0x170] ss:$8 sps:$4 sm:$0xff]  }
 0x121   :  { %3841 = vmatprep.subr.bf16.mxu1 %v7948_v4  ;;  %2909 = vmatprep.subr.bf16.mxu0 %v9025_v7  ;;  %v9040_v4 = vld [vmem:[%s12394_s5 + $0x174] ss:$8 sps:$4 sm:$0xff]   ;;  %v9043_v7 = vld [vmem:[%s12394_s5 + $0x184] ss:$8 sps:$4 sm:$0xff]  }
 0x123   :  { %3842 = vmatpush1.bf16.msra.mxu1 %v7947_v62  ;;  %v53_v62 = vld [vmem:[%s12389_s0 + $0xc8] sm:$0xff] }
 0x124   :  { %2910 = vmatpush1.bf16.msra.mxu0 %v9023_v12  ;;  %v10101_v36 = vpack.c.bf16 %v53_v62, %v52_v61  ;;  %v9041_v12 = vld [vmem:[%s12394_s5 + $0x180] ss:$8 sps:$4 sm:$0xff]   ;;  %v9055_v61 = vld [vmem:[%s12394_s5 + $0x1c4] ss:$8 sps:$4 sm:$0xff]  }
 0x125   :  { %867 = vmatmul.mubr.bf16.gmra.mrb[8].mxu0 %v9930_v39  ;;  %2911 = vmatprep.subr.bf16.mxu0 %v9028_v22  ;;  %v9046_v22 = vld [vmem:[%s12394_s5 + $0x194] ss:$8 sps:$4 sm:$0xff]   ;;  %v9053_v62 = vld [vmem:[%s12394_s5 + $0x1c0] ss:$8 sps:$4 sm:$0xff]  }
 0x126   :  { %2081 = vmatmul.mubr.bf16.gmra.mrb[8].mxu1 %v9930_v39  ;;  %876 = vmatprep.mubr.bf16.mxu0 %v12435_v8  ;;  %12546 = vst [vmem:[#allocation48_spill] sm:$0xff] %v10101_v36 }
 0x127   :  { %2090 = vmatprep.mubr.bf16.mxu1 %v12435_v8 }
 0x128   :  { %2912 = vmatpush1.bf16.msra.mxu0 %v9026_v25  ;;  %v10125_v25 = vpack.c.bf16 %v55_v21, %v54_v15  ;;  %v9056_v15 = vld [vmem:[%s12394_s5 + $0x1d0] ss:$8 sps:$4 sm:$0xff]   ;;  %v9061_v21 = vld [vmem:[%s12394_s5 + $0x1e4] ss:$8 sps:$4 sm:$0xff]  }
 0x129   :  { %2913 = vmatprep.subr.bf16.mxu0 %v9031_v34  ;;  %v9044_v34 = vld [vmem:[%s12394_s5 + $0x190] ss:$8 sps:$4 sm:$0xff]  }
 0x12a   :  { %12547 = vst [vmem:[#allocation49_spill] sm:$0xff] %v10125_v25 }
 0x12c   :  { %2914 = vmatpush1.bf16.msra.mxu0 %v9029_v35  ;;  %v9049_v35 = vld [vmem:[%s12394_s5 + $0x1a4] ss:$8 sps:$4 sm:$0xff]  }
 0x12d   :  { %877 = vmatmul.mubr.bf16.gmra.mrb[12].mxu0 %v9942_v10  ;;  %2915 = vmatprep.subr.bf16.mxu0 %v9034_v50  ;;  %v57_v50 = vld [vmem:[%s12389_s0 + $0xe8] sm:$0xff] }
 0x12e   :  { %2091 = vmatmul.mubr.bf16.gmra.mrb[12].mxu1 %v9942_v10  ;;  %886 = vmatprep.mubr.bf16.mxu0 %v12435_v8 }
 0x12f   :  { %2100 = vmatprep.mubr.bf16.mxu1 %v12435_v8 }
 0x130   :  { %2916 = vmatpush1.bf16.msra.mxu0 %v9032_v55  ;;  %v9052_v55 = vld [vmem:[%s12394_s5 + $0x1b4] ss:$8 sps:$4 sm:$0xff]  }
 0x131   :  { %2917 = vmatprep.subr.bf16.mxu0 %v9037_v57  ;;  %v10149_v57 = vpack.c.bf16 %v57_v50, %v56_v47  ;;  %v9062_v50 = vld [vmem:[%s12394_s5 + $0x1f0] ss:$8 sps:$4 sm:$0xff]  }
 0x133   :  { %12548 = vst [vmem:[#allocation50_spill] sm:$0xff] %v10149_v57 }
 0x134   :  { %2918 = vmatpush1.bf16.msra.mxu0 %v9035_v58  ;;  %v9050_v58 = vld [vmem:[%s12394_s5 + $0x1b0] ss:$8 sps:$4 sm:$0xff]  }
 0x135   :  { %887 = vmatmul.mubr.bf16.gmra.mrb[16].mxu0 %v9954_v16  ;;  %2919 = vmatprep.subr.bf16.mxu0 %v9040_v4  ;;  %v58_v4 = vld [vmem:[%s12389_s0 + $0xf0] sm:$0xff] }
 0x136   :  { %2101 = vmatmul.mubr.bf16.gmra.mrb[16].mxu1 %v9954_v16  ;;  %896 = vmatprep.mubr.bf16.mxu0 %v12435_v8 }
 0x137   :  { %2110 = vmatprep.mubr.bf16.mxu1 %v12435_v8 }
 0x138   :  { %2920 = vmatpush1.bf16.msra.mxu0 %v9038_v37  ;;  %v59_v37 = vld [vmem:[%s12389_s0 + $0xf8] sm:$0xff] }
 0x139   :  { %2921 = vmatprep.subr.bf16.mxu0 %v9043_v7  ;;  %v9058_v7 = vld [vmem:[%s12394_s5 + $0x1d4] ss:$8 sps:$4 sm:$0xff]  }
 0x13c   :  { %2922 = vmatpush1.bf16.msra.mxu0 %v9041_v12  ;;  %v10173_v12 = vpack.c.bf16 %v59_v37, %v58_v4 }
 0x13d   :  { %897 = vmatmul.mubr.bf16.gmra.mrb[20].mxu0 %v9966_v24  ;;  %2923 = vmatprep.subr.bf16.mxu0 %v9046_v22  ;;  %v9059_v22 = vld [vmem:[%s12394_s5 + $0x1e0] ss:$8 sps:$4 sm:$0xff]  }
 0x13e   :  { %2111 = vmatmul.mubr.bf16.gmra.mrb[20].mxu1 %v9966_v24  ;;  %906 = vmatprep.mubr.bf16.mxu0 %v12435_v8  ;;  %12549 = vst [vmem:[#allocation51_spill] sm:$0xff] %v10173_v12 }
 0x13f   :  { %2120 = vmatprep.mubr.bf16.mxu1 %v12435_v8 }
 0x140   :  { %2924 = vmatpush1.bf16.msra.mxu0 %v9044_v34  ;;  %v60_v34 = vld [vmem:[%s12389_s0 + $0x100] sm:$0xff] }
 0x141   :  { %2925 = vmatprep.subr.bf16.mxu0 %v9049_v35  ;;  %v61_v35 = vld [vmem:[%s12389_s0 + $0x108] sm:$0xff] }
 0x142   :  { %v10197_v47 = vpack.c.bf16 %v61_v35, %v60_v34  ;;  %v66_v34 = vld [vmem:[%s12389_s0 + $0x130] sm:$0xff]  ;;  %v67_v35 = vld [vmem:[%s12389_s0 + $0x138] sm:$0xff] }
 0x144   :  { %2926 = vmatpush1.bf16.msra.mxu0 %v9047_v44  ;;  %v9064_v44 = vld [vmem:[%s12394_s5 + $0x1f4] ss:$8 sps:$4 sm:$0xff]   ;;  %12550 = vst [vmem:[#allocation52_spill] sm:$0xff] %v10197_v47 }
 0x145   :  { %907 = vmatmul.mubr.bf16.gmra.mrb[24].mxu0 %v9978_v29  ;;  %2927 = vmatprep.subr.bf16.mxu0 %v9052_v55  ;;  %v62_v55 = vld [vmem:[%s12389_s0 + $0x110] sm:$0xff] }
 0x146   :  { %2121 = vmatmul.mubr.bf16.gmra.mrb[24].mxu1 %v9978_v29  ;;  %916 = vmatprep.mubr.bf16.mxu0 %v12435_v8 }
 0x147   :  { %2130 = vmatprep.mubr.bf16.mxu1 %v12435_v8 }
 0x148   :  { %2928 = vmatpush1.bf16.msra.mxu0 %v9050_v58  ;;  %v63_v58 = vld [vmem:[%s12389_s0 + $0x118] sm:$0xff] }
 0x149   :  { %2929 = vmatprep.subr.bf16.mxu0 %v9055_v61  ;;  %v10215_v61 = vld [vmem:[%s12391_s2 + $0x10] sm:$0xff]  ;;  %v10222_v4 = vpack.c.bf16 %v63_v58, %v62_v55  ;;  %v69_v55 = vld [vmem:[%s12389_s0 + $0x148] sm:$0xff] }
 0x14b   :  { %12551 = vst [vmem:[#allocation53_spill] sm:$0xff] %v10222_v4 }
 0x14c   :  { %2930 = vmatpush1.bf16.msra.mxu0 %v9053_v62  ;;  %v10220_v62 = vld [vmem:[%s12391_s2 + $0x30] sm:$0xff] }
 0x14d   :  { %917 = vmatmul.mubr.bf16.gmra.mrb[28].mxu0 %v9990_v43  ;;  %2931 = vmatprep.subr.bf16.mxu0 %v9058_v7  ;;  %v7982_v7 = vcombine.high %v10215_v61, %v10220_v62 }
 0x14e   :  { %2131 = vmatmul.mubr.bf16.gmra.mrb[28].mxu1 %v9990_v43  ;;  %926 = vmatprep.mubr.bf16.mxu0 %v12435_v8 }
 0x14f   :  { %2140 = vmatprep.mubr.bf16.mxu1 %v12435_v8  ;;  %4268 = vmatprep.subr.bf16.mxu1 %v7982_v7  ;;  %v70_v7 = vld [vmem:[%s12389_s0 + $0x150] sm:$0xff] }
 0x150   :  { %2932 = vmatpush1.bf16.msra.mxu0 %v9056_v15  ;;  %v64_v15 = vld [vmem:[%s12389_s0 + $0x120] sm:$0xff] }
 0x151   :  { %2933 = vmatprep.subr.bf16.mxu0 %v9061_v21  ;;  %v65_v21 = vld [vmem:[%s12389_s0 + $0x128] sm:$0xff] }
 0x154   :  { %2934 = vmatpush1.bf16.msra.mxu0 %v9059_v22  ;;  %v10238_v22 = vpack.c.bf16 %v65_v21, %v64_v15  ;;  %v71_v15 = vld [vmem:[%s12389_s0 + $0x158] sm:$0xff] }
 0x155   :  { %927 = vmatmul.mubr.bf16.gmra.mrb[32].mxu0 %v10002_v49  ;;  %2935 = vmatprep.subr.bf16.mxu0 %v9064_v44  ;;  %v10250_v44 = vpack.c.bf16 %v67_v35, %v66_v34  ;;  %v10274_v21 = vpack.c.bf16 %v71_v15, %v70_v7  ;;  %v72_v34 = vld [vmem:[%s12389_s0 + $0x160] sm:$0xff]  ;;  %v73_v35 = vld [vmem:[%s12389_s0 + $0x168] sm:$0xff]  ;;  %v75_v7 = vld [vmem:[%s12389_s0 + $0x178] sm:$0xff] }
 0x156   :  { %2141 = vmatmul.mubr.bf16.gmra.mrb[32].mxu1 %v10002_v49  ;;  %936 = vmatprep.mubr.bf16.mxu0 %v12435_v8  ;;  %12552 = vst [vmem:[#allocation54_spill] sm:$0xff] %v10238_v22 }
 0x157   :  { %2150 = vmatprep.mubr.bf16.mxu1 %v12435_v8  ;;  %12553 = vst [vmem:[#allocation55_spill] sm:$0xff] %v10250_v44  ;;  %12555 = vst [vmem:[#allocation57_spill] sm:$0xff] %v10274_v21 }
 0x158   :  { %2936 = vmatpush1.bf16.msra.mxu0 %v9062_v50  ;;  %v68_v50 = vld [vmem:[%s12389_s0 + $0x140] sm:$0xff] }
 0x159   :  { %v10262_v58 = vpack.c.bf16 %v69_v55, %v68_v50  ;;  %v10286_v50 = vpack.c.bf16 %v73_v35, %v72_v34  ;;  %v74_v55 = vld [vmem:[%s12389_s0 + $0x170] sm:$0xff]  ;;  %v76_v34 = vld [vmem:[%s12389_s0 + $0x180] sm:$0xff]  ;;  %v77_v35 = vld [vmem:[%s12389_s0 + $0x188] sm:$0xff] }
 0x15a   :  { %v10298_v15 = vpack.c.bf16 %v75_v7, %v74_v55  ;;  %v10310_v37 = vpack.c.bf16 %v77_v35, %v76_v34  ;;  %v78_v55 = vld [vmem:[%s12389_s0 + $0x190] sm:$0xff]  ;;  %v79_v7 = vld [vmem:[%s12389_s0 + $0x198] sm:$0xff]  ;;  %v1169_v34 = vlaneseq }
 0x15b   :  { %12554 = vst [vmem:[#allocation56_spill] sm:$0xff] %v10262_v58  ;;  %12556 = vst [vmem:[#allocation58_spill] sm:$0xff] %v10286_v50 }
 0x15c   :  { %12557 = vst [vmem:[#allocation59_spill] sm:$0xff] %v10298_v15  ;;  %12558 = vst [vmem:[#allocation60_spill] sm:$0xff] %v10310_v37  ;;  %v1170_v35 = vshrl.u32 %v1169_v34, 7  ;;  %v1167_v34 = vld [vmem:[%s12393_s4] sm:$0x3] }
 0x15d   :  { %937 = vmatmul.mubr.bf16.gmra.mrb[36].mxu0 %v10032_v6 }
 0x15e   :  { %2151 = vmatmul.mubr.bf16.gmra.mrb[36].mxu1 %v10032_v6  ;;  %946 = vmatprep.mubr.bf16.mxu0 %v12435_v8 }
 0x15f   :  { %2160 = vmatprep.mubr.bf16.mxu1 %v12435_v8 }
 0x165   :  { %947 = vmatmul.mubr.bf16.gmra.mrb[40].mxu0 %v10056_v28 }
 0x166   :  { %2161 = vmatmul.mubr.bf16.gmra.mrb[40].mxu1 %v10056_v28  ;;  %956 = vmatprep.mubr.bf16.mxu0 %v12435_v8 }
 0x167   :  { %2170 = vmatprep.mubr.bf16.mxu1 %v12435_v8 }
 0x16d   :  { %957 = vmatmul.mubr.bf16.gmra.mrb[44].mxu0 %v10077_v54 }
 0x16e   :  { %2171 = vmatmul.mubr.bf16.gmra.mrb[44].mxu1 %v10077_v54  ;;  %966 = vmatprep.mubr.bf16.mxu0 %v12435_v8 }
 0x16f   :  { %2180 = vmatprep.mubr.bf16.mxu1 %v12435_v8 }
 0x175   :  { %967 = vmatmul.mubr.bf16.gmra.mrb[48].mxu0 %v10101_v36 }
 0x176   :  { %2181 = vmatmul.mubr.bf16.gmra.mrb[48].mxu1 %v10101_v36  ;;  %976 = vmatprep.mubr.bf16.mxu0 %v12435_v8 }
 0x177   :  { %2190 = vmatprep.mubr.bf16.mxu1 %v12435_v8 }
 0x17d   :  { %977 = vmatmul.mubr.bf16.gmra.mrb[52].mxu0 %v10125_v25 }
 0x17e   :  { %2191 = vmatmul.mubr.bf16.gmra.mrb[52].mxu1 %v10125_v25  ;;  %986 = vmatprep.mubr.bf16.mxu0 %v12435_v8 }
 0x17f   :  { %2200 = vmatprep.mubr.bf16.mxu1 %v12435_v8 }
 0x185   :  { %987 = vmatmul.mubr.bf16.gmra.mrb[56].mxu0 %v10149_v57 }
 0x186   :  { %2201 = vmatmul.mubr.bf16.gmra.mrb[56].mxu1 %v10149_v57  ;;  %996 = vmatprep.mubr.bf16.mxu0 %v12435_v8 }
 0x187   :  { %2210 = vmatprep.mubr.bf16.mxu1 %v12435_v8 }
 0x18d   :  { %997 = vmatmul.mubr.bf16.gmra.mrb[60].mxu0 %v10173_v12 }
 0x18e   :  { %2211 = vmatmul.mubr.bf16.gmra.mrb[60].mxu1 %v10173_v12  ;;  %1006 = vmatprep.mubr.bf16.mxu0 %v12435_v8 }
 0x18f   :  { %2220 = vmatprep.mubr.bf16.mxu1 %v12435_v8 }
 0x195   :  { %1007 = vmatmul.mubr.bf16.gmra.mrb[64].mxu0 %v10197_v47 }
 0x196   :  { %2221 = vmatmul.mubr.bf16.gmra.mrb[64].mxu1 %v10197_v47  ;;  %1016 = vmatprep.mubr.bf16.mxu0 %v12435_v8 }
 0x197   :  { %2230 = vmatprep.mubr.bf16.mxu1 %v12435_v8 }
 0x19d   :  { %1017 = vmatmul.mubr.bf16.gmra.mrb[68].mxu0 %v10222_v4 }
 0x19e   :  { %2231 = vmatmul.mubr.bf16.gmra.mrb[68].mxu1 %v10222_v4  ;;  %1026 = vmatprep.mubr.bf16.mxu0 %v12435_v8 }
 0x19f   :  { %2240 = vmatprep.mubr.bf16.mxu1 %v12435_v8 }
 0x1a5   :  { %1027 = vmatmul.mubr.bf16.gmra.mrb[72].mxu0 %v10238_v22 }
 0x1a6   :  { %2241 = vmatmul.mubr.bf16.gmra.mrb[72].mxu1 %v10238_v22  ;;  %1036 = vmatprep.mubr.bf16.mxu0 %v12435_v8 }
 0x1a7   :  { %2250 = vmatprep.mubr.bf16.mxu1 %v12435_v8 }
 0x1ad   :  { %1037 = vmatmul.mubr.bf16.gmra.mrb[76].mxu0 %v10250_v44 }
 0x1ae   :  { %2251 = vmatmul.mubr.bf16.gmra.mrb[76].mxu1 %v10250_v44  ;;  %1046 = vmatprep.mubr.bf16.mxu0 %v12435_v8  ;;  %v83_v44 = vld [vmem:[%s12389_s0 + $0x1b8] sm:$0xff] }
 0x1af   :  { %2260 = vmatprep.mubr.bf16.mxu1 %v12435_v8 }
 0x1b5   :  { %1047 = vmatmul.mubr.bf16.gmra.mrb[80].mxu0 %v10262_v58 }
 0x1b6   :  { %2261 = vmatmul.mubr.bf16.gmra.mrb[80].mxu1 %v10262_v58  ;;  %1056 = vmatprep.mubr.bf16.mxu0 %v12435_v8 }
 0x1b7   :  { %2270 = vmatprep.mubr.bf16.mxu1 %v12435_v8 }
 0x1bd   :  { %1057 = vmatmul.mubr.bf16.gmra.mrb[84].mxu0 %v10274_v21 }
 0x1be   :  { %2271 = vmatmul.mubr.bf16.gmra.mrb[84].mxu1 %v10274_v21  ;;  %1066 = vmatprep.mubr.bf16.mxu0 %v12435_v8  ;;  %v2381_v21 = vld [vmem:[%s12393_s4 + $0x2] sm:$0x3] }
 0x1bf   :  { %2280 = vmatprep.mubr.bf16.mxu1 %v12435_v8 }
 0x1c5   :  { %1067 = vmatmul.mubr.bf16.gmra.mrb[88].mxu0 %v10286_v50 }
 0x1c6   :  { %2281 = vmatmul.mubr.bf16.gmra.mrb[88].mxu1 %v10286_v50  ;;  %1076 = vmatprep.mubr.bf16.mxu0 %v12435_v8  ;;  %v81_v50 = vld [vmem:[%s12389_s0 + $0x1a8] sm:$0xff] }
 0x1c7   :  { %2290 = vmatprep.mubr.bf16.mxu1 %v12435_v8 }
 0x1cd   :  { %1077 = vmatmul.mubr.bf16.gmra.mrb[92].mxu0 %v10298_v15 }
 0x1ce   :  { %2291 = vmatmul.mubr.bf16.gmra.mrb[92].mxu1 %v10298_v15  ;;  %1086 = vmatprep.mubr.bf16.mxu0 %v12435_v8  ;;  %v10322_v15 = vpack.c.bf16 %v79_v7, %v78_v55  ;;  %v10336_v7 = vsub.s32 0, %v1170_v35 }
 0x1cf   :  { %2300 = vmatprep.mubr.bf16.mxu1 %v12435_v8 }
 0x1d0   :  { %12559 = vst [vmem:[#allocation61_spill] sm:$0xff] %v10322_v15  ;;  %12561 = vst [vmem:[#allocation63_spill] sm:$0xff] %v10336_v7  ;;  %v10348_v58 = vrot.slane %v1167_v34, %v10336_v7 }
 0x1d5   :  { %1087 = vmatmul.mubr.bf16.gmra.mrb[96].mxu0 %v10310_v37 }
 0x1d6   :  { %2301 = vmatmul.mubr.bf16.gmra.mrb[96].mxu1 %v10310_v37  ;;  %1096 = vmatprep.mubr.bf16.mxu0 %v12435_v8  ;;  %v80_v37 = vld [vmem:[%s12389_s0 + $0x1a0] sm:$0xff] }
 0x1d7   :  { %2310 = vmatprep.mubr.bf16.mxu1 %v12435_v8  ;;  %v10334_v55 = vpack.c.bf16 %v81_v50, %v80_v37  ;;  %v10352_v37 = vrot.slane %v2381_v21, %v10336_v7 }
 0x1d9   :  { %12560 = vst [vmem:[#allocation62_spill] sm:$0xff] %v10334_v55 }
 0x1dd   :  { %1097 = vmatmul.mubr.bf16.gmra.mrb[100].mxu0 %v10322_v15 }
 0x1de   :  { %2311 = vmatmul.mubr.bf16.gmra.mrb[100].mxu1 %v10322_v15  ;;  %1106 = vmatprep.mubr.bf16.mxu0 %v12435_v8  ;;  %v10341_v15 = vsub.s32 1, %v1170_v35  ;;  %v82_v35 = vld [vmem:[%s12389_s0 + $0x1b0] sm:$0xff] }
 0x1df   :  { %2320 = vmatprep.mubr.bf16.mxu1 %v12435_v8  ;;  %v10369_v47 = vpack.c.bf16 %v83_v44, %v82_v35 }
 0x1e0   :  { %12562 = vst [vmem:[#allocation64_spill] sm:$0xff] %v10341_v15  ;;  %v10355_v50 = vrot.slane %v1167_v34, %v10341_v15  ;;  %v10365_v22 = vrot.slane %v2381_v21, %v10341_v15 }
 0x1e1   :  { %12563 = vst [vmem:[#allocation65_spill] sm:$0xff] %v10369_v47 }
 0x1e5   :  { %1107 = vmatmul.mubr.bf16.gmra.mrb[104].mxu0 %v10334_v55 }
 0x1e6   :  { %2321 = vmatmul.mubr.bf16.gmra.mrb[104].mxu1 %v10334_v55  ;;  %1116 = vmatprep.mubr.bf16.mxu0 %v12435_v8 }
 0x1e7   :  { %2330 = vmatprep.mubr.bf16.mxu1 %v12435_v8 }
 0x1e8   :  { %v848_v7 = vpop.f32.mrb[0].mxu0 }
 0x1e9   :  { %v1179_v55 = vadd.f32 %v10348_v58, %v848_v7  ;;  %v2062_v34 = vpop.f32.mrb[0].mxu1  ;;  %v850_v4 = vpop.f32.mrb[1].mxu0 }
 0x1ea   :  { %v2393_v12 = vadd.f32 %v10352_v37, %v2062_v34  ;;  %v1180_v57 = vadd.f32 %v10355_v50, %v850_v4  ;;  %v2064_v25 = vpop.f32.mrb[1].mxu1  ;;  %v852_v36 = vpop.f32.mrb[2].mxu0 }
 0x1eb   :  { %v2394_v54 = vadd.f32 %v10365_v22, %v2064_v25  ;;  %v1181_v21 = vadd.f32 %v10348_v58, %v852_v36  ;;  %v2066_v15 = vpop.f32.mrb[2].mxu1  ;;  %v854_v28 = vpop.f32.mrb[3].mxu0  ;;  %v1307_v49 = vmax.f32 %v1179_v55, 0.0  ;;  %v12564_v36 = vmov 0   ;;  %v84_v25 = vld [vmem:[%s12389_s0 + $0x1c0] sm:$0xff] }
 0x1ec   :  { %v2395_v8 = vadd.f32 %v10352_v37, %v2066_v15  ;;  %v1182_v7 = vadd.f32 %v10355_v50, %v854_v28  ;;  %v2068_v6 = vpop.f32.mrb[3].mxu1  ;;  %v2521_v4 = vmax.f32 %v2393_v12, 0.0  ;;  %v1308_v34 = vmax.f32 %v1180_v57, 0.0  ;;  %v85_v28 = vld [vmem:[%s12389_s0 + $0x1c8] sm:$0xff] }
 0x1ed   :  { %v1309_v44 = vmax.f32 %v1181_v21, 0.0  ;;  %v2396_v35 = vadd.f32 %v10365_v22, %v2068_v6  ;;  %1117 = vmatmul.mubr.bf16.gmra.mrb[108].mxu0 %v10369_v47  ;;  %v2522_v6 = vmax.f32 %v2394_v54, 0.0  ;;  %v10395_v24 = vpack.c.bf16 %v85_v28, %v84_v25 }
 0x1ee   :  { %v2523_v43 = vmax.f32 %v2395_v8, 0.0  ;;  %v1310_v29 = vmax.f32 %v1182_v7, 0.0  ;;  %2331 = vmatmul.mubr.bf16.gmra.mrb[108].mxu1 %v10369_v47  ;;  %1126 = vmatprep.mubr.bf16.mxu0 %v12564_v36 }
 0x1ef   :  { %v10387_v15 = vpack.c.bf16 %v1309_v44, %v1307_v49  ;;  %2340 = vmatprep.mubr.bf16.mxu1 %v12564_v36  ;;  %v2524_v57 = vmax.f32 %v2396_v35, 0.0  ;;  %12567 = vst [vmem:[#allocation68_spill] sm:$0xff] %v10395_v24 }
 0x1f0   :  { %v10390_v8 = vpack.c.bf16 %v2523_v43, %v2521_v4  ;;  %v10392_v12 = vpack.c.bf16 %v1310_v29, %v1308_v34  ;;  %v858_v55 = vpop.f32.mrb[4].mxu0 }
 0x1f1   :  { %12565 = vst [vmem:[#allocation66_spill] sm:$0xff] %v10387_v15  ;;  %v1183_v21 = vadd.f32 %v10348_v58, %v858_v55  ;;  %v2072_v7 = vpop.f32.mrb[4].mxu1  ;;  %v860_v47 = vpop.f32.mrb[5].mxu0  ;;  %v10397_v16 = vpack.c.bf16 %v2524_v57, %v2522_v6 }
 0x1f2   :  { %12566 = vst [vmem:[#allocation67_spill] sm:$0xff] %v10392_v12  ;;  %v2397_v49 = vadd.f32 %v10352_v37, %v2072_v7  ;;  %v1184_v44 = vadd.f32 %v10355_v50, %v860_v47  ;;  %v2074_v10 = vpop.f32.mrb[5].mxu1  ;;  %v862_v54 = vpop.f32.mrb[6].mxu0 }
 0x1f3   :  { %v2398_v43 = vadd.f32 %v10365_v22, %v2074_v10  ;;  %v1185_v29 = vadd.f32 %v10348_v58, %v862_v54  ;;  %v2076_v35 = vpop.f32.mrb[6].mxu1  ;;  %v864_v4 = vpop.f32.mrb[7].mxu0  ;;  %v1311_v28 = vmax.f32 %v1183_v21, 0.0  ;;  %v86_v10 = vld [vmem:[%s12389_s0 + $0x1d0] sm:$0xff]  ;;  %v87_v54 = vld [vmem:[%s12389_s0 + $0x1d8] sm:$0xff] }
 0x1f4   :  { %v2399_v34 = vadd.f32 %v10352_v37, %v2076_v35  ;;  %v1186_v55 = vadd.f32 %v10355_v50, %v864_v4  ;;  %v2078_v25 = vpop.f32.mrb[7].mxu1  ;;  %v1312_v47 = vmax.f32 %v1184_v44, 0.0  ;;  %v2525_v21 = vmax.f32 %v2397_v49, 0.0 }
 0x1f5   :  { %v1313_v6 = vmax.f32 %v1185_v29, 0.0  ;;  %v2400_v57 = vadd.f32 %v10365_v22, %v2078_v25  ;;  %1127 = vmatmul.mubr.bf16.gmra.mrb[112].mxu0 %v10395_v24  ;;  %v2526_v44 = vmax.f32 %v2398_v43, 0.0  ;;  %v10423_v15 = vpack.c.bf16 %v87_v54, %v86_v10 }
 0x1f6   :  { %v1314_v7 = vmax.f32 %v1186_v55, 0.0  ;;  %2341 = vmatmul.mubr.bf16.gmra.mrb[112].mxu1 %v10395_v24  ;;  %1136 = vmatprep.mubr.bf16.mxu0 %v12564_v36  ;;  %v2527_v29 = vmax.f32 %v2399_v34, 0.0 }
 0x1f7   :  { %v10415_v35 = vpack.c.bf16 %v1313_v6, %v1311_v28  ;;  %2350 = vmatprep.mubr.bf16.mxu1 %v12564_v36  ;;  %v2528_v4 = vmax.f32 %v2400_v57, 0.0  ;;  %12570 = vst [vmem:[#allocation71_spill] sm:$0xff] %v10423_v15 }
 0x1f8   :  { %v10418_v55 = vpack.c.bf16 %v1314_v7, %v1312_v47  ;;  %v868_v25 = vpop.f32.mrb[8].mxu0  ;;  %v10420_v24 = vpack.c.bf16 %v2527_v29, %v2525_v21 }
 0x1f9   :  { %12568 = vst [vmem:[#allocation69_spill] sm:$0xff] %v10415_v35  ;;  %v1187_v39 = vadd.f32 %v10348_v58, %v868_v25  ;;  %v2082_v1 = vpop.f32.mrb[8].mxu1  ;;  %v870_v46 = vpop.f32.mrb[9].mxu0  ;;  %v10425_v12 = vpack.c.bf16 %v2528_v4, %v2526_v44  ;;  %v88_v25 = vld [vmem:[%s12389_s0 + $0x1e0] sm:$0xff] }
 0x1fa   :  { %12569 = vst [vmem:[#allocation70_spill] sm:$0xff] %v10418_v55  ;;  %v2401_v49 = vadd.f32 %v10352_v37, %v2082_v1  ;;  %v1188_v34 = vadd.f32 %v10355_v50, %v870_v46  ;;  %v2084_v28 = vpop.f32.mrb[9].mxu1  ;;  %v872_v43 = vpop.f32.mrb[10].mxu0 }
 0x1fb   :  { %v2402_v6 = vadd.f32 %v10365_v22, %v2084_v28  ;;  %v1189_v57 = vadd.f32 %v10348_v58, %v872_v43  ;;  %v2086_v47 = vpop.f32.mrb[10].mxu1  ;;  %v874_v7 = vpop.f32.mrb[11].mxu0  ;;  %v1315_v54 = vmax.f32 %v1187_v39, 0.0  ;;  %v89_v28 = vld [vmem:[%s12389_s0 + $0x1e8] sm:$0xff] }
 0x1fc   :  { %v2403_v21 = vadd.f32 %v10352_v37, %v2086_v47  ;;  %v1190_v29 = vadd.f32 %v10355_v50, %v874_v7  ;;  %v2088_v10 = vpop.f32.mrb[11].mxu1  ;;  %v1316_v46 = vmax.f32 %v1188_v34, 0.0  ;;  %v2529_v39 = vmax.f32 %v2401_v49, 0.0 }
 0x1fd   :  { %v1317_v44 = vmax.f32 %v1189_v57, 0.0  ;;  %v2404_v4 = vadd.f32 %v10365_v22, %v2088_v10  ;;  %1137 = vmatmul.mubr.bf16.gmra.mrb[116].mxu0 %v10423_v15  ;;  %v2530_v34 = vmax.f32 %v2402_v6, 0.0  ;;  %v10451_v40 = vpack.c.bf16 %v89_v28, %v88_v25 }
 0x1fe   :  { %v1318_v1 = vmax.f32 %v1190_v29, 0.0  ;;  %2351 = vmatmul.mubr.bf16.gmra.mrb[116].mxu1 %v10423_v15  ;;  %1146 = vmatprep.mubr.bf16.mxu0 %v12564_v36  ;;  %v2531_v43 = vmax.f32 %v2403_v21, 0.0 }
 0x1ff   :  { %v10443_v57 = vpack.c.bf16 %v1317_v44, %v1315_v54  ;;  %2360 = vmatprep.mubr.bf16.mxu1 %v12564_v36  ;;  %v2532_v47 = vmax.f32 %v2404_v4, 0.0  ;;  %12573 = vst [vmem:[#allocation74_spill] sm:$0xff] %v10451_v40 }
 0x200   :  { %v10446_v7 = vpack.c.bf16 %v1318_v1, %v1316_v46  ;;  %v878_v29 = vpop.f32.mrb[12].mxu0  ;;  %v10448_v10 = vpack.c.bf16 %v2531_v43, %v2529_v39 }
 0x201   :  { %12571 = vst [vmem:[#allocation72_spill] sm:$0xff] %v10443_v57  ;;  %v1191_v15 = vadd.f32 %v10348_v58, %v878_v29  ;;  %v2092_v35 = vpop.f32.mrb[12].mxu1  ;;  %v880_v55 = vpop.f32.mrb[13].mxu0  ;;  %v10453_v31 = vpack.c.bf16 %v2532_v47, %v2530_v34  ;;  %v90_v29 = vld [vmem:[%s12389_s0 + $0x1f0] sm:$0xff] }
 0x202   :  { %12572 = vst [vmem:[#allocation73_spill] sm:$0xff] %v10446_v7  ;;  %v2405_v49 = vadd.f32 %v10352_v37, %v2092_v35  ;;  %v1192_v21 = vadd.f32 %v10355_v50, %v880_v55  ;;  %v2094_v54 = vpop.f32.mrb[13].mxu1  ;;  %v882_v6 = vpop.f32.mrb[14].mxu0 }
 0x203   :  { %v2406_v44 = vadd.f32 %v10365_v22, %v2094_v54  ;;  %v1193_v4 = vadd.f32 %v10348_v58, %v882_v6  ;;  %v2096_v46 = vpop.f32.mrb[14].mxu1  ;;  %v884_v1 = vpop.f32.mrb[15].mxu0  ;;  %v1319_v28 = vmax.f32 %v1191_v15, 0.0  ;;  %v91_v54 = vld [vmem:[%s12389_s0 + $0x1f8] sm:$0xff] }
 0x204   :  { %v2407_v39 = vadd.f32 %v10352_v37, %v2096_v46  ;;  %v1194_v43 = vadd.f32 %v10355_v50, %v884_v1  ;;  %v2098_v25 = vpop.f32.mrb[15].mxu1  ;;  %v1320_v35 = vmax.f32 %v1192_v21, 0.0  ;;  %v2533_v15 = vmax.f32 %v2405_v49, 0.0 }
 0x205   :  { %v1321_v34 = vmax.f32 %v1193_v4, 0.0  ;;  %v2408_v47 = vadd.f32 %v10365_v22, %v2098_v25  ;;  %1147 = vmatmul.mubr.bf16.gmra.mrb[120].mxu0 %v10451_v40  ;;  %v2534_v21 = vmax.f32 %v2406_v44, 0.0  ;;  %v10479_v26 = vpack.c.bf16 %v91_v54, %v90_v29 }
 0x206   :  { %v1322_v55 = vmax.f32 %v1194_v43, 0.0  ;;  %2361 = vmatmul.mubr.bf16.gmra.mrb[120].mxu1 %v10451_v40  ;;  %1156 = vmatprep.mubr.bf16.mxu0 %v12564_v36  ;;  %v2535_v6 = vmax.f32 %v2407_v39, 0.0 }
 0x207   :  { %v10471_v4 = vpack.c.bf16 %v1321_v34, %v1319_v28  ;;  %2370 = vmatprep.mubr.bf16.mxu1 %v12564_v36  ;;  %v2536_v46 = vmax.f32 %v2408_v47, 0.0  ;;  %12576 = vst [vmem:[#allocation77_spill] sm:$0xff] %v10479_v26 }
 0x208   :  { %v10474_v1 = vpack.c.bf16 %v1322_v55, %v1320_v35  ;;  %v888_v43 = vpop.f32.mrb[16].mxu0  ;;  %v10476_v25 = vpack.c.bf16 %v2535_v6, %v2533_v15 }
 0x209   :  { %12574 = vst [vmem:[#allocation75_spill] sm:$0xff] %v10471_v4  ;;  %v1195_v40 = vadd.f32 %v10348_v58, %v888_v43  ;;  %v2102_v57 = vpop.f32.mrb[16].mxu1  ;;  %v890_v7 = vpop.f32.mrb[17].mxu0  ;;  %v10481_v23 = vpack.c.bf16 %v2536_v46, %v2534_v21 }
 0x20a   :  { %12575 = vst [vmem:[#allocation76_spill] sm:$0xff] %v10474_v1  ;;  %v2409_v49 = vadd.f32 %v10352_v37, %v2102_v57  ;;  %v1196_v39 = vadd.f32 %v10355_v50, %v890_v7  ;;  %v2104_v28 = vpop.f32.mrb[17].mxu1  ;;  %v892_v44 = vpop.f32.mrb[18].mxu0 }
 0x20b   :  { %v2410_v34 = vadd.f32 %v10365_v22, %v2104_v28  ;;  %v1197_v47 = vadd.f32 %v10348_v58, %v892_v44  ;;  %v2106_v35 = vpop.f32.mrb[18].mxu1  ;;  %v894_v55 = vpop.f32.mrb[19].mxu0  ;;  %v1323_v54 = vmax.f32 %v1195_v40, 0.0 }
 0x20c   :  { %v2411_v15 = vadd.f32 %v10352_v37, %v2106_v35  ;;  %v1198_v6 = vadd.f32 %v10355_v50, %v894_v55  ;;  %v2108_v29 = vpop.f32.mrb[19].mxu1  ;;  %v1324_v57 = vmax.f32 %v1196_v39, 0.0  ;;  %v2537_v43 = vmax.f32 %v2409_v49, 0.0  ;;  %v3774_v49 = vld [vmem:[%s12391_s2 + $0x70] sm:$0xff] }
 0x20d   :  { %v1325_v21 = vmax.f32 %v1197_v47, 0.0  ;;  %v2412_v46 = vadd.f32 %v10365_v22, %v2108_v29  ;;  %1157 = vmatmul.mubr.bf16.gmra.mrb[124].mxu0 %v10479_v26  ;;  %v2538_v35 = vmax.f32 %v2410_v34, 0.0 }
 0x20e   :  { %v1326_v7 = vmax.f32 %v1198_v6, 0.0  ;;  %2371 = vmatmul.mubr.bf16.gmra.mrb[124].mxu1 %v10479_v26  ;;  %2937 = vmatprep.mubr.bf16.mxu0 %v10397_v16  ;;  %v2539_v28 = vmax.f32 %v2411_v15, 0.0  ;;  %v3773_v16 = vld [vmem:[%s12391_s2 + $0x50] sm:$0xff] }
 0x20f   :  { %v10493_v44 = vpack.c.bf16 %v1325_v21, %v1323_v54  ;;  %3867 = vmatprep.mubr.bf16.mxu1 %v12564_v36  ;;  %v2540_v55 = vmax.f32 %v2412_v46, 0.0 }
 0x210   :  { %v10496_v40 = vpack.c.bf16 %v1326_v7, %v1324_v57  ;;  %v898_v47 = vpop.f32.mrb[20].mxu0  ;;  %v10498_v29 = vpack.c.bf16 %v2539_v28, %v2537_v43 }
 0x211   :  { %12577 = vst [vmem:[#allocation78_spill] sm:$0xff] %v10493_v44  ;;  %v1199_v39 = vadd.f32 %v10348_v58, %v898_v47  ;;  %v2112_v6 = vpop.f32.mrb[20].mxu1  ;;  %v900_v4 = vpop.f32.mrb[21].mxu0  ;;  %v10501_v26 = vpack.c.bf16 %v2540_v55, %v2538_v35  ;;  %v7984_v47 = vcombine.high %v3773_v16, %v3774_v49 }
 0x212   :  { %12578 = vst [vmem:[#allocation79_spill] sm:$0xff] %v10496_v40  ;;  %v2413_v34 = vadd.f32 %v10352_v37, %v2112_v6  ;;  %v1200_v15 = vadd.f32 %v10355_v50, %v900_v4  ;;  %v2114_v54 = vpop.f32.mrb[21].mxu1  ;;  %v902_v21 = vpop.f32.mrb[22].mxu0  ;;  %v3775_v4 = vld [vmem:[%s12391_s2 + $0x90] sm:$0xff] }
 0x213   :  { %v2414_v46 = vadd.f32 %v10365_v22, %v2114_v54  ;;  %v1201_v57 = vadd.f32 %v10348_v58, %v902_v21  ;;  %v2116_v7 = vpop.f32.mrb[22].mxu1  ;;  %v904_v43 = vpop.f32.mrb[23].mxu0  ;;  %v1327_v44 = vmax.f32 %v1199_v39, 0.0  ;;  %v3776_v54 = vld [vmem:[%s12391_s2 + $0xb0] sm:$0xff] }
 0x214   :  { %v2415_v28 = vadd.f32 %v10352_v37, %v2116_v7  ;;  %v1202_v35 = vadd.f32 %v10355_v50, %v904_v43  ;;  %v2118_v55 = vpop.f32.mrb[23].mxu1  ;;  %v1328_v21 = vmax.f32 %v1200_v15, 0.0  ;;  %v2541_v39 = vmax.f32 %v2413_v34, 0.0 }
 0x215   :  { %v1329_v40 = vmax.f32 %v1201_v57, 0.0  ;;  %v2416_v6 = vadd.f32 %v10365_v22, %v2118_v55  ;;  %2938 = vmatmul.mubr.bf16.vlgmr.msra.gmra.mrb[128].mxu0 %v10390_v8  ;;  %v12580_v8 = vcombine.low %v10215_v61, %v10220_v62  ;;  %v7983_v55 = vcombine.low %v3773_v16, %v3774_v49  ;;  %v3777_v61 = vld [vmem:[%s12391_s2 + $0xd0] sm:$0xff] }
 0x216   :  { %v1330_v7 = vmax.f32 %v1202_v35, 0.0  ;;  %7949 = vmatmul.mubr.msk.bf16.vlgmr.msra.gmra.mrb[128].mxu1 %vm284_vm0, %v9339_v38  ;;  %2947 = vmatprep.mubr.bf16.mxu0 %v10425_v12  ;;  %v2543_v57 = vmax.f32 %v2415_v28, 0.0  ;;  %v2542_v1 = vmax.f32 %v2414_v46, 0.0  ;;  %v7986_v12 = vcombine.high %v3775_v4, %v3776_v54  ;;  %v3778_v62 = vld [vmem:[%s12391_s2 + $0xf0] sm:$0xff] }
 0x217   :  { %v10526_v43 = vpack.c.bf16 %v1329_v40, %v1327_v44  ;;  %4269 = vmatpush1.bf16.msra.mxu1 %v12580_v8  ;;  %3877 = vmatprep.mubr.bf16.mxu1 %v12564_v36  ;;  %v2544_v19 = vmax.f32 %v2416_v6, 0.0 }
 0x218   :  { %v10532_v15 = vpack.c.bf16 %v1330_v7, %v1328_v21  ;;  %v908_v35 = vpop.f32.mrb[24].mxu0  ;;  %4270 = vmatprep.subr.bf16.mxu1 %v7984_v47  ;;  %v10534_v38 = vpack.c.bf16 %v2543_v57, %v2541_v39  ;;  %v7985_v7 = vcombine.low %v3775_v4, %v3776_v54  ;;  %v3780_v4 = vld [vmem:[%s12391_s2 + $0x130] sm:$0xff] }
 0x219   :  { %12579 = vst [vmem:[#allocation80_spill] sm:$0xff] %v10526_v43  ;;  %v1203_v34 = vadd.f32 %v10348_v58, %v908_v35  ;;  %v2122_v44 = vpop.f32.mrb[24].mxu1  ;;  %v910_v40 = vpop.f32.mrb[25].mxu0  ;;  %v10537_v28 = vpack.c.bf16 %v2544_v19, %v2542_v1  ;;  %v7988_v35 = vcombine.high %v3777_v61, %v3778_v62 }
 0x21a   :  { %v2417_v16 = vadd.f32 %v10352_v37, %v2122_v44  ;;  %v1204_v49 = vadd.f32 %v10355_v50, %v910_v40  ;;  %v2124_v46 = vpop.f32.mrb[25].mxu1  ;;  %v912_v47 = vpop.f32.mrb[26].mxu0 }
 0x21b   :  { %v2418_v6 = vadd.f32 %v10365_v22, %v2124_v46  ;;  %v1205_v21 = vadd.f32 %v10348_v58, %v912_v47  ;;  %v2126_v19 = vpop.f32.mrb[26].mxu1  ;;  %v914_v1 = vpop.f32.mrb[27].mxu0  ;;  %4271 = vmatpush1.bf16.msra.mxu1 %v7983_v55  ;;  %v1331_v44 = vmax.f32 %v1203_v34, 0.0  ;;  %v3779_v46 = vld [vmem:[%s12391_s2 + $0x110] sm:$0xff] }
 0x21c   :  { %v2419_v39 = vadd.f32 %v10352_v37, %v2126_v19  ;;  %v1206_v57 = vadd.f32 %v10355_v50, %v914_v1  ;;  %v2128_v8 = vpop.f32.mrb[27].mxu1  ;;  %4272 = vmatprep.subr.bf16.mxu1 %v7986_v12  ;;  %v1332_v54 = vmax.f32 %v1204_v49, 0.0  ;;  %v2545_v12 = vmax.f32 %v2417_v16, 0.0 }
 0x21d   :  { %v1333_v43 = vmax.f32 %v1205_v21, 0.0  ;;  %v2420_v40 = vadd.f32 %v10365_v22, %v2128_v8  ;;  %2948 = vmatmul.mubr.bf16.gmra.mrb[132].mxu0 %v10420_v24  ;;  %v2546_v24 = vmax.f32 %v2418_v6, 0.0  ;;  %v7987_v19 = vcombine.low %v3777_v61, %v3778_v62 }
 0x21e   :  { %v1334_v55 = vmax.f32 %v1206_v57, 0.0  ;;  %7950 = vmatmul.mubr.msk.bf16.gmra.mrb[132].mxu1 %vm284_vm0, %v9371_v51  ;;  %2957 = vmatprep.mubr.bf16.mxu0 %v10453_v31  ;;  %v2547_v34 = vmax.f32 %v2419_v39, 0.0  ;;  %v7990_v57 = vcombine.high %v3779_v46, %v3780_v4 }
 0x21f   :  { %v10562_v47 = vpack.c.bf16 %v1333_v43, %v1331_v44  ;;  %3887 = vmatprep.mubr.bf16.mxu1 %v12564_v36  ;;  %v2548_v21 = vmax.f32 %v2420_v40, 0.0  ;;  %4273 = vmatpush1.bf16.msra.mxu1 %v7985_v7 }
 0x220   :  { %v10565_v1 = vpack.c.bf16 %v1334_v55, %v1332_v54  ;;  %v918_v8 = vpop.f32.mrb[28].mxu0  ;;  %v10567_v49 = vpack.c.bf16 %v2547_v34, %v2545_v12  ;;  %4274 = vmatprep.subr.bf16.mxu1 %v7988_v35  ;;  %v7989_v35 = vcombine.low %v3779_v46, %v3780_v4 }
 0x221   :  { %v1207_v51 = vadd.f32 %v10348_v58, %v918_v8  ;;  %v2132_v31 = vpop.f32.mrb[28].mxu1  ;;  %v920_v16 = vpop.f32.mrb[29].mxu0  ;;  %v10570_v39 = vpack.c.bf16 %v2548_v21, %v2546_v24 }
 0x222   :  { %v2421_v43 = vadd.f32 %v10352_v37, %v2132_v31  ;;  %v1208_v6 = vadd.f32 %v10355_v50, %v920_v16  ;;  %v2134_v44 = vpop.f32.mrb[29].mxu1  ;;  %v922_v7 = vpop.f32.mrb[30].mxu0 }
 0x223   :  { %v2422_v61 = vadd.f32 %v10365_v22, %v2134_v44  ;;  %v1209_v62 = vadd.f32 %v10348_v58, %v922_v7  ;;  %v2136_v40 = vpop.f32.mrb[30].mxu1  ;;  %v924_v54 = vpop.f32.mrb[31].mxu0  ;;  %4275 = vmatpush1.bf16.msra.mxu1 %v7987_v19  ;;  %v1335_v24 = vmax.f32 %v1207_v51, 0.0 }
 0x224   :  { %v2423_v55 = vadd.f32 %v10352_v37, %v2136_v40  ;;  %v1210_v12 = vadd.f32 %v10355_v50, %v924_v54  ;;  %v2138_v34 = vpop.f32.mrb[31].mxu1  ;;  %4276 = vmatprep.subr.bf16.mxu1 %v7990_v57  ;;  %v1336_v31 = vmax.f32 %v1208_v6, 0.0  ;;  %v2549_v46 = vmax.f32 %v2421_v43, 0.0 }
 0x225   :  { %v1337_v21 = vmax.f32 %v1209_v62, 0.0  ;;  %v2424_v8 = vadd.f32 %v10365_v22, %v2138_v34  ;;  %2958 = vmatmul.mubr.bf16.gmra.mrb[136].mxu0 %v10448_v10  ;;  %v2550_v57 = vmax.f32 %v2422_v61, 0.0 }
 0x226   :  { %v1338_v16 = vmax.f32 %v1210_v12, 0.0  ;;  %7951 = vmatmul.mubr.msk.bf16.gmra.mrb[136].mxu1 %vm284_vm0, %v9391_v60  ;;  %2967 = vmatprep.mubr.bf16.mxu0 %v10481_v23  ;;  %v2551_v4 = vmax.f32 %v2423_v55, 0.0 }
 0x227   :  { %v10583_v19 = vpack.c.bf16 %v1337_v21, %v1335_v24  ;;  %3897 = vmatprep.mubr.bf16.mxu1 %v12564_v36  ;;  %v2552_v51 = vmax.f32 %v2424_v8, 0.0  ;;  %4277 = vmatpush1.bf16.msra.mxu1 %v7989_v35 }
 0x228   :  { %v10586_v44 = vpack.c.bf16 %v1338_v16, %v1336_v31  ;;  %v928_v7 = vpop.f32.mrb[32].mxu0  ;;  %v10588_v10 = vpack.c.bf16 %v2551_v4, %v2549_v46 }
 0x229   :  { %v1211_v6 = vadd.f32 %v10348_v58, %v928_v7  ;;  %v2142_v62 = vpop.f32.mrb[32].mxu1  ;;  %v930_v40 = vpop.f32.mrb[33].mxu0  ;;  %v10591_v54 = vpack.c.bf16 %v2552_v51, %v2550_v57 }
 0x22a   :  { %v2425_v23 = vadd.f32 %v10352_v37, %v2142_v62  ;;  %v1212_v43 = vadd.f32 %v10355_v50, %v930_v40  ;;  %v2144_v55 = vpop.f32.mrb[33].mxu1  ;;  %v932_v12 = vpop.f32.mrb[34].mxu0 }
 0x22b   :  { %v2426_v61 = vadd.f32 %v10365_v22, %v2144_v55  ;;  %v1213_v35 = vadd.f32 %v10348_v58, %v932_v12  ;;  %v2146_v34 = vpop.f32.mrb[34].mxu1  ;;  %v934_v24 = vpop.f32.mrb[35].mxu0  ;;  %v1339_v16 = vmax.f32 %v1211_v6, 0.0 }
 0x22c   :  { %v2427_v21 = vadd.f32 %v10352_v37, %v2146_v34  ;;  %v1214_v8 = vadd.f32 %v10355_v50, %v934_v24  ;;  %v2148_v31 = vpop.f32.mrb[35].mxu1  ;;  %v1340_v57 = vmax.f32 %v1212_v43, 0.0  ;;  %v2553_v7 = vmax.f32 %v2425_v23, 0.0 }
 0x22d   :  { %v1341_v46 = vmax.f32 %v1213_v35, 0.0  ;;  %v2428_v4 = vadd.f32 %v10365_v22, %v2148_v31  ;;  %2968 = vmatmul.mubr.bf16.gmra.mrb[140].mxu0 %v10476_v25  ;;  %v2554_v55 = vmax.f32 %v2426_v61, 0.0 }
 0x22e   :  { %v1342_v51 = vmax.f32 %v1214_v8, 0.0  ;;  %7952 = vmatmul.mubr.msk.bf16.gmra.mrb[140].mxu1 %vm284_vm0, %v9405_v0  ;;  %2977 = vmatprep.mubr.bf16.mxu0 %v10501_v26  ;;  %v2555_v62 = vmax.f32 %v2427_v21, 0.0 }
 0x22f   :  { %v10604_v40 = vpack.c.bf16 %v1341_v46, %v1339_v16  ;;  %3907 = vmatprep.mubr.bf16.mxu1 %v12564_v36  ;;  %v2556_v6 = vmax.f32 %v2428_v4, 0.0 }
 0x230   :  { %v10607_v12 = vpack.c.bf16 %v1342_v51, %v1340_v57  ;;  %v938_v35 = vpop.f32.mrb[36].mxu0  ;;  %v10609_v34 = vpack.c.bf16 %v2555_v62, %v2553_v7 }
 0x231   :  { %v1215_v25 = vadd.f32 %v10348_v58, %v938_v35  ;;  %v2152_v43 = vpop.f32.mrb[36].mxu1  ;;  %v940_v24 = vpop.f32.mrb[37].mxu0  ;;  %v10612_v8 = vpack.c.bf16 %v2556_v6, %v2554_v55 }
 0x232   :  { %v2429_v26 = vadd.f32 %v10352_v37, %v2152_v43  ;;  %v1216_v23 = vadd.f32 %v10355_v50, %v940_v24  ;;  %v2154_v21 = vpop.f32.mrb[37].mxu1  ;;  %v942_v31 = vpop.f32.mrb[38].mxu0 }
 0x233   :  { %v2430_v61 = vadd.f32 %v10365_v22, %v2154_v21  ;;  %v1217_v16 = vadd.f32 %v10348_v58, %v942_v31  ;;  %v2156_v46 = vpop.f32.mrb[38].mxu1  ;;  %v944_v4 = vpop.f32.mrb[39].mxu0  ;;  %v1343_v62 = vmax.f32 %v1215_v25, 0.0 }
 0x234   :  { %v2431_v57 = vadd.f32 %v10352_v37, %v2156_v46  ;;  %v1218_v51 = vadd.f32 %v10355_v50, %v944_v4  ;;  %v2158_v7 = vpop.f32.mrb[39].mxu1  ;;  %v1344_v35 = vmax.f32 %v1216_v23, 0.0  ;;  %v2557_v24 = vmax.f32 %v2429_v26, 0.0 }
 0x235   :  { %v1345_v55 = vmax.f32 %v1217_v16, 0.0  ;;  %v2432_v6 = vadd.f32 %v10365_v22, %v2158_v7  ;;  %2978 = vmatmul.mubr.bf16.gmra.mrb[144].mxu0 %v10498_v29  ;;  %v2558_v46 = vmax.f32 %v2430_v61, 0.0  ;;  %v3781_v29 = vld [vmem:[%s12391_s2 + $0x150] sm:$0xff] }
 0x236   :  { %v1346_v43 = vmax.f32 %v1218_v51, 0.0  ;;  %7953 = vmatmul.mubr.msk.bf16.gmra.mrb[144].mxu1 %vm284_vm0, %v9419_v3  ;;  %2987 = vmatprep.mubr.bf16.mxu0 %v10537_v28  ;;  %v2559_v21 = vmax.f32 %v2431_v57, 0.0  ;;  %v3782_v28 = vld [vmem:[%s12391_s2 + $0x170] sm:$0xff] }
 0x237   :  { %v10625_v31 = vpack.c.bf16 %v1345_v55, %v1343_v62  ;;  %3917 = vmatprep.mubr.bf16.mxu1 %v12564_v36  ;;  %v2560_v25 = vmax.f32 %v2432_v6, 0.0  ;;  %v7991_v61 = vcombine.low %v3781_v29, %v3782_v28  ;;  %v7992_v62 = vcombine.high %v3781_v29, %v3782_v28 }
 0x238   :  { %v10628_v16 = vpack.c.bf16 %v1346_v43, %v1344_v35  ;;  %v948_v4 = vpop.f32.mrb[40].mxu0  ;;  %v10630_v7 = vpack.c.bf16 %v2559_v21, %v2557_v24 }
 0x239   :  { %v1219_v26 = vadd.f32 %v10348_v58, %v948_v4  ;;  %v2162_v23 = vpop.f32.mrb[40].mxu1  ;;  %v950_v57 = vpop.f32.mrb[41].mxu0  ;;  %v10639_v51 = vpack.c.bf16 %v2560_v25, %v2558_v46  ;;  %4278 = vmatprep.subr.bf16.mxu1 %v7992_v62 }
 0x23a   :  { %v2433_v55 = vadd.f32 %v10352_v37, %v2162_v23  ;;  %v1220_v6 = vadd.f32 %v10355_v50, %v950_v57  ;;  %v2164_v35 = vpop.f32.mrb[41].mxu1  ;;  %v952_v43 = vpop.f32.mrb[42].mxu0  ;;  %4279 = vmatpush1.bf16.msra.mxu1 %v7991_v61 }
 0x23b   :  { %v2434_v24 = vadd.f32 %v10365_v22, %v2164_v35  ;;  %v1221_v21 = vadd.f32 %v10348_v58, %v952_v43  ;;  %v2166_v3 = vpop.f32.mrb[42].mxu1  ;;  %v954_v0 = vpop.f32.mrb[43].mxu0  ;;  %v1347_v29 = vmax.f32 %v1219_v26, 0.0 }
 0x23c   :  { %v2435_v4 = vadd.f32 %v10352_v37, %v2166_v3  ;;  %v1222_v46 = vadd.f32 %v10355_v50, %v954_v0  ;;  %v2168_v25 = vpop.f32.mrb[43].mxu1  ;;  %v1348_v57 = vmax.f32 %v1220_v6, 0.0  ;;  %v2561_v62 = vmax.f32 %v2433_v55, 0.0 }
 0x23d   :  { %v1349_v28 = vmax.f32 %v1221_v21, 0.0  ;;  %v2436_v23 = vadd.f32 %v10365_v22, %v2168_v25  ;;  %2988 = vmatmul.mubr.bf16.gmra.mrb[148].mxu0 %v10534_v38  ;;  %v2562_v0 = vmax.f32 %v2434_v24, 0.0 }
 0x23e   :  { %v1350_v60 = vmax.f32 %v1222_v46, 0.0  ;;  %7954 = vmatmul.mubr.msk.bf16.gmra.mrb[148].mxu1 %vm284_vm0, %v9439_v11  ;;  %2997 = vmatprep.mubr.bf16.mxu0 %v10570_v39  ;;  %v2563_v35 = vmax.f32 %v2435_v4, 0.0 }
 0x23f   :  { %v10652_v3 = vpack.c.bf16 %v1349_v28, %v1347_v29  ;;  %3927 = vmatprep.mubr.bf16.mxu1 %v12564_v36  ;;  %v2564_v26 = vmax.f32 %v2436_v23, 0.0 }
 0x240   :  { %v10655_v61 = vpack.c.bf16 %v1350_v60, %v1348_v57  ;;  %v958_v43 = vpop.f32.mrb[44].mxu0  ;;  %v10657_v21 = vpack.c.bf16 %v2563_v35, %v2561_v62 }
 0x241   :  { %v1223_v38 = vadd.f32 %v10348_v58, %v958_v43  ;;  %v2172_v6 = vpop.f32.mrb[44].mxu1  ;;  %v960_v46 = vpop.f32.mrb[45].mxu0  ;;  %v10660_v25 = vpack.c.bf16 %v2564_v26, %v2562_v0 }
 0x242   :  { %v2437_v39 = vadd.f32 %v10352_v37, %v2172_v6  ;;  %v1224_v55 = vadd.f32 %v10355_v50, %v960_v46  ;;  %v2174_v4 = vpop.f32.mrb[45].mxu1  ;;  %v962_v29 = vpop.f32.mrb[46].mxu0 }
 0x243   :  { %v2438_v24 = vadd.f32 %v10365_v22, %v2174_v4  ;;  %v1225_v60 = vadd.f32 %v10348_v58, %v962_v29  ;;  %v2176_v28 = vpop.f32.mrb[46].mxu1  ;;  %v964_v23 = vpop.f32.mrb[47].mxu0  ;;  %v1351_v43 = vmax.f32 %v1223_v38, 0.0 }
 0x244   :  { %v2439_v57 = vadd.f32 %v10352_v37, %v2176_v28  ;;  %v1226_v62 = vadd.f32 %v10355_v50, %v964_v23  ;;  %v2178_v35 = vpop.f32.mrb[47].mxu1  ;;  %v1352_v6 = vmax.f32 %v1224_v55, 0.0  ;;  %v2565_v4 = vmax.f32 %v2437_v39, 0.0 }
 0x245   :  { %v1353_v0 = vmax.f32 %v1225_v60, 0.0  ;;  %v2440_v26 = vadd.f32 %v10365_v22, %v2178_v35  ;;  %2998 = vmatmul.mubr.bf16.gmra.mrb[152].mxu0 %v10567_v49  ;;  %v2566_v28 = vmax.f32 %v2438_v24, 0.0 }
 0x246   :  { %v1354_v46 = vmax.f32 %v1226_v62, 0.0  ;;  %7955 = vmatmul.mubr.msk.bf16.gmra.mrb[152].mxu1 %vm284_vm0, %v9453_v14  ;;  %3007 = vmatprep.mubr.bf16.mxu0 %v10591_v54  ;;  %v2567_v29 = vmax.f32 %v2439_v57, 0.0 }
 0x247   :  { %v10673_v11 = vpack.c.bf16 %v1353_v0, %v1351_v43  ;;  %3937 = vmatprep.mubr.bf16.mxu1 %v12564_v36  ;;  %v2568_v38 = vmax.f32 %v2440_v26, 0.0 }
 0x248   :  { %v10676_v60 = vpack.c.bf16 %v1354_v46, %v1352_v6  ;;  %v968_v23 = vpop.f32.mrb[48].mxu0  ;;  %v10678_v35 = vpack.c.bf16 %v2567_v29, %v2565_v4 }
 0x249   :  { %12581 = vst [vmem:[#allocation81_spill] sm:$0xff] %v10673_v11  ;;  %v1227_v49 = vadd.f32 %v10348_v58, %v968_v23  ;;  %v2182_v55 = vpop.f32.mrb[48].mxu1  ;;  %v970_v62 = vpop.f32.mrb[49].mxu0  ;;  %v10681_v14 = vpack.c.bf16 %v2568_v38, %v2566_v28 }
 0x24a   :  { %v2441_v54 = vadd.f32 %v10352_v37, %v2182_v55  ;;  %v1228_v39 = vadd.f32 %v10355_v50, %v970_v62  ;;  %v2184_v57 = vpop.f32.mrb[49].mxu1  ;;  %v972_v43 = vpop.f32.mrb[50].mxu0 }
 0x24b   :  { %v2442_v24 = vadd.f32 %v10365_v22, %v2184_v57  ;;  %v1229_v0 = vadd.f32 %v10348_v58, %v972_v43  ;;  %v2186_v26 = vpop.f32.mrb[50].mxu1  ;;  %v974_v6 = vpop.f32.mrb[51].mxu0  ;;  %v1355_v23 = vmax.f32 %v1227_v49, 0.0 }
 0x24c   :  { %v2443_v46 = vadd.f32 %v10352_v37, %v2186_v26  ;;  %v1230_v4 = vadd.f32 %v10355_v50, %v974_v6  ;;  %v2188_v29 = vpop.f32.mrb[51].mxu1  ;;  %v1356_v55 = vmax.f32 %v1228_v39, 0.0  ;;  %v2569_v57 = vmax.f32 %v2441_v54, 0.0 }
 0x24d   :  { %v1357_v28 = vmax.f32 %v1229_v0, 0.0  ;;  %v2444_v38 = vadd.f32 %v10365_v22, %v2188_v29  ;;  %3008 = vmatmul.mubr.bf16.gmra.mrb[156].mxu0 %v10588_v10  ;;  %v2570_v26 = vmax.f32 %v2442_v24, 0.0 }
 0x24e   :  { %v1358_v62 = vmax.f32 %v1230_v4, 0.0  ;;  %7956 = vmatmul.mubr.msk.bf16.gmra.mrb[156].mxu1 %vm284_vm0, %v9467_v17  ;;  %3017 = vmatprep.mubr.bf16.mxu0 %v10612_v8  ;;  %v2571_v43 = vmax.f32 %v2443_v46, 0.0 }
 0x24f   :  { %v10694_v11 = vpack.c.bf16 %v1357_v28, %v1355_v23  ;;  %3947 = vmatprep.mubr.bf16.mxu1 %v12564_v36  ;;  %v2572_v49 = vmax.f32 %v2444_v38, 0.0 }
 0x250   :  { %v10697_v0 = vpack.c.bf16 %v1358_v62, %v1356_v55  ;;  %v978_v6 = vpop.f32.mrb[52].mxu0  ;;  %v10699_v29 = vpack.c.bf16 %v2571_v43, %v2569_v57 }
 0x251   :  { %12582 = vst [vmem:[#allocation82_spill] sm:$0xff] %v10694_v11  ;;  %v1231_v10 = vadd.f32 %v10348_v58, %v978_v6  ;;  %v2192_v39 = vpop.f32.mrb[52].mxu1  ;;  %v980_v4 = vpop.f32.mrb[53].mxu0  ;;  %v10702_v17 = vpack.c.bf16 %v2572_v49, %v2570_v26  ;;  %v9067_v26 = vld [vmem:[%s12394_s5 + $0x4] ss:$8 sps:$4 sm:$0xff]  }
 0x252   :  { %12583 = vst [vmem:[#allocation83_spill] sm:$0xff] %v10697_v0  ;;  %v2445_v8 = vadd.f32 %v10352_v37, %v2192_v39  ;;  %v1232_v54 = vadd.f32 %v10355_v50, %v980_v4  ;;  %v2194_v46 = vpop.f32.mrb[53].mxu1  ;;  %v982_v23 = vpop.f32.mrb[54].mxu0  ;;  %v9065_v4 = vld [vmem:[%s12394_s5] ss:$8 sps:$4 sm:$0xff]   ;;  %3418 = vmatprep.subr.bf16.mxu0 %v9067_v26 }
 0x253   :  { %v2446_v24 = vadd.f32 %v10365_v22, %v2194_v46  ;;  %v1233_v28 = vadd.f32 %v10348_v58, %v982_v23  ;;  %v2196_v38 = vpop.f32.mrb[54].mxu1  ;;  %v984_v55 = vpop.f32.mrb[55].mxu0  ;;  %v1359_v49 = vmax.f32 %v1231_v10, 0.0  ;;  %3419 = vmatpush1.bf16.msra.mxu0 %v9065_v4 }
 0x254   :  { %v2447_v62 = vadd.f32 %v10352_v37, %v2196_v38  ;;  %v1234_v57 = vadd.f32 %v10355_v50, %v984_v55  ;;  %v2198_v43 = vpop.f32.mrb[55].mxu1  ;;  %v1360_v46 = vmax.f32 %v1232_v54, 0.0  ;;  %v2573_v38 = vmax.f32 %v2445_v8, 0.0  ;;  %v3783_v54 = vld [vmem:[%s12391_s2 + $0x190] sm:$0xff] }
 0x255   :  { %v1361_v6 = vmax.f32 %v1233_v28, 0.0  ;;  %v2448_v39 = vadd.f32 %v10365_v22, %v2198_v43  ;;  %3018 = vmatmul.mubr.bf16.gmra.mrb[160].mxu0 %v10609_v34  ;;  %v2574_v10 = vmax.f32 %v2446_v24, 0.0  ;;  %v9070_v8 = vld [vmem:[%s12394_s5 + $0x14] ss:$8 sps:$4 sm:$0xff]  }
 0x256   :  { %v1362_v23 = vmax.f32 %v1234_v57, 0.0  ;;  %7957 = vmatmul.mubr.msk.bf16.gmra.mrb[160].mxu1 %vm284_vm0, %v9481_v20  ;;  %3027 = vmatprep.mubr.bf16.mxu0 %v10639_v51  ;;  %v2575_v55 = vmax.f32 %v2447_v62, 0.0  ;;  %v3784_v51 = vld [vmem:[%s12391_s2 + $0x1b0] sm:$0xff] }
 0x257   :  { %v10721_v11 = vpack.c.bf16 %v1361_v6, %v1359_v49  ;;  %3957 = vmatprep.mubr.bf16.mxu1 %v12564_v36  ;;  %v2576_v28 = vmax.f32 %v2448_v39, 0.0  ;;  %v7993_v49 = vcombine.low %v3783_v54, %v3784_v51  ;;  %v7994_v6 = vcombine.high %v3783_v54, %v3784_v51  ;;  %v9068_v39 = vld [vmem:[%s12394_s5 + $0x10] ss:$8 sps:$4 sm:$0xff]   ;;  %3420 = vmatprep.subr.bf16.mxu0 %v9070_v8 }
 0x258   :  { %v10724_v34 = vpack.c.bf16 %v1362_v23, %v1360_v46  ;;  %v988_v43 = vpop.f32.mrb[56].mxu0  ;;  %v10726_v0 = vpack.c.bf16 %v2575_v55, %v2573_v38  ;;  %3421 = vmatpush1.bf16.msra.mxu0 %v9068_v39 }
 0x259   :  { %12584 = vst [vmem:[#allocation84_spill] sm:$0xff] %v10721_v11  ;;  %v1235_v24 = vadd.f32 %v10348_v58, %v988_v43  ;;  %v2202_v62 = vpop.f32.mrb[56].mxu1  ;;  %v990_v57 = vpop.f32.mrb[57].mxu0  ;;  %v10738_v26 = vpack.c.bf16 %v2576_v28, %v2574_v10  ;;  %4280 = vmatprep.subr.bf16.mxu1 %v7994_v6  ;;  %v9071_v6 = vld [vmem:[%s12394_s5 + $0x20] ss:$8 sps:$4 sm:$0xff]  }
 0x25a   :  { %v2449_v46 = vadd.f32 %v10352_v37, %v2202_v62  ;;  %v1236_v4 = vadd.f32 %v10355_v50, %v990_v57  ;;  %v2204_v23 = vpop.f32.mrb[57].mxu1  ;;  %v992_v38 = vpop.f32.mrb[58].mxu0  ;;  %4281 = vmatpush1.bf16.msra.mxu1 %v7993_v49  ;;  %v9073_v62 = vld [vmem:[%s12394_s5 + $0x24] ss:$8 sps:$4 sm:$0xff]  }
 0x25b   :  { %v2450_v55 = vadd.f32 %v10365_v22, %v2204_v23  ;;  %v1237_v43 = vadd.f32 %v10348_v58, %v992_v38  ;;  %v2206_v20 = vpop.f32.mrb[58].mxu1  ;;  %v994_v10 = vpop.f32.mrb[59].mxu0  ;;  %v1363_v57 = vmax.f32 %v1235_v24, 0.0  ;;  %3422 = vmatprep.subr.bf16.mxu0 %v9073_v62 }
 0x25c   :  { %v2451_v28 = vadd.f32 %v10352_v37, %v2206_v20  ;;  %v1238_v54 = vadd.f32 %v10355_v50, %v994_v10  ;;  %v2208_v51 = vpop.f32.mrb[59].mxu1  ;;  %v1364_v20 = vmax.f32 %v1236_v4, 0.0  ;;  %v2577_v49 = vmax.f32 %v2449_v46, 0.0  ;;  %3423 = vmatpush1.bf16.msra.mxu0 %v9071_v6  ;;  %v9076_v4 = vld [vmem:[%s12394_s5 + $0x34] ss:$8 sps:$4 sm:$0xff]  }
 0x25d   :  { %v1365_v8 = vmax.f32 %v1237_v43, 0.0  ;;  %v2452_v23 = vadd.f32 %v10365_v22, %v2208_v51  ;;  %3028 = vmatmul.mubr.bf16.gmra.mrb[164].mxu0 %v10630_v7  ;;  %v2578_v24 = vmax.f32 %v2450_v55, 0.0  ;;  %v9074_v55 = vld [vmem:[%s12394_s5 + $0x30] ss:$8 sps:$4 sm:$0xff]   ;;  %3424 = vmatprep.subr.bf16.mxu0 %v9076_v4 }
 0x25e   :  { %v1366_v38 = vmax.f32 %v1238_v54, 0.0  ;;  %7958 = vmatmul.mubr.msk.bf16.gmra.mrb[164].mxu1 %vm284_vm0, %v9501_v27  ;;  %3037 = vmatprep.mubr.bf16.mxu0 %v10660_v25  ;;  %v2579_v39 = vmax.f32 %v2451_v28, 0.0 }
 0x25f   :  { %v10760_v10 = vpack.c.bf16 %v1365_v8, %v1363_v57  ;;  %3967 = vmatprep.mubr.bf16.mxu1 %v12564_v36  ;;  %v2580_v43 = vmax.f32 %v2452_v23, 0.0 }
 0x260   :  { %v10763_v7 = vpack.c.bf16 %v1366_v38, %v1364_v20  ;;  %v998_v51 = vpop.f32.mrb[60].mxu0  ;;  %v10765_v11 = vpack.c.bf16 %v2579_v39, %v2577_v49  ;;  %3425 = vmatpush1.bf16.msra.mxu0 %v9074_v55 }
 0x261   :  { %12585 = vst [vmem:[#allocation85_spill] sm:$0xff] %v10760_v10  ;;  %v1239_v25 = vadd.f32 %v10348_v58, %v998_v51  ;;  %v2212_v46 = vpop.f32.mrb[60].mxu1  ;;  %v1000_v28 = vpop.f32.mrb[61].mxu0  ;;  %v10771_v54 = vpack.c.bf16 %v2580_v43, %v2578_v24  ;;  %v9079_v51 = vld [vmem:[%s12394_s5 + $0x44] ss:$8 sps:$4 sm:$0xff]  }
 0x262   :  { %v2453_v62 = vadd.f32 %v10352_v37, %v2212_v46  ;;  %v1240_v57 = vadd.f32 %v10355_v50, %v1000_v28  ;;  %v2214_v8 = vpop.f32.mrb[61].mxu1  ;;  %v1002_v23 = vpop.f32.mrb[62].mxu0  ;;  %3426 = vmatprep.subr.bf16.mxu0 %v9079_v51 }
 0x263   :  { %v2454_v6 = vadd.f32 %v10365_v22, %v2214_v8  ;;  %v1241_v20 = vadd.f32 %v10348_v58, %v1002_v23  ;;  %v2216_v38 = vpop.f32.mrb[62].mxu1  ;;  %v1004_v49 = vpop.f32.mrb[63].mxu0  ;;  %v1367_v46 = vmax.f32 %v1239_v25, 0.0  ;;  %v9077_v8 = vld [vmem:[%s12394_s5 + $0x40] ss:$8 sps:$4 sm:$0xff]  }
 0x264   :  { %v2455_v39 = vadd.f32 %v10352_v37, %v2216_v38  ;;  %v1242_v24 = vadd.f32 %v10355_v50, %v1004_v49  ;;  %v2218_v43 = vpop.f32.mrb[63].mxu1  ;;  %v1368_v23 = vmax.f32 %v1240_v57, 0.0  ;;  %v2581_v55 = vmax.f32 %v2453_v62, 0.0  ;;  %3427 = vmatpush1.bf16.msra.mxu0 %v9077_v8  ;;  %v9080_v57 = vld [vmem:[%s12394_s5 + $0x50] ss:$8 sps:$4 sm:$0xff]  }
 0x265   :  { %v1369_v28 = vmax.f32 %v1241_v20, 0.0  ;;  %v2456_v4 = vadd.f32 %v10365_v22, %v2218_v43  ;;  %3038 = vmatmul.mubr.bf16.gmra.mrb[168].mxu0 %v10657_v21  ;;  %v2582_v25 = vmax.f32 %v2454_v6, 0.0 }
 0x266   :  { %v1370_v38 = vmax.f32 %v1242_v24, 0.0  ;;  %7959 = vmatmul.mubr.msk.bf16.gmra.mrb[168].mxu1 %vm284_vm0, %v9515_v30  ;;  %3047 = vmatprep.mubr.bf16.mxu0 %v10681_v14  ;;  %v2583_v49 = vmax.f32 %v2455_v39, 0.0  ;;  %v9082_v14 = vld [vmem:[%s12394_s5 + $0x54] ss:$8 sps:$4 sm:$0xff]  }
 0x267   :  { %v10793_v27 = vpack.c.bf16 %v1369_v28, %v1367_v46  ;;  %3977 = vmatprep.mubr.bf16.mxu1 %v12564_v36  ;;  %v2584_v20 = vmax.f32 %v2456_v4, 0.0  ;;  %3428 = vmatprep.subr.bf16.mxu0 %v9082_v14 }
 0x268   :  { %v10796_v21 = vpack.c.bf16 %v1370_v38, %v1368_v23  ;;  %v1008_v43 = vpop.f32.mrb[64].mxu0  ;;  %v10798_v10 = vpack.c.bf16 %v2583_v49, %v2581_v55  ;;  %3429 = vmatpush1.bf16.msra.mxu0 %v9080_v57 }
 0x269   :  { %v1243_v62 = vadd.f32 %v10348_v58, %v1008_v43  ;;  %v2222_v39 = vpop.f32.mrb[64].mxu1  ;;  %v1010_v6 = vpop.f32.mrb[65].mxu0  ;;  %v10807_v24 = vpack.c.bf16 %v2584_v20, %v2582_v25  ;;  %v9085_v25 = vld [vmem:[%s12394_s5 + $0x64] ss:$8 sps:$4 sm:$0xff]  }
 0x26a   :  { %v2457_v51 = vadd.f32 %v10352_v37, %v2222_v39  ;;  %v1244_v46 = vadd.f32 %v10355_v50, %v1010_v6  ;;  %v2224_v28 = vpop.f32.mrb[65].mxu1  ;;  %v1012_v4 = vpop.f32.mrb[66].mxu0  ;;  %v9083_v6 = vld [vmem:[%s12394_s5 + $0x60] ss:$8 sps:$4 sm:$0xff]   ;;  %3430 = vmatprep.subr.bf16.mxu0 %v9085_v25 }
 0x26b   :  { %v2458_v8 = vadd.f32 %v10365_v22, %v2224_v28  ;;  %v1245_v23 = vadd.f32 %v10348_v58, %v1012_v4  ;;  %v2226_v38 = vpop.f32.mrb[66].mxu1  ;;  %v1014_v55 = vpop.f32.mrb[67].mxu0  ;;  %v1371_v20 = vmax.f32 %v1243_v62, 0.0  ;;  %v9088_v62 = vld [vmem:[%s12394_s5 + $0x74] ss:$8 sps:$4 sm:$0xff]  }
 0x26c   :  { %v2459_v49 = vadd.f32 %v10352_v37, %v2226_v38  ;;  %v1246_v43 = vadd.f32 %v10355_v50, %v1014_v55  ;;  %v2228_v30 = vpop.f32.mrb[67].mxu1  ;;  %v1372_v28 = vmax.f32 %v1244_v46, 0.0  ;;  %v2585_v57 = vmax.f32 %v2457_v51, 0.0  ;;  %3431 = vmatpush1.bf16.msra.mxu0 %v9083_v6 }
 0x26d   :  { %v1373_v39 = vmax.f32 %v1245_v23, 0.0  ;;  %v2460_v14 = vadd.f32 %v10365_v22, %v2228_v30  ;;  %3048 = vmatmul.mubr.bf16.gmra.mrb[172].mxu0 %v10678_v35  ;;  %v2586_v35 = vmax.f32 %v2458_v8, 0.0  ;;  %3432 = vmatprep.subr.bf16.mxu0 %v9088_v62  ;;  %v9091_v62 = vld [vmem:[%s12394_s5 + $0x84] ss:$8 sps:$4 sm:$0xff]  }
 0x26e   :  { %v1374_v4 = vmax.f32 %v1246_v43, 0.0  ;;  %7960 = vmatmul.mubr.msk.bf16.gmra.mrb[172].mxu1 %vm284_vm0, %v9529_v33  ;;  %3057 = vmatprep.mubr.bf16.mxu0 %v10702_v17  ;;  %v2587_v38 = vmax.f32 %v2459_v49, 0.0  ;;  %v9086_v17 = vld [vmem:[%s12394_s5 + $0x70] ss:$8 sps:$4 sm:$0xff]  }
 0x26f   :  { %v10829_v30 = vpack.c.bf16 %v1373_v39, %v1371_v20  ;;  %3987 = vmatprep.mubr.bf16.mxu1 %v12564_v36  ;;  %v2588_v23 = vmax.f32 %v2460_v14, 0.0 }
 0x270   :  { %v10832_v46 = vpack.c.bf16 %v1374_v4, %v1372_v28  ;;  %v1018_v55 = vpop.f32.mrb[68].mxu0  ;;  %v10834_v43 = vpack.c.bf16 %v2587_v38, %v2585_v57  ;;  %3433 = vmatpush1.bf16.msra.mxu0 %v9086_v17 }
 0x271   :  { %12586 = vst [vmem:[#allocation86_spill] sm:$0xff] %v10829_v30  ;;  %v1247_v51 = vadd.f32 %v10348_v58, %v1018_v55  ;;  %v2232_v49 = vpop.f32.mrb[68].mxu1  ;;  %v1020_v20 = vpop.f32.mrb[69].mxu0  ;;  %v10840_v39 = vpack.c.bf16 %v2588_v23, %v2586_v35  ;;  %3434 = vmatprep.subr.bf16.mxu0 %v9091_v62 }
 0x272   :  { %v2461_v8 = vadd.f32 %v10352_v37, %v2232_v49  ;;  %v1248_v25 = vadd.f32 %v10355_v50, %v1020_v20  ;;  %v2234_v14 = vpop.f32.mrb[69].mxu1  ;;  %v1022_v28 = vpop.f32.mrb[70].mxu0 }
 0x273   :  { %v2462_v4 = vadd.f32 %v10365_v22, %v2234_v14  ;;  %v1249_v6 = vadd.f32 %v10348_v58, %v1022_v28  ;;  %v2236_v57 = vpop.f32.mrb[70].mxu1  ;;  %v1024_v38 = vpop.f32.mrb[71].mxu0  ;;  %v1375_v35 = vmax.f32 %v1247_v51, 0.0  ;;  %v9089_v14 = vld [vmem:[%s12394_s5 + $0x80] ss:$8 sps:$4 sm:$0xff]   ;;  %v3785_v51 = vld [vmem:[%s12391_s2 + $0x1d0] sm:$0xff] }
 0x274   :  { %v2463_v33 = vadd.f32 %v10352_v37, %v2236_v57  ;;  %v1250_v55 = vadd.f32 %v10355_v50, %v1024_v38  ;;  %v2238_v30 = vpop.f32.mrb[71].mxu1  ;;  %v1376_v23 = vmax.f32 %v1248_v25, 0.0  ;;  %v2589_v57 = vmax.f32 %v2461_v8, 0.0  ;;  %3435 = vmatpush1.bf16.msra.mxu0 %v9089_v14 }
 0x275   :  { %v1377_v49 = vmax.f32 %v1249_v6, 0.0  ;;  %v2464_v20 = vadd.f32 %v10365_v22, %v2238_v30  ;;  %3058 = vmatmul.mubr.bf16.gmra.mrb[176].mxu0 %v10699_v29  ;;  %v2590_v17 = vmax.f32 %v2462_v4, 0.0  ;;  %v3786_v29 = vld [vmem:[%s12391_s2 + $0x1f0] sm:$0xff] }
 0x276   :  { %v1378_v28 = vmax.f32 %v1250_v55, 0.0  ;;  %7961 = vmatmul.mubr.msk.bf16.gmra.mrb[176].mxu1 %vm284_vm0, %v9549_v41  ;;  %3067 = vmatprep.mubr.bf16.mxu0 %v10738_v26  ;;  %v2591_v38 = vmax.f32 %v2463_v33, 0.0  ;;  %v7995_v6 = vcombine.low %v3785_v51, %v3786_v29  ;;  %v7996_v55 = vcombine.high %v3785_v51, %v3786_v29  ;;  %v9094_v33 = vld [vmem:[%s12394_s5 + $0x94] ss:$8 sps:$4 sm:$0xff]  }
 0x277   :  { %v10865_v30 = vpack.c.bf16 %v1377_v49, %v1375_v35  ;;  %3997 = vmatprep.mubr.bf16.mxu1 %v12564_v36  ;;  %v2592_v25 = vmax.f32 %v2464_v20, 0.0  ;;  %v9092_v35 = vld [vmem:[%s12394_s5 + $0x90] ss:$8 sps:$4 sm:$0xff]   ;;  %3436 = vmatprep.subr.bf16.mxu0 %v9094_v33 }
 0x278   :  { %v10871_v26 = vpack.c.bf16 %v1378_v28, %v1376_v23  ;;  %v1028_v8 = vpop.f32.mrb[72].mxu0  ;;  %v10873_v4 = vpack.c.bf16 %v2591_v38, %v2589_v57  ;;  %4282 = vmatprep.subr.bf16.mxu1 %v7996_v55  ;;  %3437 = vmatpush1.bf16.msra.mxu0 %v9092_v35  ;;  %v9097_v55 = vld [vmem:[%s12394_s5 + $0xa4] ss:$8 sps:$4 sm:$0xff]  }
 0x279   :  { %12587 = vst [vmem:[#allocation87_spill] sm:$0xff] %v10865_v30  ;;  %v1251_v49 = vadd.f32 %v10348_v58, %v1028_v8  ;;  %v2242_v20 = vpop.f32.mrb[72].mxu1  ;;  %v1030_v62 = vpop.f32.mrb[73].mxu0  ;;  %v10879_v41 = vpack.c.bf16 %v2592_v25, %v2590_v17  ;;  %4283 = vmatpush1.bf16.msra.mxu1 %v7995_v6  ;;  %3438 = vmatprep.subr.bf16.mxu0 %v9097_v55 }
 0x27a   :  { %v2465_v51 = vadd.f32 %v10352_v37, %v2242_v20  ;;  %v1252_v23 = vadd.f32 %v10355_v50, %v1030_v62  ;;  %v2244_v28 = vpop.f32.mrb[73].mxu1  ;;  %v1032_v57 = vpop.f32.mrb[74].mxu0  ;;  %v9095_v62 = vld [vmem:[%s12394_s5 + $0xa0] ss:$8 sps:$4 sm:$0xff]  }
 0x27b   :  { %v2466_v14 = vadd.f32 %v10365_v22, %v2244_v28  ;;  %v1253_v38 = vadd.f32 %v10348_v58, %v1032_v57  ;;  %v2246_v29 = vpop.f32.mrb[74].mxu1  ;;  %v1034_v30 = vpop.f32.mrb[75].mxu0  ;;  %v1379_v33 = vmax.f32 %v1251_v49, 0.0  ;;  %v9100_v49 = vld [vmem:[%s12394_s5 + $0xb4] ss:$8 sps:$4 sm:$0xff]  }
 0x27c   :  { %v2467_v8 = vadd.f32 %v10352_v37, %v2246_v29  ;;  %v1254_v17 = vadd.f32 %v10355_v50, %v1034_v30  ;;  %v2248_v25 = vpop.f32.mrb[75].mxu1  ;;  %v1380_v28 = vmax.f32 %v1252_v23, 0.0  ;;  %v2593_v30 = vmax.f32 %v2465_v51, 0.0  ;;  %3439 = vmatpush1.bf16.msra.mxu0 %v9095_v62 }
 0x27d   :  { %v1381_v20 = vmax.f32 %v1253_v38, 0.0  ;;  %v2468_v6 = vadd.f32 %v10365_v22, %v2248_v25  ;;  %3068 = vmatmul.mubr.bf16.gmra.mrb[180].mxu0 %v10726_v0  ;;  %v2594_v0 = vmax.f32 %v2466_v14, 0.0  ;;  %3440 = vmatprep.subr.bf16.mxu0 %v9100_v49  ;;  %v9103_v49 = vld [vmem:[%s12394_s5 + $0xc4] ss:$8 sps:$4 sm:$0xff]  }
 0x27e   :  { %v1382_v57 = vmax.f32 %v1254_v17, 0.0  ;;  %7962 = vmatmul.mubr.msk.bf16.gmra.mrb[180].mxu1 %vm284_vm0, %v9575_v53  ;;  %3077 = vmatprep.mubr.bf16.mxu0 %v10771_v54  ;;  %v2595_v35 = vmax.f32 %v2467_v8, 0.0  ;;  %v9098_v54 = vld [vmem:[%s12394_s5 + $0xb0] ss:$8 sps:$4 sm:$0xff]  }
 0x27f   :  { %v10901_v38 = vpack.c.bf16 %v1381_v20, %v1379_v33  ;;  %4007 = vmatprep.mubr.bf16.mxu1 %v12564_v36  ;;  %v2596_v29 = vmax.f32 %v2468_v6, 0.0 }
 0x280   :  { %v10904_v23 = vpack.c.bf16 %v1382_v57, %v1380_v28  ;;  %v1038_v17 = vpop.f32.mrb[76].mxu0  ;;  %v10906_v25 = vpack.c.bf16 %v2595_v35, %v2593_v30  ;;  %3441 = vmatpush1.bf16.msra.mxu0 %v9098_v54 }
 0x281   :  { %12588 = vst [vmem:[#allocation88_spill] sm:$0xff] %v10901_v38  ;;  %v1255_v51 = vadd.f32 %v10348_v58, %v1038_v17  ;;  %v2252_v8 = vpop.f32.mrb[76].mxu1  ;;  %v1040_v33 = vpop.f32.mrb[77].mxu0  ;;  %v10912_v20 = vpack.c.bf16 %v2596_v29, %v2594_v0  ;;  %3442 = vmatprep.subr.bf16.mxu0 %v9103_v49 }
 0x282   :  { %v2469_v14 = vadd.f32 %v10352_v37, %v2252_v8  ;;  %v1256_v55 = vadd.f32 %v10355_v50, %v1040_v33  ;;  %v2254_v6 = vpop.f32.mrb[77].mxu1  ;;  %v1042_v28 = vpop.f32.mrb[78].mxu0  ;;  %v9101_v33 = vld [vmem:[%s12394_s5 + $0xc0] ss:$8 sps:$4 sm:$0xff]  }
 0x283   :  { %v2470_v57 = vadd.f32 %v10365_v22, %v2254_v6  ;;  %v1257_v62 = vadd.f32 %v10348_v58, %v1042_v28  ;;  %v2256_v30 = vpop.f32.mrb[78].mxu1  ;;  %v1044_v35 = vpop.f32.mrb[79].mxu0  ;;  %v1383_v0 = vmax.f32 %v1255_v51, 0.0  ;;  %v9106_v51 = vld [vmem:[%s12394_s5 + $0xd4] ss:$8 sps:$4 sm:$0xff]  }
 0x284   :  { %v2471_v53 = vadd.f32 %v10352_v37, %v2256_v30  ;;  %v1258_v17 = vadd.f32 %v10355_v50, %v1044_v35  ;;  %v2258_v38 = vpop.f32.mrb[79].mxu1  ;;  %v1384_v6 = vmax.f32 %v1256_v55, 0.0  ;;  %v2597_v54 = vmax.f32 %v2469_v14, 0.0  ;;  %3443 = vmatpush1.bf16.msra.mxu0 %v9101_v33 }
 0x285   :  { %v1385_v29 = vmax.f32 %v1257_v62, 0.0  ;;  %v2472_v8 = vadd.f32 %v10365_v22, %v2258_v38  ;;  %3078 = vmatmul.mubr.bf16.gmra.mrb[184].mxu0 %v10765_v11  ;;  %v2598_v11 = vmax.f32 %v2470_v57, 0.0  ;;  %3444 = vmatprep.subr.bf16.mxu0 %v9106_v51  ;;  %v9109_v51 = vld [vmem:[%s12394_s5 + $0xe4] ss:$8 sps:$4 sm:$0xff]  }
 0x286   :  { %v1386_v28 = vmax.f32 %v1258_v17, 0.0  ;;  %7963 = vmatmul.mubr.msk.bf16.gmra.mrb[184].mxu1 %vm284_vm0, %v9601_v2  ;;  %3087 = vmatprep.mubr.bf16.mxu0 %v10807_v24  ;;  %v2599_v30 = vmax.f32 %v2471_v53, 0.0  ;;  %v9104_v53 = vld [vmem:[%s12394_s5 + $0xd0] ss:$8 sps:$4 sm:$0xff]  }
 0x287   :  { %v10934_v38 = vpack.c.bf16 %v1385_v29, %v1383_v0  ;;  %4017 = vmatprep.mubr.bf16.mxu1 %v12564_v36  ;;  %v2600_v62 = vmax.f32 %v2472_v8, 0.0 }
 0x288   :  { %v10937_v55 = vpack.c.bf16 %v1386_v28, %v1384_v6  ;;  %v1048_v35 = vpop.f32.mrb[80].mxu0  ;;  %v10939_v17 = vpack.c.bf16 %v2599_v30, %v2597_v54  ;;  %3445 = vmatpush1.bf16.msra.mxu0 %v9104_v53 }
 0x289   :  { %12589 = vst [vmem:[#allocation89_spill] sm:$0xff] %v10934_v38  ;;  %v1259_v24 = vadd.f32 %v10348_v58, %v1048_v35  ;;  %v2262_v14 = vpop.f32.mrb[80].mxu1  ;;  %v1050_v0 = vpop.f32.mrb[81].mxu0  ;;  %v10945_v29 = vpack.c.bf16 %v2600_v62, %v2598_v11  ;;  %3446 = vmatprep.subr.bf16.mxu0 %v9109_v51 }
 0x28a   :  { %v2473_v57 = vadd.f32 %v10352_v37, %v2262_v14  ;;  %v1260_v49 = vadd.f32 %v10355_v50, %v1050_v0  ;;  %v2264_v8 = vpop.f32.mrb[81].mxu1  ;;  %v1052_v6 = vpop.f32.mrb[82].mxu0  ;;  %v9107_v0 = vld [vmem:[%s12394_s5 + $0xe0] ss:$8 sps:$4 sm:$0xff]  }
 0x28b   :  { %v2474_v28 = vadd.f32 %v10365_v22, %v2264_v8  ;;  %v1261_v33 = vadd.f32 %v10348_v58, %v1052_v6  ;;  %v2266_v54 = vpop.f32.mrb[82].mxu1  ;;  %v1054_v30 = vpop.f32.mrb[83].mxu0  ;;  %v1387_v11 = vmax.f32 %v1259_v24, 0.0  ;;  %v9112_v24 = vld [vmem:[%s12394_s5 + $0xf4] ss:$8 sps:$4 sm:$0xff]  }
 0x28c   :  { %v2475_v2 = vadd.f32 %v10352_v37, %v2266_v54  ;;  %v1262_v35 = vadd.f32 %v10355_v50, %v1054_v30  ;;  %v2268_v38 = vpop.f32.mrb[83].mxu1  ;;  %v1388_v8 = vmax.f32 %v1260_v49, 0.0  ;;  %v2601_v53 = vmax.f32 %v2473_v57, 0.0  ;;  %3447 = vmatpush1.bf16.msra.mxu0 %v9107_v0 }
 0x28d   :  { %v1389_v62 = vmax.f32 %v1261_v33, 0.0  ;;  %v2476_v14 = vadd.f32 %v10365_v22, %v2268_v38  ;;  %3088 = vmatmul.mubr.bf16.gmra.mrb[188].mxu0 %v10798_v10  ;;  %v2602_v10 = vmax.f32 %v2474_v28, 0.0  ;;  %3448 = vmatprep.subr.bf16.mxu0 %v9112_v24 }
 0x28e   :  { %v1390_v6 = vmax.f32 %v1262_v35, 0.0  ;;  %7964 = vmatmul.mubr.msk.bf16.gmra.mrb[188].mxu1 %vm284_vm0, %v9627_v18  ;;  %3097 = vmatprep.mubr.bf16.mxu0 %v10840_v39  ;;  %v2603_v54 = vmax.f32 %v2475_v2, 0.0  ;;  %v9110_v2 = vld [vmem:[%s12394_s5 + $0xf0] ss:$8 sps:$4 sm:$0xff]  }
 0x28f   :  { %v10967_v38 = vpack.c.bf16 %v1389_v62, %v1387_v11  ;;  %4027 = vmatprep.mubr.bf16.mxu1 %v12564_v36  ;;  %v2604_v33 = vmax.f32 %v2476_v14, 0.0 }
 0x290   :  { %v10970_v49 = vpack.c.bf16 %v1390_v6, %v1388_v8  ;;  %v1058_v30 = vpop.f32.mrb[84].mxu0  ;;  %v10972_v35 = vpack.c.bf16 %v2603_v54, %v2601_v53  ;;  %3449 = vmatpush1.bf16.msra.mxu0 %v9110_v2  ;;  %v10994_v2 = vld [vmem:[%s12392_s3 + $0x18] sm:$0xff] }
 0x291   :  { %12590 = vst [vmem:[#allocation90_spill] sm:$0xff] %v10967_v38  ;;  %v1263_v39 = vadd.f32 %v10348_v58, %v1058_v30  ;;  %v2272_v57 = vpop.f32.mrb[84].mxu1  ;;  %v1060_v11 = vpop.f32.mrb[85].mxu0  ;;  %v10978_v62 = vpack.c.bf16 %v2604_v33, %v2602_v10 }
 0x292   :  { %12591 = vst [vmem:[#allocation91_spill] sm:$0xff] %v10970_v49  ;;  %v2477_v28 = vadd.f32 %v10352_v37, %v2272_v57  ;;  %v1264_v51 = vadd.f32 %v10355_v50, %v1060_v11  ;;  %v2274_v14 = vpop.f32.mrb[85].mxu1  ;;  %v1062_v8 = vpop.f32.mrb[86].mxu0 }
 0x293   :  { %v2478_v6 = vadd.f32 %v10365_v22, %v2274_v14  ;;  %v1265_v0 = vadd.f32 %v10348_v58, %v1062_v8  ;;  %v2276_v53 = vpop.f32.mrb[86].mxu1  ;;  %v1064_v54 = vpop.f32.mrb[87].mxu0  ;;  %v1391_v10 = vmax.f32 %v1263_v39, 0.0 }
 0x294   :  { %v2479_v18 = vadd.f32 %v10352_v37, %v2276_v53  ;;  %v1266_v30 = vadd.f32 %v10355_v50, %v1064_v54  ;;  %v2278_v38 = vpop.f32.mrb[87].mxu1  ;;  %v1392_v24 = vmax.f32 %v1264_v51, 0.0  ;;  %v2605_v8 = vmax.f32 %v2477_v28, 0.0 }
 0x295   :  { %v1393_v33 = vmax.f32 %v1265_v0, 0.0  ;;  %v2480_v57 = vadd.f32 %v10365_v22, %v2278_v38  ;;  %3098 = vmatmul.mubr.bf16.gmra.mrb[192].mxu0 %v10834_v43  ;;  %v2606_v14 = vmax.f32 %v2478_v6, 0.0  ;;  %v10999_v38 = vld [vmem:[%s12392_s3 + $0x38] sm:$0xff] }
 0x296   :  { %v1394_v11 = vmax.f32 %v1266_v30, 0.0  ;;  %7965 = vmatmul.mubr.msk.bf16.gmra.mrb[192].mxu1 %vm284_vm0, %v9653_v32  ;;  %3107 = vmatprep.mubr.bf16.mxu0 %v10879_v41  ;;  %v2607_v53 = vmax.f32 %v2479_v18, 0.0  ;;  %v8030_v18 = vcombine.high %v10994_v2, %v10999_v38 }
 0x297   :  { %v11001_v43 = vpack.c.bf16 %v1393_v33, %v1391_v10  ;;  %4037 = vmatprep.mubr.bf16.mxu1 %v12564_v36  ;;  %v2608_v39 = vmax.f32 %v2480_v57, 0.0 }
 0x298   :  { %v11008_v28 = vpack.c.bf16 %v1394_v11, %v1392_v24  ;;  %v1068_v51 = vpop.f32.mrb[88].mxu0  ;;  %v11010_v6 = vpack.c.bf16 %v2607_v53, %v2605_v8  ;;  %5690 = vmatprep.subr.bf16.mxu1 %v8030_v18 }
 0x299   :  { %12592 = vst [vmem:[#allocation92_spill] sm:$0xff] %v11001_v43  ;;  %v1267_v0 = vadd.f32 %v10348_v58, %v1068_v51  ;;  %v2282_v54 = vpop.f32.mrb[88].mxu1  ;;  %v1070_v30 = vpop.f32.mrb[89].mxu0  ;;  %v11013_v10 = vpack.c.bf16 %v2608_v39, %v2606_v14 }
 0x29a   :  { %12593 = vst [vmem:[#allocation93_spill] sm:$0xff] %v11008_v28  ;;  %v2481_v33 = vadd.f32 %v10352_v37, %v2282_v54  ;;  %v1268_v57 = vadd.f32 %v10355_v50, %v1070_v30  ;;  %v2284_v41 = vpop.f32.mrb[89].mxu1  ;;  %v1072_v32 = vpop.f32.mrb[90].mxu0 }
 0x29b   :  { %v2482_v43 = vadd.f32 %v10365_v22, %v2284_v41  ;;  %v1269_v24 = vadd.f32 %v10348_v58, %v1072_v32  ;;  %v2286_v11 = vpop.f32.mrb[90].mxu1  ;;  %v1074_v8 = vpop.f32.mrb[91].mxu0  ;;  %v1395_v14 = vmax.f32 %v1267_v0, 0.0 }
 0x29c   :  { %v2483_v53 = vadd.f32 %v10352_v37, %v2286_v11  ;;  %v1270_v51 = vadd.f32 %v10355_v50, %v1074_v8  ;;  %v2288_v28 = vpop.f32.mrb[91].mxu1  ;;  %v1396_v54 = vmax.f32 %v1268_v57, 0.0  ;;  %v2609_v32 = vmax.f32 %v2481_v33, 0.0 }
 0x29d   :  { %v1397_v39 = vmax.f32 %v1269_v24, 0.0  ;;  %v2484_v18 = vadd.f32 %v10365_v22, %v2288_v28  ;;  %3108 = vmatmul.mubr.bf16.gmra.mrb[196].mxu0 %v10873_v4  ;;  %v2610_v11 = vmax.f32 %v2482_v43, 0.0 }
 0x29e   :  { %v1398_v30 = vmax.f32 %v1270_v51, 0.0  ;;  %7966 = vmatmul.mubr.msk.bf16.gmra.mrb[196].mxu1 %vm284_vm0, %v9681_v42  ;;  %3117 = vmatprep.mubr.bf16.mxu0 %v10912_v20  ;;  %v2611_v41 = vmax.f32 %v2483_v53, 0.0 }
 0x29f   :  { %v11026_v49 = vpack.c.bf16 %v1397_v39, %v1395_v14  ;;  %4047 = vmatprep.mubr.bf16.mxu1 %v12564_v36  ;;  %v2612_v0 = vmax.f32 %v2484_v18, 0.0 }
 0x2a0   :  { %v11029_v24 = vpack.c.bf16 %v1398_v30, %v1396_v54  ;;  %v1078_v28 = vpop.f32.mrb[92].mxu0  ;;  %v11031_v8 = vpack.c.bf16 %v2611_v41, %v2609_v32 }
 0x2a1   :  { %12594 = vst [vmem:[#allocation94_spill] sm:$0xff] %v11026_v49  ;;  %v1271_v4 = vadd.f32 %v10348_v58, %v1078_v28  ;;  %v2292_v57 = vpop.f32.mrb[92].mxu1  ;;  %v1080_v51 = vpop.f32.mrb[93].mxu0  ;;  %v11034_v42 = vpack.c.bf16 %v2612_v0, %v2610_v11 }
 0x2a2   :  { %v2485_v20 = vadd.f32 %v10352_v37, %v2292_v57  ;;  %v1272_v33 = vadd.f32 %v10355_v50, %v1080_v51  ;;  %v2294_v53 = vpop.f32.mrb[93].mxu1  ;;  %v1082_v14 = vpop.f32.mrb[94].mxu0 }
 0x2a3   :  { %v2486_v43 = vadd.f32 %v10365_v22, %v2294_v53  ;;  %v1273_v39 = vadd.f32 %v10348_v58, %v1082_v14  ;;  %v2296_v18 = vpop.f32.mrb[94].mxu1  ;;  %v1084_v54 = vpop.f32.mrb[95].mxu0  ;;  %v1399_v28 = vmax.f32 %v1271_v4, 0.0 }
 0x2a4   :  { %v2487_v30 = vadd.f32 %v10352_v37, %v2296_v18  ;;  %v1274_v32 = vadd.f32 %v10355_v50, %v1084_v54  ;;  %v2298_v41 = vpop.f32.mrb[95].mxu1  ;;  %v1400_v57 = vmax.f32 %v1272_v33, 0.0  ;;  %v2613_v53 = vmax.f32 %v2485_v20, 0.0 }
 0x2a5   :  { %v1401_v11 = vmax.f32 %v1273_v39, 0.0  ;;  %v2488_v0 = vadd.f32 %v10365_v22, %v2298_v41  ;;  %3118 = vmatmul.mubr.bf16.gmra.mrb[200].mxu0 %v10906_v25  ;;  %v2614_v18 = vmax.f32 %v2486_v43, 0.0 }
 0x2a6   :  { %v1402_v51 = vmax.f32 %v1274_v32, 0.0  ;;  %7967 = vmatmul.mubr.msk.bf16.gmra.mrb[200].mxu1 %vm284_vm0, %v9695_v45  ;;  %3127 = vmatprep.mubr.bf16.mxu0 %v10945_v29  ;;  %v2615_v14 = vmax.f32 %v2487_v30, 0.0 }
 0x2a7   :  { %v11047_v49 = vpack.c.bf16 %v1401_v11, %v1399_v28  ;;  %4057 = vmatprep.mubr.bf16.mxu1 %v12564_v36  ;;  %v2616_v4 = vmax.f32 %v2488_v0, 0.0 }
 0x2a8   :  { %v11050_v39 = vpack.c.bf16 %v1402_v51, %v1400_v57  ;;  %v1088_v54 = vpop.f32.mrb[96].mxu0  ;;  %v11052_v41 = vpack.c.bf16 %v2615_v14, %v2613_v53 }
 0x2a9   :  { %12595 = vst [vmem:[#allocation95_spill] sm:$0xff] %v11047_v49  ;;  %v1275_v25 = vadd.f32 %v10348_v58, %v1088_v54  ;;  %v2302_v33 = vpop.f32.mrb[96].mxu1  ;;  %v1090_v32 = vpop.f32.mrb[97].mxu0  ;;  %v11055_v45 = vpack.c.bf16 %v2616_v4, %v2614_v18 }
 0x2aa   :  { %v2489_v29 = vadd.f32 %v10352_v37, %v2302_v33  ;;  %v1276_v20 = vadd.f32 %v10355_v50, %v1090_v32  ;;  %v2304_v30 = vpop.f32.mrb[97].mxu1  ;;  %v1092_v28 = vpop.f32.mrb[98].mxu0 }
 0x2ab   :  { %v2490_v43 = vadd.f32 %v10365_v22, %v2304_v30  ;;  %v1277_v11 = vadd.f32 %v10348_v58, %v1092_v28  ;;  %v2306_v0 = vpop.f32.mrb[98].mxu1  ;;  %v1094_v57 = vpop.f32.mrb[99].mxu0  ;;  %v1403_v54 = vmax.f32 %v1275_v25, 0.0 }
 0x2ac   :  { %v2491_v51 = vadd.f32 %v10352_v37, %v2306_v0  ;;  %v1278_v53 = vadd.f32 %v10355_v50, %v1094_v57  ;;  %v2308_v14 = vpop.f32.mrb[99].mxu1  ;;  %v1404_v33 = vmax.f32 %v1276_v20, 0.0  ;;  %v2617_v30 = vmax.f32 %v2489_v29, 0.0 }
 0x2ad   :  { %v1405_v18 = vmax.f32 %v1277_v11, 0.0  ;;  %v2492_v4 = vadd.f32 %v10365_v22, %v2308_v14  ;;  %3128 = vmatmul.mubr.bf16.gmra.mrb[204].mxu0 %v10939_v17  ;;  %v2618_v0 = vmax.f32 %v2490_v43, 0.0 }
 0x2ae   :  { %v1406_v32 = vmax.f32 %v1278_v53, 0.0  ;;  %7968 = vmatmul.mubr.msk.bf16.gmra.mrb[204].mxu1 %vm284_vm0, %v9709_v48  ;;  %3137 = vmatprep.mubr.bf16.mxu0 %v10978_v62  ;;  %v2619_v28 = vmax.f32 %v2491_v51, 0.0 }
 0x2af   :  { %v11068_v49 = vpack.c.bf16 %v1405_v18, %v1403_v54  ;;  %4067 = vmatprep.mubr.bf16.mxu1 %v12564_v36  ;;  %v2620_v25 = vmax.f32 %v2492_v4, 0.0 }
 0x2b0   :  { %v11071_v11 = vpack.c.bf16 %v1406_v32, %v1404_v33  ;;  %v1098_v57 = vpop.f32.mrb[100].mxu0  ;;  %v11073_v14 = vpack.c.bf16 %v2619_v28, %v2617_v30 }
 0x2b1   :  { %12596 = vst [vmem:[#allocation96_spill] sm:$0xff] %v11068_v49  ;;  %v1279_v17 = vadd.f32 %v10348_v58, %v1098_v57  ;;  %v2312_v20 = vpop.f32.mrb[100].mxu1  ;;  %v1100_v53 = vpop.f32.mrb[101].mxu0  ;;  %v11076_v48 = vpack.c.bf16 %v2620_v25, %v2618_v0 }
 0x2b2   :  { %v2493_v62 = vadd.f32 %v10352_v37, %v2312_v20  ;;  %v1280_v29 = vadd.f32 %v10355_v50, %v1100_v53  ;;  %v2314_v51 = vpop.f32.mrb[101].mxu1  ;;  %v1102_v54 = vpop.f32.mrb[102].mxu0 }
 0x2b3   :  { %v2494_v43 = vadd.f32 %v10365_v22, %v2314_v51  ;;  %v1281_v18 = vadd.f32 %v10348_v58, %v1102_v54  ;;  %v2316_v4 = vpop.f32.mrb[102].mxu1  ;;  %v1104_v33 = vpop.f32.mrb[103].mxu0  ;;  %v1407_v57 = vmax.f32 %v1279_v17, 0.0 }
 0x2b4   :  { %v2495_v32 = vadd.f32 %v10352_v37, %v2316_v4  ;;  %v1282_v30 = vadd.f32 %v10355_v50, %v1104_v33  ;;  %v2318_v28 = vpop.f32.mrb[103].mxu1  ;;  %v1408_v20 = vmax.f32 %v1280_v29, 0.0  ;;  %v2621_v51 = vmax.f32 %v2493_v62, 0.0 }
 0x2b5   :  { %v1409_v0 = vmax.f32 %v1281_v18, 0.0  ;;  %v2496_v25 = vadd.f32 %v10365_v22, %v2318_v28  ;;  %3138 = vmatmul.mubr.bf16.gmra.mrb[208].mxu0 %v10972_v35  ;;  %v2622_v4 = vmax.f32 %v2494_v43, 0.0 }
 0x2b6   :  { %v1410_v53 = vmax.f32 %v1282_v30, 0.0  ;;  %7969 = vmatmul.mubr.msk.bf16.gmra.mrb[208].mxu1 %vm284_vm0, %v9723_v52  ;;  %3147 = vmatprep.mubr.bf16.mxu0 %v11013_v10  ;;  %v2623_v54 = vmax.f32 %v2495_v32, 0.0 }
 0x2b7   :  { %v11089_v49 = vpack.c.bf16 %v1409_v0, %v1407_v57  ;;  %4077 = vmatprep.mubr.bf16.mxu1 %v12564_v36  ;;  %v2624_v17 = vmax.f32 %v2496_v25, 0.0 }
 0x2b8   :  { %v11092_v18 = vpack.c.bf16 %v1410_v53, %v1408_v20  ;;  %v1108_v33 = vpop.f32.mrb[104].mxu0  ;;  %v11094_v28 = vpack.c.bf16 %v2623_v54, %v2621_v51 }
 0x2b9   :  { %12597 = vst [vmem:[#allocation97_spill] sm:$0xff] %v11089_v49  ;;  %v1283_v35 = vadd.f32 %v10348_v58, %v1108_v33  ;;  %v2322_v29 = vpop.f32.mrb[104].mxu1  ;;  %v1110_v30 = vpop.f32.mrb[105].mxu0  ;;  %v11097_v52 = vpack.c.bf16 %v2624_v17, %v2622_v4 }
 0x2ba   :  { %v2497_v10 = vadd.f32 %v10352_v37, %v2322_v29  ;;  %v1284_v62 = vadd.f32 %v10355_v50, %v1110_v30  ;;  %v2324_v32 = vpop.f32.mrb[105].mxu1  ;;  %v1112_v57 = vpop.f32.mrb[106].mxu0 }
 0x2bb   :  { %v2498_v43 = vadd.f32 %v10365_v22, %v2324_v32  ;;  %v1285_v0 = vadd.f32 %v10348_v58, %v1112_v57  ;;  %v2326_v25 = vpop.f32.mrb[106].mxu1  ;;  %v1114_v20 = vpop.f32.mrb[107].mxu0  ;;  %v1411_v33 = vmax.f32 %v1283_v35, 0.0 }
 0x2bc   :  { %v2499_v53 = vadd.f32 %v10352_v37, %v2326_v25  ;;  %v1286_v51 = vadd.f32 %v10355_v50, %v1114_v20  ;;  %v2328_v54 = vpop.f32.mrb[107].mxu1  ;;  %v1412_v29 = vmax.f32 %v1284_v62, 0.0  ;;  %v2625_v32 = vmax.f32 %v2497_v10, 0.0 }
 0x2bd   :  { %v1413_v4 = vmax.f32 %v1285_v0, 0.0  ;;  %v2500_v17 = vadd.f32 %v10365_v22, %v2328_v54  ;;  %3148 = vmatmul.mubr.bf16.gmra.mrb[212].mxu0 %v11010_v6  ;;  %v2626_v25 = vmax.f32 %v2498_v43, 0.0 }
 0x2be   :  { %v1414_v30 = vmax.f32 %v1286_v51, 0.0  ;;  %7970 = vmatmul.mubr.msk.bf16.gmra.mrb[212].mxu1 %vm284_vm0, %v9737_v56  ;;  %3157 = vmatprep.mubr.bf16.mxu0 %v11034_v42  ;;  %v2627_v57 = vmax.f32 %v2499_v53, 0.0 }
 0x2bf   :  { %v11110_v49 = vpack.c.bf16 %v1413_v4, %v1411_v33  ;;  %4087 = vmatprep.mubr.bf16.mxu1 %v12564_v36  ;;  %v2628_v35 = vmax.f32 %v2500_v17, 0.0 }
 0x2c0   :  { %v11113_v0 = vpack.c.bf16 %v1414_v30, %v1412_v29  ;;  %v1118_v20 = vpop.f32.mrb[108].mxu0  ;;  %v11115_v54 = vpack.c.bf16 %v2627_v57, %v2625_v32 }
 0x2c1   :  { %12598 = vst [vmem:[#allocation98_spill] sm:$0xff] %v11110_v49  ;;  %v1287_v6 = vadd.f32 %v10348_v58, %v1118_v20  ;;  %v2332_v62 = vpop.f32.mrb[108].mxu1  ;;  %v1120_v51 = vpop.f32.mrb[109].mxu0  ;;  %v11118_v56 = vpack.c.bf16 %v2628_v35, %v2626_v25 }
 0x2c2   :  { %v2501_v42 = vadd.f32 %v10352_v37, %v2332_v62  ;;  %v1288_v10 = vadd.f32 %v10355_v50, %v1120_v51  ;;  %v2334_v53 = vpop.f32.mrb[109].mxu1  ;;  %v1122_v33 = vpop.f32.mrb[110].mxu0 }
 0x2c3   :  { %v2502_v43 = vadd.f32 %v10365_v22, %v2334_v53  ;;  %v1289_v4 = vadd.f32 %v10348_v58, %v1122_v33  ;;  %v2336_v17 = vpop.f32.mrb[110].mxu1  ;;  %v1124_v29 = vpop.f32.mrb[111].mxu0  ;;  %v1415_v20 = vmax.f32 %v1287_v6, 0.0 }
 0x2c4   :  { %v2503_v30 = vadd.f32 %v10352_v37, %v2336_v17  ;;  %v1290_v32 = vadd.f32 %v10355_v50, %v1124_v29  ;;  %v2338_v57 = vpop.f32.mrb[111].mxu1  ;;  %v1416_v62 = vmax.f32 %v1288_v10, 0.0  ;;  %v2629_v53 = vmax.f32 %v2501_v42, 0.0 }
 0x2c5   :  { %v1417_v25 = vmax.f32 %v1289_v4, 0.0  ;;  %v2504_v35 = vadd.f32 %v10365_v22, %v2338_v57  ;;  %3158 = vmatmul.mubr.bf16.gmra.mrb[216].mxu0 %v11031_v8  ;;  %v2630_v17 = vmax.f32 %v2502_v43, 0.0 }
 0x2c6   :  { %v1418_v51 = vmax.f32 %v1290_v32, 0.0  ;;  %7971 = vmatmul.mubr.msk.bf16.gmra.mrb[216].mxu1 %vm284_vm0, %v9751_v59  ;;  %3167 = vmatprep.mubr.bf16.mxu0 %v11055_v45  ;;  %v2631_v33 = vmax.f32 %v2503_v30, 0.0 }
 0x2c7   :  { %v11131_v49 = vpack.c.bf16 %v1417_v25, %v1415_v20  ;;  %4097 = vmatprep.mubr.bf16.mxu1 %v12564_v36  ;;  %v2632_v6 = vmax.f32 %v2504_v35, 0.0 }
 0x2c8   :  { %v11134_v4 = vpack.c.bf16 %v1418_v51, %v1416_v62  ;;  %v1128_v29 = vpop.f32.mrb[112].mxu0  ;;  %v11136_v57 = vpack.c.bf16 %v2631_v33, %v2629_v53 }
 0x2c9   :  { %12599 = vst [vmem:[#allocation99_spill] sm:$0xff] %v11131_v49  ;;  %v1291_v8 = vadd.f32 %v10348_v58, %v1128_v29  ;;  %v2342_v10 = vpop.f32.mrb[112].mxu1  ;;  %v1130_v32 = vpop.f32.mrb[113].mxu0  ;;  %v11139_v59 = vpack.c.bf16 %v2632_v6, %v2630_v17 }
 0x2ca   :  { %v2505_v45 = vadd.f32 %v10352_v37, %v2342_v10  ;;  %v1292_v42 = vadd.f32 %v10355_v50, %v1130_v32  ;;  %v2344_v30 = vpop.f32.mrb[113].mxu1  ;;  %v1132_v20 = vpop.f32.mrb[114].mxu0 }
 0x2cb   :  { %v2506_v43 = vadd.f32 %v10365_v22, %v2344_v30  ;;  %v1293_v25 = vadd.f32 %v10348_v58, %v1132_v20  ;;  %v2346_v35 = vpop.f32.mrb[114].mxu1  ;;  %v1134_v62 = vpop.f32.mrb[115].mxu0  ;;  %v1419_v29 = vmax.f32 %v1291_v8, 0.0 }
 0x2cc   :  { %v2507_v51 = vadd.f32 %v10352_v37, %v2346_v35  ;;  %v1294_v53 = vadd.f32 %v10355_v50, %v1134_v62  ;;  %v2348_v33 = vpop.f32.mrb[115].mxu1  ;;  %v1420_v10 = vmax.f32 %v1292_v42, 0.0  ;;  %v2633_v30 = vmax.f32 %v2505_v45, 0.0 }
 0x2cd   :  { %v1421_v17 = vmax.f32 %v1293_v25, 0.0  ;;  %v2508_v6 = vadd.f32 %v10365_v22, %v2348_v33  ;;  %3168 = vmatmul.mubr.bf16.gmra.mrb[220].mxu0 %v11052_v41  ;;  %v2634_v35 = vmax.f32 %v2506_v43, 0.0 }
 0x2ce   :  { %v1422_v32 = vmax.f32 %v1294_v53, 0.0  ;;  %7972 = vmatmul.mubr.msk.bf16.gmra.mrb[220].mxu1 %vm284_vm0, %v9765_v63  ;;  %3177 = vmatprep.mubr.bf16.mxu0 %v11076_v48  ;;  %v2635_v20 = vmax.f32 %v2507_v51, 0.0 }
 0x2cf   :  { %v11152_v49 = vpack.c.bf16 %v1421_v17, %v1419_v29  ;;  %4107 = vmatprep.mubr.bf16.mxu1 %v12564_v36  ;;  %v2636_v8 = vmax.f32 %v2508_v6, 0.0 }
 0x2d0   :  { %v11155_v25 = vpack.c.bf16 %v1422_v32, %v1420_v10  ;;  %v1138_v62 = vpop.f32.mrb[116].mxu0  ;;  %v11157_v33 = vpack.c.bf16 %v2635_v20, %v2633_v30 }
 0x2d1   :  { %12600 = vst [vmem:[#allocation100_spill] sm:$0xff] %v11152_v49  ;;  %v1295_v41 = vadd.f32 %v10348_v58, %v1138_v62  ;;  %v2352_v42 = vpop.f32.mrb[116].mxu1  ;;  %v1140_v53 = vpop.f32.mrb[117].mxu0  ;;  %v11160_v63 = vpack.c.bf16 %v2636_v8, %v2634_v35 }
 0x2d2   :  { %v2509_v48 = vadd.f32 %v10352_v37, %v2352_v42  ;;  %v1296_v45 = vadd.f32 %v10355_v50, %v1140_v53  ;;  %v2354_v51 = vpop.f32.mrb[117].mxu1  ;;  %v1142_v29 = vpop.f32.mrb[118].mxu0 }
 0x2d3   :  { %v2510_v43 = vadd.f32 %v10365_v22, %v2354_v51  ;;  %v1297_v17 = vadd.f32 %v10348_v58, %v1142_v29  ;;  %v2356_v6 = vpop.f32.mrb[118].mxu1  ;;  %v1144_v10 = vpop.f32.mrb[119].mxu0  ;;  %v1423_v62 = vmax.f32 %v1295_v41, 0.0 }
 0x2d4   :  { %v2511_v32 = vadd.f32 %v10352_v37, %v2356_v6  ;;  %v1298_v30 = vadd.f32 %v10355_v50, %v1144_v10  ;;  %v2358_v20 = vpop.f32.mrb[119].mxu1  ;;  %v1424_v42 = vmax.f32 %v1296_v45, 0.0  ;;  %v2637_v51 = vmax.f32 %v2509_v48, 0.0 }
 0x2d5   :  { %v1425_v35 = vmax.f32 %v1297_v17, 0.0  ;;  %v2512_v8 = vadd.f32 %v10365_v22, %v2358_v20  ;;  %3178 = vmatmul.mubr.bf16.gmra.mrb[224].mxu0 %v11073_v14  ;;  %v2638_v6 = vmax.f32 %v2510_v43, 0.0 }
 0x2d6   :  { %v1426_v53 = vmax.f32 %v1298_v30, 0.0  ;;  %7973 = vmatmul.mubr.msk.bf16.gmra.mrb[224].mxu1 %vm284_vm0, %v9779_v5  ;;  %3187 = vmatprep.mubr.bf16.mxu0 %v11097_v52  ;;  %v2639_v29 = vmax.f32 %v2511_v32, 0.0 }
 0x2d7   :  { %v11173_v49 = vpack.c.bf16 %v1425_v35, %v1423_v62  ;;  %4117 = vmatprep.mubr.bf16.mxu1 %v12564_v36  ;;  %v2640_v41 = vmax.f32 %v2512_v8, 0.0 }
 0x2d8   :  { %v11176_v17 = vpack.c.bf16 %v1426_v53, %v1424_v42  ;;  %v1148_v10 = vpop.f32.mrb[120].mxu0  ;;  %v11178_v20 = vpack.c.bf16 %v2639_v29, %v2637_v51 }
 0x2d9   :  { %12601 = vst [vmem:[#allocation101_spill] sm:$0xff] %v11173_v49  ;;  %v1299_v14 = vadd.f32 %v10348_v58, %v1148_v10  ;;  %v2362_v45 = vpop.f32.mrb[120].mxu1  ;;  %v1150_v30 = vpop.f32.mrb[121].mxu0  ;;  %v11181_v5 = vpack.c.bf16 %v2640_v41, %v2638_v6 }
 0x2da   :  { %12602 = vst [vmem:[#allocation102_spill] sm:$0xff] %v11176_v17  ;;  %v2513_v52 = vadd.f32 %v10352_v37, %v2362_v45  ;;  %v1300_v48 = vadd.f32 %v10355_v50, %v1150_v30  ;;  %v2364_v32 = vpop.f32.mrb[121].mxu1  ;;  %v1152_v62 = vpop.f32.mrb[122].mxu0 }
 0x2db   :  { %v2514_v43 = vadd.f32 %v10365_v22, %v2364_v32  ;;  %v1301_v35 = vadd.f32 %v10348_v58, %v1152_v62  ;;  %v2366_v8 = vpop.f32.mrb[122].mxu1  ;;  %v1154_v42 = vpop.f32.mrb[123].mxu0  ;;  %v1427_v10 = vmax.f32 %v1299_v14, 0.0 }
 0x2dc   :  { %v2515_v53 = vadd.f32 %v10352_v37, %v2366_v8  ;;  %v1302_v51 = vadd.f32 %v10355_v50, %v1154_v42  ;;  %v2368_v29 = vpop.f32.mrb[123].mxu1  ;;  %v1428_v45 = vmax.f32 %v1300_v48, 0.0  ;;  %v2641_v32 = vmax.f32 %v2513_v52, 0.0 }
 0x2dd   :  { %v1429_v6 = vmax.f32 %v1301_v35, 0.0  ;;  %v2516_v41 = vadd.f32 %v10365_v22, %v2368_v29  ;;  %3188 = vmatmul.mubr.bf16.gmra.mrb[228].mxu0 %v11094_v28  ;;  %v2642_v8 = vmax.f32 %v2514_v43, 0.0 }
 0x2de   :  { %v1430_v30 = vmax.f32 %v1302_v51, 0.0  ;;  %7974 = vmatmul.mubr.msk.bf16.gmra.mrb[228].mxu1 %vm284_vm0, %v9793_v9  ;;  %3197 = vmatprep.mubr.bf16.mxu0 %v11118_v56  ;;  %v2643_v62 = vmax.f32 %v2515_v53, 0.0 }
 0x2df   :  { %v11194_v49 = vpack.c.bf16 %v1429_v6, %v1427_v10  ;;  %4127 = vmatprep.mubr.bf16.mxu1 %v12564_v36  ;;  %v2644_v14 = vmax.f32 %v2516_v41, 0.0 }
 0x2e0   :  { %v11197_v35 = vpack.c.bf16 %v1430_v30, %v1428_v45  ;;  %v1158_v42 = vpop.f32.mrb[124].mxu0  ;;  %v2709_v29 = vpack.c.bf16 %v2643_v62, %v2641_v32 }
 0x2e1   :  { %v1303_v28 = vadd.f32 %v10348_v58, %v1158_v42  ;;  %v2372_v48 = vpop.f32.mrb[124].mxu1  ;;  %v1160_v51 = vpop.f32.mrb[125].mxu0  ;;  %v2710_v17 = vpack.c.bf16 %v2644_v14, %v2642_v8 }
 0x2e2   :  { %v2517_v9 = vadd.f32 %v10352_v37, %v2372_v48  ;;  %v1304_v56 = vadd.f32 %v10355_v50, %v1160_v51  ;;  %v2374_v52 = vpop.f32.mrb[125].mxu1  ;;  %v1162_v53 = vpop.f32.mrb[126].mxu0 }
 0x2e3   :  { %v2518_v10 = vadd.f32 %v10365_v22, %v2374_v52  ;;  %v1305_v43 = vadd.f32 %v10348_v58, %v1162_v53  ;;  %v2376_v6 = vpop.f32.mrb[126].mxu1  ;;  %v1164_v41 = vpop.f32.mrb[127].mxu0  ;;  %v1431_v62 = vmax.f32 %v1303_v28, 0.0 }
 0x2e4   :  { %v2519_v45 = vadd.f32 %v10352_v37, %v2376_v6  ;;  %v1306_v30 = vadd.f32 %v10355_v50, %v1164_v41  ;;  %v2378_v32 = vpop.f32.mrb[127].mxu1  ;;  %v1432_v14 = vmax.f32 %v1304_v56, 0.0  ;;  %v2645_v58 = vmax.f32 %v2517_v9, 0.0  ;;  %v12605_v9 = vld [vmem:[#allocation33_spill] sm:$0xff]  ;;  %v12610_v56 = vld [vmem:[#allocation36_spill] sm:$0xff] }
 0x2e5   :  { %v1433_v42 = vmax.f32 %v1305_v43, 0.0  ;;  %v2520_v8 = vadd.f32 %v10365_v22, %v2378_v32  ;;  %3198 = vmatmul.mubr.bf16.gmra.mrb[232].mxu0 %v11115_v54  ;;  %v2646_v37 = vmax.f32 %v2518_v10, 0.0  ;;  %v12603_v54 = vld [vmem:[#allocation31_spill] sm:$0xff]  ;;  %v12611_v10 = vld [vmem:[#allocation70_spill] sm:$0xff]  ;;  %v5646_v43 = vld [vmem:[%s12392_s3 + $0x98] sm:$0xff]  ;;  %v12612_v41 = vcombine.low %v10994_v2, %v10999_v38 }
 0x2e6   :  { %v1434_v48 = vmax.f32 %v1306_v30, 0.0  ;;  %7975 = vmatmul.mubr.msk.bf16.gmra.mrb[232].mxu1 %vm284_vm0, %v9807_v13  ;;  %3207 = vmatprep.mubr.bf16.mxu0 %v11139_v59  ;;  %v2647_v51 = vmax.f32 %v2519_v45, 0.0  ;;  %v12604_v59 = vld [vmem:[#allocation32_spill] sm:$0xff]  ;;  %v12617_v2 = vld [vmem:[#allocation38_spill] sm:$0xff] }
 0x2e7   :  { %v11211_v52 = vpack.c.bf16 %v1433_v42, %v1431_v62  ;;  %4137 = vmatprep.mubr.bf16.mxu1 %v12564_v36  ;;  %v2648_v50 = vmax.f32 %v2520_v8, 0.0  ;;  %v5647_v6 = vld [vmem:[%s12392_s3 + $0xb8] sm:$0xff]  ;;  %v12613_v62 = vld [vmem:[#allocation69_spill] sm:$0xff] }
 0x2e8   :  { %v11214_v28 = vpack.c.bf16 %v1434_v48, %v1432_v14  ;;  %v2711_v22 = vpack.c.bf16 %v2647_v51, %v2645_v58  ;;  %v8034_v30 = vcombine.high %v5646_v43, %v5647_v6  ;;  %v8033_v32 = vcombine.low %v5646_v43, %v5647_v6  ;;  %v12614_v42 = vld [vmem:[#allocation37_spill] sm:$0xff]  ;;  %v12616_v14 = vld [vmem:[#allocation72_spill] sm:$0xff]  ;;  %v12619_v48 = vld [vmem:[#allocation75_spill] sm:$0xff] }
 0x2e9   :  { %v2712_v53 = vpack.c.bf16 %v2648_v50, %v2646_v37  ;;  %v12615_v8 = vld [vmem:[#allocation73_spill] sm:$0xff]  ;;  %v12618_v38 = vld [vmem:[#allocation76_spill] sm:$0xff]  ;;  %v12620_v58 = vld [vmem:[#allocation39_spill] sm:$0xff] }
 0x2ea   :  { %v12621_v51 = vld [vmem:[#allocation79_spill] sm:$0xff]  ;;  %v12622_v37 = vld [vmem:[#allocation78_spill] sm:$0xff]  ;;  %v12623_v50 = vld [vmem:[#allocation40_spill] sm:$0xff] }
 0x2eb   :  { %v9124_v43 = vld [vmem:[%s12394_s5 + $0x234] ss:$8 sps:$4 sm:$0xff]   ;;  %v9127_v6 = vld [vmem:[%s12394_s5 + $0x244] ss:$8 sps:$4 sm:$0xff]  }
 0x2ed   :  { %3208 = vmatmul.mubr.bf16.gmra.mrb[236].mxu0 %v11136_v57  ;;  %v12607_v57 = vld [vmem:[#allocation35_spill] sm:$0xff] }
 0x2ee   :  { %7976 = vmatmul.mubr.msk.bf16.gmra.mrb[236].mxu1 %vm284_vm0, %v12603_v54  ;;  %3217 = vmatprep.mubr.bf16.mxu0 %v11160_v63  ;;  %v12606_v63 = vld [vmem:[#allocation34_spill] sm:$0xff] }
 0x2ef   :  { %4147 = vmatprep.mubr.bf16.mxu1 %v12564_v36 }
 0x2f5   :  { %3218 = vmatmul.mubr.bf16.gmra.mrb[240].mxu0 %v11157_v33  ;;  %v5644_v33 = vld [vmem:[%s12392_s3 + $0x58] sm:$0xff] }
 0x2f6   :  { %7977 = vmatmul.mubr.msk.bf16.gmra.mrb[240].mxu1 %vm284_vm0, %v12604_v59  ;;  %3227 = vmatprep.mubr.bf16.mxu0 %v11181_v5  ;;  %v12608_v5 = vld [vmem:[#allocation67_spill] sm:$0xff] }
 0x2f7   :  { %4157 = vmatprep.mubr.bf16.mxu1 %v12564_v36 }
 0x2fd   :  { %3228 = vmatmul.mubr.bf16.gmra.mrb[244].mxu0 %v11178_v20 }
 0x2fe   :  { %7978 = vmatmul.mubr.msk.bf16.gmra.mrb[244].mxu1 %vm284_vm0, %v12605_v9  ;;  %3237 = vmatprep.mubr.bf16.mxu0 %v2710_v17  ;;  %v5645_v17 = vld [vmem:[%s12392_s3 + $0x78] sm:$0xff] }
 0x2ff   :  { %4167 = vmatprep.mubr.bf16.mxu1 %v12564_v36  ;;  %v8032_v20 = vcombine.high %v5644_v33, %v5645_v17  ;;  %v8031_v45 = vcombine.low %v5644_v33, %v5645_v17  ;;  %v9118_v17 = vld [vmem:[%s12394_s5 + $0x214] ss:$8 sps:$4 sm:$0xff]  }
 0x305   :  { %3238 = vmatmul.mubr.bf16.gmra.mrb[248].mxu0 %v2709_v29  ;;  %v12609_v29 = vld [vmem:[#allocation66_spill] sm:$0xff] }
 0x306   :  { %7979 = vmatmul.mubr.msk.bf16.gmra.mrb[248].mxu1 %vm284_vm0, %v12606_v63  ;;  %3247 = vmatprep.mubr.bf16.mxu0 %v2712_v53  ;;  %v12625_v53 = vld [vmem:[#allocation41_spill] sm:$0xff] }
 0x307   :  { %4177 = vmatprep.mubr.bf16.mxu1 %v12564_v36 }
 0x30d   :  { %3248 = vmatmul.mubr.bf16.gmra.mrb[252].mxu0 %v2711_v22  ;;  %v12624_v22 = vld [vmem:[#allocation80_spill] sm:$0xff] }
 0x30e   :  { %7980 = vmatmul.mubr.msk.bf16.gmra.mrb[252].mxu1 %vm284_vm0, %v12607_v57  ;;  %3450 = vmatprep.mubr.bf16.mxu0 %v12608_v5  ;;  %v12626_v5 = vld [vmem:[#allocation42_spill] sm:$0xff] }
 0x30f   :  { %4300 = vmatprep.mubr.bf16.mxu1 %v12564_v36 }
 0x315   :  { %3451 = vmatmul.mubr.bf16.vlgmr.msra.gmra.mrb[128].mxu0 %v12609_v29  ;;  %v9119_v29 = vld [vmem:[%s12394_s5 + $0x220] ss:$8 sps:$4 sm:$0xff]  }
 0x316   :  { %4301 = vmatmul.mubr.bf16.vlgmr.msra.gmra.mrb[128].mxu1 %v12610_v56  ;;  %3460 = vmatprep.mubr.bf16.mxu0 %v12611_v10  ;;  %v12629_v10 = vld [vmem:[#allocation45_spill] sm:$0xff] }
 0x317   :  { %5691 = vmatpush1.bf16.msra.mxu1 %v12612_v41  ;;  %4310 = vmatprep.mubr.bf16.mxu1 %v12564_v36  ;;  %v12630_v41 = vld [vmem:[#allocation46_spill] sm:$0xff] }
 0x318   :  { %5692 = vmatprep.subr.bf16.mxu1 %v8032_v20  ;;  %v9121_v20 = vld [vmem:[%s12394_s5 + $0x224] ss:$8 sps:$4 sm:$0xff]  }
 0x31b   :  { %5693 = vmatpush1.bf16.msra.mxu1 %v8031_v45  ;;  %v9130_v45 = vld [vmem:[%s12394_s5 + $0x254] ss:$8 sps:$4 sm:$0xff]  }
 0x31c   :  { %5694 = vmatprep.subr.bf16.mxu1 %v8034_v30  ;;  %v9133_v30 = vld [vmem:[%s12394_s5 + $0x264] ss:$8 sps:$4 sm:$0xff]  }
 0x31d   :  { %3461 = vmatmul.mubr.bf16.gmra.mrb[132].mxu0 %v12613_v62  ;;  %v12632_v62 = vld [vmem:[#allocation47_spill] sm:$0xff] }
 0x31e   :  { %4311 = vmatmul.mubr.bf16.gmra.mrb[132].mxu1 %v12614_v42  ;;  %3470 = vmatprep.mubr.bf16.mxu0 %v12615_v8  ;;  %v12633_v8 = vld [vmem:[#allocation83_spill] sm:$0xff] }
 0x31f   :  { %4320 = vmatprep.mubr.bf16.mxu1 %v12564_v36  ;;  %5695 = vmatpush1.bf16.msra.mxu1 %v8033_v32  ;;  %v12631_v32 = vld [vmem:[#allocation81_spill] sm:$0xff] }
 0x325   :  { %3471 = vmatmul.mubr.bf16.gmra.mrb[136].mxu0 %v12616_v14  ;;  %v9136_v14 = vld [vmem:[%s12394_s5 + $0x274] ss:$8 sps:$4 sm:$0xff]  }
 0x326   :  { %4321 = vmatmul.mubr.bf16.gmra.mrb[136].mxu1 %v12617_v2  ;;  %3480 = vmatprep.mubr.bf16.mxu0 %v12618_v38  ;;  %v9134_v38 = vld [vmem:[%s12394_s5 + $0x270] ss:$8 sps:$4 sm:$0xff]  }
 0x327   :  { %4330 = vmatprep.mubr.bf16.mxu1 %v12564_v36 }
 0x32d   :  { %3481 = vmatmul.mubr.bf16.gmra.mrb[140].mxu0 %v12619_v48  ;;  %v9139_v48 = vld [vmem:[%s12394_s5 + $0x284] ss:$8 sps:$4 sm:$0xff]  }
 0x32e   :  { %4331 = vmatmul.mubr.bf16.gmra.mrb[140].mxu1 %v12620_v58  ;;  %3490 = vmatprep.mubr.bf16.mxu0 %v12621_v51  ;;  %v12634_v51 = vld [vmem:[#allocation82_spill] sm:$0xff] }
 0x32f   :  { %4340 = vmatprep.mubr.bf16.mxu1 %v12564_v36 }
 0x335   :  { %3491 = vmatmul.mubr.bf16.gmra.mrb[144].mxu0 %v12622_v37  ;;  %v9137_v37 = vld [vmem:[%s12394_s5 + $0x280] ss:$8 sps:$4 sm:$0xff]  }
 0x336   :  { %4341 = vmatmul.mubr.bf16.gmra.mrb[144].mxu1 %v12623_v50  ;;  %3500 = vmatprep.mubr.bf16.mxu0 %v10532_v15  ;;  %v12627_v15 = vld [vmem:[#allocation43_spill] sm:$0xff] }
 0x337   :  { %4350 = vmatprep.mubr.bf16.mxu1 %v12564_v36 }
 0x33d   :  { %3501 = vmatmul.mubr.bf16.gmra.mrb[148].mxu0 %v12624_v22  ;;  %v12635_v22 = vld [vmem:[#allocation48_spill] sm:$0xff] }
 0x33e   :  { %4351 = vmatmul.mubr.bf16.gmra.mrb[148].mxu1 %v12625_v53  ;;  %3510 = vmatprep.mubr.bf16.mxu0 %v10565_v1  ;;  %v9115_v1 = vld [vmem:[%s12394_s5 + $0x204] ss:$8 sps:$4 sm:$0xff]  }
 0x33f   :  { %4360 = vmatprep.mubr.bf16.mxu1 %v12564_v36  ;;  %5145 = vmatprep.subr.bf16.mxu0 %v9115_v1  ;;  %v9142_v1 = vld [vmem:[%s12394_s5 + $0x294] ss:$8 sps:$4 sm:$0xff]  }
 0x345   :  { %3511 = vmatmul.mubr.bf16.gmra.mrb[152].mxu0 %v10562_v47  ;;  %v9113_v47 = vld [vmem:[%s12394_s5 + $0x200] ss:$8 sps:$4 sm:$0xff]  }
 0x346   :  { %4361 = vmatmul.mubr.bf16.gmra.mrb[152].mxu1 %v12626_v5  ;;  %3520 = vmatprep.mubr.bf16.mxu0 %v10586_v44  ;;  %v12628_v44 = vld [vmem:[#allocation44_spill] sm:$0xff] }
 0x347   :  { %4370 = vmatprep.mubr.bf16.mxu1 %v12564_v36  ;;  %5146 = vmatpush1.bf16.msra.mxu0 %v9113_v47  ;;  %v9140_v47 = vld [vmem:[%s12394_s5 + $0x290] ss:$8 sps:$4 sm:$0xff]  }
 0x348   :  { %5147 = vmatprep.subr.bf16.mxu0 %v9118_v17  ;;  %v9146_v17 = vld [vmem:[%s12394_s5 + $0x2b0] ss:$8 sps:$4 sm:$0xff]  }
 0x34d   :  { %3521 = vmatmul.mubr.bf16.gmra.mrb[156].mxu0 %v10583_v19  ;;  %v5648_v19 = vld [vmem:[%s12392_s3 + $0xd8] sm:$0xff] }
 0x34e   :  { %4371 = vmatmul.mubr.bf16.gmra.mrb[156].mxu1 %v12627_v15  ;;  %3530 = vmatprep.mubr.bf16.mxu0 %v10607_v12  ;;  %v5649_v12 = vld [vmem:[%s12392_s3 + $0xf8] sm:$0xff] }
 0x34f   :  { %4380 = vmatprep.mubr.bf16.mxu1 %v12564_v36  ;;  %v8036_v33 = vcombine.high %v5648_v19, %v5649_v12 }
 0x351   :  { %5696 = vmatprep.subr.bf16.mxu1 %v8036_v33  ;;  %v9148_v33 = vld [vmem:[%s12394_s5 + $0x2b4] ss:$8 sps:$4 sm:$0xff]  }
 0x355   :  { %3531 = vmatmul.mubr.bf16.gmra.mrb[160].mxu0 %v10604_v40  ;;  %v8035_v40 = vcombine.low %v5648_v19, %v5649_v12  ;;  %v9145_v19 = vld [vmem:[%s12394_s5 + $0x2a4] ss:$8 sps:$4 sm:$0xff]   ;;  %v12636_v12 = vld [vmem:[#allocation84_spill] sm:$0xff] }
 0x356   :  { %4381 = vmatmul.mubr.bf16.gmra.mrb[160].mxu1 %v12628_v44  ;;  %3540 = vmatprep.mubr.bf16.mxu0 %v10628_v16  ;;  %v9116_v16 = vld [vmem:[%s12394_s5 + $0x210] ss:$8 sps:$4 sm:$0xff]  }
 0x357   :  { %4390 = vmatprep.mubr.bf16.mxu1 %v12564_v36  ;;  %5697 = vmatpush1.bf16.msra.mxu1 %v8035_v40  ;;  %v12637_v40 = vld [vmem:[#allocation49_spill] sm:$0xff] }
 0x358   :  { %5148 = vmatpush1.bf16.msra.mxu0 %v9116_v16  ;;  %v9151_v16 = vld [vmem:[%s12394_s5 + $0x2c4] ss:$8 sps:$4 sm:$0xff]  }
 0x359   :  { %5149 = vmatprep.subr.bf16.mxu0 %v9121_v20  ;;  %v12638_v20 = vld [vmem:[#allocation85_spill] sm:$0xff] }
 0x35c   :  { %5150 = vmatpush1.bf16.msra.mxu0 %v9119_v29  ;;  %v12639_v29 = vld [vmem:[#allocation50_spill] sm:$0xff] }
 0x35d   :  { %3541 = vmatmul.mubr.bf16.gmra.mrb[164].mxu0 %v10625_v31  ;;  %v9122_v31 = vld [vmem:[%s12394_s5 + $0x230] ss:$8 sps:$4 sm:$0xff]   ;;  %5151 = vmatprep.subr.bf16.mxu0 %v9124_v43  ;;  %v9154_v43 = vld [vmem:[%s12394_s5 + $0x2d4] ss:$8 sps:$4 sm:$0xff]  }
 0x35e   :  { %4391 = vmatmul.mubr.bf16.gmra.mrb[164].mxu1 %v12629_v10  ;;  %3550 = vmatprep.mubr.bf16.mxu0 %v10655_v61  ;;  %v9125_v61 = vld [vmem:[%s12394_s5 + $0x240] ss:$8 sps:$4 sm:$0xff]  }
 0x35f   :  { %4400 = vmatprep.mubr.bf16.mxu1 %v12564_v36 }
 0x360   :  { %5152 = vmatpush1.bf16.msra.mxu0 %v9122_v31  ;;  %v9152_v31 = vld [vmem:[%s12394_s5 + $0x2d0] ss:$8 sps:$4 sm:$0xff]  }
 0x361   :  { %5153 = vmatprep.subr.bf16.mxu0 %v9127_v6  ;;  %v9157_v6 = vld [vmem:[%s12394_s5 + $0x2e4] ss:$8 sps:$4 sm:$0xff]  }
 0x364   :  { %5154 = vmatpush1.bf16.msra.mxu0 %v9125_v61  ;;  %v12640_v61 = vld [vmem:[#allocation51_spill] sm:$0xff] }
 0x365   :  { %3551 = vmatmul.mubr.bf16.gmra.mrb[168].mxu0 %v10652_v3  ;;  %v9128_v3 = vld [vmem:[%s12394_s5 + $0x250] ss:$8 sps:$4 sm:$0xff]   ;;  %5155 = vmatprep.subr.bf16.mxu0 %v9130_v45  ;;  %v9160_v45 = vld [vmem:[%s12394_s5 + $0x2f4] ss:$8 sps:$4 sm:$0xff]  }
 0x366   :  { %4401 = vmatmul.mubr.bf16.gmra.mrb[168].mxu1 %v12630_v41  ;;  %3560 = vmatprep.mubr.bf16.mxu0 %v10676_v60  ;;  %v9131_v60 = vld [vmem:[%s12394_s5 + $0x260] ss:$8 sps:$4 sm:$0xff]  }
 0x367   :  { %4410 = vmatprep.mubr.bf16.mxu1 %v12564_v36 }
 0x368   :  { %5156 = vmatpush1.bf16.msra.mxu0 %v9128_v3  ;;  %v12641_v3 = vld [vmem:[#allocation86_spill] sm:$0xff] }
 0x369   :  { %5157 = vmatprep.subr.bf16.mxu0 %v9133_v30  ;;  %v12642_v30 = vld [vmem:[#allocation52_spill] sm:$0xff] }
 0x36c   :  { %5158 = vmatpush1.bf16.msra.mxu0 %v9131_v60 }
 0x36d   :  { %3561 = vmatmul.mubr.bf16.gmra.mrb[172].mxu0 %v12631_v32  ;;  %5159 = vmatprep.subr.bf16.mxu0 %v9136_v14  ;;  %v11430_v32 = vld [vmem:[%s12391_s2 + $0x38] sm:$0xff]  ;;  %v12644_v14 = vld [vmem:[#allocation53_spill] sm:$0xff] }
 0x36e   :  { %4411 = vmatmul.mubr.bf16.gmra.mrb[172].mxu1 %v12632_v62  ;;  %3570 = vmatprep.mubr.bf16.mxu0 %v12633_v8 }
 0x36f   :  { %4420 = vmatprep.mubr.bf16.mxu1 %v12564_v36 }
 0x370   :  { %5160 = vmatpush1.bf16.msra.mxu0 %v9134_v38  ;;  %v12645_v38 = vld [vmem:[#allocation88_spill] sm:$0xff] }
 0x371   :  { %5161 = vmatprep.subr.bf16.mxu0 %v9139_v48  ;;  %v12646_v48 = vld [vmem:[#allocation54_spill] sm:$0xff] }
 0x374   :  { %5162 = vmatpush1.bf16.msra.mxu0 %v9137_v37  ;;  %v12648_v37 = vld [vmem:[#allocation55_spill] sm:$0xff] }
 0x375   :  { %3571 = vmatmul.mubr.bf16.gmra.mrb[176].mxu0 %v12634_v51  ;;  %5163 = vmatprep.subr.bf16.mxu0 %v9142_v1  ;;  %v12647_v51 = vld [vmem:[#allocation89_spill] sm:$0xff]  ;;  %v12649_v1 = vld [vmem:[#allocation91_spill] sm:$0xff] }
 0x376   :  { %4421 = vmatmul.mubr.bf16.gmra.mrb[176].mxu1 %v12635_v22  ;;  %3580 = vmatprep.mubr.bf16.mxu0 %v10724_v34  ;;  %v9143_v34 = vld [vmem:[%s12394_s5 + $0x2a0] ss:$8 sps:$4 sm:$0xff]  }
 0x377   :  { %4430 = vmatprep.mubr.bf16.mxu1 %v12564_v36 }
 0x378   :  { %5164 = vmatpush1.bf16.msra.mxu0 %v9140_v47  ;;  %v12650_v47 = vld [vmem:[#allocation90_spill] sm:$0xff] }
 0x379   :  { %5165 = vmatprep.subr.bf16.mxu0 %v9145_v19  ;;  %v12652_v19 = vld [vmem:[#allocation93_spill] sm:$0xff] }
 0x37c   :  { %5166 = vmatpush1.bf16.msra.mxu0 %v9143_v34  ;;  %v12655_v34 = vld [vmem:[#allocation94_spill] sm:$0xff] }
 0x37d   :  { %3581 = vmatmul.mubr.bf16.gmra.mrb[180].mxu0 %v12636_v12  ;;  %5167 = vmatprep.subr.bf16.mxu0 %v9148_v33  ;;  %v12653_v12 = vld [vmem:[#allocation92_spill] sm:$0xff]  ;;  %v12656_v33 = vld [vmem:[#allocation58_spill] sm:$0xff] }
 0x37e   :  { %4431 = vmatmul.mubr.bf16.gmra.mrb[180].mxu1 %v12637_v40  ;;  %3590 = vmatprep.mubr.bf16.mxu0 %v10763_v7  ;;  %v9149_v7 = vld [vmem:[%s12394_s5 + $0x2c0] ss:$8 sps:$4 sm:$0xff]  }
 0x37f   :  { %4440 = vmatprep.mubr.bf16.mxu1 %v12564_v36 }
 0x380   :  { %5168 = vmatpush1.bf16.msra.mxu0 %v9146_v17  ;;  %v12657_v17 = vld [vmem:[#allocation95_spill] sm:$0xff] }
 0x381   :  { %5169 = vmatprep.subr.bf16.mxu0 %v9151_v16  ;;  %v12658_v16 = vld [vmem:[#allocation59_spill] sm:$0xff] }
 0x384   :  { %5170 = vmatpush1.bf16.msra.mxu0 %v9149_v7  ;;  %v12661_v7 = vld [vmem:[#allocation97_spill] sm:$0xff] }
 0x385   :  { %3591 = vmatmul.mubr.bf16.gmra.mrb[184].mxu0 %v12638_v20  ;;  %5171 = vmatprep.subr.bf16.mxu0 %v9154_v43  ;;  %v12659_v20 = vld [vmem:[#allocation96_spill] sm:$0xff]  ;;  %v12663_v43 = vld [vmem:[#allocation98_spill] sm:$0xff] }
 0x386   :  { %4441 = vmatmul.mubr.bf16.gmra.mrb[184].mxu1 %v12639_v29  ;;  %3600 = vmatprep.mubr.bf16.mxu0 %v10796_v21  ;;  %v9155_v21 = vld [vmem:[%s12394_s5 + $0x2e0] ss:$8 sps:$4 sm:$0xff]  }
 0x387   :  { %4450 = vmatprep.mubr.bf16.mxu1 %v12564_v36 }
 0x388   :  { %5172 = vmatpush1.bf16.msra.mxu0 %v9152_v31  ;;  %v12664_v31 = vld [vmem:[#allocation62_spill] sm:$0xff] }
 0x389   :  { %5173 = vmatprep.subr.bf16.mxu0 %v9157_v6 }
 0x38c   :  { %5174 = vmatpush1.bf16.msra.mxu0 %v9155_v21  ;;  %v12666_v21 = vld [vmem:[#allocation64_spill] sm:$0xff] }
 0x38d   :  { %3601 = vmatmul.mubr.bf16.gmra.mrb[188].mxu0 %v10793_v27  ;;  %v9158_v27 = vld [vmem:[%s12394_s5 + $0x2f0] ss:$8 sps:$4 sm:$0xff]   ;;  %5175 = vmatprep.subr.bf16.mxu0 %v9160_v45 }
 0x38e   :  { %4451 = vmatmul.mubr.bf16.gmra.mrb[188].mxu1 %v12640_v61  ;;  %3610 = vmatprep.mubr.bf16.mxu0 %v10832_v46  ;;  %v11425_v46 = vld [vmem:[%s12391_s2 + $0x18] sm:$0xff] }
 0x38f   :  { %4460 = vmatprep.mubr.bf16.mxu1 %v12564_v36  ;;  %v8070_v8 = vcombine.high %v11425_v46, %v11430_v32 }
 0x390   :  { %5176 = vmatpush1.bf16.msra.mxu0 %v9158_v27 }
 0x391   :  { %6123 = vmatprep.subr.bf16.mxu1 %v8070_v8 }
 0x395   :  { %3611 = vmatmul.mubr.bf16.gmra.mrb[192].mxu0 %v12641_v3 }
 0x396   :  { %4461 = vmatmul.mubr.bf16.gmra.mrb[192].mxu1 %v12642_v30  ;;  %3620 = vmatprep.mubr.bf16.mxu0 %v10871_v26  ;;  %v12643_v26 = vld [vmem:[#allocation87_spill] sm:$0xff] }
 0x397   :  { %4470 = vmatprep.mubr.bf16.mxu1 %v12564_v36 }
 0x39d   :  { %3621 = vmatmul.mubr.bf16.gmra.mrb[196].mxu0 %v12643_v26 }
 0x39e   :  { %4471 = vmatmul.mubr.bf16.gmra.mrb[196].mxu1 %v12644_v14  ;;  %3630 = vmatprep.mubr.bf16.mxu0 %v10904_v23  ;;  %v12651_v23 = vld [vmem:[#allocation56_spill] sm:$0xff] }
 0x39f   :  { %4480 = vmatprep.mubr.bf16.mxu1 %v12564_v36 }
 0x3a5   :  { %3631 = vmatmul.mubr.bf16.gmra.mrb[200].mxu0 %v12645_v38 }
 0x3a6   :  { %4481 = vmatmul.mubr.bf16.gmra.mrb[200].mxu1 %v12646_v48  ;;  %3640 = vmatprep.mubr.bf16.mxu0 %v10937_v55  ;;  %v12654_v55 = vld [vmem:[#allocation57_spill] sm:$0xff] }
 0x3a7   :  { %4490 = vmatprep.mubr.bf16.mxu1 %v12564_v36 }
 0x3ad   :  { %3641 = vmatmul.mubr.bf16.gmra.mrb[204].mxu0 %v12647_v51 }
 0x3ae   :  { %4491 = vmatmul.mubr.bf16.gmra.mrb[204].mxu1 %v12648_v37  ;;  %3650 = vmatprep.mubr.bf16.mxu0 %v12649_v1  ;;  %v12667_v1 = vld [vmem:[#allocation99_spill] sm:$0xff] }
 0x3af   :  { %4500 = vmatprep.mubr.bf16.mxu1 %v12564_v36 }
 0x3b5   :  { %3651 = vmatmul.mubr.bf16.gmra.mrb[208].mxu0 %v12650_v47 }
 0x3b6   :  { %4501 = vmatmul.mubr.bf16.gmra.mrb[208].mxu1 %v12651_v23  ;;  %3660 = vmatprep.mubr.bf16.mxu0 %v12652_v19 }
 0x3b7   :  { %4510 = vmatprep.mubr.bf16.mxu1 %v12564_v36 }
 0x3bd   :  { %3661 = vmatmul.mubr.bf16.gmra.mrb[212].mxu0 %v12653_v12  ;;  %v12668_v12 = vld [vmem:[#allocation65_spill] sm:$0xff] }
 0x3be   :  { %4511 = vmatmul.mubr.bf16.gmra.mrb[212].mxu1 %v12654_v55  ;;  %3670 = vmatprep.mubr.bf16.mxu0 %v11029_v24  ;;  %v12660_v24 = vld [vmem:[#allocation60_spill] sm:$0xff] }
 0x3bf   :  { %4520 = vmatprep.mubr.bf16.mxu1 %v12564_v36 }
 0x3c5   :  { %3671 = vmatmul.mubr.bf16.gmra.mrb[216].mxu0 %v12655_v34 }
 0x3c6   :  { %4521 = vmatmul.mubr.bf16.gmra.mrb[216].mxu1 %v12656_v33  ;;  %3680 = vmatprep.mubr.bf16.mxu0 %v11050_v39  ;;  %v12662_v39 = vld [vmem:[#allocation61_spill] sm:$0xff] }
 0x3c7   :  { %4530 = vmatprep.mubr.bf16.mxu1 %v12564_v36 }
 0x3cd   :  { %3681 = vmatmul.mubr.bf16.gmra.mrb[220].mxu0 %v12657_v17 }
 0x3ce   :  { %4531 = vmatmul.mubr.bf16.gmra.mrb[220].mxu1 %v12658_v16  ;;  %3690 = vmatprep.mubr.bf16.mxu0 %v11071_v11  ;;  %v4621_v11 = vld [vmem:[%s12393_s4 + $0x4] sm:$0x3] }
 0x3cf   :  { %4540 = vmatprep.mubr.bf16.mxu1 %v12564_v36  ;;  %v11482_v45 = vrot.slane %v4621_v11, %v12666_v21 }
 0x3d5   :  { %3691 = vmatmul.mubr.bf16.gmra.mrb[224].mxu0 %v12659_v20 }
 0x3d6   :  { %4541 = vmatmul.mubr.bf16.gmra.mrb[224].mxu1 %v12660_v24  ;;  %3700 = vmatprep.mubr.bf16.mxu0 %v11092_v18  ;;  %v12665_v18 = vld [vmem:[#allocation63_spill] sm:$0xff] }
 0x3d7   :  { %4550 = vmatprep.mubr.bf16.mxu1 %v12564_v36  ;;  %v11479_v6 = vrot.slane %v4621_v11, %v12665_v18 }
 0x3dd   :  { %3701 = vmatmul.mubr.bf16.gmra.mrb[228].mxu0 %v12661_v7 }
 0x3de   :  { %4551 = vmatmul.mubr.bf16.gmra.mrb[228].mxu1 %v12662_v39  ;;  %3710 = vmatprep.mubr.bf16.mxu0 %v11113_v0 }
 0x3df   :  { %4560 = vmatprep.mubr.bf16.mxu1 %v12564_v36 }
 0x3e5   :  { %3711 = vmatmul.mubr.bf16.gmra.mrb[232].mxu0 %v12663_v43 }
 0x3e6   :  { %4561 = vmatmul.mubr.bf16.gmra.mrb[232].mxu1 %v12664_v31  ;;  %3720 = vmatprep.mubr.bf16.mxu0 %v11134_v4 }
 0x3e7   :  { %4570 = vmatprep.mubr.bf16.mxu1 %v12564_v36 }
 0x3e9   :  { %v4302_v0 = vpop.f32.mrb[128].mxu1 }
 0x3ea   :  { %v4633_v27 = vadd.f32 %v11479_v6, %v4302_v0  ;;  %v4304_v3 = vpop.f32.mrb[129].mxu1 }
 0x3eb   :  { %v4634_v8 = vadd.f32 %v11482_v45, %v4304_v3  ;;  %v4306_v26 = vpop.f32.mrb[130].mxu1 }
 0x3ec   :  { %v4635_v38 = vadd.f32 %v11479_v6, %v4306_v26  ;;  %v4308_v51 = vpop.f32.mrb[131].mxu1  ;;  %v4761_v47 = vmax.f32 %v4633_v27, 0.0 }
 0x3ed   :  { %v4636_v4 = vadd.f32 %v11482_v45, %v4308_v51  ;;  %3721 = vmatmul.mubr.bf16.gmra.mrb[236].mxu0 %v12667_v1  ;;  %v4762_v34 = vmax.f32 %v4634_v8, 0.0  ;;  %v12669_v8 = vld [vmem:[#allocation100_spill] sm:$0xff] }
 0x3ee   :  { %v4763_v19 = vmax.f32 %v4635_v38, 0.0  ;;  %4571 = vmatmul.mubr.bf16.gmra.mrb[236].mxu1 %v12668_v12  ;;  %3730 = vmatprep.mubr.bf16.mxu0 %v11155_v25  ;;  %v12670_v1 = vld [vmem:[#allocation68_spill] sm:$0xff] }
 0x3ef   :  { %v4764_v17 = vmax.f32 %v4636_v4, 0.0  ;;  %4580 = vmatprep.mubr.bf16.mxu1 %v12564_v36 }
 0x3f0   :  { %v11493_v20 = vpack.c.bf16 %v4763_v19, %v4761_v47  ;;  %v12671_v47 = vld [vmem:[#allocation102_spill] sm:$0xff] }
 0x3f1   :  { %v11495_v7 = vpack.c.bf16 %v4764_v17, %v4762_v34  ;;  %v4312_v11 = vpop.f32.mrb[132].mxu1 }
 0x3f2   :  { %v4637_v43 = vadd.f32 %v11479_v6, %v4312_v11  ;;  %v4314_v0 = vpop.f32.mrb[133].mxu1 }
 0x3f3   :  { %v4638_v3 = vadd.f32 %v11482_v45, %v4314_v0  ;;  %v4316_v27 = vpop.f32.mrb[134].mxu1 }
 0x3f4   :  { %v4639_v26 = vadd.f32 %v11479_v6, %v4316_v27  ;;  %v4318_v38 = vpop.f32.mrb[135].mxu1  ;;  %v4765_v51 = vmax.f32 %v4637_v43, 0.0 }
 0x3f5   :  { %v4640_v25 = vadd.f32 %v11482_v45, %v4318_v38  ;;  %3731 = vmatmul.mubr.bf16.gmra.mrb[240].mxu0 %v12669_v8  ;;  %v4766_v19 = vmax.f32 %v4638_v3, 0.0  ;;  %v12672_v3 = vld [vmem:[#allocation101_spill] sm:$0xff] }
 0x3f6   :  { %v4767_v4 = vmax.f32 %v4639_v26, 0.0  ;;  %4581 = vmatmul.mubr.bf16.gmra.mrb[240].mxu1 %v12670_v1  ;;  %3740 = vmatprep.mubr.bf16.mxu0 %v12671_v47 }
 0x3f7   :  { %v4768_v34 = vmax.f32 %v4640_v25, 0.0  ;;  %4590 = vmatprep.mubr.bf16.mxu1 %v12564_v36 }
 0x3f8   :  { %v11505_v17 = vpack.c.bf16 %v4767_v4, %v4765_v51  ;;  %v12673_v51 = vld [vmem:[#allocation71_spill] sm:$0xff] }
 0x3f9   :  { %v11507_v11 = vpack.c.bf16 %v4768_v34, %v4766_v19  ;;  %v4322_v0 = vpop.f32.mrb[136].mxu1 }
 0x3fa   :  { %v4641_v27 = vadd.f32 %v11479_v6, %v4322_v0  ;;  %v4324_v38 = vpop.f32.mrb[137].mxu1 }
 0x3fb   :  { %v4642_v8 = vadd.f32 %v11482_v45, %v4324_v38  ;;  %v4326_v43 = vpop.f32.mrb[138].mxu1 }
 0x3fc   :  { %v4643_v26 = vadd.f32 %v11479_v6, %v4326_v43  ;;  %v4328_v60 = vpop.f32.mrb[139].mxu1  ;;  %v4769_v25 = vmax.f32 %v4641_v27, 0.0 }
 0x3fd   :  { %v4644_v47 = vadd.f32 %v11482_v45, %v4328_v60  ;;  %3741 = vmatmul.mubr.bf16.gmra.mrb[244].mxu0 %v12672_v3  ;;  %v4770_v4 = vmax.f32 %v4642_v8, 0.0 }
 0x3fe   :  { %v4771_v1 = vmax.f32 %v4643_v26, 0.0  ;;  %4591 = vmatmul.mubr.bf16.gmra.mrb[244].mxu1 %v12673_v51  ;;  %3750 = vmatprep.mubr.bf16.mxu0 %v11197_v35 }
 0x3ff   :  { %v4772_v19 = vmax.f32 %v4644_v47, 0.0  ;;  %4600 = vmatprep.mubr.bf16.mxu1 %v12564_v36 }
 0x400   :  { %v11517_v34 = vpack.c.bf16 %v4771_v1, %v4769_v25  ;;  %v12674_v1 = vld [vmem:[#allocation74_spill] sm:$0xff] }
 0x401   :  { %v11519_v0 = vpack.c.bf16 %v4772_v19, %v4770_v4  ;;  %v4332_v38 = vpop.f32.mrb[140].mxu1 }
 0x402   :  { %v4645_v43 = vadd.f32 %v11479_v6, %v4332_v38  ;;  %v4334_v60 = vpop.f32.mrb[141].mxu1 }
 0x403   :  { %v4646_v3 = vadd.f32 %v11482_v45, %v4334_v60  ;;  %v4336_v27 = vpop.f32.mrb[142].mxu1 }
 0x404   :  { %v4647_v26 = vadd.f32 %v11479_v6, %v4336_v27  ;;  %v4338_v51 = vpop.f32.mrb[143].mxu1  ;;  %v4773_v8 = vmax.f32 %v4645_v43, 0.0 }
 0x405   :  { %v4648_v35 = vadd.f32 %v11482_v45, %v4338_v51  ;;  %3751 = vmatmul.mubr.bf16.gmra.mrb[248].mxu0 %v11194_v49  ;;  %v4774_v25 = vmax.f32 %v4646_v3, 0.0 }
 0x406   :  { %v4775_v47 = vmax.f32 %v4647_v26, 0.0  ;;  %4601 = vmatmul.mubr.bf16.gmra.mrb[248].mxu1 %v12674_v1  ;;  %3760 = vmatprep.mubr.bf16.mxu0 %v11214_v28 }
 0x407   :  { %v4776_v4 = vmax.f32 %v4648_v35, 0.0  ;;  %4610 = vmatprep.mubr.bf16.mxu1 %v12564_v36 }
 0x408   :  { %v11529_v19 = vpack.c.bf16 %v4775_v47, %v4773_v8  ;;  %v12675_v8 = vld [vmem:[#allocation77_spill] sm:$0xff] }
 0x409   :  { %v11531_v38 = vpack.c.bf16 %v4776_v4, %v4774_v25  ;;  %v4342_v60 = vpop.f32.mrb[144].mxu1 }
 0x40a   :  { %v4649_v27 = vadd.f32 %v11479_v6, %v4342_v60  ;;  %v4344_v51 = vpop.f32.mrb[145].mxu1 }
 0x40b   :  { %v4650_v49 = vadd.f32 %v11482_v45, %v4344_v51  ;;  %v4346_v43 = vpop.f32.mrb[146].mxu1 }
 0x40c   :  { %v4651_v26 = vadd.f32 %v11479_v6, %v4346_v43  ;;  %v4348_v1 = vpop.f32.mrb[147].mxu1  ;;  %v4777_v3 = vmax.f32 %v4649_v27, 0.0 }
 0x40d   :  { %v4652_v28 = vadd.f32 %v11482_v45, %v4348_v1  ;;  %3761 = vmatmul.mubr.bf16.gmra.mrb[252].mxu0 %v11211_v52  ;;  %v4778_v47 = vmax.f32 %v4650_v49, 0.0  ;;  %v5628_v1 = vld [vmem:[%s12391_s2 + $0x58] sm:$0xff] }
 0x40e   :  { %v4779_v35 = vmax.f32 %v4651_v26, 0.0  ;;  %4611 = vmatmul.mubr.bf16.gmra.mrb[252].mxu1 %v12675_v8  ;;  %5177 = vmatprep.mubr.bf16.mxu0 %v11495_v7  ;;  %v5629_v52 = vld [vmem:[%s12391_s2 + $0x78] sm:$0xff] }
 0x40f   :  { %v4780_v25 = vmax.f32 %v4652_v28, 0.0  ;;  %5722 = vmatprep.mubr.bf16.mxu1 %v12564_v36 }
 0x410   :  { %v11541_v4 = vpack.c.bf16 %v4779_v35, %v4777_v3  ;;  %v8072_v3 = vcombine.high %v5628_v1, %v5629_v52 }
 0x411   :  { %v11543_v60 = vpack.c.bf16 %v4780_v25, %v4778_v47  ;;  %v4352_v51 = vpop.f32.mrb[148].mxu1  ;;  %v5630_v47 = vld [vmem:[%s12391_s2 + $0x98] sm:$0xff] }
 0x412   :  { %v4653_v27 = vadd.f32 %v11479_v6, %v4352_v51  ;;  %v4354_v7 = vpop.f32.mrb[149].mxu1  ;;  %v5631_v25 = vld [vmem:[%s12391_s2 + $0xb8] sm:$0xff] }
 0x413   :  { %v4654_v49 = vadd.f32 %v11482_v45, %v4354_v7  ;;  %v4356_v43 = vpop.f32.mrb[150].mxu1  ;;  %v12676_v7 = vld [vmem:[#allocation5_spill] sm:$0xff]  ;;  %v8074_v18 = vcombine.high %v5630_v47, %v5631_v25 }
 0x414   :  { %v4655_v26 = vadd.f32 %v11479_v6, %v4356_v43  ;;  %v4358_v28 = vpop.f32.mrb[151].mxu1  ;;  %v4781_v51 = vmax.f32 %v4653_v27, 0.0 }
 0x415   :  { %v4656_v35 = vadd.f32 %v11482_v45, %v4358_v28  ;;  %5178 = vmatmul.mubr.bf16.vlgmr.msra.gmra.mrb[128].mxu0 %v11493_v20  ;;  %v4782_v43 = vmax.f32 %v4654_v49, 0.0  ;;  %v12677_v20 = vcombine.low %v11425_v46, %v11430_v32  ;;  %v8071_v28 = vcombine.low %v5628_v1, %v5629_v52  ;;  %v5633_v49 = vld [vmem:[%s12391_s2 + $0xf8] sm:$0xff] }
 0x416   :  { %v4783_v8 = vmax.f32 %v4655_v26, 0.0  ;;  %8037 = vmatmul.mubr.msk.bf16.vlgmr.msra.gmra.mrb[0].mxu1 %vm284_vm0, %v12676_v7  ;;  %5187 = vmatprep.mubr.bf16.mxu0 %v11507_v11  ;;  %v5632_v11 = vld [vmem:[%s12391_s2 + $0xd8] sm:$0xff]  ;;  %v8073_v52 = vcombine.low %v5630_v47, %v5631_v25  ;;  %v12678_v47 = vld [vmem:[#allocation6_spill] sm:$0xff] }
 0x417   :  { %v4784_v12 = vmax.f32 %v4656_v35, 0.0  ;;  %6124 = vmatpush1.bf16.msra.mxu1 %v12677_v20  ;;  %5732 = vmatprep.mubr.bf16.mxu1 %v12564_v36  ;;  %v8076_v35 = vcombine.high %v5632_v11, %v5633_v49  ;;  %v5634_v7 = vld [vmem:[%s12391_s2 + $0x118] sm:$0xff] }
 0x418   :  { %v11569_v21 = vpack.c.bf16 %v4783_v8, %v4781_v51  ;;  %6125 = vmatprep.subr.bf16.mxu1 %v8072_v3 }
 0x419   :  { %v11571_v27 = vpack.c.bf16 %v4784_v12, %v4782_v43  ;;  %v4362_v26 = vpop.f32.mrb[152].mxu1  ;;  %v5635_v43 = vld [vmem:[%s12391_s2 + $0x138] sm:$0xff] }
 0x41a   :  { %v4657_v46 = vadd.f32 %v11479_v6, %v4362_v26  ;;  %v4364_v32 = vpop.f32.mrb[153].mxu1 }
 0x41b   :  { %v4658_v1 = vadd.f32 %v11482_v45, %v4364_v32  ;;  %v4366_v8 = vpop.f32.mrb[154].mxu1  ;;  %6126 = vmatpush1.bf16.msra.mxu1 %v8071_v28  ;;  %v8078_v32 = vcombine.high %v5634_v7, %v5635_v43 }
 0x41c   :  { %v4659_v12 = vadd.f32 %v11479_v6, %v4366_v8  ;;  %v4368_v3 = vpop.f32.mrb[155].mxu1  ;;  %6127 = vmatprep.subr.bf16.mxu1 %v8074_v18  ;;  %v4785_v20 = vmax.f32 %v4657_v46, 0.0 }
 0x41d   :  { %v4660_v51 = vadd.f32 %v11482_v45, %v4368_v3  ;;  %5188 = vmatmul.mubr.bf16.gmra.mrb[132].mxu0 %v11505_v17  ;;  %v4786_v18 = vmax.f32 %v4658_v1, 0.0  ;;  %v8075_v17 = vcombine.low %v5632_v11, %v5633_v49 }
 0x41e   :  { %v4787_v28 = vmax.f32 %v4659_v12, 0.0  ;;  %8038 = vmatmul.mubr.msk.bf16.gmra.mrb[4].mxu1 %vm284_vm0, %v12678_v47  ;;  %5197 = vmatprep.mubr.bf16.mxu0 %v11519_v0  ;;  %v8077_v0 = vcombine.low %v5634_v7, %v5635_v43 }
 0x41f   :  { %v4788_v25 = vmax.f32 %v4660_v51, 0.0  ;;  %5742 = vmatprep.mubr.bf16.mxu1 %v12564_v36  ;;  %6128 = vmatpush1.bf16.msra.mxu1 %v8073_v52 }
 0x420   :  { %v11594_v26 = vpack.c.bf16 %v4787_v28, %v4785_v20  ;;  %6129 = vmatprep.subr.bf16.mxu1 %v8076_v35  ;;  %v12679_v35 = vld [vmem:[#allocation7_spill] sm:$0xff] }
 0x421   :  { %v11596_v8 = vpack.c.bf16 %v4788_v25, %v4786_v18  ;;  %v4372_v3 = vpop.f32.mrb[156].mxu1 }
 0x422   :  { %v4661_v46 = vadd.f32 %v11479_v6, %v4372_v3  ;;  %v4374_v12 = vpop.f32.mrb[157].mxu1 }
 0x423   :  { %v4662_v47 = vadd.f32 %v11482_v45, %v4374_v12  ;;  %v4376_v31 = vpop.f32.mrb[158].mxu1  ;;  %6130 = vmatpush1.bf16.msra.mxu1 %v8075_v17 }
 0x424   :  { %v4663_v1 = vadd.f32 %v11479_v6, %v4376_v31  ;;  %v4378_v51 = vpop.f32.mrb[159].mxu1  ;;  %6131 = vmatprep.subr.bf16.mxu1 %v8078_v32  ;;  %v4789_v49 = vmax.f32 %v4661_v46, 0.0 }
 0x425   :  { %v4664_v11 = vadd.f32 %v11482_v45, %v4378_v51  ;;  %5198 = vmatmul.mubr.bf16.gmra.mrb[136].mxu0 %v11517_v34  ;;  %v4790_v20 = vmax.f32 %v4662_v47, 0.0  ;;  %v12680_v47 = vld [vmem:[#allocation8_spill] sm:$0xff] }
 0x426   :  { %v4791_v52 = vmax.f32 %v4663_v1, 0.0  ;;  %8039 = vmatmul.mubr.msk.bf16.gmra.mrb[8].mxu1 %vm284_vm0, %v12679_v35  ;;  %5207 = vmatprep.mubr.bf16.mxu0 %v11531_v38 }
 0x427   :  { %v4792_v28 = vmax.f32 %v4664_v11, 0.0  ;;  %5752 = vmatprep.mubr.bf16.mxu1 %v12564_v36  ;;  %6132 = vmatpush1.bf16.msra.mxu1 %v8077_v0 }
 0x428   :  { %v11607_v7 = vpack.c.bf16 %v4791_v52, %v4789_v49 }
 0x429   :  { %v11609_v31 = vpack.c.bf16 %v4792_v28, %v4790_v20  ;;  %v4382_v43 = vpop.f32.mrb[160].mxu1 }
 0x42a   :  { %v4665_v18 = vadd.f32 %v11479_v6, %v4382_v43  ;;  %v4384_v34 = vpop.f32.mrb[161].mxu1 }
 0x42b   :  { %v4666_v25 = vadd.f32 %v11482_v45, %v4384_v34  ;;  %v4386_v17 = vpop.f32.mrb[162].mxu1 }
 0x42c   :  { %v4667_v32 = vadd.f32 %v11479_v6, %v4386_v17  ;;  %v4388_v3 = vpop.f32.mrb[163].mxu1  ;;  %v4793_v46 = vmax.f32 %v4665_v18, 0.0 }
 0x42d   :  { %v4668_v38 = vadd.f32 %v11482_v45, %v4388_v3  ;;  %5208 = vmatmul.mubr.bf16.gmra.mrb[140].mxu0 %v11529_v19  ;;  %v4794_v0 = vmax.f32 %v4666_v25, 0.0  ;;  %v12681_v25 = vld [vmem:[#allocation9_spill] sm:$0xff] }
 0x42e   :  { %v4795_v12 = vmax.f32 %v4667_v32, 0.0  ;;  %8040 = vmatmul.mubr.msk.bf16.gmra.mrb[12].mxu1 %vm284_vm0, %v12680_v47  ;;  %5217 = vmatprep.mubr.bf16.mxu0 %v11543_v60 }
 0x42f   :  { %v4796_v1 = vmax.f32 %v4668_v38, 0.0  ;;  %5762 = vmatprep.mubr.bf16.mxu1 %v12564_v36 }
 0x430   :  { %v11620_v51 = vpack.c.bf16 %v4795_v12, %v4793_v46  ;;  %v5637_v12 = vld [vmem:[%s12391_s2 + $0x178] sm:$0xff] }
 0x431   :  { %v11622_v11 = vpack.c.bf16 %v4796_v1, %v4794_v0  ;;  %v4392_v49 = vpop.f32.mrb[164].mxu1 }
 0x432   :  { %v4669_v52 = vadd.f32 %v11479_v6, %v4392_v49  ;;  %v4394_v35 = vpop.f32.mrb[165].mxu1 }
 0x433   :  { %v4670_v19 = vadd.f32 %v11482_v45, %v4394_v35  ;;  %v4396_v20 = vpop.f32.mrb[166].mxu1 }
 0x434   :  { %v4671_v28 = vadd.f32 %v11479_v6, %v4396_v20  ;;  %v4398_v43 = vpop.f32.mrb[167].mxu1  ;;  %v4797_v18 = vmax.f32 %v4669_v52, 0.0 }
 0x435   :  { %v4672_v60 = vadd.f32 %v11482_v45, %v4398_v43  ;;  %5218 = vmatmul.mubr.bf16.gmra.mrb[144].mxu0 %v11541_v4  ;;  %v4798_v17 = vmax.f32 %v4670_v19, 0.0  ;;  %v5636_v4 = vld [vmem:[%s12391_s2 + $0x158] sm:$0xff] }
 0x436   :  { %v4799_v34 = vmax.f32 %v4671_v28, 0.0  ;;  %8041 = vmatmul.mubr.msk.bf16.gmra.mrb[16].mxu1 %vm284_vm0, %v12681_v25  ;;  %5227 = vmatprep.mubr.bf16.mxu0 %v11571_v27  ;;  %v8079_v0 = vcombine.low %v5636_v4, %v5637_v12  ;;  %v8080_v1 = vcombine.high %v5636_v4, %v5637_v12 }
 0x437   :  { %v4800_v32 = vmax.f32 %v4672_v60, 0.0  ;;  %5772 = vmatprep.mubr.bf16.mxu1 %v12564_v36  ;;  %v12682_v60 = vld [vmem:[#allocation10_spill] sm:$0xff] }
 0x438   :  { %v11633_v3 = vpack.c.bf16 %v4799_v34, %v4797_v18  ;;  %6133 = vmatprep.subr.bf16.mxu1 %v8080_v1 }
 0x439   :  { %v11635_v38 = vpack.c.bf16 %v4800_v32, %v4798_v17  ;;  %v4402_v46 = vpop.f32.mrb[168].mxu1  ;;  %6134 = vmatpush1.bf16.msra.mxu1 %v8079_v0 }
 0x43a   :  { %v4673_v47 = vadd.f32 %v11479_v6, %v4402_v46  ;;  %v4404_v27 = vpop.f32.mrb[169].mxu1 }
 0x43b   :  { %v4674_v49 = vadd.f32 %v11482_v45, %v4404_v27  ;;  %v4406_v52 = vpop.f32.mrb[170].mxu1 }
 0x43c   :  { %v4675_v35 = vadd.f32 %v11479_v6, %v4406_v52  ;;  %v4408_v19 = vpop.f32.mrb[171].mxu1  ;;  %v4801_v28 = vmax.f32 %v4673_v47, 0.0 }
 0x43d   :  { %v4676_v20 = vadd.f32 %v11482_v45, %v4408_v19  ;;  %5228 = vmatmul.mubr.bf16.gmra.mrb[148].mxu0 %v11569_v21  ;;  %v4802_v18 = vmax.f32 %v4674_v49, 0.0  ;;  %v12683_v49 = vld [vmem:[#allocation11_spill] sm:$0xff] }
 0x43e   :  { %v4803_v43 = vmax.f32 %v4675_v35, 0.0  ;;  %8042 = vmatmul.mubr.msk.bf16.gmra.mrb[20].mxu1 %vm284_vm0, %v12682_v60  ;;  %5237 = vmatprep.mubr.bf16.mxu0 %v11596_v8 }
 0x43f   :  { %v4804_v34 = vmax.f32 %v4676_v20, 0.0  ;;  %5782 = vmatprep.mubr.bf16.mxu1 %v12564_v36 }
 0x440   :  { %v11652_v25 = vpack.c.bf16 %v4803_v43, %v4801_v28 }
 0x441   :  { %v11654_v17 = vpack.c.bf16 %v4804_v34, %v4802_v18  ;;  %v4412_v32 = vpop.f32.mrb[172].mxu1 }
 0x442   :  { %v4677_v46 = vadd.f32 %v11479_v6, %v4412_v32  ;;  %v4414_v21 = vpop.f32.mrb[173].mxu1 }
 0x443   :  { %v4678_v4 = vadd.f32 %v11482_v45, %v4414_v21  ;;  %v4416_v12 = vpop.f32.mrb[174].mxu1 }
 0x444   :  { %v4679_v47 = vadd.f32 %v11479_v6, %v4416_v12  ;;  %v4418_v27 = vpop.f32.mrb[175].mxu1  ;;  %v4805_v0 = vmax.f32 %v4677_v46, 0.0 }
 0x445   :  { %v4680_v8 = vadd.f32 %v11482_v45, %v4418_v27  ;;  %5238 = vmatmul.mubr.bf16.gmra.mrb[152].mxu0 %v11594_v26  ;;  %v4806_v52 = vmax.f32 %v4678_v4, 0.0  ;;  %v12684_v4 = vld [vmem:[#allocation12_spill] sm:$0xff] }
 0x446   :  { %v4807_v1 = vmax.f32 %v4679_v47, 0.0  ;;  %8043 = vmatmul.mubr.msk.bf16.gmra.mrb[24].mxu1 %vm284_vm0, %v12683_v49  ;;  %5247 = vmatprep.mubr.bf16.mxu0 %v11609_v31 }
 0x447   :  { %v4808_v35 = vmax.f32 %v4680_v8, 0.0  ;;  %5792 = vmatprep.mubr.bf16.mxu1 %v12564_v36 }
 0x448   :  { %v11665_v19 = vpack.c.bf16 %v4807_v1, %v4805_v0 }
 0x449   :  { %v11667_v20 = vpack.c.bf16 %v4808_v35, %v4806_v52  ;;  %v4422_v28 = vpop.f32.mrb[176].mxu1 }
 0x44a   :  { %v4681_v43 = vadd.f32 %v11479_v6, %v4422_v28  ;;  %v4424_v60 = vpop.f32.mrb[177].mxu1 }
 0x44b   :  { %v4682_v26 = vadd.f32 %v11482_v45, %v4424_v60  ;;  %v4426_v18 = vpop.f32.mrb[178].mxu1 }
 0x44c   :  { %v4683_v34 = vadd.f32 %v11479_v6, %v4426_v18  ;;  %v4428_v32 = vpop.f32.mrb[179].mxu1  ;;  %v4809_v46 = vmax.f32 %v4681_v43, 0.0 }
 0x44d   :  { %v4684_v31 = vadd.f32 %v11482_v45, %v4428_v32  ;;  %5248 = vmatmul.mubr.bf16.gmra.mrb[156].mxu0 %v11607_v7  ;;  %v4810_v12 = vmax.f32 %v4682_v26, 0.0  ;;  %v12685_v26 = vld [vmem:[#allocation13_spill] sm:$0xff] }
 0x44e   :  { %v4811_v21 = vmax.f32 %v4683_v34, 0.0  ;;  %8044 = vmatmul.mubr.msk.bf16.gmra.mrb[28].mxu1 %vm284_vm0, %v12684_v4  ;;  %5257 = vmatprep.mubr.bf16.mxu0 %v11622_v11 }
 0x44f   :  { %v4812_v47 = vmax.f32 %v4684_v31, 0.0  ;;  %5802 = vmatprep.mubr.bf16.mxu1 %v12564_v36 }
 0x450   :  { %v11678_v27 = vpack.c.bf16 %v4811_v21, %v4809_v46  ;;  %v5639_v21 = vld [vmem:[%s12391_s2 + $0x1b8] sm:$0xff] }
 0x451   :  { %v11680_v8 = vpack.c.bf16 %v4812_v47, %v4810_v12  ;;  %v4432_v0 = vpop.f32.mrb[180].mxu1 }
 0x452   :  { %v4685_v1 = vadd.f32 %v11479_v6, %v4432_v0  ;;  %v4434_v49 = vpop.f32.mrb[181].mxu1 }
 0x453   :  { %v4686_v7 = vadd.f32 %v11482_v45, %v4434_v49  ;;  %v4436_v52 = vpop.f32.mrb[182].mxu1 }
 0x454   :  { %v4687_v35 = vadd.f32 %v11479_v6, %v4436_v52  ;;  %v4438_v28 = vpop.f32.mrb[183].mxu1  ;;  %v4813_v43 = vmax.f32 %v4685_v1, 0.0 }
 0x455   :  { %v4688_v11 = vadd.f32 %v11482_v45, %v4438_v28  ;;  %5258 = vmatmul.mubr.bf16.gmra.mrb[160].mxu0 %v11620_v51  ;;  %v4814_v18 = vmax.f32 %v4686_v7, 0.0  ;;  %v5638_v51 = vld [vmem:[%s12391_s2 + $0x198] sm:$0xff] }
 0x456   :  { %v4815_v60 = vmax.f32 %v4687_v35, 0.0  ;;  %8045 = vmatmul.mubr.msk.bf16.gmra.mrb[32].mxu1 %vm284_vm0, %v12685_v26  ;;  %5267 = vmatprep.mubr.bf16.mxu0 %v11635_v38  ;;  %v8081_v12 = vcombine.low %v5638_v51, %v5639_v21  ;;  %v8082_v47 = vcombine.high %v5638_v51, %v5639_v21 }
 0x457   :  { %v4816_v34 = vmax.f32 %v4688_v11, 0.0  ;;  %5812 = vmatprep.mubr.bf16.mxu1 %v12564_v36  ;;  %v12686_v11 = vld [vmem:[#allocation14_spill] sm:$0xff] }
 0x458   :  { %v11691_v32 = vpack.c.bf16 %v4815_v60, %v4813_v43  ;;  %6135 = vmatprep.subr.bf16.mxu1 %v8082_v47 }
 0x459   :  { %v11693_v31 = vpack.c.bf16 %v4816_v34, %v4814_v18  ;;  %v4442_v46 = vpop.f32.mrb[184].mxu1  ;;  %6136 = vmatpush1.bf16.msra.mxu1 %v8081_v12 }
 0x45a   :  { %v4689_v4 = vadd.f32 %v11479_v6, %v4442_v46  ;;  %v4444_v38 = vpop.f32.mrb[185].mxu1 }
 0x45b   :  { %v4690_v0 = vadd.f32 %v11482_v45, %v4444_v38  ;;  %v4446_v1 = vpop.f32.mrb[186].mxu1 }
 0x45c   :  { %v4691_v49 = vadd.f32 %v11479_v6, %v4446_v1  ;;  %v4448_v7 = vpop.f32.mrb[187].mxu1  ;;  %v4817_v35 = vmax.f32 %v4689_v4, 0.0 }
 0x45d   :  { %v4692_v52 = vadd.f32 %v11482_v45, %v4448_v7  ;;  %5268 = vmatmul.mubr.bf16.gmra.mrb[164].mxu0 %v11633_v3  ;;  %v4818_v43 = vmax.f32 %v4690_v0, 0.0  ;;  %v12687_v0 = vld [vmem:[#allocation15_spill] sm:$0xff] }
 0x45e   :  { %v4819_v28 = vmax.f32 %v4691_v49, 0.0  ;;  %8046 = vmatmul.mubr.msk.bf16.gmra.mrb[36].mxu1 %vm284_vm0, %v12686_v11  ;;  %5277 = vmatprep.mubr.bf16.mxu0 %v11654_v17 }
 0x45f   :  { %v4820_v60 = vmax.f32 %v4692_v52, 0.0  ;;  %5822 = vmatprep.mubr.bf16.mxu1 %v12564_v36 }
 0x460   :  { %v11710_v26 = vpack.c.bf16 %v4819_v28, %v4817_v35 }
 0x461   :  { %v11712_v18 = vpack.c.bf16 %v4820_v60, %v4818_v43  ;;  %v4452_v34 = vpop.f32.mrb[188].mxu1 }
 0x462   :  { %v4693_v46 = vadd.f32 %v11479_v6, %v4452_v34  ;;  %v4454_v3 = vpop.f32.mrb[189].mxu1 }
 0x463   :  { %v4694_v51 = vadd.f32 %v11482_v45, %v4454_v3  ;;  %v4456_v21 = vpop.f32.mrb[190].mxu1 }
 0x464   :  { %v4695_v4 = vadd.f32 %v11479_v6, %v4456_v21  ;;  %v4458_v38 = vpop.f32.mrb[191].mxu1  ;;  %v4821_v12 = vmax.f32 %v4693_v46, 0.0  ;;  %v9161_v21 = vld [vmem:[%s12394_s5 + $0x300] ss:$8 sps:$4 sm:$0xff]  }
 0x465   :  { %v4696_v17 = vadd.f32 %v11482_v45, %v4458_v38  ;;  %5278 = vmatmul.mubr.bf16.gmra.mrb[168].mxu0 %v11652_v25  ;;  %v4822_v1 = vmax.f32 %v4694_v51, 0.0  ;;  %v12688_v51 = vld [vmem:[#allocation16_spill] sm:$0xff] }
 0x466   :  { %v4823_v47 = vmax.f32 %v4695_v4, 0.0  ;;  %8047 = vmatmul.mubr.msk.bf16.gmra.mrb[40].mxu1 %vm284_vm0, %v12687_v0  ;;  %5287 = vmatprep.mubr.bf16.mxu0 %v11667_v20  ;;  %v9163_v4 = vld [vmem:[%s12394_s5 + $0x304] ss:$8 sps:$4 sm:$0xff]  }
 0x467   :  { %v4824_v49 = vmax.f32 %v4696_v17, 0.0  ;;  %5832 = vmatprep.mubr.bf16.mxu1 %v12564_v36  ;;  %7000 = vmatprep.subr.bf16.mxu0 %v9163_v4 }
 0x468   :  { %v11723_v7 = vpack.c.bf16 %v4823_v47, %v4821_v12  ;;  %7001 = vmatpush1.bf16.msra.mxu0 %v9161_v21 }
 0x469   :  { %v11725_v52 = vpack.c.bf16 %v4824_v49, %v4822_v1  ;;  %v4462_v35 = vpop.f32.mrb[192].mxu1 }
 0x46a   :  { %v4697_v28 = vadd.f32 %v11479_v6, %v4462_v35  ;;  %v4464_v11 = vpop.f32.mrb[193].mxu1 }
 0x46b   :  { %v4698_v25 = vadd.f32 %v11482_v45, %v4464_v11  ;;  %v4466_v43 = vpop.f32.mrb[194].mxu1 }
 0x46c   :  { %v4699_v60 = vadd.f32 %v11479_v6, %v4466_v43  ;;  %v4468_v34 = vpop.f32.mrb[195].mxu1  ;;  %v4825_v46 = vmax.f32 %v4697_v28, 0.0 }
 0x46d   :  { %v4700_v20 = vadd.f32 %v11482_v45, %v4468_v34  ;;  %5288 = vmatmul.mubr.bf16.gmra.mrb[172].mxu0 %v11665_v19  ;;  %v4826_v38 = vmax.f32 %v4698_v25, 0.0  ;;  %v5640_v34 = vld [vmem:[%s12391_s2 + $0x1d8] sm:$0xff] }
 0x46e   :  { %v4827_v3 = vmax.f32 %v4699_v60, 0.0  ;;  %8048 = vmatmul.mubr.msk.bf16.gmra.mrb[44].mxu1 %vm284_vm0, %v12688_v51  ;;  %5297 = vmatprep.mubr.bf16.mxu0 %v11680_v8  ;;  %v12689_v60 = vld [vmem:[#allocation17_spill] sm:$0xff] }
 0x46f   :  { %v4828_v17 = vmax.f32 %v4700_v20, 0.0  ;;  %5842 = vmatprep.mubr.bf16.mxu1 %v12564_v36  ;;  %v5641_v20 = vld [vmem:[%s12391_s2 + $0x1f8] sm:$0xff] }
 0x470   :  { %v11742_v19 = vpack.c.bf16 %v4827_v3, %v4825_v46  ;;  %v8084_v51 = vcombine.high %v5640_v34, %v5641_v20 }
 0x471   :  { %v11744_v12 = vpack.c.bf16 %v4828_v17, %v4826_v38  ;;  %v4472_v47 = vpop.f32.mrb[196].mxu1 }
 0x472   :  { %v4701_v8 = vadd.f32 %v11479_v6, %v4472_v47  ;;  %v4474_v0 = vpop.f32.mrb[197].mxu1  ;;  %6137 = vmatprep.subr.bf16.mxu1 %v8084_v51 }
 0x473   :  { %v4702_v1 = vadd.f32 %v11482_v45, %v4474_v0  ;;  %v4476_v49 = vpop.f32.mrb[198].mxu1 }
 0x474   :  { %v4703_v35 = vadd.f32 %v11479_v6, %v4476_v49  ;;  %v4478_v28 = vpop.f32.mrb[199].mxu1  ;;  %v4829_v25 = vmax.f32 %v4701_v8, 0.0 }
 0x475   :  { %v4704_v11 = vadd.f32 %v11482_v45, %v4478_v28  ;;  %5298 = vmatmul.mubr.bf16.gmra.mrb[176].mxu0 %v11678_v27  ;;  %v4830_v46 = vmax.f32 %v4702_v1, 0.0  ;;  %v8083_v27 = vcombine.low %v5640_v34, %v5641_v20 }
 0x476   :  { %v4831_v43 = vmax.f32 %v4703_v35, 0.0  ;;  %8049 = vmatmul.mubr.msk.bf16.gmra.mrb[48].mxu1 %vm284_vm0, %v12689_v60  ;;  %5307 = vmatprep.mubr.bf16.mxu0 %v11693_v31 }
 0x477   :  { %v4832_v3 = vmax.f32 %v4704_v11, 0.0  ;;  %5852 = vmatprep.mubr.bf16.mxu1 %v12564_v36  ;;  %6138 = vmatpush1.bf16.msra.mxu1 %v8083_v27  ;;  %v12690_v11 = vld [vmem:[#allocation18_spill] sm:$0xff] }
 0x478   :  { %v11761_v21 = vpack.c.bf16 %v4831_v43, %v4829_v25  ;;  %v9164_v25 = vld [vmem:[%s12394_s5 + $0x310] ss:$8 sps:$4 sm:$0xff]   ;;  %v9166_v43 = vld [vmem:[%s12394_s5 + $0x314] ss:$8 sps:$4 sm:$0xff]  }
 0x479   :  { %v11763_v4 = vpack.c.bf16 %v4832_v3, %v4830_v46  ;;  %v4482_v38 = vpop.f32.mrb[200].mxu1  ;;  %7002 = vmatprep.subr.bf16.mxu0 %v9166_v43 }
 0x47a   :  { %v4705_v31 = vadd.f32 %v11479_v6, %v4482_v38  ;;  %v4484_v17 = vpop.f32.mrb[201].mxu1  ;;  %7003 = vmatpush1.bf16.msra.mxu0 %v9164_v25 }
 0x47b   :  { %v4706_v47 = vadd.f32 %v11482_v45, %v4484_v17  ;;  %v4486_v8 = vpop.f32.mrb[202].mxu1 }
 0x47c   :  { %v4707_v0 = vadd.f32 %v11479_v6, %v4486_v8  ;;  %v4488_v1 = vpop.f32.mrb[203].mxu1  ;;  %v4833_v35 = vmax.f32 %v4705_v31, 0.0 }
 0x47d   :  { %v4708_v49 = vadd.f32 %v11482_v45, %v4488_v1  ;;  %5308 = vmatmul.mubr.bf16.gmra.mrb[180].mxu0 %v11691_v32  ;;  %v4834_v60 = vmax.f32 %v4706_v47, 0.0 }
 0x47e   :  { %v4835_v28 = vmax.f32 %v4707_v0, 0.0  ;;  %8050 = vmatmul.mubr.msk.bf16.gmra.mrb[52].mxu1 %vm284_vm0, %v12690_v11  ;;  %5317 = vmatprep.mubr.bf16.mxu0 %v11712_v18  ;;  %v12691_v0 = vld [vmem:[#allocation19_spill] sm:$0xff] }
 0x47f   :  { %v4836_v34 = vmax.f32 %v4708_v49, 0.0  ;;  %5862 = vmatprep.mubr.bf16.mxu1 %v12564_v36 }
 0x480   :  { %v11780_v32 = vpack.c.bf16 %v4835_v28, %v4833_v35 }
 0x481   :  { %v11782_v20 = vpack.c.bf16 %v4836_v34, %v4834_v60  ;;  %v4492_v46 = vpop.f32.mrb[204].mxu1 }
 0x482   :  { %v4709_v18 = vadd.f32 %v11479_v6, %v4492_v46  ;;  %v4494_v3 = vpop.f32.mrb[205].mxu1 }
 0x483   :  { %v4710_v27 = vadd.f32 %v11482_v45, %v4494_v3  ;;  %v4496_v51 = vpop.f32.mrb[206].mxu1 }
 0x484   :  { %v4711_v38 = vadd.f32 %v11479_v6, %v4496_v51  ;;  %v4498_v31 = vpop.f32.mrb[207].mxu1  ;;  %v4837_v47 = vmax.f32 %v4709_v18, 0.0  ;;  %v9167_v51 = vld [vmem:[%s12394_s5 + $0x320] ss:$8 sps:$4 sm:$0xff]  }
 0x485   :  { %v4712_v17 = vadd.f32 %v11482_v45, %v4498_v31  ;;  %5318 = vmatmul.mubr.bf16.gmra.mrb[184].mxu0 %v11710_v26  ;;  %v4838_v1 = vmax.f32 %v4710_v27, 0.0  ;;  %v12692_v27 = vld [vmem:[#allocation20_spill] sm:$0xff] }
 0x486   :  { %v4839_v8 = vmax.f32 %v4711_v38, 0.0  ;;  %8051 = vmatmul.mubr.msk.bf16.gmra.mrb[56].mxu1 %vm284_vm0, %v12691_v0  ;;  %5327 = vmatprep.mubr.bf16.mxu0 %v11725_v52  ;;  %v9169_v38 = vld [vmem:[%s12394_s5 + $0x324] ss:$8 sps:$4 sm:$0xff]  }
 0x487   :  { %v4840_v49 = vmax.f32 %v4712_v17, 0.0  ;;  %5872 = vmatprep.mubr.bf16.mxu1 %v12564_v36  ;;  %7004 = vmatprep.subr.bf16.mxu0 %v9169_v38 }
 0x488   :  { %v11793_v35 = vpack.c.bf16 %v4839_v8, %v4837_v47  ;;  %7005 = vmatpush1.bf16.msra.mxu0 %v9167_v51 }
 0x489   :  { %v11795_v28 = vpack.c.bf16 %v4840_v49, %v4838_v1  ;;  %v4502_v11 = vpop.f32.mrb[208].mxu1 }
 0x48a   :  { %v4713_v25 = vadd.f32 %v11479_v6, %v4502_v11  ;;  %v4504_v43 = vpop.f32.mrb[209].mxu1 }
 0x48b   :  { %v4714_v26 = vadd.f32 %v11482_v45, %v4504_v43  ;;  %v4506_v60 = vpop.f32.mrb[210].mxu1 }
 0x48c   :  { %v4715_v34 = vadd.f32 %v11479_v6, %v4506_v60  ;;  %v4508_v46 = vpop.f32.mrb[211].mxu1  ;;  %v4841_v18 = vmax.f32 %v4713_v25, 0.0 }
 0x48d   :  { %v4716_v52 = vadd.f32 %v11482_v45, %v4508_v46  ;;  %5328 = vmatmul.mubr.bf16.gmra.mrb[188].mxu0 %v11723_v7  ;;  %v4842_v31 = vmax.f32 %v4714_v26, 0.0 }
 0x48e   :  { %v4843_v3 = vmax.f32 %v4715_v34, 0.0  ;;  %8052 = vmatmul.mubr.msk.bf16.gmra.mrb[60].mxu1 %vm284_vm0, %v12692_v27  ;;  %5337 = vmatprep.mubr.bf16.mxu0 %v11744_v12  ;;  %v12693_v34 = vld [vmem:[#allocation21_spill] sm:$0xff] }
 0x48f   :  { %v4844_v17 = vmax.f32 %v4716_v52, 0.0  ;;  %5882 = vmatprep.mubr.bf16.mxu1 %v12564_v36 }
 0x490   :  { %v11812_v7 = vpack.c.bf16 %v4843_v3, %v4841_v18 }
 0x491   :  { %v11814_v47 = vpack.c.bf16 %v4844_v17, %v4842_v31  ;;  %v4512_v8 = vpop.f32.mrb[212].mxu1 }
 0x492   :  { %v4717_v12 = vadd.f32 %v11479_v6, %v4512_v8  ;;  %v4514_v0 = vpop.f32.mrb[213].mxu1 }
 0x493   :  { %v4718_v1 = vadd.f32 %v11482_v45, %v4514_v0  ;;  %v4516_v49 = vpop.f32.mrb[214].mxu1 }
 0x494   :  { %v4719_v11 = vadd.f32 %v11479_v6, %v4516_v49  ;;  %v4518_v25 = vpop.f32.mrb[215].mxu1  ;;  %v4845_v26 = vmax.f32 %v4717_v12, 0.0  ;;  %v9170_v49 = vld [vmem:[%s12394_s5 + $0x330] ss:$8 sps:$4 sm:$0xff]  }
 0x495   :  { %v4720_v43 = vadd.f32 %v11482_v45, %v4518_v25  ;;  %5338 = vmatmul.mubr.bf16.gmra.mrb[192].mxu0 %v11742_v19  ;;  %v4846_v46 = vmax.f32 %v4718_v1, 0.0  ;;  %v12694_v1 = vld [vmem:[#allocation22_spill] sm:$0xff] }
 0x496   :  { %v4847_v60 = vmax.f32 %v4719_v11, 0.0  ;;  %8053 = vmatmul.mubr.msk.bf16.gmra.mrb[64].mxu1 %vm284_vm0, %v12693_v34  ;;  %5347 = vmatprep.mubr.bf16.mxu0 %v11763_v4  ;;  %v9172_v11 = vld [vmem:[%s12394_s5 + $0x334] ss:$8 sps:$4 sm:$0xff]  }
 0x497   :  { %v4848_v52 = vmax.f32 %v4720_v43, 0.0  ;;  %5892 = vmatprep.mubr.bf16.mxu1 %v12564_v36  ;;  %7006 = vmatprep.subr.bf16.mxu0 %v9172_v11 }
 0x498   :  { %v11825_v18 = vpack.c.bf16 %v4847_v60, %v4845_v26  ;;  %7007 = vmatpush1.bf16.msra.mxu0 %v9170_v49 }
 0x499   :  { %v11827_v3 = vpack.c.bf16 %v4848_v52, %v4846_v46  ;;  %v4522_v27 = vpop.f32.mrb[216].mxu1 }
 0x49a   :  { %v4721_v51 = vadd.f32 %v11479_v6, %v4522_v27  ;;  %v4524_v38 = vpop.f32.mrb[217].mxu1 }
 0x49b   :  { %v4722_v19 = vadd.f32 %v11482_v45, %v4524_v38  ;;  %v4526_v31 = vpop.f32.mrb[218].mxu1 }
 0x49c   :  { %v4723_v17 = vadd.f32 %v11479_v6, %v4526_v31  ;;  %v4528_v8 = vpop.f32.mrb[219].mxu1  ;;  %v4849_v12 = vmax.f32 %v4721_v51, 0.0 }
 0x49d   :  { %v4724_v4 = vadd.f32 %v11482_v45, %v4528_v8  ;;  %5348 = vmatmul.mubr.bf16.gmra.mrb[196].mxu0 %v11761_v21  ;;  %v4850_v25 = vmax.f32 %v4722_v19, 0.0 }
 0x49e   :  { %v4851_v0 = vmax.f32 %v4723_v17, 0.0  ;;  %8054 = vmatmul.mubr.msk.bf16.gmra.mrb[68].mxu1 %vm284_vm0, %v12694_v1  ;;  %5357 = vmatprep.mubr.bf16.mxu0 %v11782_v20  ;;  %v12695_v17 = vld [vmem:[#allocation23_spill] sm:$0xff] }
 0x49f   :  { %v4852_v43 = vmax.f32 %v4724_v4, 0.0  ;;  %5902 = vmatprep.mubr.bf16.mxu1 %v12564_v36 }
 0x4a0   :  { %v11844_v21 = vpack.c.bf16 %v4851_v0, %v4849_v12 }
 0x4a1   :  { %v11846_v26 = vpack.c.bf16 %v4852_v43, %v4850_v25  ;;  %v4532_v60 = vpop.f32.mrb[220].mxu1 }
 0x4a2   :  { %v4725_v20 = vadd.f32 %v11479_v6, %v4532_v60  ;;  %v4534_v34 = vpop.f32.mrb[221].mxu1 }
 0x4a3   :  { %v4726_v46 = vadd.f32 %v11482_v45, %v4534_v34  ;;  %v4536_v52 = vpop.f32.mrb[222].mxu1 }
 0x4a4   :  { %v4727_v27 = vadd.f32 %v11479_v6, %v4536_v52  ;;  %v4538_v51 = vpop.f32.mrb[223].mxu1  ;;  %v4853_v19 = vmax.f32 %v4725_v20, 0.0  ;;  %v9173_v52 = vld [vmem:[%s12394_s5 + $0x340] ss:$8 sps:$4 sm:$0xff]  }
 0x4a5   :  { %v4728_v38 = vadd.f32 %v11482_v45, %v4538_v51  ;;  %5358 = vmatmul.mubr.bf16.gmra.mrb[200].mxu0 %v11780_v32  ;;  %v4854_v8 = vmax.f32 %v4726_v46, 0.0  ;;  %v12696_v46 = vld [vmem:[#allocation24_spill] sm:$0xff] }
 0x4a6   :  { %v4855_v31 = vmax.f32 %v4727_v27, 0.0  ;;  %8055 = vmatmul.mubr.msk.bf16.gmra.mrb[72].mxu1 %vm284_vm0, %v12695_v17  ;;  %5367 = vmatprep.mubr.bf16.mxu0 %v11795_v28  ;;  %v9175_v27 = vld [vmem:[%s12394_s5 + $0x344] ss:$8 sps:$4 sm:$0xff]  }
 0x4a7   :  { %v4856_v4 = vmax.f32 %v4728_v38, 0.0  ;;  %5912 = vmatprep.mubr.bf16.mxu1 %v12564_v36  ;;  %7008 = vmatprep.subr.bf16.mxu0 %v9175_v27 }
 0x4a8   :  { %v11857_v12 = vpack.c.bf16 %v4855_v31, %v4853_v19  ;;  %7009 = vmatpush1.bf16.msra.mxu0 %v9173_v52 }
 0x4a9   :  { %v11859_v0 = vpack.c.bf16 %v4856_v4, %v4854_v8  ;;  %v4542_v1 = vpop.f32.mrb[224].mxu1 }
 0x4aa   :  { %v4729_v49 = vadd.f32 %v11479_v6, %v4542_v1  ;;  %v4544_v11 = vpop.f32.mrb[225].mxu1 }
 0x4ab   :  { %v4730_v32 = vadd.f32 %v11482_v45, %v4544_v11  ;;  %v4546_v25 = vpop.f32.mrb[226].mxu1 }
 0x4ac   :  { %v4731_v43 = vadd.f32 %v11479_v6, %v4546_v25  ;;  %v4548_v60 = vpop.f32.mrb[227].mxu1  ;;  %v4857_v20 = vmax.f32 %v4729_v49, 0.0 }
 0x4ad   :  { %v4732_v28 = vadd.f32 %v11482_v45, %v4548_v60  ;;  %5368 = vmatmul.mubr.bf16.gmra.mrb[204].mxu0 %v11793_v35  ;;  %v4858_v51 = vmax.f32 %v4730_v32, 0.0 }
 0x4ae   :  { %v4859_v34 = vmax.f32 %v4731_v43, 0.0  ;;  %8056 = vmatmul.mubr.msk.bf16.gmra.mrb[76].mxu1 %vm284_vm0, %v12696_v46  ;;  %5377 = vmatprep.mubr.bf16.mxu0 %v11814_v47  ;;  %v12697_v43 = vld [vmem:[#allocation25_spill] sm:$0xff] }
 0x4af   :  { %v4860_v38 = vmax.f32 %v4732_v28, 0.0  ;;  %5922 = vmatprep.mubr.bf16.mxu1 %v12564_v36 }
 0x4b0   :  { %v11876_v35 = vpack.c.bf16 %v4859_v34, %v4857_v20 }
 0x4b1   :  { %v11878_v19 = vpack.c.bf16 %v4860_v38, %v4858_v51  ;;  %v4552_v31 = vpop.f32.mrb[228].mxu1 }
 0x4b2   :  { %v4733_v47 = vadd.f32 %v11479_v6, %v4552_v31  ;;  %v4554_v17 = vpop.f32.mrb[229].mxu1 }
 0x4b3   :  { %v4734_v8 = vadd.f32 %v11482_v45, %v4554_v17  ;;  %v4556_v4 = vpop.f32.mrb[230].mxu1 }
 0x4b4   :  { %v4735_v1 = vadd.f32 %v11479_v6, %v4556_v4  ;;  %v4558_v49 = vpop.f32.mrb[231].mxu1  ;;  %v4861_v32 = vmax.f32 %v4733_v47, 0.0  ;;  %v9176_v4 = vld [vmem:[%s12394_s5 + $0x350] ss:$8 sps:$4 sm:$0xff]  }
 0x4b5   :  { %v4736_v11 = vadd.f32 %v11482_v45, %v4558_v49  ;;  %5378 = vmatmul.mubr.bf16.gmra.mrb[208].mxu0 %v11812_v7  ;;  %v4862_v60 = vmax.f32 %v4734_v8, 0.0  ;;  %v12698_v8 = vld [vmem:[#allocation26_spill] sm:$0xff] }
 0x4b6   :  { %v4863_v25 = vmax.f32 %v4735_v1, 0.0  ;;  %8057 = vmatmul.mubr.msk.bf16.gmra.mrb[80].mxu1 %vm284_vm0, %v12697_v43  ;;  %5387 = vmatprep.mubr.bf16.mxu0 %v11827_v3  ;;  %v9178_v1 = vld [vmem:[%s12394_s5 + $0x354] ss:$8 sps:$4 sm:$0xff]  }
 0x4b7   :  { %v4864_v28 = vmax.f32 %v4736_v11, 0.0  ;;  %5932 = vmatprep.mubr.bf16.mxu1 %v12564_v36  ;;  %7010 = vmatprep.subr.bf16.mxu0 %v9178_v1 }
 0x4b8   :  { %v11889_v20 = vpack.c.bf16 %v4863_v25, %v4861_v32  ;;  %7011 = vmatpush1.bf16.msra.mxu0 %v9176_v4 }
 0x4b9   :  { %v11891_v34 = vpack.c.bf16 %v4864_v28, %v4862_v60  ;;  %v4562_v46 = vpop.f32.mrb[232].mxu1 }
 0x4ba   :  { %v4737_v52 = vadd.f32 %v11479_v6, %v4562_v46  ;;  %v4564_v27 = vpop.f32.mrb[233].mxu1 }
 0x4bb   :  { %v4738_v7 = vadd.f32 %v11482_v45, %v4564_v27  ;;  %v4566_v51 = vpop.f32.mrb[234].mxu1 }
 0x4bc   :  { %v4739_v38 = vadd.f32 %v11479_v6, %v4566_v51  ;;  %v4568_v31 = vpop.f32.mrb[235].mxu1  ;;  %v4865_v47 = vmax.f32 %v4737_v52, 0.0 }
 0x4bd   :  { %v4740_v3 = vadd.f32 %v11482_v45, %v4568_v31  ;;  %5388 = vmatmul.mubr.bf16.gmra.mrb[212].mxu0 %v11825_v18  ;;  %v4866_v49 = vmax.f32 %v4738_v7, 0.0 }
 0x4be   :  { %v4867_v17 = vmax.f32 %v4739_v38, 0.0  ;;  %8058 = vmatmul.mubr.msk.bf16.gmra.mrb[84].mxu1 %vm284_vm0, %v12698_v8  ;;  %5397 = vmatprep.mubr.bf16.mxu0 %v11846_v26  ;;  %v12699_v38 = vld [vmem:[#allocation27_spill] sm:$0xff] }
 0x4bf   :  { %v4868_v11 = vmax.f32 %v4740_v3, 0.0  ;;  %5942 = vmatprep.mubr.bf16.mxu1 %v12564_v36 }
 0x4c0   :  { %v11908_v18 = vpack.c.bf16 %v4867_v17, %v4865_v47 }
 0x4c1   :  { %v11910_v32 = vpack.c.bf16 %v4868_v11, %v4866_v49  ;;  %v4572_v25 = vpop.f32.mrb[236].mxu1 }
 0x4c2   :  { %v4741_v26 = vadd.f32 %v11479_v6, %v4572_v25  ;;  %v4574_v43 = vpop.f32.mrb[237].mxu1 }
 0x4c3   :  { %v4742_v60 = vadd.f32 %v11482_v45, %v4574_v43  ;;  %v4576_v28 = vpop.f32.mrb[238].mxu1 }
 0x4c4   :  { %v4743_v46 = vadd.f32 %v11479_v6, %v4576_v28  ;;  %v4578_v52 = vpop.f32.mrb[239].mxu1  ;;  %v4869_v7 = vmax.f32 %v4741_v26, 0.0  ;;  %v9179_v28 = vld [vmem:[%s12394_s5 + $0x360] ss:$8 sps:$4 sm:$0xff]  }
 0x4c5   :  { %v4744_v27 = vadd.f32 %v11482_v45, %v4578_v52  ;;  %5398 = vmatmul.mubr.bf16.gmra.mrb[216].mxu0 %v11844_v21  ;;  %v4870_v31 = vmax.f32 %v4742_v60, 0.0  ;;  %v12700_v60 = vld [vmem:[#allocation28_spill] sm:$0xff] }
 0x4c6   :  { %v4871_v51 = vmax.f32 %v4743_v46, 0.0  ;;  %8059 = vmatmul.mubr.msk.bf16.gmra.mrb[88].mxu1 %vm284_vm0, %v12699_v38  ;;  %5407 = vmatprep.mubr.bf16.mxu0 %v11859_v0  ;;  %v9181_v46 = vld [vmem:[%s12394_s5 + $0x364] ss:$8 sps:$4 sm:$0xff]  }
 0x4c7   :  { %v4872_v3 = vmax.f32 %v4744_v27, 0.0  ;;  %5952 = vmatprep.mubr.bf16.mxu1 %v12564_v36  ;;  %7012 = vmatprep.subr.bf16.mxu0 %v9181_v46 }
 0x4c8   :  { %v11921_v47 = vpack.c.bf16 %v4871_v51, %v4869_v7  ;;  %7013 = vmatpush1.bf16.msra.mxu0 %v9179_v28 }
 0x4c9   :  { %v11923_v17 = vpack.c.bf16 %v4872_v3, %v4870_v31  ;;  %v4582_v8 = vpop.f32.mrb[240].mxu1 }
 0x4ca   :  { %v4745_v4 = vadd.f32 %v11479_v6, %v4582_v8  ;;  %v4584_v1 = vpop.f32.mrb[241].mxu1 }
 0x4cb   :  { %v4746_v21 = vadd.f32 %v11482_v45, %v4584_v1  ;;  %v4586_v49 = vpop.f32.mrb[242].mxu1 }
 0x4cc   :  { %v4747_v11 = vadd.f32 %v11479_v6, %v4586_v49  ;;  %v4588_v25 = vpop.f32.mrb[243].mxu1  ;;  %v4873_v26 = vmax.f32 %v4745_v4, 0.0 }
 0x4cd   :  { %v4748_v0 = vadd.f32 %v11482_v45, %v4588_v25  ;;  %5408 = vmatmul.mubr.bf16.gmra.mrb[220].mxu0 %v11857_v12  ;;  %v4874_v52 = vmax.f32 %v4746_v21, 0.0 }
 0x4ce   :  { %v4875_v43 = vmax.f32 %v4747_v11, 0.0  ;;  %8060 = vmatmul.mubr.msk.bf16.gmra.mrb[92].mxu1 %vm284_vm0, %v12700_v60  ;;  %5417 = vmatprep.mubr.bf16.mxu0 %v11878_v19  ;;  %v12701_v11 = vld [vmem:[#allocation29_spill] sm:$0xff] }
 0x4cf   :  { %v4876_v27 = vmax.f32 %v4748_v0, 0.0  ;;  %5962 = vmatprep.mubr.bf16.mxu1 %v12564_v36 }
 0x4d0   :  { %v11940_v12 = vpack.c.bf16 %v4875_v43, %v4873_v26 }
 0x4d1   :  { %v4946_v7 = vpack.c.bf16 %v4876_v27, %v4874_v52  ;;  %v4592_v51 = vpop.f32.mrb[244].mxu1 }
 0x4d2   :  { %v4749_v19 = vadd.f32 %v11479_v6, %v4592_v51  ;;  %v4594_v38 = vpop.f32.mrb[245].mxu1 }
 0x4d3   :  { %v4750_v31 = vadd.f32 %v11482_v45, %v4594_v38  ;;  %v4596_v3 = vpop.f32.mrb[246].mxu1 }
 0x4d4   :  { %v4751_v8 = vadd.f32 %v11479_v6, %v4596_v3  ;;  %v4598_v4 = vpop.f32.mrb[247].mxu1  ;;  %v4877_v21 = vmax.f32 %v4749_v19, 0.0  ;;  %v9182_v3 = vld [vmem:[%s12394_s5 + $0x370] ss:$8 sps:$4 sm:$0xff]  }
 0x4d5   :  { %v4752_v1 = vadd.f32 %v11482_v45, %v4598_v4  ;;  %5418 = vmatmul.mubr.bf16.gmra.mrb[224].mxu0 %v11876_v35  ;;  %v4878_v25 = vmax.f32 %v4750_v31, 0.0  ;;  %v12702_v31 = vld [vmem:[#allocation30_spill] sm:$0xff] }
 0x4d6   :  { %v4879_v49 = vmax.f32 %v4751_v8, 0.0  ;;  %8061 = vmatmul.mubr.msk.bf16.gmra.mrb[96].mxu1 %vm284_vm0, %v12701_v11  ;;  %5427 = vmatprep.mubr.bf16.mxu0 %v11891_v34  ;;  %v9184_v8 = vld [vmem:[%s12394_s5 + $0x374] ss:$8 sps:$4 sm:$0xff]  }
 0x4d7   :  { %v4880_v0 = vmax.f32 %v4752_v1, 0.0  ;;  %5972 = vmatprep.mubr.bf16.mxu1 %v12564_v36  ;;  %7014 = vmatprep.subr.bf16.mxu0 %v9184_v8 }
 0x4d8   :  { %v4947_v26 = vpack.c.bf16 %v4879_v49, %v4877_v21  ;;  %7015 = vmatpush1.bf16.msra.mxu0 %v9182_v3 }
 0x4d9   :  { %v4948_v43 = vpack.c.bf16 %v4880_v0, %v4878_v25  ;;  %v4602_v60 = vpop.f32.mrb[248].mxu1 }
 0x4da   :  { %v4753_v28 = vadd.f32 %v11479_v6, %v4602_v60  ;;  %v4604_v46 = vpop.f32.mrb[249].mxu1 }
 0x4db   :  { %v4754_v52 = vadd.f32 %v11482_v45, %v4604_v46  ;;  %v4606_v35 = vpop.f32.mrb[250].mxu1 }
 0x4dc   :  { %v4755_v27 = vadd.f32 %v11479_v6, %v4606_v35  ;;  %v4608_v51 = vpop.f32.mrb[251].mxu1  ;;  %v4881_v34 = vmax.f32 %v4753_v28, 0.0 }
 0x4dd   :  { %v4756_v19 = vadd.f32 %v11482_v45, %v4608_v51  ;;  %5428 = vmatmul.mubr.bf16.gmra.mrb[228].mxu0 %v11889_v20  ;;  %v4882_v4 = vmax.f32 %v4754_v52, 0.0 }
 0x4de   :  { %v4883_v38 = vmax.f32 %v4755_v27, 0.0  ;;  %8062 = vmatmul.mubr.msk.bf16.gmra.mrb[100].mxu1 %vm284_vm0, %v12702_v31  ;;  %5437 = vmatprep.mubr.bf16.mxu0 %v11910_v32 }
 0x4df   :  { %v4884_v1 = vmax.f32 %v4756_v19, 0.0  ;;  %5982 = vmatprep.mubr.bf16.mxu1 %v12564_v36 }
 0x4e0   :  { %v4949_v20 = vpack.c.bf16 %v4883_v38, %v4881_v34 }
 0x4e1   :  { %v4950_v21 = vpack.c.bf16 %v4884_v1, %v4882_v4  ;;  %v4612_v49 = vpop.f32.mrb[252].mxu1 }
 0x4e2   :  { %v4757_v11 = vadd.f32 %v11479_v6, %v4612_v49  ;;  %v4614_v32 = vpop.f32.mrb[253].mxu1 }
 0x4e3   :  { %v4758_v25 = vadd.f32 %v11482_v45, %v4614_v32  ;;  %v4616_v0 = vpop.f32.mrb[254].mxu1 }
 0x4e4   :  { %v4759_v60 = vadd.f32 %v11479_v6, %v4616_v0  ;;  %v4618_v28 = vpop.f32.mrb[255].mxu1  ;;  %v4885_v52 = vmax.f32 %v4757_v11, 0.0  ;;  %v9185_v6 = vld [vmem:[%s12394_s5 + $0x380] ss:$8 sps:$4 sm:$0xff]  }
 0x4e5   :  { %v4760_v46 = vadd.f32 %v11482_v45, %v4618_v28  ;;  %5438 = vmatmul.mubr.bf16.gmra.mrb[232].mxu0 %v11908_v18  ;;  %v4886_v27 = vmax.f32 %v4758_v25, 0.0  ;;  %v9190_v45 = vld [vmem:[%s12394_s5 + $0x394] ss:$8 sps:$4 sm:$0xff]  }
 0x4e6   :  { %v4887_v35 = vmax.f32 %v4759_v60, 0.0  ;;  %8063 = vmatmul.mubr.msk.bf16.gmra.mrb[104].mxu1 %vm284_vm0, %v9807_v13  ;;  %5447 = vmatprep.mubr.bf16.mxu0 %v11923_v17  ;;  %v9187_v13 = vld [vmem:[%s12394_s5 + $0x384] ss:$8 sps:$4 sm:$0xff]  }
 0x4e7   :  { %v4888_v51 = vmax.f32 %v4760_v46, 0.0  ;;  %5992 = vmatprep.mubr.bf16.mxu1 %v12564_v36  ;;  %7016 = vmatprep.subr.bf16.mxu0 %v9187_v13 }
 0x4e8   :  { %v4951_v19 = vpack.c.bf16 %v4887_v35, %v4885_v52  ;;  %7017 = vmatpush1.bf16.msra.mxu0 %v9185_v6 }
 0x4e9   :  { %v4952_v34 = vpack.c.bf16 %v4888_v51, %v4886_v27  ;;  %7018 = vmatprep.subr.bf16.mxu0 %v9190_v45 }
 0x4ed   :  { %5448 = vmatmul.mubr.bf16.gmra.mrb[236].mxu0 %v11921_v47 }
 0x4ee   :  { %8064 = vmatmul.mubr.msk.bf16.gmra.mrb[108].mxu1 %vm284_vm0, %v12603_v54  ;;  %5457 = vmatprep.mubr.bf16.mxu0 %v4946_v7  ;;  %v9188_v54 = vld [vmem:[%s12394_s5 + $0x390] ss:$8 sps:$4 sm:$0xff]  }
 0x4ef   :  { %6002 = vmatprep.mubr.bf16.mxu1 %v12564_v36  ;;  %7019 = vmatpush1.bf16.msra.mxu0 %v9188_v54 }
 0x4f5   :  { %5458 = vmatmul.mubr.bf16.gmra.mrb[240].mxu0 %v11940_v12 }
 0x4f6   :  { %8065 = vmatmul.mubr.msk.bf16.gmra.mrb[112].mxu1 %vm284_vm0, %v12604_v59  ;;  %5467 = vmatprep.mubr.bf16.mxu0 %v4948_v43  ;;  %v9191_v59 = vld [vmem:[%s12394_s5 + $0x3a0] ss:$8 sps:$4 sm:$0xff]  }
 0x4f7   :  { %6012 = vmatprep.mubr.bf16.mxu1 %v12564_v36 }
 0x4fd   :  { %5468 = vmatmul.mubr.bf16.gmra.mrb[244].mxu0 %v4947_v26 }
 0x4fe   :  { %8066 = vmatmul.mubr.msk.bf16.gmra.mrb[116].mxu1 %vm284_vm0, %v12605_v9  ;;  %5477 = vmatprep.mubr.bf16.mxu0 %v4950_v21  ;;  %v9193_v9 = vld [vmem:[%s12394_s5 + $0x3a4] ss:$8 sps:$4 sm:$0xff]  }
 0x4ff   :  { %6022 = vmatprep.mubr.bf16.mxu1 %v12564_v36  ;;  %7020 = vmatprep.subr.bf16.mxu0 %v9193_v9 }
 0x500   :  { %7021 = vmatpush1.bf16.msra.mxu0 %v9191_v59 }
 0x505   :  { %5478 = vmatmul.mubr.bf16.gmra.mrb[248].mxu0 %v4949_v20  ;;  %v12707_v20 = vld [vmem:[#allocation68_spill] sm:$0xff] }
 0x506   :  { %8067 = vmatmul.mubr.msk.bf16.gmra.mrb[120].mxu1 %vm284_vm0, %v12606_v63  ;;  %5487 = vmatprep.mubr.bf16.mxu0 %v4952_v34  ;;  %v9194_v63 = vld [vmem:[%s12394_s5 + $0x3b0] ss:$8 sps:$4 sm:$0xff]  }
 0x507   :  { %6032 = vmatprep.mubr.bf16.mxu1 %v12564_v36  ;;  %v12708_v34 = vld [vmem:[#allocation71_spill] sm:$0xff] }
 0x50d   :  { %5488 = vmatmul.mubr.bf16.gmra.mrb[252].mxu0 %v4951_v19 }
 0x50e   :  { %8068 = vmatmul.mubr.msk.bf16.gmra.mrb[124].mxu1 %vm284_vm0, %v12607_v57  ;;  %v9196_v57 = vld [vmem:[%s12394_s5 + $0x3b4] ss:$8 sps:$4 sm:$0xff]  }
 0x50f   :  { %6155 = vmatprep.mubr.bf16.mxu1 %v12564_v36  ;;  %7022 = vmatprep.subr.bf16.mxu0 %v9196_v57 }
 0x510   :  { %7023 = vmatpush1.bf16.msra.mxu0 %v9194_v63 }
 0x516   :  { %6156 = vmatmul.mubr.bf16.vlgmr.msra.gmra.mrb[0].mxu1 %v12610_v56  ;;  %v9197_v56 = vld [vmem:[%s12394_s5 + $0x3c0] ss:$8 sps:$4 sm:$0xff]  }
 0x517   :  { %6165 = vmatprep.mubr.bf16.mxu1 %v12564_v36 }
 0x51e   :  { %6166 = vmatmul.mubr.bf16.gmra.mrb[4].mxu1 %v12614_v42  ;;  %v9199_v42 = vld [vmem:[%s12394_s5 + $0x3c4] ss:$8 sps:$4 sm:$0xff]  }
 0x51f   :  { %6175 = vmatprep.mubr.bf16.mxu1 %v12564_v36  ;;  %7024 = vmatprep.subr.bf16.mxu0 %v9199_v42 }
 0x520   :  { %7025 = vmatpush1.bf16.msra.mxu0 %v9197_v56 }
 0x526   :  { %6176 = vmatmul.mubr.bf16.gmra.mrb[8].mxu1 %v12617_v2  ;;  %v9200_v2 = vld [vmem:[%s12394_s5 + $0x3d0] ss:$8 sps:$4 sm:$0xff]  }
 0x527   :  { %6185 = vmatprep.mubr.bf16.mxu1 %v12564_v36 }
 0x52e   :  { %6186 = vmatmul.mubr.bf16.gmra.mrb[12].mxu1 %v12620_v58  ;;  %v9202_v58 = vld [vmem:[%s12394_s5 + $0x3d4] ss:$8 sps:$4 sm:$0xff]  }
 0x52f   :  { %6195 = vmatprep.mubr.bf16.mxu1 %v12564_v36  ;;  %7026 = vmatprep.subr.bf16.mxu0 %v9202_v58 }
 0x530   :  { %7027 = vmatpush1.bf16.msra.mxu0 %v9200_v2 }
 0x536   :  { %6196 = vmatmul.mubr.bf16.gmra.mrb[16].mxu1 %v12623_v50  ;;  %v9203_v50 = vld [vmem:[%s12394_s5 + $0x3e0] ss:$8 sps:$4 sm:$0xff]  }
 0x537   :  { %6205 = vmatprep.mubr.bf16.mxu1 %v12564_v36 }
 0x53e   :  { %6206 = vmatmul.mubr.bf16.gmra.mrb[20].mxu1 %v12625_v53  ;;  %v9205_v53 = vld [vmem:[%s12394_s5 + $0x3e4] ss:$8 sps:$4 sm:$0xff]  }
 0x53f   :  { %6215 = vmatprep.mubr.bf16.mxu1 %v12564_v36  ;;  %7028 = vmatprep.subr.bf16.mxu0 %v9205_v53 }
 0x540   :  { %7029 = vmatpush1.bf16.msra.mxu0 %v9203_v50 }
 0x546   :  { %6216 = vmatmul.mubr.bf16.gmra.mrb[24].mxu1 %v12626_v5  ;;  %v9206_v5 = vld [vmem:[%s12394_s5 + $0x3f0] ss:$8 sps:$4 sm:$0xff]  }
 0x547   :  { %6225 = vmatprep.mubr.bf16.mxu1 %v12564_v36 }
 0x54e   :  { %6226 = vmatmul.mubr.bf16.gmra.mrb[28].mxu1 %v12627_v15  ;;  %v9208_v15 = vld [vmem:[%s12394_s5 + $0x3f4] ss:$8 sps:$4 sm:$0xff]  }
 0x54f   :  { %6235 = vmatprep.mubr.bf16.mxu1 %v12564_v36  ;;  %7030 = vmatprep.subr.bf16.mxu0 %v9208_v15 }
 0x550   :  { %7031 = vmatpush1.bf16.msra.mxu0 %v9206_v5  ;;  %v12709_v5 = vld [vmem:[#allocation74_spill] sm:$0xff] }
 0x556   :  { %6236 = vmatmul.mubr.bf16.gmra.mrb[32].mxu1 %v12628_v44  ;;  %v6476_v44 = vld [vmem:[%s12393_s4 + $0x6] sm:$0x3] }
 0x557   :  { %6245 = vmatprep.mubr.bf16.mxu1 %v12564_v36 }
 0x55e   :  { %6246 = vmatmul.mubr.bf16.gmra.mrb[36].mxu1 %v12629_v10  ;;  %v12703_v10 = vld [vmem:[#allocation62_spill] sm:$0xff] }
 0x55f   :  { %6255 = vmatprep.mubr.bf16.mxu1 %v12564_v36 }
 0x566   :  { %6256 = vmatmul.mubr.bf16.gmra.mrb[40].mxu1 %v12630_v41  ;;  %v12704_v41 = vld [vmem:[#allocation63_spill] sm:$0xff] }
 0x567   :  { %6265 = vmatprep.mubr.bf16.mxu1 %v12564_v36 }
 0x56e   :  { %6266 = vmatmul.mubr.bf16.gmra.mrb[44].mxu1 %v12632_v62  ;;  %v12097_v62 = vrot.slane %v6476_v44, %v12704_v41 }
 0x56f   :  { %6275 = vmatprep.mubr.bf16.mxu1 %v12564_v36 }
 0x576   :  { %6276 = vmatmul.mubr.bf16.gmra.mrb[48].mxu1 %v12635_v22  ;;  %v12705_v22 = vld [vmem:[#allocation64_spill] sm:$0xff] }
 0x577   :  { %6285 = vmatprep.mubr.bf16.mxu1 %v12564_v36 }
 0x57e   :  { %6286 = vmatmul.mubr.bf16.gmra.mrb[52].mxu1 %v12637_v40  ;;  %v12100_v40 = vrot.slane %v6476_v44, %v12705_v22 }
 0x57f   :  { %6295 = vmatprep.mubr.bf16.mxu1 %v12564_v36 }
 0x586   :  { %6296 = vmatmul.mubr.bf16.gmra.mrb[56].mxu1 %v12639_v29 }
 0x587   :  { %6305 = vmatprep.mubr.bf16.mxu1 %v12564_v36 }
 0x58e   :  { %6306 = vmatmul.mubr.bf16.gmra.mrb[60].mxu1 %v12640_v61 }
 0x58f   :  { %6315 = vmatprep.mubr.bf16.mxu1 %v12564_v36 }
 0x596   :  { %6316 = vmatmul.mubr.bf16.gmra.mrb[64].mxu1 %v12642_v30 }
 0x597   :  { %6325 = vmatprep.mubr.bf16.mxu1 %v12564_v36 }
 0x59e   :  { %6326 = vmatmul.mubr.bf16.gmra.mrb[68].mxu1 %v12644_v14 }
 0x59f   :  { %6335 = vmatprep.mubr.bf16.mxu1 %v12564_v36 }
 0x5a6   :  { %6336 = vmatmul.mubr.bf16.gmra.mrb[72].mxu1 %v12646_v48 }
 0x5a7   :  { %6345 = vmatprep.mubr.bf16.mxu1 %v12564_v36 }
 0x5ae   :  { %6346 = vmatmul.mubr.bf16.gmra.mrb[76].mxu1 %v12648_v37 }
 0x5af   :  { %6355 = vmatprep.mubr.bf16.mxu1 %v12564_v36 }
 0x5b6   :  { %6356 = vmatmul.mubr.bf16.gmra.mrb[80].mxu1 %v12651_v23 }
 0x5b7   :  { %6365 = vmatprep.mubr.bf16.mxu1 %v12564_v36 }
 0x5be   :  { %6366 = vmatmul.mubr.bf16.gmra.mrb[84].mxu1 %v12654_v55 }
 0x5bf   :  { %6375 = vmatprep.mubr.bf16.mxu1 %v12564_v36 }
 0x5c6   :  { %6376 = vmatmul.mubr.bf16.gmra.mrb[88].mxu1 %v12656_v33 }
 0x5c7   :  { %6385 = vmatprep.mubr.bf16.mxu1 %v12564_v36 }
 0x5ce   :  { %6386 = vmatmul.mubr.bf16.gmra.mrb[92].mxu1 %v12658_v16 }
 0x5cf   :  { %6395 = vmatprep.mubr.bf16.mxu1 %v12564_v36 }
 0x5d6   :  { %6396 = vmatmul.mubr.bf16.gmra.mrb[96].mxu1 %v12660_v24  ;;  %v12706_v24 = vld [vmem:[#allocation65_spill] sm:$0xff] }
 0x5d7   :  { %6405 = vmatprep.mubr.bf16.mxu1 %v12564_v36 }
 0x5de   :  { %6406 = vmatmul.mubr.bf16.gmra.mrb[100].mxu1 %v12662_v39 }
 0x5df   :  { %6415 = vmatprep.mubr.bf16.mxu1 %v12564_v36 }
 0x5e6   :  { %6416 = vmatmul.mubr.bf16.gmra.mrb[104].mxu1 %v12703_v10 }
 0x5e7   :  { %6425 = vmatprep.mubr.bf16.mxu1 %v12564_v36 }
 0x5e9   :  { %v6157_v29 = vpop.f32.mrb[0].mxu1 }
 0x5ea   :  { %v6488_v61 = vadd.f32 %v12097_v62, %v6157_v29  ;;  %v6159_v30 = vpop.f32.mrb[1].mxu1 }
 0x5eb   :  { %v6489_v14 = vadd.f32 %v12100_v40, %v6159_v30  ;;  %v6161_v48 = vpop.f32.mrb[2].mxu1 }
 0x5ec   :  { %v6490_v37 = vadd.f32 %v12097_v62, %v6161_v48  ;;  %v6163_v23 = vpop.f32.mrb[3].mxu1  ;;  %v6616_v33 = vmax.f32 %v6488_v61, 0.0 }
 0x5ed   :  { %v6491_v55 = vadd.f32 %v12100_v40, %v6163_v23  ;;  %v6617_v39 = vmax.f32 %v6489_v14, 0.0 }
 0x5ee   :  { %v6618_v16 = vmax.f32 %v6490_v37, 0.0  ;;  %6426 = vmatmul.mubr.bf16.gmra.mrb[108].mxu1 %v12706_v24 }
 0x5ef   :  { %v6619_v18 = vmax.f32 %v6491_v55, 0.0  ;;  %6435 = vmatprep.mubr.bf16.mxu1 %v12564_v36 }
 0x5f0   :  { %v6744_v47 = vpack.c.bf16 %v6618_v16, %v6616_v33 }
 0x5f1   :  { %v6745_v17 = vpack.c.bf16 %v6619_v18, %v6617_v39  ;;  %v6167_v12 = vpop.f32.mrb[4].mxu1  ;;  %v12710_v39 = vld [vmem:[#allocation77_spill] sm:$0xff] }
 0x5f2   :  { %v6492_v7 = vadd.f32 %v12097_v62, %v6167_v12  ;;  %v6169_v26 = vpop.f32.mrb[5].mxu1 }
 0x5f3   :  { %v6493_v43 = vadd.f32 %v12100_v40, %v6169_v26  ;;  %v6171_v38 = vpop.f32.mrb[6].mxu1  ;;  %7032 = vmatprep.mubr.bf16.mxu0 %v6745_v17 }
 0x5f4   :  { %v6494_v31 = vadd.f32 %v12097_v62, %v6171_v38  ;;  %v6173_v3 = vpop.f32.mrb[7].mxu1  ;;  %7033 = vmatmul.mubr.bf16.vlgmr.msra.gmra.mrb[128].mxu0 %v6744_v47  ;;  %v6620_v4 = vmax.f32 %v6492_v7, 0.0 }
 0x5f5   :  { %v6495_v8 = vadd.f32 %v12100_v40, %v6173_v3  ;;  %v6621_v21 = vmax.f32 %v6493_v43, 0.0 }
 0x5f6   :  { %v6622_v1 = vmax.f32 %v6494_v31, 0.0  ;;  %6436 = vmatmul.mubr.bf16.gmra.mrb[112].mxu1 %v12707_v20 }
 0x5f7   :  { %v6623_v49 = vmax.f32 %v6495_v8, 0.0  ;;  %6445 = vmatprep.mubr.bf16.mxu1 %v12564_v36 }
 0x5f8   :  { %v6746_v11 = vpack.c.bf16 %v6622_v1, %v6620_v4 }
 0x5f9   :  { %v6747_v32 = vpack.c.bf16 %v6623_v49, %v6621_v21  ;;  %v6177_v25 = vpop.f32.mrb[8].mxu1 }
 0x5fa   :  { %v6496_v0 = vadd.f32 %v12097_v62, %v6177_v25  ;;  %v6179_v60 = vpop.f32.mrb[9].mxu1 }
 0x5fb   :  { %v6497_v28 = vadd.f32 %v12100_v40, %v6179_v60  ;;  %v6181_v46 = vpop.f32.mrb[10].mxu1  ;;  %7042 = vmatprep.mubr.bf16.mxu0 %v6747_v32 }
 0x5fc   :  { %v6498_v52 = vadd.f32 %v12097_v62, %v6181_v46  ;;  %v6183_v35 = vpop.f32.mrb[11].mxu1  ;;  %7043 = vmatmul.mubr.bf16.gmra.mrb[132].mxu0 %v6746_v11  ;;  %v6624_v51 = vmax.f32 %v6496_v0, 0.0 }
 0x5fd   :  { %v6499_v27 = vadd.f32 %v12100_v40, %v6183_v35  ;;  %v6625_v6 = vmax.f32 %v6497_v28, 0.0 }
 0x5fe   :  { %v6626_v19 = vmax.f32 %v6498_v52, 0.0  ;;  %6446 = vmatmul.mubr.bf16.gmra.mrb[116].mxu1 %v12708_v34 }
 0x5ff   :  { %v6627_v13 = vmax.f32 %v6499_v27, 0.0  ;;  %6455 = vmatprep.mubr.bf16.mxu1 %v12564_v36 }
 0x600   :  { %v6748_v54 = vpack.c.bf16 %v6626_v19, %v6624_v51 }
 0x601   :  { %v6749_v45 = vpack.c.bf16 %v6627_v13, %v6625_v6  ;;  %v6187_v59 = vpop.f32.mrb[12].mxu1 }
 0x602   :  { %v6500_v9 = vadd.f32 %v12097_v62, %v6187_v59  ;;  %v6189_v63 = vpop.f32.mrb[13].mxu1 }
 0x603   :  { %v6501_v57 = vadd.f32 %v12100_v40, %v6189_v63  ;;  %v6191_v56 = vpop.f32.mrb[14].mxu1  ;;  %7052 = vmatprep.mubr.bf16.mxu0 %v6749_v45 }
 0x604   :  { %v6502_v42 = vadd.f32 %v12097_v62, %v6191_v56  ;;  %v6193_v2 = vpop.f32.mrb[15].mxu1  ;;  %7053 = vmatmul.mubr.bf16.gmra.mrb[136].mxu0 %v6748_v54  ;;  %v6628_v50 = vmax.f32 %v6500_v9, 0.0 }
 0x605   :  { %v6503_v58 = vadd.f32 %v12100_v40, %v6193_v2  ;;  %v6629_v15 = vmax.f32 %v6501_v57, 0.0 }
 0x606   :  { %v6630_v53 = vmax.f32 %v6502_v42, 0.0  ;;  %6456 = vmatmul.mubr.bf16.gmra.mrb[120].mxu1 %v12709_v5 }
 0x607   :  { %v6631_v44 = vmax.f32 %v6503_v58, 0.0  ;;  %6465 = vmatprep.mubr.bf16.mxu1 %v12564_v36 }
 0x608   :  { %v6750_v10 = vpack.c.bf16 %v6630_v53, %v6628_v50 }
 0x609   :  { %v6751_v29 = vpack.c.bf16 %v6631_v44, %v6629_v15  ;;  %v6197_v61 = vpop.f32.mrb[16].mxu1 }
 0x60a   :  { %v6504_v30 = vadd.f32 %v12097_v62, %v6197_v61  ;;  %v6199_v14 = vpop.f32.mrb[17].mxu1 }
 0x60b   :  { %v6505_v48 = vadd.f32 %v12100_v40, %v6199_v14  ;;  %v6201_v37 = vpop.f32.mrb[18].mxu1  ;;  %7062 = vmatprep.mubr.bf16.mxu0 %v6751_v29 }
 0x60c   :  { %v6506_v23 = vadd.f32 %v12097_v62, %v6201_v37  ;;  %v6203_v55 = vpop.f32.mrb[19].mxu1  ;;  %7063 = vmatmul.mubr.bf16.gmra.mrb[140].mxu0 %v6750_v10  ;;  %v6632_v16 = vmax.f32 %v6504_v30, 0.0 }
 0x60d   :  { %v6507_v33 = vadd.f32 %v12100_v40, %v6203_v55  ;;  %v6633_v36 = vmax.f32 %v6505_v48, 0.0 }
 0x60e   :  { %v6634_v24 = vmax.f32 %v6506_v23, 0.0  ;;  %6466 = vmatmul.mubr.bf16.gmra.mrb[124].mxu1 %v12710_v39 }
 0x60f   :  { %v6635_v18 = vmax.f32 %v6507_v33, 0.0 }
 0x610   :  { %v6752_v47 = vpack.c.bf16 %v6634_v24, %v6632_v16 }
 0x611   :  { %v6753_v17 = vpack.c.bf16 %v6635_v18, %v6633_v36  ;;  %v6207_v12 = vpop.f32.mrb[20].mxu1 }
 0x612   :  { %v6508_v7 = vadd.f32 %v12097_v62, %v6207_v12  ;;  %v6209_v26 = vpop.f32.mrb[21].mxu1 }
 0x613   :  { %v6509_v43 = vadd.f32 %v12100_v40, %v6209_v26  ;;  %v6211_v38 = vpop.f32.mrb[22].mxu1  ;;  %7072 = vmatprep.mubr.bf16.mxu0 %v6753_v17 }
 0x614   :  { %v6510_v31 = vadd.f32 %v12097_v62, %v6211_v38  ;;  %v6213_v3 = vpop.f32.mrb[23].mxu1  ;;  %7073 = vmatmul.mubr.bf16.gmra.mrb[144].mxu0 %v6752_v47  ;;  %v6636_v4 = vmax.f32 %v6508_v7, 0.0 }
 0x615   :  { %v6511_v8 = vadd.f32 %v12100_v40, %v6213_v3  ;;  %v6637_v20 = vmax.f32 %v6509_v43, 0.0 }
 0x616   :  { %v6638_v1 = vmax.f32 %v6510_v31, 0.0 }
 0x617   :  { %v6639_v21 = vmax.f32 %v6511_v8, 0.0 }
 0x618   :  { %v6754_v49 = vpack.c.bf16 %v6638_v1, %v6636_v4 }
 0x619   :  { %v6755_v11 = vpack.c.bf16 %v6639_v21, %v6637_v20  ;;  %v6217_v32 = vpop.f32.mrb[24].mxu1 }
 0x61a   :  { %v6512_v25 = vadd.f32 %v12097_v62, %v6217_v32  ;;  %v6219_v0 = vpop.f32.mrb[25].mxu1 }
 0x61b   :  { %v6513_v60 = vadd.f32 %v12100_v40, %v6219_v0  ;;  %v6221_v28 = vpop.f32.mrb[26].mxu1  ;;  %7082 = vmatprep.mubr.bf16.mxu0 %v6755_v11 }
 0x61c   :  { %v6514_v46 = vadd.f32 %v12097_v62, %v6221_v28  ;;  %v6223_v52 = vpop.f32.mrb[27].mxu1  ;;  %7083 = vmatmul.mubr.bf16.gmra.mrb[148].mxu0 %v6754_v49  ;;  %v6640_v27 = vmax.f32 %v6512_v25, 0.0 }
 0x61d   :  { %v6515_v35 = vadd.f32 %v12100_v40, %v6223_v52  ;;  %v6641_v19 = vmax.f32 %v6513_v60, 0.0 }
 0x61e   :  { %v6642_v51 = vmax.f32 %v6514_v46, 0.0 }
 0x61f   :  { %v6643_v34 = vmax.f32 %v6515_v35, 0.0 }
 0x620   :  { %v6756_v6 = vpack.c.bf16 %v6642_v51, %v6640_v27 }
 0x621   :  { %v6757_v13 = vpack.c.bf16 %v6643_v34, %v6641_v19  ;;  %v6227_v54 = vpop.f32.mrb[28].mxu1 }
 0x622   :  { %v6516_v45 = vadd.f32 %v12097_v62, %v6227_v54  ;;  %v6229_v59 = vpop.f32.mrb[29].mxu1 }
 0x623   :  { %v6517_v9 = vadd.f32 %v12100_v40, %v6229_v59  ;;  %v6231_v63 = vpop.f32.mrb[30].mxu1  ;;  %7092 = vmatprep.mubr.bf16.mxu0 %v6757_v13 }
 0x624   :  { %v6518_v57 = vadd.f32 %v12097_v62, %v6231_v63  ;;  %v6233_v56 = vpop.f32.mrb[31].mxu1  ;;  %7093 = vmatmul.mubr.bf16.gmra.mrb[152].mxu0 %v6756_v6  ;;  %v6644_v2 = vmax.f32 %v6516_v45, 0.0 }
 0x625   :  { %v6519_v42 = vadd.f32 %v12100_v40, %v6233_v56  ;;  %v6645_v50 = vmax.f32 %v6517_v9, 0.0 }
 0x626   :  { %v6646_v58 = vmax.f32 %v6518_v57, 0.0 }
 0x627   :  { %v6647_v53 = vmax.f32 %v6519_v42, 0.0 }
 0x628   :  { %v6758_v5 = vpack.c.bf16 %v6646_v58, %v6644_v2 }
 0x629   :  { %v6759_v15 = vpack.c.bf16 %v6647_v53, %v6645_v50  ;;  %v6237_v44 = vpop.f32.mrb[32].mxu1 }
 0x62a   :  { %v6520_v10 = vadd.f32 %v12097_v62, %v6237_v44  ;;  %v6239_v29 = vpop.f32.mrb[33].mxu1 }
 0x62b   :  { %v6521_v61 = vadd.f32 %v12100_v40, %v6239_v29  ;;  %v6241_v30 = vpop.f32.mrb[34].mxu1  ;;  %7102 = vmatprep.mubr.bf16.mxu0 %v6759_v15 }
 0x62c   :  { %v6522_v14 = vadd.f32 %v12097_v62, %v6241_v30  ;;  %v6243_v48 = vpop.f32.mrb[35].mxu1  ;;  %7103 = vmatmul.mubr.bf16.gmra.mrb[156].mxu0 %v6758_v5  ;;  %v6648_v23 = vmax.f32 %v6520_v10, 0.0 }
 0x62d   :  { %v6523_v37 = vadd.f32 %v12100_v40, %v6243_v48  ;;  %v6649_v33 = vmax.f32 %v6521_v61, 0.0 }
 0x62e   :  { %v6650_v55 = vmax.f32 %v6522_v14, 0.0 }
 0x62f   :  { %v6651_v16 = vmax.f32 %v6523_v37, 0.0 }
 0x630   :  { %v6760_v24 = vpack.c.bf16 %v6650_v55, %v6648_v23 }
 0x631   :  { %v6761_v39 = vpack.c.bf16 %v6651_v16, %v6649_v33  ;;  %v6247_v36 = vpop.f32.mrb[36].mxu1 }
 0x632   :  { %v6524_v18 = vadd.f32 %v12097_v62, %v6247_v36  ;;  %v6249_v47 = vpop.f32.mrb[37].mxu1 }
 0x633   :  { %v6525_v17 = vadd.f32 %v12100_v40, %v6249_v47  ;;  %v6251_v12 = vpop.f32.mrb[38].mxu1  ;;  %7112 = vmatprep.mubr.bf16.mxu0 %v6761_v39 }
 0x634   :  { %v6526_v7 = vadd.f32 %v12097_v62, %v6251_v12  ;;  %v6253_v26 = vpop.f32.mrb[39].mxu1  ;;  %7113 = vmatmul.mubr.bf16.gmra.mrb[160].mxu0 %v6760_v24  ;;  %v6652_v38 = vmax.f32 %v6524_v18, 0.0 }
 0x635   :  { %v6527_v43 = vadd.f32 %v12100_v40, %v6253_v26  ;;  %v6653_v3 = vmax.f32 %v6525_v17, 0.0 }
 0x636   :  { %v6654_v31 = vmax.f32 %v6526_v7, 0.0 }
 0x637   :  { %v6655_v8 = vmax.f32 %v6527_v43, 0.0 }
 0x638   :  { %v6762_v4 = vpack.c.bf16 %v6654_v31, %v6652_v38 }
 0x639   :  { %v6763_v1 = vpack.c.bf16 %v6655_v8, %v6653_v3  ;;  %v6257_v20 = vpop.f32.mrb[40].mxu1 }
 0x63a   :  { %v6528_v21 = vadd.f32 %v12097_v62, %v6257_v20  ;;  %v6259_v49 = vpop.f32.mrb[41].mxu1 }
 0x63b   :  { %v6529_v11 = vadd.f32 %v12100_v40, %v6259_v49  ;;  %v6261_v32 = vpop.f32.mrb[42].mxu1  ;;  %7122 = vmatprep.mubr.bf16.mxu0 %v6763_v1 }
 0x63c   :  { %v6530_v25 = vadd.f32 %v12097_v62, %v6261_v32  ;;  %v6263_v0 = vpop.f32.mrb[43].mxu1  ;;  %7123 = vmatmul.mubr.bf16.gmra.mrb[164].mxu0 %v6762_v4  ;;  %v6656_v28 = vmax.f32 %v6528_v21, 0.0 }
 0x63d   :  { %v6531_v60 = vadd.f32 %v12100_v40, %v6263_v0  ;;  %v6657_v52 = vmax.f32 %v6529_v11, 0.0 }
 0x63e   :  { %v6658_v46 = vmax.f32 %v6530_v25, 0.0 }
 0x63f   :  { %v6659_v35 = vmax.f32 %v6531_v60, 0.0 }
 0x640   :  { %v6764_v27 = vpack.c.bf16 %v6658_v46, %v6656_v28 }
 0x641   :  { %v6765_v51 = vpack.c.bf16 %v6659_v35, %v6657_v52  ;;  %v6267_v19 = vpop.f32.mrb[44].mxu1 }
 0x642   :  { %v6532_v34 = vadd.f32 %v12097_v62, %v6267_v19  ;;  %v6269_v6 = vpop.f32.mrb[45].mxu1 }
 0x643   :  { %v6533_v13 = vadd.f32 %v12100_v40, %v6269_v6  ;;  %v6271_v54 = vpop.f32.mrb[46].mxu1  ;;  %7132 = vmatprep.mubr.bf16.mxu0 %v6765_v51 }
 0x644   :  { %v6534_v45 = vadd.f32 %v12097_v62, %v6271_v54  ;;  %v6273_v59 = vpop.f32.mrb[47].mxu1  ;;  %7133 = vmatmul.mubr.bf16.gmra.mrb[168].mxu0 %v6764_v27  ;;  %v6660_v63 = vmax.f32 %v6532_v34, 0.0 }
 0x645   :  { %v6535_v9 = vadd.f32 %v12100_v40, %v6273_v59  ;;  %v6661_v56 = vmax.f32 %v6533_v13, 0.0 }
 0x646   :  { %v6662_v57 = vmax.f32 %v6534_v45, 0.0 }
 0x647   :  { %v6663_v42 = vmax.f32 %v6535_v9, 0.0 }
 0x648   :  { %v6766_v2 = vpack.c.bf16 %v6662_v57, %v6660_v63 }
 0x649   :  { %v6767_v58 = vpack.c.bf16 %v6663_v42, %v6661_v56  ;;  %v6277_v50 = vpop.f32.mrb[48].mxu1 }
 0x64a   :  { %v6536_v53 = vadd.f32 %v12097_v62, %v6277_v50  ;;  %v6279_v5 = vpop.f32.mrb[49].mxu1 }
 0x64b   :  { %v6537_v15 = vadd.f32 %v12100_v40, %v6279_v5  ;;  %v6281_v44 = vpop.f32.mrb[50].mxu1  ;;  %7142 = vmatprep.mubr.bf16.mxu0 %v6767_v58 }
 0x64c   :  { %v6538_v10 = vadd.f32 %v12097_v62, %v6281_v44  ;;  %v6283_v29 = vpop.f32.mrb[51].mxu1  ;;  %7143 = vmatmul.mubr.bf16.gmra.mrb[172].mxu0 %v6766_v2  ;;  %v6664_v30 = vmax.f32 %v6536_v53, 0.0 }
 0x64d   :  { %v6539_v61 = vadd.f32 %v12100_v40, %v6283_v29  ;;  %v6665_v48 = vmax.f32 %v6537_v15, 0.0 }
 0x64e   :  { %v6666_v14 = vmax.f32 %v6538_v10, 0.0 }
 0x64f   :  { %v6667_v37 = vmax.f32 %v6539_v61, 0.0 }
 0x650   :  { %v6768_v23 = vpack.c.bf16 %v6666_v14, %v6664_v30 }
 0x651   :  { %v6769_v55 = vpack.c.bf16 %v6667_v37, %v6665_v48  ;;  %v6287_v33 = vpop.f32.mrb[52].mxu1 }
 0x652   :  { %v6540_v16 = vadd.f32 %v12097_v62, %v6287_v33  ;;  %v6289_v24 = vpop.f32.mrb[53].mxu1 }
 0x653   :  { %v6541_v39 = vadd.f32 %v12100_v40, %v6289_v24  ;;  %v6291_v36 = vpop.f32.mrb[54].mxu1  ;;  %7152 = vmatprep.mubr.bf16.mxu0 %v6769_v55 }
 0x654   :  { %v6542_v18 = vadd.f32 %v12097_v62, %v6291_v36  ;;  %v6293_v47 = vpop.f32.mrb[55].mxu1  ;;  %7153 = vmatmul.mubr.bf16.gmra.mrb[176].mxu0 %v6768_v23  ;;  %v6668_v12 = vmax.f32 %v6540_v16, 0.0 }
 0x655   :  { %v6543_v17 = vadd.f32 %v12100_v40, %v6293_v47  ;;  %v6669_v26 = vmax.f32 %v6541_v39, 0.0 }
 0x656   :  { %v6670_v7 = vmax.f32 %v6542_v18, 0.0 }
 0x657   :  { %v6671_v43 = vmax.f32 %v6543_v17, 0.0 }
 0x658   :  { %v6770_v38 = vpack.c.bf16 %v6670_v7, %v6668_v12 }
 0x659   :  { %v6771_v31 = vpack.c.bf16 %v6671_v43, %v6669_v26  ;;  %v6297_v3 = vpop.f32.mrb[56].mxu1 }
 0x65a   :  { %v6544_v8 = vadd.f32 %v12097_v62, %v6297_v3  ;;  %v6299_v4 = vpop.f32.mrb[57].mxu1 }
 0x65b   :  { %v6545_v1 = vadd.f32 %v12100_v40, %v6299_v4  ;;  %v6301_v20 = vpop.f32.mrb[58].mxu1  ;;  %7162 = vmatprep.mubr.bf16.mxu0 %v6771_v31 }
 0x65c   :  { %v6546_v21 = vadd.f32 %v12097_v62, %v6301_v20  ;;  %v6303_v49 = vpop.f32.mrb[59].mxu1  ;;  %7163 = vmatmul.mubr.bf16.gmra.mrb[180].mxu0 %v6770_v38  ;;  %v6672_v32 = vmax.f32 %v6544_v8, 0.0 }
 0x65d   :  { %v6547_v11 = vadd.f32 %v12100_v40, %v6303_v49  ;;  %v6673_v0 = vmax.f32 %v6545_v1, 0.0 }
 0x65e   :  { %v6674_v25 = vmax.f32 %v6546_v21, 0.0 }
 0x65f   :  { %v6675_v60 = vmax.f32 %v6547_v11, 0.0 }
 0x660   :  { %v6772_v28 = vpack.c.bf16 %v6674_v25, %v6672_v32 }
 0x661   :  { %v6773_v46 = vpack.c.bf16 %v6675_v60, %v6673_v0  ;;  %v6307_v52 = vpop.f32.mrb[60].mxu1 }
 0x662   :  { %v6548_v35 = vadd.f32 %v12097_v62, %v6307_v52  ;;  %v6309_v27 = vpop.f32.mrb[61].mxu1 }
 0x663   :  { %v6549_v51 = vadd.f32 %v12100_v40, %v6309_v27  ;;  %v6311_v19 = vpop.f32.mrb[62].mxu1  ;;  %7172 = vmatprep.mubr.bf16.mxu0 %v6773_v46 }
 0x664   :  { %v6550_v34 = vadd.f32 %v12097_v62, %v6311_v19  ;;  %v6313_v6 = vpop.f32.mrb[63].mxu1  ;;  %7173 = vmatmul.mubr.bf16.gmra.mrb[184].mxu0 %v6772_v28  ;;  %v6676_v54 = vmax.f32 %v6548_v35, 0.0 }
 0x665   :  { %v6551_v13 = vadd.f32 %v12100_v40, %v6313_v6  ;;  %v6677_v59 = vmax.f32 %v6549_v51, 0.0 }
 0x666   :  { %v6678_v45 = vmax.f32 %v6550_v34, 0.0 }
 0x667   :  { %v6679_v9 = vmax.f32 %v6551_v13, 0.0 }
 0x668   :  { %v6774_v63 = vpack.c.bf16 %v6678_v45, %v6676_v54 }
 0x669   :  { %v6775_v57 = vpack.c.bf16 %v6679_v9, %v6677_v59  ;;  %v6317_v56 = vpop.f32.mrb[64].mxu1 }
 0x66a   :  { %v6552_v42 = vadd.f32 %v12097_v62, %v6317_v56  ;;  %v6319_v2 = vpop.f32.mrb[65].mxu1 }
 0x66b   :  { %v6553_v58 = vadd.f32 %v12100_v40, %v6319_v2  ;;  %v6321_v50 = vpop.f32.mrb[66].mxu1  ;;  %7182 = vmatprep.mubr.bf16.mxu0 %v6775_v57 }
 0x66c   :  { %v6554_v53 = vadd.f32 %v12097_v62, %v6321_v50  ;;  %v6323_v5 = vpop.f32.mrb[67].mxu1  ;;  %7183 = vmatmul.mubr.bf16.gmra.mrb[188].mxu0 %v6774_v63  ;;  %v6680_v44 = vmax.f32 %v6552_v42, 0.0 }
 0x66d   :  { %v6555_v15 = vadd.f32 %v12100_v40, %v6323_v5  ;;  %v6681_v29 = vmax.f32 %v6553_v58, 0.0 }
 0x66e   :  { %v6682_v10 = vmax.f32 %v6554_v53, 0.0 }
 0x66f   :  { %v6683_v61 = vmax.f32 %v6555_v15, 0.0 }
 0x670   :  { %v6776_v30 = vpack.c.bf16 %v6682_v10, %v6680_v44 }
 0x671   :  { %v6777_v14 = vpack.c.bf16 %v6683_v61, %v6681_v29  ;;  %v6327_v48 = vpop.f32.mrb[68].mxu1 }
 0x672   :  { %v6556_v37 = vadd.f32 %v12097_v62, %v6327_v48  ;;  %v6329_v23 = vpop.f32.mrb[69].mxu1 }
 0x673   :  { %v6557_v55 = vadd.f32 %v12100_v40, %v6329_v23  ;;  %v6331_v33 = vpop.f32.mrb[70].mxu1  ;;  %7192 = vmatprep.mubr.bf16.mxu0 %v6777_v14 }
 0x674   :  { %v6558_v16 = vadd.f32 %v12097_v62, %v6331_v33  ;;  %v6333_v24 = vpop.f32.mrb[71].mxu1  ;;  %7193 = vmatmul.mubr.bf16.gmra.mrb[192].mxu0 %v6776_v30  ;;  %v6684_v36 = vmax.f32 %v6556_v37, 0.0 }
 0x675   :  { %v6559_v39 = vadd.f32 %v12100_v40, %v6333_v24  ;;  %v6685_v47 = vmax.f32 %v6557_v55, 0.0 }
 0x676   :  { %v6686_v18 = vmax.f32 %v6558_v16, 0.0 }
 0x677   :  { %v6687_v17 = vmax.f32 %v6559_v39, 0.0 }
 0x678   :  { %v6778_v12 = vpack.c.bf16 %v6686_v18, %v6684_v36 }
 0x679   :  { %v6779_v7 = vpack.c.bf16 %v6687_v17, %v6685_v47  ;;  %v6337_v26 = vpop.f32.mrb[72].mxu1 }
 0x67a   :  { %v6560_v43 = vadd.f32 %v12097_v62, %v6337_v26  ;;  %v6339_v38 = vpop.f32.mrb[73].mxu1 }
 0x67b   :  { %v6561_v31 = vadd.f32 %v12100_v40, %v6339_v38  ;;  %v6341_v3 = vpop.f32.mrb[74].mxu1  ;;  %7202 = vmatprep.mubr.bf16.mxu0 %v6779_v7 }
 0x67c   :  { %v6562_v8 = vadd.f32 %v12097_v62, %v6341_v3  ;;  %v6343_v4 = vpop.f32.mrb[75].mxu1  ;;  %7203 = vmatmul.mubr.bf16.gmra.mrb[196].mxu0 %v6778_v12  ;;  %v6688_v20 = vmax.f32 %v6560_v43, 0.0 }
 0x67d   :  { %v6563_v1 = vadd.f32 %v12100_v40, %v6343_v4  ;;  %v6689_v49 = vmax.f32 %v6561_v31, 0.0 }
 0x67e   :  { %v6690_v21 = vmax.f32 %v6562_v8, 0.0 }
 0x67f   :  { %v6691_v11 = vmax.f32 %v6563_v1, 0.0 }
 0x680   :  { %v6780_v32 = vpack.c.bf16 %v6690_v21, %v6688_v20 }
 0x681   :  { %v6781_v25 = vpack.c.bf16 %v6691_v11, %v6689_v49  ;;  %v6347_v0 = vpop.f32.mrb[76].mxu1 }
 0x682   :  { %v6564_v60 = vadd.f32 %v12097_v62, %v6347_v0  ;;  %v6349_v28 = vpop.f32.mrb[77].mxu1 }
 0x683   :  { %v6565_v46 = vadd.f32 %v12100_v40, %v6349_v28  ;;  %v6351_v52 = vpop.f32.mrb[78].mxu1  ;;  %7212 = vmatprep.mubr.bf16.mxu0 %v6781_v25 }
 0x684   :  { %v6566_v35 = vadd.f32 %v12097_v62, %v6351_v52  ;;  %v6353_v27 = vpop.f32.mrb[79].mxu1  ;;  %7213 = vmatmul.mubr.bf16.gmra.mrb[200].mxu0 %v6780_v32  ;;  %v6692_v19 = vmax.f32 %v6564_v60, 0.0 }
 0x685   :  { %v6567_v51 = vadd.f32 %v12100_v40, %v6353_v27  ;;  %v6693_v6 = vmax.f32 %v6565_v46, 0.0 }
 0x686   :  { %v6694_v34 = vmax.f32 %v6566_v35, 0.0 }
 0x687   :  { %v6695_v13 = vmax.f32 %v6567_v51, 0.0 }
 0x688   :  { %v6782_v54 = vpack.c.bf16 %v6694_v34, %v6692_v19 }
 0x689   :  { %v6783_v45 = vpack.c.bf16 %v6695_v13, %v6693_v6  ;;  %v6357_v59 = vpop.f32.mrb[80].mxu1 }
 0x68a   :  { %v6568_v9 = vadd.f32 %v12097_v62, %v6357_v59  ;;  %v6359_v63 = vpop.f32.mrb[81].mxu1 }
 0x68b   :  { %v6569_v57 = vadd.f32 %v12100_v40, %v6359_v63  ;;  %v6361_v56 = vpop.f32.mrb[82].mxu1  ;;  %7222 = vmatprep.mubr.bf16.mxu0 %v6783_v45 }
 0x68c   :  { %v6570_v42 = vadd.f32 %v12097_v62, %v6361_v56  ;;  %v6363_v2 = vpop.f32.mrb[83].mxu1  ;;  %7223 = vmatmul.mubr.bf16.gmra.mrb[204].mxu0 %v6782_v54  ;;  %v6696_v50 = vmax.f32 %v6568_v9, 0.0 }
 0x68d   :  { %v6571_v58 = vadd.f32 %v12100_v40, %v6363_v2  ;;  %v6697_v5 = vmax.f32 %v6569_v57, 0.0 }
 0x68e   :  { %v6698_v53 = vmax.f32 %v6570_v42, 0.0 }
 0x68f   :  { %v6699_v15 = vmax.f32 %v6571_v58, 0.0 }
 0x690   :  { %v6784_v44 = vpack.c.bf16 %v6698_v53, %v6696_v50 }
 0x691   :  { %v6785_v10 = vpack.c.bf16 %v6699_v15, %v6697_v5  ;;  %v6367_v29 = vpop.f32.mrb[84].mxu1 }
 0x692   :  { %v6572_v61 = vadd.f32 %v12097_v62, %v6367_v29  ;;  %v6369_v30 = vpop.f32.mrb[85].mxu1 }
 0x693   :  { %v6573_v14 = vadd.f32 %v12100_v40, %v6369_v30  ;;  %v6371_v48 = vpop.f32.mrb[86].mxu1  ;;  %7232 = vmatprep.mubr.bf16.mxu0 %v6785_v10 }
 0x694   :  { %v6574_v37 = vadd.f32 %v12097_v62, %v6371_v48  ;;  %v6373_v23 = vpop.f32.mrb[87].mxu1  ;;  %7233 = vmatmul.mubr.bf16.gmra.mrb[208].mxu0 %v6784_v44  ;;  %v6700_v33 = vmax.f32 %v6572_v61, 0.0 }
 0x695   :  { %v6575_v55 = vadd.f32 %v12100_v40, %v6373_v23  ;;  %v6701_v24 = vmax.f32 %v6573_v14, 0.0 }
 0x696   :  { %v6702_v16 = vmax.f32 %v6574_v37, 0.0 }
 0x697   :  { %v6703_v39 = vmax.f32 %v6575_v55, 0.0 }
 0x698   :  { %v6786_v36 = vpack.c.bf16 %v6702_v16, %v6700_v33 }
 0x699   :  { %v6787_v18 = vpack.c.bf16 %v6703_v39, %v6701_v24  ;;  %v6377_v47 = vpop.f32.mrb[88].mxu1 }
 0x69a   :  { %v6576_v17 = vadd.f32 %v12097_v62, %v6377_v47  ;;  %v6379_v12 = vpop.f32.mrb[89].mxu1 }
 0x69b   :  { %v6577_v7 = vadd.f32 %v12100_v40, %v6379_v12  ;;  %v6381_v26 = vpop.f32.mrb[90].mxu1  ;;  %7242 = vmatprep.mubr.bf16.mxu0 %v6787_v18 }
 0x69c   :  { %v6578_v43 = vadd.f32 %v12097_v62, %v6381_v26  ;;  %v6383_v38 = vpop.f32.mrb[91].mxu1  ;;  %7243 = vmatmul.mubr.bf16.gmra.mrb[212].mxu0 %v6786_v36  ;;  %v6704_v3 = vmax.f32 %v6576_v17, 0.0 }
 0x69d   :  { %v6579_v31 = vadd.f32 %v12100_v40, %v6383_v38  ;;  %v6705_v4 = vmax.f32 %v6577_v7, 0.0 }
 0x69e   :  { %v6706_v8 = vmax.f32 %v6578_v43, 0.0 }
 0x69f   :  { %v6707_v1 = vmax.f32 %v6579_v31, 0.0 }
 0x6a0   :  { %v6788_v20 = vpack.c.bf16 %v6706_v8, %v6704_v3 }
 0x6a1   :  { %v6789_v21 = vpack.c.bf16 %v6707_v1, %v6705_v4  ;;  %v6387_v49 = vpop.f32.mrb[92].mxu1  ;;  %v7481_v1 = vld [vmem:[%s12395_s6] sm:$0x3]  ;;  %s9234_s6 = smov [#allocation2]  }
 0x6a2   :  { %v6580_v11 = vadd.f32 %v12097_v62, %v6387_v49  ;;  %v6389_v32 = vpop.f32.mrb[93].mxu1  ;;  %s7754_s29 = sshll.u32 %s9234_s6, 4  ;;  %s7755_s29 = int_to_ptr.vmem [resolvable:$true] %s7754_s29 }
 0x6a3   :  { %v6581_v25 = vadd.f32 %v12100_v40, %v6389_v32  ;;  %v6391_v0 = vpop.f32.mrb[94].mxu1  ;;  %7252 = vmatprep.mubr.bf16.mxu0 %v6789_v21  ;;  %s9209_s30 = scalar_lea.vmem %s7755_s29, 16384  ;;  %p9214_p1 = scmp.lt.s32.totalorder %s7755_s29, %s7755_s29 }
 0x6a4   :  { %v6582_v60 = vadd.f32 %v12097_v62, %v6391_v0  ;;  %v6393_v28 = vpop.f32.mrb[95].mxu1  ;;  %7253 = vmatmul.mubr.bf16.gmra.mrb[216].mxu0 %v6788_v20  ;;  %v6708_v52 = vmax.f32 %v6580_v11, 0.0  ;;  %v12227_v0 = vrot.slane %v7481_v1, %v12704_v41  ;;  %p9210_p0 = scmp.ne.s32.totalorder %s7755_s29, %s9209_s30  ;;  %p9215_p2 = scmp.lt.s32.totalorder %s9209_s30, %s9209_s30 }
 0x6a5   :  { %v6583_v46 = vadd.f32 %v12100_v40, %v6393_v28  ;;  %v6709_v27 = vmax.f32 %v6581_v25, 0.0  ;;  %v12231_v28 = vrot.slane %v7481_v1, %v12705_v22 }
 0x6a6   :  { %v6710_v35 = vmax.f32 %v6582_v60, 0.0  ;;  %p9216_p3 = por %p9215_p2, %p9214_p1 }
 0x6a7   :  { %v6711_v51 = vmax.f32 %v6583_v46, 0.0 }
 0x6a8   :  { %v6790_v19 = vpack.c.bf16 %v6710_v35, %v6708_v52  ;;  %p9217_p4 = pnand %p9216_p3, %p9210_p0 }
 0x6a9   :  { %v6791_v34 = vpack.c.bf16 %v6711_v51, %v6709_v27  ;;  %v6397_v6 = vpop.f32.mrb[96].mxu1 }
 0x6aa   :  { %v6584_v13 = vadd.f32 %v12097_v62, %v6397_v6  ;;  %v6399_v54 = vpop.f32.mrb[97].mxu1 }
 0x6ab   :  { %v6585_v45 = vadd.f32 %v12100_v40, %v6399_v54  ;;  %v6401_v59 = vpop.f32.mrb[98].mxu1  ;;  %7262 = vmatprep.mubr.bf16.mxu0 %v6791_v34 }
 0x6ac   :  { %v6586_v9 = vadd.f32 %v12097_v62, %v6401_v59  ;;  %v6403_v63 = vpop.f32.mrb[99].mxu1  ;;  %7263 = vmatmul.mubr.bf16.gmra.mrb[220].mxu0 %v6790_v19  ;;  %v6712_v56 = vmax.f32 %v6584_v13, 0.0 }
 0x6ad   :  { %v6587_v57 = vadd.f32 %v12100_v40, %v6403_v63  ;;  %v6713_v2 = vmax.f32 %v6585_v45, 0.0 }
 0x6ae   :  { %v6714_v42 = vmax.f32 %v6586_v9, 0.0 }
 0x6af   :  { %v6715_v58 = vmax.f32 %v6587_v57, 0.0 }
 0x6b0   :  { %v6792_v50 = vpack.c.bf16 %v6714_v42, %v6712_v56 }
 0x6b1   :  { %v6793_v53 = vpack.c.bf16 %v6715_v58, %v6713_v2  ;;  %v6407_v5 = vpop.f32.mrb[100].mxu1 }
 0x6b2   :  { %v6588_v15 = vadd.f32 %v12097_v62, %v6407_v5  ;;  %v6409_v44 = vpop.f32.mrb[101].mxu1 }
 0x6b3   :  { %v6589_v10 = vadd.f32 %v12100_v40, %v6409_v44  ;;  %v6411_v29 = vpop.f32.mrb[102].mxu1  ;;  %7272 = vmatprep.mubr.bf16.mxu0 %v6793_v53 }
 0x6b4   :  { %v6590_v61 = vadd.f32 %v12097_v62, %v6411_v29  ;;  %v6413_v30 = vpop.f32.mrb[103].mxu1  ;;  %7273 = vmatmul.mubr.bf16.gmra.mrb[224].mxu0 %v6792_v50  ;;  %v6716_v48 = vmax.f32 %v6588_v15, 0.0 }
 0x6b5   :  { %v6591_v14 = vadd.f32 %v12100_v40, %v6413_v30  ;;  %v6717_v23 = vmax.f32 %v6589_v10, 0.0 }
 0x6b6   :  { %v6718_v37 = vmax.f32 %v6590_v61, 0.0 }
 0x6b7   :  { %v6719_v55 = vmax.f32 %v6591_v14, 0.0 }
 0x6b8   :  { %v6794_v33 = vpack.c.bf16 %v6718_v37, %v6716_v48 }
 0x6b9   :  { %v6795_v16 = vpack.c.bf16 %v6719_v55, %v6717_v23  ;;  %v6417_v24 = vpop.f32.mrb[104].mxu1 }
 0x6ba   :  { %v6592_v39 = vadd.f32 %v12097_v62, %v6417_v24  ;;  %v6419_v36 = vpop.f32.mrb[105].mxu1 }
 0x6bb   :  { %v6593_v18 = vadd.f32 %v12100_v40, %v6419_v36  ;;  %v6421_v47 = vpop.f32.mrb[106].mxu1  ;;  %7282 = vmatprep.mubr.bf16.mxu0 %v6795_v16 }
 0x6bc   :  { %v6594_v17 = vadd.f32 %v12097_v62, %v6421_v47  ;;  %v6423_v12 = vpop.f32.mrb[107].mxu1  ;;  %7283 = vmatmul.mubr.bf16.gmra.mrb[228].mxu0 %v6794_v33  ;;  %v6720_v26 = vmax.f32 %v6592_v39, 0.0 }
 0x6bd   :  { %v6595_v7 = vadd.f32 %v12100_v40, %v6423_v12  ;;  %v6721_v38 = vmax.f32 %v6593_v18, 0.0 }
 0x6be   :  { %v6722_v43 = vmax.f32 %v6594_v17, 0.0 }
 0x6bf   :  { %v6723_v31 = vmax.f32 %v6595_v7, 0.0 }
 0x6c0   :  { %v6796_v3 = vpack.c.bf16 %v6722_v43, %v6720_v26 }
 0x6c1   :  { %v6797_v8 = vpack.c.bf16 %v6723_v31, %v6721_v38  ;;  %v6427_v4 = vpop.f32.mrb[108].mxu1 }
 0x6c2   :  { %v6596_v20 = vadd.f32 %v12097_v62, %v6427_v4  ;;  %v6429_v21 = vpop.f32.mrb[109].mxu1 }
 0x6c3   :  { %v6597_v49 = vadd.f32 %v12100_v40, %v6429_v21  ;;  %v6431_v11 = vpop.f32.mrb[110].mxu1  ;;  %7292 = vmatprep.mubr.bf16.mxu0 %v6797_v8 }
 0x6c4   :  { %v6598_v32 = vadd.f32 %v12097_v62, %v6431_v11  ;;  %v6433_v25 = vpop.f32.mrb[111].mxu1  ;;  %7293 = vmatmul.mubr.bf16.gmra.mrb[232].mxu0 %v6796_v3  ;;  %v6724_v46 = vmax.f32 %v6596_v20, 0.0 }
 0x6c5   :  { %v6599_v60 = vadd.f32 %v12100_v40, %v6433_v25  ;;  %v6725_v35 = vmax.f32 %v6597_v49, 0.0 }
 0x6c6   :  { %v6726_v52 = vmax.f32 %v6598_v32, 0.0 }
 0x6c7   :  { %v6727_v27 = vmax.f32 %v6599_v60, 0.0  ;;  %v7034_v51 = vpop.f32.mrb[128].mxu0 }
 0x6c8   :  { %v6798_v19 = vpack.c.bf16 %v6726_v52, %v6724_v46  ;;  %v7493_v34 = vadd.f32 %v12227_v0, %v7034_v51  ;;  %v7036_v6 = vpop.f32.mrb[129].mxu0 }
 0x6c9   :  { %v6799_v13 = vpack.c.bf16 %v6727_v27, %v6725_v35  ;;  %v7494_v54 = vadd.f32 %v12231_v28, %v7036_v6  ;;  %v6437_v45 = vpop.f32.mrb[112].mxu1  ;;  %v7038_v41 = vpop.f32.mrb[130].mxu0 }
 0x6ca   :  { %7621 = vst [vmem:[#allocation2] sm:$0xff] %v7493_v34  ;;  %v6600_v59 = vadd.f32 %v12097_v62, %v6437_v45  ;;  %v7495_v22 = vadd.f32 %v12227_v0, %v7038_v41  ;;  %v6439_v9 = vpop.f32.mrb[113].mxu1  ;;  %v7040_v63 = vpop.f32.mrb[131].mxu0 }
 0x6cb   :  { %7622 = vst [vmem:[#allocation2 + $0x8] sm:$0xff] %v7494_v54  ;;  %v6601_v57 = vadd.f32 %v12100_v40, %v6439_v9  ;;  %v7496_v56 = vadd.f32 %v12231_v28, %v7040_v63  ;;  %v6441_v42 = vpop.f32.mrb[114].mxu1  ;;  %7302 = vmatprep.mubr.bf16.mxu0 %v6799_v13 }
 0x6cc   :  { %7623 = vst [vmem:[#allocation2 + $0x10] sm:$0xff] %v7495_v22  ;;  %v6602_v2 = vadd.f32 %v12097_v62, %v6441_v42  ;;  %v6443_v58 = vpop.f32.mrb[115].mxu1  ;;  %7303 = vmatmul.mubr.bf16.gmra.mrb[236].mxu0 %v6798_v19  ;;  %v6728_v53 = vmax.f32 %v6600_v59, 0.0 }
 0x6cd   :  { %7624 = vst [vmem:[#allocation2 + $0x18] sm:$0xff] %v7496_v56  ;;  %v6603_v50 = vadd.f32 %v12100_v40, %v6443_v58  ;;  %v6729_v15 = vmax.f32 %v6601_v57, 0.0 }
 0x6ce   :  { %v6730_v5 = vmax.f32 %v6602_v2, 0.0 }
 0x6cf   :  { %v6731_v44 = vmax.f32 %v6603_v50, 0.0  ;;  %v7044_v10 = vpop.f32.mrb[132].mxu0 }
 0x6d0   :  { %v6800_v29 = vpack.c.bf16 %v6730_v5, %v6728_v53  ;;  %v7497_v61 = vadd.f32 %v12227_v0, %v7044_v10  ;;  %v7046_v30 = vpop.f32.mrb[133].mxu0 }
 0x6d1   :  { %v6801_v14 = vpack.c.bf16 %v6731_v44, %v6729_v15  ;;  %v7498_v48 = vadd.f32 %v12231_v28, %v7046_v30  ;;  %v6447_v37 = vpop.f32.mrb[116].mxu1  ;;  %v7048_v23 = vpop.f32.mrb[134].mxu0 }
 0x6d2   :  { %7625 = vst [vmem:[#allocation2 + $0x20] sm:$0xff] %v7497_v61  ;;  %v6604_v55 = vadd.f32 %v12097_v62, %v6447_v37  ;;  %v7499_v33 = vadd.f32 %v12227_v0, %v7048_v23  ;;  %v6449_v16 = vpop.f32.mrb[117].mxu1  ;;  %v7050_v24 = vpop.f32.mrb[135].mxu0 }
 0x6d3   :  { %7626 = vst [vmem:[#allocation2 + $0x28] sm:$0xff] %v7498_v48  ;;  %v6605_v39 = vadd.f32 %v12100_v40, %v6449_v16  ;;  %v7500_v36 = vadd.f32 %v12231_v28, %v7050_v24  ;;  %v6451_v18 = vpop.f32.mrb[118].mxu1  ;;  %7312 = vmatprep.mubr.bf16.mxu0 %v6801_v14 }
 0x6d4   :  { %7627 = vst [vmem:[#allocation2 + $0x30] sm:$0xff] %v7499_v33  ;;  %v6606_v47 = vadd.f32 %v12097_v62, %v6451_v18  ;;  %v6453_v17 = vpop.f32.mrb[119].mxu1  ;;  %7313 = vmatmul.mubr.bf16.gmra.mrb[240].mxu0 %v6800_v29  ;;  %v6732_v7 = vmax.f32 %v6604_v55, 0.0 }
 0x6d5   :  { %7628 = vst [vmem:[#allocation2 + $0x38] sm:$0xff] %v7500_v36  ;;  %v6607_v12 = vadd.f32 %v12100_v40, %v6453_v17  ;;  %v6733_v43 = vmax.f32 %v6605_v39, 0.0 }
 0x6d6   :  { %v6734_v26 = vmax.f32 %v6606_v47, 0.0 }
 0x6d7   :  { %v6735_v38 = vmax.f32 %v6607_v12, 0.0  ;;  %v7054_v31 = vpop.f32.mrb[136].mxu0 }
 0x6d8   :  { %v6802_v3 = vpack.c.bf16 %v6734_v26, %v6732_v7  ;;  %v7501_v8 = vadd.f32 %v12227_v0, %v7054_v31  ;;  %v7056_v4 = vpop.f32.mrb[137].mxu0 }
 0x6d9   :  { %v6803_v1 = vpack.c.bf16 %v6735_v38, %v6733_v43  ;;  %v7502_v20 = vadd.f32 %v12231_v28, %v7056_v4  ;;  %v6457_v21 = vpop.f32.mrb[120].mxu1  ;;  %v7058_v49 = vpop.f32.mrb[138].mxu0 }
 0x6da   :  { %7629 = vst [vmem:[#allocation2 + $0x40] sm:$0xff] %v7501_v8  ;;  %v6608_v11 = vadd.f32 %v12097_v62, %v6457_v21  ;;  %v7503_v32 = vadd.f32 %v12227_v0, %v7058_v49  ;;  %v6459_v25 = vpop.f32.mrb[121].mxu1  ;;  %v7060_v60 = vpop.f32.mrb[139].mxu0 }
 0x6db   :  { %7630 = vst [vmem:[#allocation2 + $0x48] sm:$0xff] %v7502_v20  ;;  %v6609_v46 = vadd.f32 %v12100_v40, %v6459_v25  ;;  %v7504_v52 = vadd.f32 %v12231_v28, %v7060_v60  ;;  %v6461_v35 = vpop.f32.mrb[122].mxu1  ;;  %7322 = vmatprep.mubr.bf16.mxu0 %v6803_v1 }
 0x6dc   :  { %7631 = vst [vmem:[#allocation2 + $0x50] sm:$0xff] %v7503_v32  ;;  %v6610_v27 = vadd.f32 %v12097_v62, %v6461_v35  ;;  %v6463_v51 = vpop.f32.mrb[123].mxu1  ;;  %7323 = vmatmul.mubr.bf16.gmra.mrb[244].mxu0 %v6802_v3  ;;  %v6736_v34 = vmax.f32 %v6608_v11, 0.0 }
 0x6dd   :  { %7632 = vst [vmem:[#allocation2 + $0x58] sm:$0xff] %v7504_v52  ;;  %v6611_v19 = vadd.f32 %v12100_v40, %v6463_v51  ;;  %v6737_v13 = vmax.f32 %v6609_v46, 0.0 }
 0x6de   :  { %v6738_v6 = vmax.f32 %v6610_v27, 0.0 }
 0x6df   :  { %v6739_v54 = vmax.f32 %v6611_v19, 0.0  ;;  %v7064_v45 = vpop.f32.mrb[140].mxu0 }
 0x6e0   :  { %v6804_v41 = vpack.c.bf16 %v6738_v6, %v6736_v34  ;;  %v7505_v59 = vadd.f32 %v12227_v0, %v7064_v45  ;;  %v7066_v22 = vpop.f32.mrb[141].mxu0 }
 0x6e1   :  { %v6805_v9 = vpack.c.bf16 %v6739_v54, %v6737_v13  ;;  %v7506_v63 = vadd.f32 %v12231_v28, %v7066_v22  ;;  %v6467_v57 = vpop.f32.mrb[124].mxu1  ;;  %v7068_v56 = vpop.f32.mrb[142].mxu0 }
 0x6e2   :  { %7633 = vst [vmem:[#allocation2 + $0x60] sm:$0xff] %v7505_v59  ;;  %v6612_v42 = vadd.f32 %v12097_v62, %v6467_v57  ;;  %v7507_v2 = vadd.f32 %v12227_v0, %v7068_v56  ;;  %v6469_v58 = vpop.f32.mrb[125].mxu1  ;;  %v7070_v50 = vpop.f32.mrb[143].mxu0 }
 0x6e3   :  { %7634 = vst [vmem:[#allocation2 + $0x68] sm:$0xff] %v7506_v63  ;;  %v6613_v53 = vadd.f32 %v12100_v40, %v6469_v58  ;;  %v7508_v5 = vadd.f32 %v12231_v28, %v7070_v50  ;;  %v6471_v15 = vpop.f32.mrb[126].mxu1  ;;  %7332 = vmatprep.mubr.bf16.mxu0 %v6805_v9 }
 0x6e4   :  { %7635 = vst [vmem:[#allocation2 + $0x70] sm:$0xff] %v7507_v2  ;;  %v6614_v44 = vadd.f32 %v12097_v62, %v6471_v15  ;;  %v6473_v10 = vpop.f32.mrb[127].mxu1  ;;  %7333 = vmatmul.mubr.bf16.gmra.mrb[248].mxu0 %v6804_v41  ;;  %v6740_v61 = vmax.f32 %v6612_v42, 0.0 }
 0x6e5   :  { %7636 = vst [vmem:[#allocation2 + $0x78] sm:$0xff] %v7508_v5  ;;  %v6615_v29 = vadd.f32 %v12100_v40, %v6473_v10  ;;  %v6741_v14 = vmax.f32 %v6613_v53, 0.0 }
 0x6e6   :  { %v6742_v30 = vmax.f32 %v6614_v44, 0.0 }
 0x6e7   :  { %v6743_v48 = vmax.f32 %v6615_v29, 0.0  ;;  %v7074_v37 = vpop.f32.mrb[144].mxu0 }
 0x6e8   :  { %v6806_v23 = vpack.c.bf16 %v6742_v30, %v6740_v61  ;;  %v7509_v55 = vadd.f32 %v12227_v0, %v7074_v37  ;;  %v7076_v33 = vpop.f32.mrb[145].mxu0 }
 0x6e9   :  { %v6807_v16 = vpack.c.bf16 %v6743_v48, %v6741_v14  ;;  %v7510_v24 = vadd.f32 %v12231_v28, %v7076_v33  ;;  %v7078_v39 = vpop.f32.mrb[146].mxu0 }
 0x6ea   :  { %7637 = vst [vmem:[#allocation2 + $0x80] sm:$0xff] %v7509_v55  ;;  %v7511_v62 = vadd.f32 %v12227_v0, %v7078_v39  ;;  %v7080_v36 = vpop.f32.mrb[147].mxu0 }
 0x6eb   :  { %7638 = vst [vmem:[#allocation2 + $0x88] sm:$0xff] %v7510_v24  ;;  %v7512_v40 = vadd.f32 %v12231_v28, %v7080_v36  ;;  %7342 = vmatprep.mubr.bf16.mxu0 %v6807_v16 }
 0x6ec   :  { %7639 = vst [vmem:[#allocation2 + $0x90] sm:$0xff] %v7511_v62  ;;  %7343 = vmatmul.mubr.bf16.gmra.mrb[252].mxu0 %v6806_v23 }
 0x6ed   :  { %7640 = vst [vmem:[#allocation2 + $0x98] sm:$0xff] %v7512_v40 }
 0x6ef   :  { %v7084_v18 = vpop.f32.mrb[148].mxu0 }
 0x6f0   :  { %v7513_v47 = vadd.f32 %v12227_v0, %v7084_v18  ;;  %v7086_v17 = vpop.f32.mrb[149].mxu0 }
 0x6f1   :  { %v7514_v12 = vadd.f32 %v12231_v28, %v7086_v17  ;;  %v7088_v7 = vpop.f32.mrb[150].mxu0 }
 0x6f2   :  { %7641 = vst [vmem:[#allocation2 + $0xa0] sm:$0xff] %v7513_v47  ;;  %v7515_v26 = vadd.f32 %v12227_v0, %v7088_v7  ;;  %v7090_v43 = vpop.f32.mrb[151].mxu0 }
 0x6f3   :  { %7642 = vst [vmem:[#allocation2 + $0xa8] sm:$0xff] %v7514_v12  ;;  %v7516_v38 = vadd.f32 %v12231_v28, %v7090_v43 }
 0x6f4   :  { %7643 = vst [vmem:[#allocation2 + $0xb0] sm:$0xff] %v7515_v26 }
 0x6f5   :  { %7644 = vst [vmem:[#allocation2 + $0xb8] sm:$0xff] %v7516_v38 }
 0x6f7   :  { %v7094_v31 = vpop.f32.mrb[152].mxu0 }
 0x6f8   :  { %v7517_v3 = vadd.f32 %v12227_v0, %v7094_v31  ;;  %v7096_v8 = vpop.f32.mrb[153].mxu0 }
 0x6f9   :  { %v7518_v4 = vadd.f32 %v12231_v28, %v7096_v8  ;;  %v7098_v1 = vpop.f32.mrb[154].mxu0 }
 0x6fa   :  { %7645 = vst [vmem:[#allocation2 + $0xc0] sm:$0xff] %v7517_v3  ;;  %v7519_v20 = vadd.f32 %v12227_v0, %v7098_v1  ;;  %v7100_v21 = vpop.f32.mrb[155].mxu0 }
 0x6fb   :  { %7646 = vst [vmem:[#allocation2 + $0xc8] sm:$0xff] %v7518_v4  ;;  %v7520_v49 = vadd.f32 %v12231_v28, %v7100_v21 }
 0x6fc   :  { %7647 = vst [vmem:[#allocation2 + $0xd0] sm:$0xff] %v7519_v20 }
 0x6fd   :  { %7648 = vst [vmem:[#allocation2 + $0xd8] sm:$0xff] %v7520_v49 }
 0x6ff   :  { %v7104_v11 = vpop.f32.mrb[156].mxu0 }
 0x700   :  { %v7521_v32 = vadd.f32 %v12227_v0, %v7104_v11  ;;  %v7106_v25 = vpop.f32.mrb[157].mxu0 }
 0x701   :  { %v7522_v60 = vadd.f32 %v12231_v28, %v7106_v25  ;;  %v7108_v46 = vpop.f32.mrb[158].mxu0 }
 0x702   :  { %7649 = vst [vmem:[#allocation2 + $0xe0] sm:$0xff] %v7521_v32  ;;  %v7523_v52 = vadd.f32 %v12227_v0, %v7108_v46  ;;  %v7110_v35 = vpop.f32.mrb[159].mxu0 }
 0x703   :  { %7650 = vst [vmem:[#allocation2 + $0xe8] sm:$0xff] %v7522_v60  ;;  %v7524_v27 = vadd.f32 %v12231_v28, %v7110_v35 }
 0x704   :  { %7651 = vst [vmem:[#allocation2 + $0xf0] sm:$0xff] %v7523_v52 }
 0x705   :  { %7652 = vst [vmem:[#allocation2 + $0xf8] sm:$0xff] %v7524_v27 }
 0x707   :  { %v7114_v51 = vpop.f32.mrb[160].mxu0 }
 0x708   :  { %v7525_v19 = vadd.f32 %v12227_v0, %v7114_v51  ;;  %v7116_v34 = vpop.f32.mrb[161].mxu0 }
 0x709   :  { %v7526_v6 = vadd.f32 %v12231_v28, %v7116_v34  ;;  %v7118_v13 = vpop.f32.mrb[162].mxu0 }
 0x70a   :  { %7653 = vst [vmem:[#allocation2 + $0x100] sm:$0xff] %v7525_v19  ;;  %v7527_v54 = vadd.f32 %v12227_v0, %v7118_v13  ;;  %v7120_v45 = vpop.f32.mrb[163].mxu0 }
 0x70b   :  { %7654 = vst [vmem:[#allocation2 + $0x108] sm:$0xff] %v7526_v6  ;;  %v7528_v41 = vadd.f32 %v12231_v28, %v7120_v45 }
 0x70c   :  { %7655 = vst [vmem:[#allocation2 + $0x110] sm:$0xff] %v7527_v54 }
 0x70d   :  { %7656 = vst [vmem:[#allocation2 + $0x118] sm:$0xff] %v7528_v41 }
 0x70f   :  { %v7124_v59 = vpop.f32.mrb[164].mxu0 }
 0x710   :  { %v7529_v22 = vadd.f32 %v12227_v0, %v7124_v59  ;;  %v7126_v9 = vpop.f32.mrb[165].mxu0 }
 0x711   :  { %v7530_v63 = vadd.f32 %v12231_v28, %v7126_v9  ;;  %v7128_v57 = vpop.f32.mrb[166].mxu0 }
 0x712   :  { %7657 = vst [vmem:[#allocation2 + $0x120] sm:$0xff] %v7529_v22  ;;  %v7531_v56 = vadd.f32 %v12227_v0, %v7128_v57  ;;  %v7130_v42 = vpop.f32.mrb[167].mxu0 }
 0x713   :  { %7658 = vst [vmem:[#allocation2 + $0x128] sm:$0xff] %v7530_v63  ;;  %v7532_v2 = vadd.f32 %v12231_v28, %v7130_v42 }
 0x714   :  { %7659 = vst [vmem:[#allocation2 + $0x130] sm:$0xff] %v7531_v56 }
 0x715   :  { %7660 = vst [vmem:[#allocation2 + $0x138] sm:$0xff] %v7532_v2 }
 0x717   :  { %v7134_v58 = vpop.f32.mrb[168].mxu0 }
 0x718   :  { %v7533_v50 = vadd.f32 %v12227_v0, %v7134_v58  ;;  %v7136_v53 = vpop.f32.mrb[169].mxu0 }
 0x719   :  { %v7534_v5 = vadd.f32 %v12231_v28, %v7136_v53  ;;  %v7138_v15 = vpop.f32.mrb[170].mxu0 }
 0x71a   :  { %7661 = vst [vmem:[#allocation2 + $0x140] sm:$0xff] %v7533_v50  ;;  %v7535_v44 = vadd.f32 %v12227_v0, %v7138_v15  ;;  %v7140_v10 = vpop.f32.mrb[171].mxu0 }
 0x71b   :  { %7662 = vst [vmem:[#allocation2 + $0x148] sm:$0xff] %v7534_v5  ;;  %v7536_v29 = vadd.f32 %v12231_v28, %v7140_v10 }
 0x71c   :  { %7663 = vst [vmem:[#allocation2 + $0x150] sm:$0xff] %v7535_v44 }
 0x71d   :  { %7664 = vst [vmem:[#allocation2 + $0x158] sm:$0xff] %v7536_v29 }
 0x71f   :  { %v7144_v61 = vpop.f32.mrb[172].mxu0 }
 0x720   :  { %v7537_v30 = vadd.f32 %v12227_v0, %v7144_v61  ;;  %v7146_v14 = vpop.f32.mrb[173].mxu0 }
 0x721   :  { %v7538_v48 = vadd.f32 %v12231_v28, %v7146_v14  ;;  %v7148_v37 = vpop.f32.mrb[174].mxu0 }
 0x722   :  { %7665 = vst [vmem:[#allocation2 + $0x160] sm:$0xff] %v7537_v30  ;;  %v7539_v23 = vadd.f32 %v12227_v0, %v7148_v37  ;;  %v7150_v55 = vpop.f32.mrb[175].mxu0 }
 0x723   :  { %7666 = vst [vmem:[#allocation2 + $0x168] sm:$0xff] %v7538_v48  ;;  %v7540_v33 = vadd.f32 %v12231_v28, %v7150_v55 }
 0x724   :  { %7667 = vst [vmem:[#allocation2 + $0x170] sm:$0xff] %v7539_v23 }
 0x725   :  { %7668 = vst [vmem:[#allocation2 + $0x178] sm:$0xff] %v7540_v33 }
 0x727   :  { %v7154_v16 = vpop.f32.mrb[176].mxu0 }
 0x728   :  { %v7541_v24 = vadd.f32 %v12227_v0, %v7154_v16  ;;  %v7156_v39 = vpop.f32.mrb[177].mxu0 }
 0x729   :  { %v7542_v62 = vadd.f32 %v12231_v28, %v7156_v39  ;;  %v7158_v36 = vpop.f32.mrb[178].mxu0 }
 0x72a   :  { %7669 = vst [vmem:[#allocation2 + $0x180] sm:$0xff] %v7541_v24  ;;  %v7543_v40 = vadd.f32 %v12227_v0, %v7158_v36  ;;  %v7160_v18 = vpop.f32.mrb[179].mxu0 }
 0x72b   :  { %7670 = vst [vmem:[#allocation2 + $0x188] sm:$0xff] %v7542_v62  ;;  %v7544_v47 = vadd.f32 %v12231_v28, %v7160_v18 }
 0x72c   :  { %7671 = vst [vmem:[#allocation2 + $0x190] sm:$0xff] %v7543_v40 }
 0x72d   :  { %7672 = vst [vmem:[#allocation2 + $0x198] sm:$0xff] %v7544_v47 }
 0x72f   :  { %v7164_v17 = vpop.f32.mrb[180].mxu0 }
 0x730   :  { %v7545_v12 = vadd.f32 %v12227_v0, %v7164_v17  ;;  %v7166_v7 = vpop.f32.mrb[181].mxu0 }
 0x731   :  { %v7546_v26 = vadd.f32 %v12231_v28, %v7166_v7  ;;  %v7168_v43 = vpop.f32.mrb[182].mxu0 }
 0x732   :  { %7673 = vst [vmem:[#allocation2 + $0x1a0] sm:$0xff] %v7545_v12  ;;  %v7547_v38 = vadd.f32 %v12227_v0, %v7168_v43  ;;  %v7170_v31 = vpop.f32.mrb[183].mxu0 }
 0x733   :  { %7674 = vst [vmem:[#allocation2 + $0x1a8] sm:$0xff] %v7546_v26  ;;  %v7548_v3 = vadd.f32 %v12231_v28, %v7170_v31 }
 0x734   :  { %7675 = vst [vmem:[#allocation2 + $0x1b0] sm:$0xff] %v7547_v38 }
 0x735   :  { %7676 = vst [vmem:[#allocation2 + $0x1b8] sm:$0xff] %v7548_v3 }
 0x737   :  { %v7174_v8 = vpop.f32.mrb[184].mxu0 }
 0x738   :  { %v7549_v4 = vadd.f32 %v12227_v0, %v7174_v8  ;;  %v7176_v1 = vpop.f32.mrb[185].mxu0 }
 0x739   :  { %v7550_v20 = vadd.f32 %v12231_v28, %v7176_v1  ;;  %v7178_v21 = vpop.f32.mrb[186].mxu0 }
 0x73a   :  { %7677 = vst [vmem:[#allocation2 + $0x1c0] sm:$0xff] %v7549_v4  ;;  %v7551_v49 = vadd.f32 %v12227_v0, %v7178_v21  ;;  %v7180_v11 = vpop.f32.mrb[187].mxu0 }
 0x73b   :  { %7678 = vst [vmem:[#allocation2 + $0x1c8] sm:$0xff] %v7550_v20  ;;  %v7552_v32 = vadd.f32 %v12231_v28, %v7180_v11 }
 0x73c   :  { %7679 = vst [vmem:[#allocation2 + $0x1d0] sm:$0xff] %v7551_v49 }
 0x73d   :  { %7680 = vst [vmem:[#allocation2 + $0x1d8] sm:$0xff] %v7552_v32 }
 0x73f   :  { %v7184_v25 = vpop.f32.mrb[188].mxu0 }
 0x740   :  { %v7553_v60 = vadd.f32 %v12227_v0, %v7184_v25  ;;  %v7186_v46 = vpop.f32.mrb[189].mxu0 }
 0x741   :  { %v7554_v52 = vadd.f32 %v12231_v28, %v7186_v46  ;;  %v7188_v35 = vpop.f32.mrb[190].mxu0 }
 0x742   :  { %7681 = vst [vmem:[#allocation2 + $0x1e0] sm:$0xff] %v7553_v60  ;;  %v7555_v27 = vadd.f32 %v12227_v0, %v7188_v35  ;;  %v7190_v51 = vpop.f32.mrb[191].mxu0 }
 0x743   :  { %7682 = vst [vmem:[#allocation2 + $0x1e8] sm:$0xff] %v7554_v52  ;;  %v7556_v19 = vadd.f32 %v12231_v28, %v7190_v51 }
 0x744   :  { %7683 = vst [vmem:[#allocation2 + $0x1f0] sm:$0xff] %v7555_v27 }
 0x745   :  { %7684 = vst [vmem:[#allocation2 + $0x1f8] sm:$0xff] %v7556_v19 }
 0x747   :  { %v7194_v34 = vpop.f32.mrb[192].mxu0 }
 0x748   :  { %v7557_v6 = vadd.f32 %v12227_v0, %v7194_v34  ;;  %v7196_v13 = vpop.f32.mrb[193].mxu0 }
 0x749   :  { %v7558_v54 = vadd.f32 %v12231_v28, %v7196_v13  ;;  %v7198_v45 = vpop.f32.mrb[194].mxu0 }
 0x74a   :  { %7685 = vst [vmem:[#allocation2 + $0x200] sm:$0xff] %v7557_v6  ;;  %v7559_v41 = vadd.f32 %v12227_v0, %v7198_v45  ;;  %v7200_v59 = vpop.f32.mrb[195].mxu0 }
 0x74b   :  { %7686 = vst [vmem:[#allocation2 + $0x208] sm:$0xff] %v7558_v54  ;;  %v7560_v22 = vadd.f32 %v12231_v28, %v7200_v59 }
 0x74c   :  { %7687 = vst [vmem:[#allocation2 + $0x210] sm:$0xff] %v7559_v41 }
 0x74d   :  { %7688 = vst [vmem:[#allocation2 + $0x218] sm:$0xff] %v7560_v22 }
 0x74f   :  { %v7204_v9 = vpop.f32.mrb[196].mxu0 }
 0x750   :  { %v7561_v63 = vadd.f32 %v12227_v0, %v7204_v9  ;;  %v7206_v57 = vpop.f32.mrb[197].mxu0 }
 0x751   :  { %v7562_v56 = vadd.f32 %v12231_v28, %v7206_v57  ;;  %v7208_v42 = vpop.f32.mrb[198].mxu0 }
 0x752   :  { %7689 = vst [vmem:[#allocation2 + $0x220] sm:$0xff] %v7561_v63  ;;  %v7563_v2 = vadd.f32 %v12227_v0, %v7208_v42  ;;  %v7210_v58 = vpop.f32.mrb[199].mxu0 }
 0x753   :  { %7690 = vst [vmem:[#allocation2 + $0x228] sm:$0xff] %v7562_v56  ;;  %v7564_v50 = vadd.f32 %v12231_v28, %v7210_v58 }
 0x754   :  { %7691 = vst [vmem:[#allocation2 + $0x230] sm:$0xff] %v7563_v2 }
 0x755   :  { %7692 = vst [vmem:[#allocation2 + $0x238] sm:$0xff] %v7564_v50 }
 0x757   :  { %v7214_v53 = vpop.f32.mrb[200].mxu0 }
 0x758   :  { %v7565_v5 = vadd.f32 %v12227_v0, %v7214_v53  ;;  %v7216_v15 = vpop.f32.mrb[201].mxu0 }
 0x759   :  { %v7566_v44 = vadd.f32 %v12231_v28, %v7216_v15  ;;  %v7218_v10 = vpop.f32.mrb[202].mxu0 }
 0x75a   :  { %7693 = vst [vmem:[#allocation2 + $0x240] sm:$0xff] %v7565_v5  ;;  %v7567_v29 = vadd.f32 %v12227_v0, %v7218_v10  ;;  %v7220_v61 = vpop.f32.mrb[203].mxu0 }
 0x75b   :  { %7694 = vst [vmem:[#allocation2 + $0x248] sm:$0xff] %v7566_v44  ;;  %v7568_v30 = vadd.f32 %v12231_v28, %v7220_v61 }
 0x75c   :  { %7695 = vst [vmem:[#allocation2 + $0x250] sm:$0xff] %v7567_v29 }
 0x75d   :  { %7696 = vst [vmem:[#allocation2 + $0x258] sm:$0xff] %v7568_v30 }
 0x75f   :  { %v7224_v14 = vpop.f32.mrb[204].mxu0 }
 0x760   :  { %v7569_v48 = vadd.f32 %v12227_v0, %v7224_v14  ;;  %v7226_v37 = vpop.f32.mrb[205].mxu0 }
 0x761   :  { %v7570_v23 = vadd.f32 %v12231_v28, %v7226_v37  ;;  %v7228_v55 = vpop.f32.mrb[206].mxu0 }
 0x762   :  { %7697 = vst [vmem:[#allocation2 + $0x260] sm:$0xff] %v7569_v48  ;;  %v7571_v33 = vadd.f32 %v12227_v0, %v7228_v55  ;;  %v7230_v16 = vpop.f32.mrb[207].mxu0 }
 0x763   :  { %7698 = vst [vmem:[#allocation2 + $0x268] sm:$0xff] %v7570_v23  ;;  %v7572_v24 = vadd.f32 %v12231_v28, %v7230_v16 }
 0x764   :  { %7699 = vst [vmem:[#allocation2 + $0x270] sm:$0xff] %v7571_v33 }
 0x765   :  { %7700 = vst [vmem:[#allocation2 + $0x278] sm:$0xff] %v7572_v24 }
 0x767   :  { %v7234_v39 = vpop.f32.mrb[208].mxu0 }
 0x768   :  { %v7573_v62 = vadd.f32 %v12227_v0, %v7234_v39  ;;  %v7236_v36 = vpop.f32.mrb[209].mxu0 }
 0x769   :  { %v7574_v40 = vadd.f32 %v12231_v28, %v7236_v36  ;;  %v7238_v18 = vpop.f32.mrb[210].mxu0 }
 0x76a   :  { %7701 = vst [vmem:[#allocation2 + $0x280] sm:$0xff] %v7573_v62  ;;  %v7575_v47 = vadd.f32 %v12227_v0, %v7238_v18  ;;  %v7240_v17 = vpop.f32.mrb[211].mxu0 }
 0x76b   :  { %7702 = vst [vmem:[#allocation2 + $0x288] sm:$0xff] %v7574_v40  ;;  %v7576_v12 = vadd.f32 %v12231_v28, %v7240_v17 }
 0x76c   :  { %7703 = vst [vmem:[#allocation2 + $0x290] sm:$0xff] %v7575_v47 }
 0x76d   :  { %7704 = vst [vmem:[#allocation2 + $0x298] sm:$0xff] %v7576_v12 }
 0x76f   :  { %v7244_v7 = vpop.f32.mrb[212].mxu0 }
 0x770   :  { %v7577_v26 = vadd.f32 %v12227_v0, %v7244_v7  ;;  %v7246_v43 = vpop.f32.mrb[213].mxu0 }
 0x771   :  { %v7578_v38 = vadd.f32 %v12231_v28, %v7246_v43  ;;  %v7248_v31 = vpop.f32.mrb[214].mxu0 }
 0x772   :  { %7705 = vst [vmem:[#allocation2 + $0x2a0] sm:$0xff] %v7577_v26  ;;  %v7579_v3 = vadd.f32 %v12227_v0, %v7248_v31  ;;  %v7250_v8 = vpop.f32.mrb[215].mxu0 }
 0x773   :  { %7706 = vst [vmem:[#allocation2 + $0x2a8] sm:$0xff] %v7578_v38  ;;  %v7580_v4 = vadd.f32 %v12231_v28, %v7250_v8 }
 0x774   :  { %7707 = vst [vmem:[#allocation2 + $0x2b0] sm:$0xff] %v7579_v3 }
 0x775   :  { %7708 = vst [vmem:[#allocation2 + $0x2b8] sm:$0xff] %v7580_v4 }
 0x777   :  { %v7254_v1 = vpop.f32.mrb[216].mxu0 }
 0x778   :  { %v7581_v20 = vadd.f32 %v12227_v0, %v7254_v1  ;;  %v7256_v21 = vpop.f32.mrb[217].mxu0 }
 0x779   :  { %v7582_v49 = vadd.f32 %v12231_v28, %v7256_v21  ;;  %v7258_v11 = vpop.f32.mrb[218].mxu0 }
 0x77a   :  { %7709 = vst [vmem:[#allocation2 + $0x2c0] sm:$0xff] %v7581_v20  ;;  %v7583_v32 = vadd.f32 %v12227_v0, %v7258_v11  ;;  %v7260_v25 = vpop.f32.mrb[219].mxu0 }
 0x77b   :  { %7710 = vst [vmem:[#allocation2 + $0x2c8] sm:$0xff] %v7582_v49  ;;  %v7584_v60 = vadd.f32 %v12231_v28, %v7260_v25 }
 0x77c   :  { %7711 = vst [vmem:[#allocation2 + $0x2d0] sm:$0xff] %v7583_v32 }
 0x77d   :  { %7712 = vst [vmem:[#allocation2 + $0x2d8] sm:$0xff] %v7584_v60 }
 0x77f   :  { %v7264_v46 = vpop.f32.mrb[220].mxu0 }
 0x780   :  { %v7585_v52 = vadd.f32 %v12227_v0, %v7264_v46  ;;  %v7266_v35 = vpop.f32.mrb[221].mxu0 }
 0x781   :  { %v7586_v27 = vadd.f32 %v12231_v28, %v7266_v35  ;;  %v7268_v51 = vpop.f32.mrb[222].mxu0 }
 0x782   :  { %7713 = vst [vmem:[#allocation2 + $0x2e0] sm:$0xff] %v7585_v52  ;;  %v7587_v19 = vadd.f32 %v12227_v0, %v7268_v51  ;;  %v7270_v34 = vpop.f32.mrb[223].mxu0 }
 0x783   :  { %7714 = vst [vmem:[#allocation2 + $0x2e8] sm:$0xff] %v7586_v27  ;;  %v7588_v6 = vadd.f32 %v12231_v28, %v7270_v34 }
 0x784   :  { %7715 = vst [vmem:[#allocation2 + $0x2f0] sm:$0xff] %v7587_v19 }
 0x785   :  { %7716 = vst [vmem:[#allocation2 + $0x2f8] sm:$0xff] %v7588_v6 }
 0x787   :  { %v7274_v13 = vpop.f32.mrb[224].mxu0 }
 0x788   :  { %v7589_v54 = vadd.f32 %v12227_v0, %v7274_v13  ;;  %v7276_v45 = vpop.f32.mrb[225].mxu0 }
 0x789   :  { %v7590_v41 = vadd.f32 %v12231_v28, %v7276_v45  ;;  %v7278_v59 = vpop.f32.mrb[226].mxu0 }
 0x78a   :  { %7717 = vst [vmem:[#allocation2 + $0x300] sm:$0xff] %v7589_v54  ;;  %v7591_v22 = vadd.f32 %v12227_v0, %v7278_v59  ;;  %v7280_v9 = vpop.f32.mrb[227].mxu0 }
 0x78b   :  { %7718 = vst [vmem:[#allocation2 + $0x308] sm:$0xff] %v7590_v41  ;;  %v7592_v63 = vadd.f32 %v12231_v28, %v7280_v9 }
 0x78c   :  { %7719 = vst [vmem:[#allocation2 + $0x310] sm:$0xff] %v7591_v22 }
 0x78d   :  { %7720 = vst [vmem:[#allocation2 + $0x318] sm:$0xff] %v7592_v63 }
 0x78f   :  { %v7284_v57 = vpop.f32.mrb[228].mxu0 }
 0x790   :  { %v7593_v56 = vadd.f32 %v12227_v0, %v7284_v57  ;;  %v7286_v42 = vpop.f32.mrb[229].mxu0 }
 0x791   :  { %v7594_v2 = vadd.f32 %v12231_v28, %v7286_v42  ;;  %v7288_v58 = vpop.f32.mrb[230].mxu0 }
 0x792   :  { %7721 = vst [vmem:[#allocation2 + $0x320] sm:$0xff] %v7593_v56  ;;  %v7595_v50 = vadd.f32 %v12227_v0, %v7288_v58  ;;  %v7290_v53 = vpop.f32.mrb[231].mxu0 }
 0x793   :  { %7722 = vst [vmem:[#allocation2 + $0x328] sm:$0xff] %v7594_v2  ;;  %v7596_v5 = vadd.f32 %v12231_v28, %v7290_v53 }
 0x794   :  { %7723 = vst [vmem:[#allocation2 + $0x330] sm:$0xff] %v7595_v50 }
 0x795   :  { %7724 = vst [vmem:[#allocation2 + $0x338] sm:$0xff] %v7596_v5 }
 0x797   :  { %v7294_v15 = vpop.f32.mrb[232].mxu0 }
 0x798   :  { %v7597_v44 = vadd.f32 %v12227_v0, %v7294_v15  ;;  %v7296_v10 = vpop.f32.mrb[233].mxu0 }
 0x799   :  { %v7598_v29 = vadd.f32 %v12231_v28, %v7296_v10  ;;  %v7298_v61 = vpop.f32.mrb[234].mxu0 }
 0x79a   :  { %7725 = vst [vmem:[#allocation2 + $0x340] sm:$0xff] %v7597_v44  ;;  %v7599_v30 = vadd.f32 %v12227_v0, %v7298_v61  ;;  %v7300_v14 = vpop.f32.mrb[235].mxu0 }
 0x79b   :  { %7726 = vst [vmem:[#allocation2 + $0x348] sm:$0xff] %v7598_v29  ;;  %v7600_v48 = vadd.f32 %v12231_v28, %v7300_v14 }
 0x79c   :  { %7727 = vst [vmem:[#allocation2 + $0x350] sm:$0xff] %v7599_v30 }
 0x79d   :  { %7728 = vst [vmem:[#allocation2 + $0x358] sm:$0xff] %v7600_v48 }
 0x79f   :  { %v7304_v37 = vpop.f32.mrb[236].mxu0 }
 0x7a0   :  { %v7601_v23 = vadd.f32 %v12227_v0, %v7304_v37  ;;  %v7306_v55 = vpop.f32.mrb[237].mxu0 }
 0x7a1   :  { %v7602_v33 = vadd.f32 %v12231_v28, %v7306_v55  ;;  %v7308_v16 = vpop.f32.mrb[238].mxu0 }
 0x7a2   :  { %7729 = vst [vmem:[#allocation2 + $0x360] sm:$0xff] %v7601_v23  ;;  %v7603_v24 = vadd.f32 %v12227_v0, %v7308_v16  ;;  %v7310_v39 = vpop.f32.mrb[239].mxu0 }
 0x7a3   :  { %7730 = vst [vmem:[#allocation2 + $0x368] sm:$0xff] %v7602_v33  ;;  %v7604_v62 = vadd.f32 %v12231_v28, %v7310_v39 }
 0x7a4   :  { %7731 = vst [vmem:[#allocation2 + $0x370] sm:$0xff] %v7603_v24 }
 0x7a5   :  { %7732 = vst [vmem:[#allocation2 + $0x378] sm:$0xff] %v7604_v62 }
 0x7a7   :  { %v7314_v36 = vpop.f32.mrb[240].mxu0 }
 0x7a8   :  { %v7605_v40 = vadd.f32 %v12227_v0, %v7314_v36  ;;  %v7316_v18 = vpop.f32.mrb[241].mxu0 }
 0x7a9   :  { %v7606_v47 = vadd.f32 %v12231_v28, %v7316_v18  ;;  %v7318_v17 = vpop.f32.mrb[242].mxu0 }
 0x7aa   :  { %7733 = vst [vmem:[#allocation2 + $0x380] sm:$0xff] %v7605_v40  ;;  %v7607_v12 = vadd.f32 %v12227_v0, %v7318_v17  ;;  %v7320_v7 = vpop.f32.mrb[243].mxu0 }
 0x7ab   :  { %7734 = vst [vmem:[#allocation2 + $0x388] sm:$0xff] %v7606_v47  ;;  %v7608_v26 = vadd.f32 %v12231_v28, %v7320_v7 }
 0x7ac   :  { %7735 = vst [vmem:[#allocation2 + $0x390] sm:$0xff] %v7607_v12 }
 0x7ad   :  { %7736 = vst [vmem:[#allocation2 + $0x398] sm:$0xff] %v7608_v26 }
 0x7af   :  { %v7324_v43 = vpop.f32.mrb[244].mxu0 }
 0x7b0   :  { %v7609_v38 = vadd.f32 %v12227_v0, %v7324_v43  ;;  %v7326_v31 = vpop.f32.mrb[245].mxu0 }
 0x7b1   :  { %v7610_v3 = vadd.f32 %v12231_v28, %v7326_v31  ;;  %v7328_v8 = vpop.f32.mrb[246].mxu0 }
 0x7b2   :  { %7737 = vst [vmem:[#allocation2 + $0x3a0] sm:$0xff] %v7609_v38  ;;  %v7611_v4 = vadd.f32 %v12227_v0, %v7328_v8  ;;  %v7330_v1 = vpop.f32.mrb[247].mxu0 }
 0x7b3   :  { %7738 = vst [vmem:[#allocation2 + $0x3a8] sm:$0xff] %v7610_v3  ;;  %v7612_v20 = vadd.f32 %v12231_v28, %v7330_v1 }
 0x7b4   :  { %7739 = vst [vmem:[#allocation2 + $0x3b0] sm:$0xff] %v7611_v4 }
 0x7b5   :  { %7740 = vst [vmem:[#allocation2 + $0x3b8] sm:$0xff] %v7612_v20 }
 0x7b7   :  { %v7334_v21 = vpop.f32.mrb[248].mxu0 }
 0x7b8   :  { %v7613_v49 = vadd.f32 %v12227_v0, %v7334_v21  ;;  %v7336_v11 = vpop.f32.mrb[249].mxu0 }
 0x7b9   :  { %v7614_v32 = vadd.f32 %v12231_v28, %v7336_v11  ;;  %v7338_v25 = vpop.f32.mrb[250].mxu0 }
 0x7ba   :  { %7741 = vst [vmem:[#allocation2 + $0x3c0] sm:$0xff] %v7613_v49  ;;  %v7615_v60 = vadd.f32 %v12227_v0, %v7338_v25  ;;  %v7340_v46 = vpop.f32.mrb[251].mxu0 }
 0x7bb   :  { %7742 = vst [vmem:[#allocation2 + $0x3c8] sm:$0xff] %v7614_v32  ;;  %v7616_v52 = vadd.f32 %v12231_v28, %v7340_v46 }
 0x7bc   :  { %7743 = vst [vmem:[#allocation2 + $0x3d0] sm:$0xff] %v7615_v60 }
 0x7bd   :  { %7744 = vst [vmem:[#allocation2 + $0x3d8] sm:$0xff] %v7616_v52 }
 0x7bf   :  { %v7344_v35 = vpop.f32.mrb[252].mxu0 }
 0x7c0   :  { %v7617_v27 = vadd.f32 %v12227_v0, %v7344_v35  ;;  %v7346_v51 = vpop.f32.mrb[253].mxu0 }
 0x7c1   :  { %v7618_v19 = vadd.f32 %v12231_v28, %v7346_v51  ;;  %v7348_v34 = vpop.f32.mrb[254].mxu0 }
 0x7c2   :  { %7745 = vst [vmem:[#allocation2 + $0x3e0] sm:$0xff] %v7617_v27  ;;  %v7619_v6 = vadd.f32 %v12227_v0, %v7348_v34  ;;  %v7350_v13 = vpop.f32.mrb[255].mxu0 }
 0x7c3   :  { %7746 = vst [vmem:[#allocation2 + $0x3e8] sm:$0xff] %v7618_v19  ;;  %v7620_v54 = vadd.f32 %v12231_v28, %v7350_v13 }
 0x7c4   :  { %7747 = vst [vmem:[#allocation2 + $0x3f0] sm:$0xff] %v7619_v6 }
 0x7c5   :  { %7748 = vst [vmem:[#allocation2 + $0x3f8] sm:$0xff] %v7620_v54 }
 0x7c6   :  { %9220 = shalt.err (!%p9217_p4)
}
 0x7c7   :  { %s9221_s3 = scalar_lea.hbm %s12396_s7, 16384 }
 0x7c8   :  { %p9222_p5 = scmp.ne.s32.totalorder %s12396_s7, %s9221_s3  ;;  %p9225_p6 = scmp.lt.u32.totalorder %s9221_s3, %s12396_s7 }
 0x7ca   :  { %p9227_p7 = pnand %p9225_p6, %p9222_p5 }
 0x7cc   :  { %9230 = shalt.err (!%p9227_p7)
}
 0x7cd   :  { %s9235_s14 = smov 256   ;;  %s9236_s15 = smov 16  }
 0x7ce   :  { %7760 = dma.vmem_to_hbm [thread:$0]  %s7755_s29, 16384, %s12396_s7, [#allocation3], %s9235_s14, %s9235_s14, %s9236_s15  }
 0x7cf   :  { %9231 = dma.done.wait [#allocation3], 16384  }
 0x7d0   :  { %9232 = vsyncadd [#allocation3], 4294950912 }
 0x7d1   :  { %7764 = vsyncpa [#allocation3], 1 }

</bundles_post_ra>
